<compile_context>
chip_gen: v7x
topology: tpu7x:2x2x1
jax: 0.10.0
libtpu: 0.0.40
codegen_flags: <defaults>
</compile_context>

<pallas_src>
import functools

import jax
import jax.numpy as jnp
import numpy as np
from jax import lax
from jax.experimental import pallas as pl
from jax.experimental.pallas import tpu as pltpu


# ------------------------------ kernel math ------------------------------ #

def _layernorm_c(x, w, b):
    # x: (C, L).  torch WithBias_LayerNorm over the channel dim (axis 0 here),
    # unbiased=False variance, eps=1e-5.  rsqrt -> EUP, leaves a VALU multiply.
    mu = jnp.mean(x, axis=0, keepdims=True)
    var = jnp.mean((x - mu) ** 2, axis=0, keepdims=True)
    return (x - mu) * lax.rsqrt(var + 1e-5) * w + b


def _l2norm_rows(v):
    # torch F.normalize(p=2, dim=-1, eps=1e-12) over HW (the lane dim):
    # v / max(||v||, 1e-12) == v * rsqrt(max(||v||^2, 1e-24)).
    ss = jnp.sum(v * v, axis=-1, keepdims=True)
    return v * lax.rsqrt(jnp.maximum(ss, 1e-24))


def _softmax_lastdim(a):
    a = a - jnp.max(a, axis=-1, keepdims=True)
    e = jnp.exp(a)
    return e * pl.reciprocal(jnp.sum(e, axis=-1, keepdims=True), approx=True)


def _dwconv3x3(v, w9, b, mask9, W, L):
    # Depthwise 3x3, pad=1, stride=1 on the flat (Cv, L) view (L = Bt*HW).
    # Each tap is one lane-rotate (XLU) + a precomputed border-mask multiply:
    # no padded copy, no per-tap compare/select chains.  mask9: (9, 1, L) f32
    # 0/1; it zeroes out-of-image taps, which also kills cross-image wrap when
    # several images share the lane axis.  w9: (Cv, 9), tap k = (dy+1)*3+(dx+1).
    acc = v * w9[:, 4:5]                     # center tap: no roll, no mask
    k = 0
    for dy in (-1, 0, 1):
        for dx in (-1, 0, 1):
            if dy == 0 and dx == 0:
                k += 1
                continue
            shift = (-(dy * W + dx)) % L
            sh = pltpu.roll(v, shift, 1)
            acc = acc + sh * (w9[:, k:k + 1] * mask9[k])
            k += 1
    return acc + b


def _block_math(x, p, *, W, C, num_heads, hidden, HW, Bt):
    (mask9,
     ln1_w, ln1_b, qkv_w, qkv_b, dw_w, dw_b, proj_w, proj_b, temp_c,
     ln2_w, ln2_b, pi_w, pi_b, fdw_w, fdw_b, po_w, po_b) = p
    L = Bt * HW
    ch = C // num_heads
    bf16 = jnp.bfloat16

    # -------- attention branch:  x = x + Attn(LN(x)) --------
    y = _layernorm_c(x, ln1_w, ln1_b)
    qkv = jnp.dot(qkv_w, y.astype(bf16),
                  preferred_element_type=jnp.float32) + qkv_b
    qkv = _dwconv3x3(qkv, dw_w, dw_b, mask9, W, L)
    q, k, v = qkv[:C], qkv[C:2 * C], qkv[2 * C:]

    # Channel attention is per image: loop over the Bt lane segments (static,
    # 128-aligned lane slices).  Per segment, the per-(head, channel) l2-norm
    # is over HW and the per-head temperature is folded into q (identical to
    # scaling q @ k^T afterwards); both head contractions are batched.
    outs = []
    for bt in range(Bt):
        sl = slice(bt * HW, (bt + 1) * HW)
        qb, kb, vb = q[:, sl], k[:, sl], v[:, sl]
        qn = (_l2norm_rows(qb) * temp_c).astype(bf16).reshape(num_heads, ch, HW)
        kn = _l2norm_rows(kb).astype(bf16).reshape(num_heads, ch, HW)
        vh = vb.astype(bf16).reshape(num_heads, ch, HW)
        attn = lax.dot_general(qn, kn, (((2,), (2,)), ((0,), (0,))),
                               preferred_element_type=jnp.float32)
        attn = _softmax_lastdim(attn)                      # (heads, ch, ch) f32
        oh = lax.dot_general(attn.astype(bf16), vh,
                             (((2,), (1,)), ((0,), (0,))),
                             preferred_element_type=jnp.float32)
        outs.append(oh.reshape(C, HW))
    attn_out = outs[0] if Bt == 1 else jnp.concatenate(outs, axis=1)

    attn_out = jnp.dot(proj_w, attn_out.astype(bf16),
                       preferred_element_type=jnp.float32) + proj_b
    x = x + attn_out

    # -------- feed-forward branch:  x = x + FFN(LN(x)) --------
    y = _layernorm_c(x, ln2_w, ln2_b)
    hcat = jnp.dot(pi_w, y.astype(bf16),
                   preferred_element_type=jnp.float32) + pi_b
    hcat = _dwconv3x3(hcat, fdw_w, fdw_b, mask9, W, L)
    h1, h2 = hcat[:hidden], hcat[hidden:]
    # tanh-approximate GELU: transcendental goes to the EUP slot instead of a
    # long erf polynomial on the VALU; difference vs exact erf is << tolerance.
    g = jax.nn.gelu(h1, approximate=True) * h2
    ffn = jnp.dot(po_w, g.astype(bf16),
                  preferred_element_type=jnp.float32) + po_b
    return x + ffn


def _tb_kernel(x_ref, *rest, W, C, num_heads, hidden, HW, Bt):
    param_refs = rest[:-1]
    out_ref = rest[-1]
    x = x_ref[0]                                          # (C, L) f32
    p = tuple(r[...] for r in param_refs)                 # no per-step casts
    out = _block_math(x, p, W=W, C=C, num_heads=num_heads,
                      hidden=hidden, HW=HW, Bt=Bt)
    out_ref[0] = out.astype(out_ref.dtype)


# ------------------------------ wrapper ------------------------------ #

def transformer_block_pallas(x_nchw, params, num_heads):
    B, C, H, W = x_nchw.shape
    HW = H * W
    hidden = int(params["po_w"].shape[1])
    ch = C // num_heads
    bf16 = jnp.bfloat16

    # Physical VMEM per core (75% cap leaves headroom for Mosaic scratch and
    # double-buffered I/O; fall back to the v7x 64 MiB floor if unavailable).
    try:
        phys_vmem = int(pltpu.get_tpu_info().vmem_capacity_bytes)
    except Exception:
        phys_vmem = 64 * 1024 * 1024

    # Images per grid step: fold Bt images into the lane axis to amortize the
    # ~0.35us/step pipeline overhead and raise matmul N, as long as the live
    # activation working set stays well inside VMEM.
    per_img = 24 * max(3 * C, 2 * hidden) * HW * 4
    max_bt = max(1, min(8, (phys_vmem // 3) // max(per_img, 1)))
    Bt = 1
    for cand in range(1, min(B, max_bt) + 1):
        if B % cand == 0:
            Bt = cand
    nb = B // Bt
    L = Bt * HW

    # NCHW -> (nb, C, Bt*HW): one XLA transpose outside the kernel.
    x = (x_nchw.reshape(nb, Bt, C, HW)
         .transpose(0, 2, 1, 3)
         .reshape(nb, C, L))

    # Precomputed depthwise-conv border masks (f32 0/1), tiled per image so the
    # roll-based taps never leak across image boundaries.
    hw = np.arange(HW)
    row, col = hw // W, hw % W
    m = []
    for dy in (-1, 0, 1):
        for dx in (-1, 0, 1):
            m.append(((row + dy >= 0) & (row + dy < H) &
                      (col + dx >= 0) & (col + dx < W)).astype(np.float32))
    mask9 = jnp.asarray(np.tile(np.stack(m, 0).reshape(9, 1, HW), (1, 1, Bt)))

    temp_c = jnp.repeat(params["temperature"], ch).reshape(C, 1)

    plist = [
        mask9,
        params["ln1_w"], params["ln1_b"],
        params["qkv_w"].astype(bf16), params["qkv_b"],
        params["dw_w"], params["dw_b"],
        params["proj_w"].astype(bf16), params["proj_b"],
        temp_c,
        params["ln2_w"], params["ln2_b"],
        params["pi_w"].astype(bf16), params["pi_b"],
        params["fdw_w"], params["fdw_b"],
        params["po_w"].astype(bf16), params["po_b"],
    ]

    kernel = functools.partial(_tb_kernel, W=W, C=C, num_heads=num_heads,
                               hidden=hidden, HW=HW, Bt=Bt)

    def _const_spec(arr):
        nd = arr.ndim
        return pl.BlockSpec(arr.shape, lambda b, _nd=nd: (0,) * _nd)

    in_specs = [pl.BlockSpec((1, C, L), lambda b: (b, 0, 0))]
    in_specs += [_const_spec(a) for a in plist]

    # VMEM budget: params + live activations + double-buffered I/O blocks,
    # capped at 75% of physical VMEM (never the full core capacity).
    param_bytes = sum(int(a.size) * a.dtype.itemsize for a in plist)
    act_bytes = max(3 * C, 2 * hidden) * L * 4
    io_bytes = 2 * 2 * C * L * x_nchw.dtype.itemsize
    need = param_bytes + 20 * act_bytes + io_bytes
    vmem_limit = int(min(max(need * 3 // 2, 32 * 1024 * 1024),
                         (phys_vmem * 3) // 4))

    out = pl.pallas_call(
        kernel,
        grid=(nb,),
        in_specs=in_specs,
        out_specs=pl.BlockSpec((1, C, L), lambda b: (b, 0, 0)),
        out_shape=jax.ShapeDtypeStruct((nb, C, L), x_nchw.dtype),
        compiler_params=pltpu.CompilerParams(
            dimension_semantics=("parallel",),
            vmem_limit_bytes=vmem_limit),
    )(x, *plist)

    return (out.reshape(nb, C, Bt, HW)
            .transpose(0, 2, 1, 3)
            .reshape(B, C, H, W))


# ------------------------------ reference ------------------------------ #

def transformer_block_ref(x_nchw, params, num_heads):
    """Pure-JAX f32 reference mirroring the torch module op-for-op
    (pad-based depthwise conv, exact-erf GELU, temperature applied after q@kT)."""
    B, C, H, W = x_nchw.shape
    HW = H * W
    hidden = int(params["po_w"].shape[1])
    ch = C // num_heads

    def ln(v, w, b):
        mu = jnp.mean(v, axis=0, keepdims=True)
        var = jnp.mean((v - mu) ** 2, axis=0, keepdims=True)
        return (v - mu) / jnp.sqrt(var + 1e-5) * w + b

    def dwconv(v, w9, b):
        Cv = v.shape[0]
        vh = v.reshape(Cv, H, W)
        pz = jnp.pad(vh, ((0, 0), (1, 1), (1, 1)))
        acc = jnp.zeros((Cv, H, W), jnp.float32)
        for ky in range(3):
            for kx in range(3):
                acc = acc + (pz[:, ky:ky + H, kx:kx + W]
                             * w9[:, ky * 3 + kx].reshape(Cv, 1, 1))
        return acc.reshape(Cv, HW) + b

    def norm_rows(v):
        n = jnp.sqrt(jnp.sum(v * v, axis=-1, keepdims=True))
        return v / jnp.maximum(n, 1e-12)

    def one(xc):
        y = ln(xc, params["ln1_w"], params["ln1_b"])
        qkv = params["qkv_w"] @ y + params["qkv_b"]
        qkv = dwconv(qkv, params["dw_w"], params["dw_b"])
        q, k, v = qkv[:C], qkv[C:2 * C], qkv[2 * C:]
        qh = norm_rows(q.reshape(num_heads, ch, HW))
        kh = norm_rows(k.reshape(num_heads, ch, HW))
        vh = v.reshape(num_heads, ch, HW)
        attn = jnp.einsum("hcn,hdn->hcd", qh, kh)
        attn = attn * params["temperature"].reshape(num_heads, 1, 1)
        attn = jax.nn.softmax(attn, axis=-1)
        out = jnp.einsum("hcd,hdn->hcn", attn, vh).reshape(C, HW)
        out = params["proj_w"] @ out + params["proj_b"]
        xa = xc + out
        y = ln(xa, params["ln2_w"], params["ln2_b"])
        hcat = params["pi_w"] @ y + params["pi_b"]
        hcat = dwconv(hcat, params["fdw_w"], params["fdw_b"])
        g = jax.nn.gelu(hcat[:hidden], approximate=False) * hcat[hidden:]
        return xa + (params["po_w"] @ g + params["po_b"])

    x = x_nchw.reshape(B, C, HW).astype(jnp.float32)
    return jax.vmap(one)(x).reshape(B, C, H, W)


# ------------------------------ params ------------------------------ #

def init_params(key, dim, num_heads, ffn_expansion_factor):
    hidden = int(dim * ffn_expansion_factor)
    ks = jax.random.split(key, 13)

    def w(k, shape, scale=0.05):
        return scale * jax.random.normal(k, shape, dtype=jnp.float32)

    return {
        # nn.Parameter(torch.ones(num_heads,1,1)); perturbed so the path is tested
        "temperature": 1.0 + 0.1 * jax.random.normal(ks[12], (num_heads,),
                                                     dtype=jnp.float32),
        # WithBias LayerNorms (torch init: weight=1, bias=0)
        "ln1_w": jnp.ones((dim, 1), jnp.float32),
        "ln1_b": jnp.zeros((dim, 1), jnp.float32),
        "ln2_w": jnp.ones((dim, 1), jnp.float32),
        "ln2_b": jnp.zeros((dim, 1), jnp.float32),
        # Attention: qkv 1x1 (dim -> 3*dim), depthwise 3x3 (taps flat 9), proj 1x1
        "qkv_w": w(ks[0], (3 * dim, dim)),      # (Cout, Cin)
        "qkv_b": w(ks[1], (3 * dim, 1)),
        "dw_w": w(ks[2], (3 * dim, 9)),         # (C, ky*3+kx)
        "dw_b": w(ks[3], (3 * dim, 1)),
        "proj_w": w(ks[4], (dim, dim)),
        "proj_b": w(ks[5], (dim, 1)),
        # FFN: project_in (dim -> 2*hidden), dw 3x3, project_out (hidden -> dim)
        "pi_w": w(ks[6], (2 * hidden, dim)),
        "pi_b": w(ks[7], (2 * hidden, 1)),
        "fdw_w": w(ks[8], (2 * hidden, 9)),
        "fdw_b": w(ks[9], (2 * hidden, 1)),
        "po_w": w(ks[10], (dim, hidden)),
        "po_b": w(ks[11], (dim, 1)),
    }


if __name__ == "__main__":
    B, dim, H, W = 2, 16, 16, 16
    num_heads = 2
    ffn_expansion_factor = 2.0   # bias=True, LayerNorm_type='WithBias'

    key = jax.random.PRNGKey(0)
    kx, kp = jax.random.split(key)
    x = jax.random.normal(kx, (B, dim, H, W), dtype=jnp.float32)
    params = init_params(kp, dim, num_heads, ffn_expansion_factor)

    out = jax.block_until_ready(transformer_block_pallas(x, params, num_heads))
    ref = jax.block_until_ready(transformer_block_ref(x, params, num_heads))

    np.testing.assert_allclose(np.asarray(out), np.asarray(ref),
                               rtol=2e-2, atol=2e-2)
    print("KERNEL_OK")
</pallas_src>

<mosaic_0001>
module attributes {stable_mosaic.version = 11 : i64} {
  func.func @_tb_kernel(%arg0: i32, %arg1: memref<1x16x512xf32, #tpu.memory_space<vmem>>, %arg2: memref<9x1x512xf32, #tpu.memory_space<vmem>>, %arg3: memref<16x1xf32, #tpu.memory_space<vmem>>, %arg4: memref<16x1xf32, #tpu.memory_space<vmem>>, %arg5: memref<48x16xbf16, #tpu.memory_space<vmem>>, %arg6: memref<48x1xf32, #tpu.memory_space<vmem>>, %arg7: memref<48x9xf32, #tpu.memory_space<vmem>>, %arg8: memref<48x1xf32, #tpu.memory_space<vmem>>, %arg9: memref<16x16xbf16, #tpu.memory_space<vmem>>, %arg10: memref<16x1xf32, #tpu.memory_space<vmem>>, %arg11: memref<16x1xf32, #tpu.memory_space<vmem>>, %arg12: memref<16x1xf32, #tpu.memory_space<vmem>>, %arg13: memref<16x1xf32, #tpu.memory_space<vmem>>, %arg14: memref<64x16xbf16, #tpu.memory_space<vmem>>, %arg15: memref<64x1xf32, #tpu.memory_space<vmem>>, %arg16: memref<64x9xf32, #tpu.memory_space<vmem>>, %arg17: memref<64x1xf32, #tpu.memory_space<vmem>>, %arg18: memref<16x32xbf16, #tpu.memory_space<vmem>>, %arg19: memref<16x1xf32, #tpu.memory_space<vmem>>, %arg20: memref<1x16x512xf32, #tpu.memory_space<vmem>>) attributes {dimension_semantics = [#tpu.dimension_semantics<parallel>], iteration_bounds = array<i64: 1>, scalar_prefetch = 0 : i64, scratch_operands = 0 : i64, tpu.core_type = #tpu.core_type<tc>, window_params = [{transform_indices = @transform_0, window_bounds = array<i64: 1, 16, 512>}, {pipeline_mode = #tpu.pipeline_mode<synchronous>, transform_indices = @transform_1, window_bounds = array<i64: 9, 1, 512>}, {pipeline_mode = #tpu.pipeline_mode<synchronous>, transform_indices = @transform_2, window_bounds = array<i64: 16, 1>}, {pipeline_mode = #tpu.pipeline_mode<synchronous>, transform_indices = @transform_3, window_bounds = array<i64: 16, 1>}, {pipeline_mode = #tpu.pipeline_mode<synchronous>, transform_indices = @transform_4, window_bounds = array<i64: 48, 16>}, {pipeline_mode = #tpu.pipeline_mode<synchronous>, transform_indices = @transform_5, window_bounds = array<i64: 48, 1>}, {pipeline_mode = #tpu.pipeline_mode<synchronous>, transform_indices = @transform_6, window_bounds = array<i64: 48, 9>}, {pipeline_mode = #tpu.pipeline_mode<synchronous>, transform_indices = @transform_7, window_bounds = array<i64: 48, 1>}, {pipeline_mode = #tpu.pipeline_mode<synchronous>, transform_indices = @transform_8, window_bounds = array<i64: 16, 16>}, {pipeline_mode = #tpu.pipeline_mode<synchronous>, transform_indices = @transform_9, window_bounds = array<i64: 16, 1>}, {pipeline_mode = #tpu.pipeline_mode<synchronous>, transform_indices = @transform_10, window_bounds = array<i64: 16, 1>}, {pipeline_mode = #tpu.pipeline_mode<synchronous>, transform_indices = @transform_11, window_bounds = array<i64: 16, 1>}, {pipeline_mode = #tpu.pipeline_mode<synchronous>, transform_indices = @transform_12, window_bounds = array<i64: 16, 1>}, {pipeline_mode = #tpu.pipeline_mode<synchronous>, transform_indices = @transform_13, window_bounds = array<i64: 64, 16>}, {pipeline_mode = #tpu.pipeline_mode<synchronous>, transform_indices = @transform_14, window_bounds = array<i64: 64, 1>}, {pipeline_mode = #tpu.pipeline_mode<synchronous>, transform_indices = @transform_15, window_bounds = array<i64: 64, 9>}, {pipeline_mode = #tpu.pipeline_mode<synchronous>, transform_indices = @transform_16, window_bounds = array<i64: 64, 1>}, {pipeline_mode = #tpu.pipeline_mode<synchronous>, transform_indices = @transform_17, window_bounds = array<i64: 16, 32>}, {pipeline_mode = #tpu.pipeline_mode<synchronous>, transform_indices = @transform_18, window_bounds = array<i64: 16, 1>}, {transform_indices = @transform_19, window_bounds = array<i64: 1, 16, 512>}]} {
    %c0 = arith.constant 0 : index
    %c0_0 = arith.constant 0 : index
    %c0_1 = arith.constant 0 : index
    %0 = vector.load %arg1[%c0, %c0_0, %c0_1] : memref<1x16x512xf32, #tpu.memory_space<vmem>>, vector<1x16x512xf32>
    %1 = vector.shape_cast %0 : vector<1x16x512xf32> to vector<16x512xf32>
    %c0_2 = arith.constant 0 : index
    %c0_3 = arith.constant 0 : index
    %c0_4 = arith.constant 0 : index
    %2 = vector.load %arg2[%c0_2, %c0_3, %c0_4] : memref<9x1x512xf32, #tpu.memory_space<vmem>>, vector<9x1x512xf32>
    %c0_5 = arith.constant 0 : index
    %c0_6 = arith.constant 0 : index
    %3 = vector.load %arg3[%c0_5, %c0_6] : memref<16x1xf32, #tpu.memory_space<vmem>>, vector<16x1xf32>
    %c0_7 = arith.constant 0 : index
    %c0_8 = arith.constant 0 : index
    %4 = vector.load %arg4[%c0_7, %c0_8] : memref<16x1xf32, #tpu.memory_space<vmem>>, vector<16x1xf32>
    %c0_9 = arith.constant 0 : index
    %c0_10 = arith.constant 0 : index
    %5 = vector.load %arg5[%c0_9, %c0_10] : memref<48x16xbf16, #tpu.memory_space<vmem>>, vector<48x16xbf16>
    %c0_11 = arith.constant 0 : index
    %c0_12 = arith.constant 0 : index
    %6 = vector.load %arg6[%c0_11, %c0_12] : memref<48x1xf32, #tpu.memory_space<vmem>>, vector<48x1xf32>
    %c0_13 = arith.constant 0 : index
    %c0_14 = arith.constant 0 : index
    %7 = vector.load %arg7[%c0_13, %c0_14] : memref<48x9xf32, #tpu.memory_space<vmem>>, vector<48x9xf32>
    %c0_15 = arith.constant 0 : index
    %c0_16 = arith.constant 0 : index
    %8 = vector.load %arg8[%c0_15, %c0_16] : memref<48x1xf32, #tpu.memory_space<vmem>>, vector<48x1xf32>
    %c0_17 = arith.constant 0 : index
    %c0_18 = arith.constant 0 : index
    %9 = vector.load %arg9[%c0_17, %c0_18] : memref<16x16xbf16, #tpu.memory_space<vmem>>, vector<16x16xbf16>
    %c0_19 = arith.constant 0 : index
    %c0_20 = arith.constant 0 : index
    %10 = vector.load %arg10[%c0_19, %c0_20] : memref<16x1xf32, #tpu.memory_space<vmem>>, vector<16x1xf32>
    %c0_21 = arith.constant 0 : index
    %c0_22 = arith.constant 0 : index
    %11 = vector.load %arg11[%c0_21, %c0_22] : memref<16x1xf32, #tpu.memory_space<vmem>>, vector<16x1xf32>
    %c0_23 = arith.constant 0 : index
    %c0_24 = arith.constant 0 : index
    %12 = vector.load %arg12[%c0_23, %c0_24] : memref<16x1xf32, #tpu.memory_space<vmem>>, vector<16x1xf32>
    %c0_25 = arith.constant 0 : index
    %c0_26 = arith.constant 0 : index
    %13 = vector.load %arg13[%c0_25, %c0_26] : memref<16x1xf32, #tpu.memory_space<vmem>>, vector<16x1xf32>
    %c0_27 = arith.constant 0 : index
    %c0_28 = arith.constant 0 : index
    %14 = vector.load %arg14[%c0_27, %c0_28] : memref<64x16xbf16, #tpu.memory_space<vmem>>, vector<64x16xbf16>
    %c0_29 = arith.constant 0 : index
    %c0_30 = arith.constant 0 : index
    %15 = vector.load %arg15[%c0_29, %c0_30] : memref<64x1xf32, #tpu.memory_space<vmem>>, vector<64x1xf32>
    %c0_31 = arith.constant 0 : index
    %c0_32 = arith.constant 0 : index
    %16 = vector.load %arg16[%c0_31, %c0_32] : memref<64x9xf32, #tpu.memory_space<vmem>>, vector<64x9xf32>
    %c0_33 = arith.constant 0 : index
    %c0_34 = arith.constant 0 : index
    %17 = vector.load %arg17[%c0_33, %c0_34] : memref<64x1xf32, #tpu.memory_space<vmem>>, vector<64x1xf32>
    %c0_35 = arith.constant 0 : index
    %c0_36 = arith.constant 0 : index
    %18 = vector.load %arg18[%c0_35, %c0_36] : memref<16x32xbf16, #tpu.memory_space<vmem>>, vector<16x32xbf16>
    %c0_37 = arith.constant 0 : index
    %c0_38 = arith.constant 0 : index
    %19 = vector.load %arg19[%c0_37, %c0_38] : memref<16x1xf32, #tpu.memory_space<vmem>>, vector<16x1xf32>
    %cst = arith.constant dense<0.000000e+00> : vector<512xf32>
    %20 = vector.multi_reduction <add>, %1, %cst [0] : vector<16x512xf32> to vector<512xf32>
    %21 = vector.shape_cast %20 : vector<512xf32> to vector<1x512xf32>
    %cst_39 = arith.constant 1.600000e+01 : f32
    %22 = vector.broadcast %cst_39 : f32 to vector<1x512xf32>
    %23 = arith.divf %21, %22 : vector<1x512xf32>
    %24 = vector.broadcast %23 : vector<1x512xf32> to vector<16x512xf32>
    %25 = arith.subf %1, %24 : vector<16x512xf32>
    %26 = arith.mulf %25, %25 : vector<16x512xf32>
    %cst_40 = arith.constant dense<0.000000e+00> : vector<512xf32>
    %27 = vector.multi_reduction <add>, %26, %cst_40 [0] : vector<16x512xf32> to vector<512xf32>
    %28 = vector.shape_cast %27 : vector<512xf32> to vector<1x512xf32>
    %cst_41 = arith.constant 1.600000e+01 : f32
    %29 = vector.broadcast %cst_41 : f32 to vector<1x512xf32>
    %30 = arith.divf %28, %29 : vector<1x512xf32>
    %31 = vector.broadcast %23 : vector<1x512xf32> to vector<16x512xf32>
    %32 = arith.subf %1, %31 : vector<16x512xf32>
    %cst_42 = arith.constant 9.99999974E-6 : f32
    %33 = vector.broadcast %cst_42 : f32 to vector<1x512xf32>
    %34 = arith.addf %30, %33 : vector<1x512xf32>
    %35 = math.rsqrt %34 : vector<1x512xf32>
    %36 = vector.broadcast %35 : vector<1x512xf32> to vector<16x512xf32>
    %37 = arith.mulf %32, %36 : vector<16x512xf32>
    %38 = vector.broadcast %3 : vector<16x1xf32> to vector<16x512xf32>
    %39 = arith.mulf %37, %38 : vector<16x512xf32>
    %40 = vector.broadcast %4 : vector<16x1xf32> to vector<16x512xf32>
    %41 = arith.addf %39, %40 : vector<16x512xf32>
    %42 = arith.truncf %41 : vector<16x512xf32> to vector<16x512xbf16>
    %cst_43 = arith.constant dense<0.000000e+00> : vector<48x512xf32>
    %43 = tpu.matmul %5, %42, %cst_43 {dimension_numbers = #tpu.dot_dimension_numbers<[1], [0], [0], [1], [0, 0, 1, 1], [], []>} : vector<48x16xbf16>, vector<16x512xbf16>, vector<48x512xf32> -> vector<48x512xf32>
    %44 = vector.broadcast %6 : vector<48x1xf32> to vector<48x512xf32>
    %45 = arith.addf %43, %44 : vector<48x512xf32>
    %46 = vector.extract_strided_slice %7 {offsets = [0, 4], sizes = [48, 1], strides = [1, 1]} : vector<48x9xf32> to vector<48x1xf32>
    %47 = vector.broadcast %46 : vector<48x1xf32> to vector<48x512xf32>
    %48 = arith.mulf %45, %47 : vector<48x512xf32>
    %c17_i32 = arith.constant 17 : i32
    %49 = tpu.dynamic_rotate %45 by %c17_i32 dim 1 : vector<48x512xf32>, i32 -> vector<48x512xf32>
    %50 = vector.extract_strided_slice %7 {offsets = [0, 0], sizes = [48, 1], strides = [1, 1]} : vector<48x9xf32> to vector<48x1xf32>
    %51 = vector.extract_strided_slice %2 {offsets = [0, 0, 0], sizes = [1, 1, 512], strides = [1, 1, 1]} : vector<9x1x512xf32> to vector<1x1x512xf32>
    %52 = vector.shape_cast %51 : vector<1x1x512xf32> to vector<1x512xf32>
    %53 = vector.broadcast %50 : vector<48x1xf32> to vector<48x512xf32>
    %54 = vector.broadcast %52 : vector<1x512xf32> to vector<48x512xf32>
    %55 = arith.mulf %53, %54 : vector<48x512xf32>
    %56 = arith.mulf %49, %55 : vector<48x512xf32>
    %57 = arith.addf %48, %56 : vector<48x512xf32>
    %c16_i32 = arith.constant 16 : i32
    %58 = tpu.dynamic_rotate %45 by %c16_i32 dim 1 : vector<48x512xf32>, i32 -> vector<48x512xf32>
    %59 = vector.extract_strided_slice %7 {offsets = [0, 1], sizes = [48, 1], strides = [1, 1]} : vector<48x9xf32> to vector<48x1xf32>
    %60 = vector.extract_strided_slice %2 {offsets = [1, 0, 0], sizes = [1, 1, 512], strides = [1, 1, 1]} : vector<9x1x512xf32> to vector<1x1x512xf32>
    %61 = vector.shape_cast %60 : vector<1x1x512xf32> to vector<1x512xf32>
    %62 = vector.broadcast %59 : vector<48x1xf32> to vector<48x512xf32>
    %63 = vector.broadcast %61 : vector<1x512xf32> to vector<48x512xf32>
    %64 = arith.mulf %62, %63 : vector<48x512xf32>
    %65 = arith.mulf %58, %64 : vector<48x512xf32>
    %66 = arith.addf %57, %65 : vector<48x512xf32>
    %c15_i32 = arith.constant 15 : i32
    %67 = tpu.dynamic_rotate %45 by %c15_i32 dim 1 : vector<48x512xf32>, i32 -> vector<48x512xf32>
    %68 = vector.extract_strided_slice %7 {offsets = [0, 2], sizes = [48, 1], strides = [1, 1]} : vector<48x9xf32> to vector<48x1xf32>
    %69 = vector.extract_strided_slice %2 {offsets = [2, 0, 0], sizes = [1, 1, 512], strides = [1, 1, 1]} : vector<9x1x512xf32> to vector<1x1x512xf32>
    %70 = vector.shape_cast %69 : vector<1x1x512xf32> to vector<1x512xf32>
    %71 = vector.broadcast %68 : vector<48x1xf32> to vector<48x512xf32>
    %72 = vector.broadcast %70 : vector<1x512xf32> to vector<48x512xf32>
    %73 = arith.mulf %71, %72 : vector<48x512xf32>
    %74 = arith.mulf %67, %73 : vector<48x512xf32>
    %75 = arith.addf %66, %74 : vector<48x512xf32>
    %c1_i32 = arith.constant 1 : i32
    %76 = tpu.dynamic_rotate %45 by %c1_i32 dim 1 : vector<48x512xf32>, i32 -> vector<48x512xf32>
    %77 = vector.extract_strided_slice %7 {offsets = [0, 3], sizes = [48, 1], strides = [1, 1]} : vector<48x9xf32> to vector<48x1xf32>
    %78 = vector.extract_strided_slice %2 {offsets = [3, 0, 0], sizes = [1, 1, 512], strides = [1, 1, 1]} : vector<9x1x512xf32> to vector<1x1x512xf32>
    %79 = vector.shape_cast %78 : vector<1x1x512xf32> to vector<1x512xf32>
    %80 = vector.broadcast %77 : vector<48x1xf32> to vector<48x512xf32>
    %81 = vector.broadcast %79 : vector<1x512xf32> to vector<48x512xf32>
    %82 = arith.mulf %80, %81 : vector<48x512xf32>
    %83 = arith.mulf %76, %82 : vector<48x512xf32>
    %84 = arith.addf %75, %83 : vector<48x512xf32>
    %c511_i32 = arith.constant 511 : i32
    %85 = tpu.dynamic_rotate %45 by %c511_i32 dim 1 : vector<48x512xf32>, i32 -> vector<48x512xf32>
    %86 = vector.extract_strided_slice %7 {offsets = [0, 5], sizes = [48, 1], strides = [1, 1]} : vector<48x9xf32> to vector<48x1xf32>
    %87 = vector.extract_strided_slice %2 {offsets = [5, 0, 0], sizes = [1, 1, 512], strides = [1, 1, 1]} : vector<9x1x512xf32> to vector<1x1x512xf32>
    %88 = vector.shape_cast %87 : vector<1x1x512xf32> to vector<1x512xf32>
    %89 = vector.broadcast %86 : vector<48x1xf32> to vector<48x512xf32>
    %90 = vector.broadcast %88 : vector<1x512xf32> to vector<48x512xf32>
    %91 = arith.mulf %89, %90 : vector<48x512xf32>
    %92 = arith.mulf %85, %91 : vector<48x512xf32>
    %93 = arith.addf %84, %92 : vector<48x512xf32>
    %c497_i32 = arith.constant 497 : i32
    %94 = tpu.dynamic_rotate %45 by %c497_i32 dim 1 : vector<48x512xf32>, i32 -> vector<48x512xf32>
    %95 = vector.extract_strided_slice %7 {offsets = [0, 6], sizes = [48, 1], strides = [1, 1]} : vector<48x9xf32> to vector<48x1xf32>
    %96 = vector.extract_strided_slice %2 {offsets = [6, 0, 0], sizes = [1, 1, 512], strides = [1, 1, 1]} : vector<9x1x512xf32> to vector<1x1x512xf32>
    %97 = vector.shape_cast %96 : vector<1x1x512xf32> to vector<1x512xf32>
    %98 = vector.broadcast %95 : vector<48x1xf32> to vector<48x512xf32>
    %99 = vector.broadcast %97 : vector<1x512xf32> to vector<48x512xf32>
    %100 = arith.mulf %98, %99 : vector<48x512xf32>
    %101 = arith.mulf %94, %100 : vector<48x512xf32>
    %102 = arith.addf %93, %101 : vector<48x512xf32>
    %c496_i32 = arith.constant 496 : i32
    %103 = tpu.dynamic_rotate %45 by %c496_i32 dim 1 : vector<48x512xf32>, i32 -> vector<48x512xf32>
    %104 = vector.extract_strided_slice %7 {offsets = [0, 7], sizes = [48, 1], strides = [1, 1]} : vector<48x9xf32> to vector<48x1xf32>
    %105 = vector.extract_strided_slice %2 {offsets = [7, 0, 0], sizes = [1, 1, 512], strides = [1, 1, 1]} : vector<9x1x512xf32> to vector<1x1x512xf32>
    %106 = vector.shape_cast %105 : vector<1x1x512xf32> to vector<1x512xf32>
    %107 = vector.broadcast %104 : vector<48x1xf32> to vector<48x512xf32>
    %108 = vector.broadcast %106 : vector<1x512xf32> to vector<48x512xf32>
    %109 = arith.mulf %107, %108 : vector<48x512xf32>
    %110 = arith.mulf %103, %109 : vector<48x512xf32>
    %111 = arith.addf %102, %110 : vector<48x512xf32>
    %c495_i32 = arith.constant 495 : i32
    %112 = tpu.dynamic_rotate %45 by %c495_i32 dim 1 : vector<48x512xf32>, i32 -> vector<48x512xf32>
    %113 = vector.extract_strided_slice %7 {offsets = [0, 8], sizes = [48, 1], strides = [1, 1]} : vector<48x9xf32> to vector<48x1xf32>
    %114 = vector.extract_strided_slice %2 {offsets = [8, 0, 0], sizes = [1, 1, 512], strides = [1, 1, 1]} : vector<9x1x512xf32> to vector<1x1x512xf32>
    %115 = vector.shape_cast %114 : vector<1x1x512xf32> to vector<1x512xf32>
    %116 = vector.broadcast %113 : vector<48x1xf32> to vector<48x512xf32>
    %117 = vector.broadcast %115 : vector<1x512xf32> to vector<48x512xf32>
    %118 = arith.mulf %116, %117 : vector<48x512xf32>
    %119 = arith.mulf %112, %118 : vector<48x512xf32>
    %120 = arith.addf %111, %119 : vector<48x512xf32>
    %121 = vector.broadcast %8 : vector<48x1xf32> to vector<48x512xf32>
    %122 = arith.addf %120, %121 : vector<48x512xf32>
    %123 = vector.extract_strided_slice %122 {offsets = [0, 0], sizes = [16, 512], strides = [1, 1]} : vector<48x512xf32> to vector<16x512xf32>
    %124 = vector.extract_strided_slice %122 {offsets = [16, 0], sizes = [16, 512], strides = [1, 1]} : vector<48x512xf32> to vector<16x512xf32>
    %125 = vector.extract_strided_slice %122 {offsets = [32, 0], sizes = [16, 512], strides = [1, 1]} : vector<48x512xf32> to vector<16x512xf32>
    %126 = vector.extract_strided_slice %123 {offsets = [0, 0], sizes = [16, 256], strides = [1, 1]} : vector<16x512xf32> to vector<16x256xf32>
    %127 = vector.extract_strided_slice %124 {offsets = [0, 0], sizes = [16, 256], strides = [1, 1]} : vector<16x512xf32> to vector<16x256xf32>
    %128 = vector.extract_strided_slice %125 {offsets = [0, 0], sizes = [16, 256], strides = [1, 1]} : vector<16x512xf32> to vector<16x256xf32>
    %129 = arith.mulf %126, %126 : vector<16x256xf32>
    %cst_44 = arith.constant dense<0.000000e+00> : vector<16xf32>
    %130 = vector.multi_reduction <add>, %129, %cst_44 [1] : vector<16x256xf32> to vector<16xf32>
    %131 = vector.shape_cast %130 : vector<16xf32> to vector<16x1xf32>
    %cst_45 = arith.constant 1.000000e-24 : f32
    %132 = vector.broadcast %cst_45 : f32 to vector<16x1xf32>
    %133 = arith.maximumf %131, %132 : vector<16x1xf32>
    %134 = math.rsqrt %133 : vector<16x1xf32>
    %135 = vector.broadcast %134 : vector<16x1xf32> to vector<16x256xf32>
    %136 = arith.mulf %126, %135 : vector<16x256xf32>
    %137 = vector.broadcast %11 : vector<16x1xf32> to vector<16x256xf32>
    %138 = arith.mulf %136, %137 : vector<16x256xf32>
    %139 = arith.truncf %138 : vector<16x256xf32> to vector<16x256xbf16>
    %140 = vector.shape_cast %139 : vector<16x256xbf16> to vector<2x8x256xbf16>
    %141 = arith.mulf %127, %127 : vector<16x256xf32>
    %cst_46 = arith.constant dense<0.000000e+00> : vector<16xf32>
    %142 = vector.multi_reduction <add>, %141, %cst_46 [1] : vector<16x256xf32> to vector<16xf32>
    %143 = vector.shape_cast %142 : vector<16xf32> to vector<16x1xf32>
    %cst_47 = arith.constant 1.000000e-24 : f32
    %144 = vector.broadcast %cst_47 : f32 to vector<16x1xf32>
    %145 = arith.maximumf %143, %144 : vector<16x1xf32>
    %146 = math.rsqrt %145 : vector<16x1xf32>
    %147 = vector.broadcast %146 : vector<16x1xf32> to vector<16x256xf32>
    %148 = arith.mulf %127, %147 : vector<16x256xf32>
    %149 = arith.truncf %148 : vector<16x256xf32> to vector<16x256xbf16>
    %150 = vector.shape_cast %149 : vector<16x256xbf16> to vector<2x8x256xbf16>
    %151 = arith.truncf %128 : vector<16x256xf32> to vector<16x256xbf16>
    %152 = vector.shape_cast %151 : vector<16x256xbf16> to vector<2x8x256xbf16>
    %cst_48 = arith.constant dense<0.000000e+00> : vector<2x8x8xf32>
    %153 = tpu.matmul %140, %150, %cst_48 {dimension_numbers = #tpu.dot_dimension_numbers<[2], [2], [1], [1], [0, 0, 0, 1, 1, 1], [0], [0]>} : vector<2x8x256xbf16>, vector<2x8x256xbf16>, vector<2x8x8xf32> -> vector<2x8x8xf32>
    %cst_49 = arith.constant dense<0xFF800000> : vector<2x8xf32>
    %154 = vector.multi_reduction <maximumf>, %153, %cst_49 [2] : vector<2x8x8xf32> to vector<2x8xf32>
    %155 = vector.shape_cast %154 : vector<2x8xf32> to vector<2x8x1xf32>
    %156 = vector.broadcast %155 : vector<2x8x1xf32> to vector<2x8x8xf32>
    %157 = arith.subf %153, %156 : vector<2x8x8xf32>
    %158 = math.exp %157 : vector<2x8x8xf32>
    %cst_50 = arith.constant dense<0.000000e+00> : vector<2x8xf32>
    %159 = vector.multi_reduction <add>, %158, %cst_50 [2] : vector<2x8x8xf32> to vector<2x8xf32>
    %160 = vector.shape_cast %159 : vector<2x8xf32> to vector<2x8x1xf32>
    %161 = tpu.reciprocal %160 {approx = true} : vector<2x8x1xf32> -> vector<2x8x1xf32>
    %162 = vector.broadcast %161 : vector<2x8x1xf32> to vector<2x8x8xf32>
    %163 = arith.mulf %158, %162 : vector<2x8x8xf32>
    %164 = arith.truncf %163 : vector<2x8x8xf32> to vector<2x8x8xbf16>
    %cst_51 = arith.constant dense<0.000000e+00> : vector<2x8x256xf32>
    %165 = tpu.matmul %164, %152, %cst_51 {dimension_numbers = #tpu.dot_dimension_numbers<[2], [1], [1], [2], [0, 0, 0, 1, 1, 2], [0], [0]>} : vector<2x8x8xbf16>, vector<2x8x256xbf16>, vector<2x8x256xf32> -> vector<2x8x256xf32>
    %166 = vector.shape_cast %165 : vector<2x8x256xf32> to vector<16x256xf32>
    %167 = vector.extract_strided_slice %123 {offsets = [0, 256], sizes = [16, 256], strides = [1, 1]} : vector<16x512xf32> to vector<16x256xf32>
    %168 = vector.extract_strided_slice %124 {offsets = [0, 256], sizes = [16, 256], strides = [1, 1]} : vector<16x512xf32> to vector<16x256xf32>
    %169 = vector.extract_strided_slice %125 {offsets = [0, 256], sizes = [16, 256], strides = [1, 1]} : vector<16x512xf32> to vector<16x256xf32>
    %170 = arith.mulf %167, %167 : vector<16x256xf32>
    %cst_52 = arith.constant dense<0.000000e+00> : vector<16xf32>
    %171 = vector.multi_reduction <add>, %170, %cst_52 [1] : vector<16x256xf32> to vector<16xf32>
    %172 = vector.shape_cast %171 : vector<16xf32> to vector<16x1xf32>
    %cst_53 = arith.constant 1.000000e-24 : f32
    %173 = vector.broadcast %cst_53 : f32 to vector<16x1xf32>
    %174 = arith.maximumf %172, %173 : vector<16x1xf32>
    %175 = math.rsqrt %174 : vector<16x1xf32>
    %176 = vector.broadcast %175 : vector<16x1xf32> to vector<16x256xf32>
    %177 = arith.mulf %167, %176 : vector<16x256xf32>
    %178 = vector.broadcast %11 : vector<16x1xf32> to vector<16x256xf32>
    %179 = arith.mulf %177, %178 : vector<16x256xf32>
    %180 = arith.truncf %179 : vector<16x256xf32> to vector<16x256xbf16>
    %181 = vector.shape_cast %180 : vector<16x256xbf16> to vector<2x8x256xbf16>
    %182 = arith.mulf %168, %168 : vector<16x256xf32>
    %cst_54 = arith.constant dense<0.000000e+00> : vector<16xf32>
    %183 = vector.multi_reduction <add>, %182, %cst_54 [1] : vector<16x256xf32> to vector<16xf32>
    %184 = vector.shape_cast %183 : vector<16xf32> to vector<16x1xf32>
    %cst_55 = arith.constant 1.000000e-24 : f32
    %185 = vector.broadcast %cst_55 : f32 to vector<16x1xf32>
    %186 = arith.maximumf %184, %185 : vector<16x1xf32>
    %187 = math.rsqrt %186 : vector<16x1xf32>
    %188 = vector.broadcast %187 : vector<16x1xf32> to vector<16x256xf32>
    %189 = arith.mulf %168, %188 : vector<16x256xf32>
    %190 = arith.truncf %189 : vector<16x256xf32> to vector<16x256xbf16>
    %191 = vector.shape_cast %190 : vector<16x256xbf16> to vector<2x8x256xbf16>
    %192 = arith.truncf %169 : vector<16x256xf32> to vector<16x256xbf16>
    %193 = vector.shape_cast %192 : vector<16x256xbf16> to vector<2x8x256xbf16>
    %cst_56 = arith.constant dense<0.000000e+00> : vector<2x8x8xf32>
    %194 = tpu.matmul %181, %191, %cst_56 {dimension_numbers = #tpu.dot_dimension_numbers<[2], [2], [1], [1], [0, 0, 0, 1, 1, 1], [0], [0]>} : vector<2x8x256xbf16>, vector<2x8x256xbf16>, vector<2x8x8xf32> -> vector<2x8x8xf32>
    %cst_57 = arith.constant dense<0xFF800000> : vector<2x8xf32>
    %195 = vector.multi_reduction <maximumf>, %194, %cst_57 [2] : vector<2x8x8xf32> to vector<2x8xf32>
    %196 = vector.shape_cast %195 : vector<2x8xf32> to vector<2x8x1xf32>
    %197 = vector.broadcast %196 : vector<2x8x1xf32> to vector<2x8x8xf32>
    %198 = arith.subf %194, %197 : vector<2x8x8xf32>
    %199 = math.exp %198 : vector<2x8x8xf32>
    %cst_58 = arith.constant dense<0.000000e+00> : vector<2x8xf32>
    %200 = vector.multi_reduction <add>, %199, %cst_58 [2] : vector<2x8x8xf32> to vector<2x8xf32>
    %201 = vector.shape_cast %200 : vector<2x8xf32> to vector<2x8x1xf32>
    %202 = tpu.reciprocal %201 {approx = true} : vector<2x8x1xf32> -> vector<2x8x1xf32>
    %203 = vector.broadcast %202 : vector<2x8x1xf32> to vector<2x8x8xf32>
    %204 = arith.mulf %199, %203 : vector<2x8x8xf32>
    %205 = arith.truncf %204 : vector<2x8x8xf32> to vector<2x8x8xbf16>
    %cst_59 = arith.constant dense<0.000000e+00> : vector<2x8x256xf32>
    %206 = tpu.matmul %205, %193, %cst_59 {dimension_numbers = #tpu.dot_dimension_numbers<[2], [1], [1], [2], [0, 0, 0, 1, 1, 2], [0], [0]>} : vector<2x8x8xbf16>, vector<2x8x256xbf16>, vector<2x8x256xf32> -> vector<2x8x256xf32>
    %207 = vector.shape_cast %206 : vector<2x8x256xf32> to vector<16x256xf32>
    %208 = tpu.concatenate %166, %207 in 1 : vector<16x256xf32>, vector<16x256xf32> -> vector<16x512xf32>
    %209 = arith.truncf %208 : vector<16x512xf32> to vector<16x512xbf16>
    %cst_60 = arith.constant dense<0.000000e+00> : vector<16x512xf32>
    %210 = tpu.matmul %9, %209, %cst_60 {dimension_numbers = #tpu.dot_dimension_numbers<[1], [0], [0], [1], [0, 0, 1, 1], [], []>} : vector<16x16xbf16>, vector<16x512xbf16>, vector<16x512xf32> -> vector<16x512xf32>
    %211 = vector.broadcast %10 : vector<16x1xf32> to vector<16x512xf32>
    %212 = arith.addf %210, %211 : vector<16x512xf32>
    %213 = arith.addf %1, %212 : vector<16x512xf32>
    %cst_61 = arith.constant dense<0.000000e+00> : vector<512xf32>
    %214 = vector.multi_reduction <add>, %213, %cst_61 [0] : vector<16x512xf32> to vector<512xf32>
    %215 = vector.shape_cast %214 : vector<512xf32> to vector<1x512xf32>
    %cst_62 = arith.constant 1.600000e+01 : f32
    %216 = vector.broadcast %cst_62 : f32 to vector<1x512xf32>
    %217 = arith.divf %215, %216 : vector<1x512xf32>
    %218 = vector.broadcast %217 : vector<1x512xf32> to vector<16x512xf32>
    %219 = arith.subf %213, %218 : vector<16x512xf32>
    %220 = arith.mulf %219, %219 : vector<16x512xf32>
    %cst_63 = arith.constant dense<0.000000e+00> : vector<512xf32>
    %221 = vector.multi_reduction <add>, %220, %cst_63 [0] : vector<16x512xf32> to vector<512xf32>
    %222 = vector.shape_cast %221 : vector<512xf32> to vector<1x512xf32>
    %cst_64 = arith.constant 1.600000e+01 : f32
    %223 = vector.broadcast %cst_64 : f32 to vector<1x512xf32>
    %224 = arith.divf %222, %223 : vector<1x512xf32>
    %225 = vector.broadcast %217 : vector<1x512xf32> to vector<16x512xf32>
    %226 = arith.subf %213, %225 : vector<16x512xf32>
    %cst_65 = arith.constant 9.99999974E-6 : f32
    %227 = vector.broadcast %cst_65 : f32 to vector<1x512xf32>
    %228 = arith.addf %224, %227 : vector<1x512xf32>
    %229 = math.rsqrt %228 : vector<1x512xf32>
    %230 = vector.broadcast %229 : vector<1x512xf32> to vector<16x512xf32>
    %231 = arith.mulf %226, %230 : vector<16x512xf32>
    %232 = vector.broadcast %12 : vector<16x1xf32> to vector<16x512xf32>
    %233 = arith.mulf %231, %232 : vector<16x512xf32>
    %234 = vector.broadcast %13 : vector<16x1xf32> to vector<16x512xf32>
    %235 = arith.addf %233, %234 : vector<16x512xf32>
    %236 = arith.truncf %235 : vector<16x512xf32> to vector<16x512xbf16>
    %cst_66 = arith.constant dense<0.000000e+00> : vector<64x512xf32>
    %237 = tpu.matmul %14, %236, %cst_66 {dimension_numbers = #tpu.dot_dimension_numbers<[1], [0], [0], [1], [0, 0, 1, 1], [], []>} : vector<64x16xbf16>, vector<16x512xbf16>, vector<64x512xf32> -> vector<64x512xf32>
    %238 = vector.broadcast %15 : vector<64x1xf32> to vector<64x512xf32>
    %239 = arith.addf %237, %238 : vector<64x512xf32>
    %240 = vector.extract_strided_slice %16 {offsets = [0, 4], sizes = [64, 1], strides = [1, 1]} : vector<64x9xf32> to vector<64x1xf32>
    %241 = vector.broadcast %240 : vector<64x1xf32> to vector<64x512xf32>
    %242 = arith.mulf %239, %241 : vector<64x512xf32>
    %c17_i32_67 = arith.constant 17 : i32
    %243 = tpu.dynamic_rotate %239 by %c17_i32_67 dim 1 : vector<64x512xf32>, i32 -> vector<64x512xf32>
    %244 = vector.extract_strided_slice %16 {offsets = [0, 0], sizes = [64, 1], strides = [1, 1]} : vector<64x9xf32> to vector<64x1xf32>
    %245 = vector.extract_strided_slice %2 {offsets = [0, 0, 0], sizes = [1, 1, 512], strides = [1, 1, 1]} : vector<9x1x512xf32> to vector<1x1x512xf32>
    %246 = vector.shape_cast %245 : vector<1x1x512xf32> to vector<1x512xf32>
    %247 = vector.broadcast %244 : vector<64x1xf32> to vector<64x512xf32>
    %248 = vector.broadcast %246 : vector<1x512xf32> to vector<64x512xf32>
    %249 = arith.mulf %247, %248 : vector<64x512xf32>
    %250 = arith.mulf %243, %249 : vector<64x512xf32>
    %251 = arith.addf %242, %250 : vector<64x512xf32>
    %c16_i32_68 = arith.constant 16 : i32
    %252 = tpu.dynamic_rotate %239 by %c16_i32_68 dim 1 : vector<64x512xf32>, i32 -> vector<64x512xf32>
    %253 = vector.extract_strided_slice %16 {offsets = [0, 1], sizes = [64, 1], strides = [1, 1]} : vector<64x9xf32> to vector<64x1xf32>
    %254 = vector.extract_strided_slice %2 {offsets = [1, 0, 0], sizes = [1, 1, 512], strides = [1, 1, 1]} : vector<9x1x512xf32> to vector<1x1x512xf32>
    %255 = vector.shape_cast %254 : vector<1x1x512xf32> to vector<1x512xf32>
    %256 = vector.broadcast %253 : vector<64x1xf32> to vector<64x512xf32>
    %257 = vector.broadcast %255 : vector<1x512xf32> to vector<64x512xf32>
    %258 = arith.mulf %256, %257 : vector<64x512xf32>
    %259 = arith.mulf %252, %258 : vector<64x512xf32>
    %260 = arith.addf %251, %259 : vector<64x512xf32>
    %c15_i32_69 = arith.constant 15 : i32
    %261 = tpu.dynamic_rotate %239 by %c15_i32_69 dim 1 : vector<64x512xf32>, i32 -> vector<64x512xf32>
    %262 = vector.extract_strided_slice %16 {offsets = [0, 2], sizes = [64, 1], strides = [1, 1]} : vector<64x9xf32> to vector<64x1xf32>
    %263 = vector.extract_strided_slice %2 {offsets = [2, 0, 0], sizes = [1, 1, 512], strides = [1, 1, 1]} : vector<9x1x512xf32> to vector<1x1x512xf32>
    %264 = vector.shape_cast %263 : vector<1x1x512xf32> to vector<1x512xf32>
    %265 = vector.broadcast %262 : vector<64x1xf32> to vector<64x512xf32>
    %266 = vector.broadcast %264 : vector<1x512xf32> to vector<64x512xf32>
    %267 = arith.mulf %265, %266 : vector<64x512xf32>
    %268 = arith.mulf %261, %267 : vector<64x512xf32>
    %269 = arith.addf %260, %268 : vector<64x512xf32>
    %c1_i32_70 = arith.constant 1 : i32
    %270 = tpu.dynamic_rotate %239 by %c1_i32_70 dim 1 : vector<64x512xf32>, i32 -> vector<64x512xf32>
    %271 = vector.extract_strided_slice %16 {offsets = [0, 3], sizes = [64, 1], strides = [1, 1]} : vector<64x9xf32> to vector<64x1xf32>
    %272 = vector.extract_strided_slice %2 {offsets = [3, 0, 0], sizes = [1, 1, 512], strides = [1, 1, 1]} : vector<9x1x512xf32> to vector<1x1x512xf32>
    %273 = vector.shape_cast %272 : vector<1x1x512xf32> to vector<1x512xf32>
    %274 = vector.broadcast %271 : vector<64x1xf32> to vector<64x512xf32>
    %275 = vector.broadcast %273 : vector<1x512xf32> to vector<64x512xf32>
    %276 = arith.mulf %274, %275 : vector<64x512xf32>
    %277 = arith.mulf %270, %276 : vector<64x512xf32>
    %278 = arith.addf %269, %277 : vector<64x512xf32>
    %c511_i32_71 = arith.constant 511 : i32
    %279 = tpu.dynamic_rotate %239 by %c511_i32_71 dim 1 : vector<64x512xf32>, i32 -> vector<64x512xf32>
    %280 = vector.extract_strided_slice %16 {offsets = [0, 5], sizes = [64, 1], strides = [1, 1]} : vector<64x9xf32> to vector<64x1xf32>
    %281 = vector.extract_strided_slice %2 {offsets = [5, 0, 0], sizes = [1, 1, 512], strides = [1, 1, 1]} : vector<9x1x512xf32> to vector<1x1x512xf32>
    %282 = vector.shape_cast %281 : vector<1x1x512xf32> to vector<1x512xf32>
    %283 = vector.broadcast %280 : vector<64x1xf32> to vector<64x512xf32>
    %284 = vector.broadcast %282 : vector<1x512xf32> to vector<64x512xf32>
    %285 = arith.mulf %283, %284 : vector<64x512xf32>
    %286 = arith.mulf %279, %285 : vector<64x512xf32>
    %287 = arith.addf %278, %286 : vector<64x512xf32>
    %c497_i32_72 = arith.constant 497 : i32
    %288 = tpu.dynamic_rotate %239 by %c497_i32_72 dim 1 : vector<64x512xf32>, i32 -> vector<64x512xf32>
    %289 = vector.extract_strided_slice %16 {offsets = [0, 6], sizes = [64, 1], strides = [1, 1]} : vector<64x9xf32> to vector<64x1xf32>
    %290 = vector.extract_strided_slice %2 {offsets = [6, 0, 0], sizes = [1, 1, 512], strides = [1, 1, 1]} : vector<9x1x512xf32> to vector<1x1x512xf32>
    %291 = vector.shape_cast %290 : vector<1x1x512xf32> to vector<1x512xf32>
    %292 = vector.broadcast %289 : vector<64x1xf32> to vector<64x512xf32>
    %293 = vector.broadcast %291 : vector<1x512xf32> to vector<64x512xf32>
    %294 = arith.mulf %292, %293 : vector<64x512xf32>
    %295 = arith.mulf %288, %294 : vector<64x512xf32>
    %296 = arith.addf %287, %295 : vector<64x512xf32>
    %c496_i32_73 = arith.constant 496 : i32
    %297 = tpu.dynamic_rotate %239 by %c496_i32_73 dim 1 : vector<64x512xf32>, i32 -> vector<64x512xf32>
    %298 = vector.extract_strided_slice %16 {offsets = [0, 7], sizes = [64, 1], strides = [1, 1]} : vector<64x9xf32> to vector<64x1xf32>
    %299 = vector.extract_strided_slice %2 {offsets = [7, 0, 0], sizes = [1, 1, 512], strides = [1, 1, 1]} : vector<9x1x512xf32> to vector<1x1x512xf32>
    %300 = vector.shape_cast %299 : vector<1x1x512xf32> to vector<1x512xf32>
    %301 = vector.broadcast %298 : vector<64x1xf32> to vector<64x512xf32>
    %302 = vector.broadcast %300 : vector<1x512xf32> to vector<64x512xf32>
    %303 = arith.mulf %301, %302 : vector<64x512xf32>
    %304 = arith.mulf %297, %303 : vector<64x512xf32>
    %305 = arith.addf %296, %304 : vector<64x512xf32>
    %c495_i32_74 = arith.constant 495 : i32
    %306 = tpu.dynamic_rotate %239 by %c495_i32_74 dim 1 : vector<64x512xf32>, i32 -> vector<64x512xf32>
    %307 = vector.extract_strided_slice %16 {offsets = [0, 8], sizes = [64, 1], strides = [1, 1]} : vector<64x9xf32> to vector<64x1xf32>
    %308 = vector.extract_strided_slice %2 {offsets = [8, 0, 0], sizes = [1, 1, 512], strides = [1, 1, 1]} : vector<9x1x512xf32> to vector<1x1x512xf32>
    %309 = vector.shape_cast %308 : vector<1x1x512xf32> to vector<1x512xf32>
    %310 = vector.broadcast %307 : vector<64x1xf32> to vector<64x512xf32>
    %311 = vector.broadcast %309 : vector<1x512xf32> to vector<64x512xf32>
    %312 = arith.mulf %310, %311 : vector<64x512xf32>
    %313 = arith.mulf %306, %312 : vector<64x512xf32>
    %314 = arith.addf %305, %313 : vector<64x512xf32>
    %315 = vector.broadcast %17 : vector<64x1xf32> to vector<64x512xf32>
    %316 = arith.addf %314, %315 : vector<64x512xf32>
    %317 = vector.extract_strided_slice %316 {offsets = [0, 0], sizes = [32, 512], strides = [1, 1]} : vector<64x512xf32> to vector<32x512xf32>
    %318 = vector.extract_strided_slice %316 {offsets = [32, 0], sizes = [32, 512], strides = [1, 1]} : vector<64x512xf32> to vector<32x512xf32>
    %319 = arith.mulf %317, %317 : vector<32x512xf32>
    %320 = arith.mulf %317, %319 : vector<32x512xf32>
    %cst_75 = arith.constant 4.471500e-02 : f32
    %321 = vector.broadcast %cst_75 : f32 to vector<32x512xf32>
    %322 = arith.mulf %321, %320 : vector<32x512xf32>
    %323 = arith.addf %317, %322 : vector<32x512xf32>
    %cst_76 = arith.constant 0.797884583 : f32
    %324 = vector.broadcast %cst_76 : f32 to vector<32x512xf32>
    %325 = arith.mulf %324, %323 : vector<32x512xf32>
    %326 = math.tanh %325 : vector<32x512xf32>
    %cst_77 = arith.constant 1.000000e+00 : f32
    %327 = vector.broadcast %cst_77 : f32 to vector<32x512xf32>
    %328 = arith.addf %327, %326 : vector<32x512xf32>
    %cst_78 = arith.constant 5.000000e-01 : f32
    %329 = vector.broadcast %cst_78 : f32 to vector<32x512xf32>
    %330 = arith.mulf %329, %328 : vector<32x512xf32>
    %331 = arith.mulf %317, %330 : vector<32x512xf32>
    %332 = arith.mulf %331, %318 : vector<32x512xf32>
    %333 = arith.truncf %332 : vector<32x512xf32> to vector<32x512xbf16>
    %cst_79 = arith.constant dense<0.000000e+00> : vector<16x512xf32>
    %334 = tpu.matmul %18, %333, %cst_79 {dimension_numbers = #tpu.dot_dimension_numbers<[1], [0], [0], [1], [0, 0, 1, 1], [], []>} : vector<16x32xbf16>, vector<32x512xbf16>, vector<16x512xf32> -> vector<16x512xf32>
    %335 = vector.broadcast %19 : vector<16x1xf32> to vector<16x512xf32>
    %336 = arith.addf %334, %335 : vector<16x512xf32>
    %337 = arith.addf %213, %336 : vector<16x512xf32>
    %c0_80 = arith.constant 0 : index
    %c0_81 = arith.constant 0 : index
    %c0_82 = arith.constant 0 : index
    %338 = vector.load %arg20[%c0_80, %c0_81, %c0_82] : memref<1x16x512xf32, #tpu.memory_space<vmem>>, vector<1x16x512xf32>
    %339 = vector.shape_cast %338 : vector<1x16x512xf32> to vector<16x512xf32>
    %340 = vector.shape_cast %337 : vector<16x512xf32> to vector<1x16x512xf32>
    tpu.vector_store %arg20[%c0_80, %c0_81, %c0_82], %340 {strides = array<i32>} : memref<1x16x512xf32, #tpu.memory_space<vmem>>, vector<1x16x512xf32>,
    return
  }
  func.func @transform_0(%arg0: i32) -> (i32, i32, i32) {
    %c0_i32 = arith.constant 0 : i32
    %c0_i32_0 = arith.constant 0 : i32
    %c0_i32_1 = arith.constant 0 : i32
    return %arg0, %c0_i32, %c0_i32_0 : i32, i32, i32
  }
  func.func @transform_1(%arg0: i32) -> (i32, i32, i32) {
    %c0_i32 = arith.constant 0 : i32
    %c0_i32_0 = arith.constant 0 : i32
    %c0_i32_1 = arith.constant 0 : i32
    %c0_i32_2 = arith.constant 0 : i32
    return %c0_i32, %c0_i32_0, %c0_i32_1 : i32, i32, i32
  }
  func.func @transform_2(%arg0: i32) -> (i32, i32) {
    %c0_i32 = arith.constant 0 : i32
    %c0_i32_0 = arith.constant 0 : i32
    %c0_i32_1 = arith.constant 0 : i32
    return %c0_i32, %c0_i32_0 : i32, i32
  }
  func.func @transform_3(%arg0: i32) -> (i32, i32) {
    %c0_i32 = arith.constant 0 : i32
    %c0_i32_0 = arith.constant 0 : i32
    %c0_i32_1 = arith.constant 0 : i32
    return %c0_i32, %c0_i32_0 : i32, i32
  }
  func.func @transform_4(%arg0: i32) -> (i32, i32) {
    %c0_i32 = arith.constant 0 : i32
    %c0_i32_0 = arith.constant 0 : i32
    %c0_i32_1 = arith.constant 0 : i32
    return %c0_i32, %c0_i32_0 : i32, i32
  }
  func.func @transform_5(%arg0: i32) -> (i32, i32) {
    %c0_i32 = arith.constant 0 : i32
    %c0_i32_0 = arith.constant 0 : i32
    %c0_i32_1 = arith.constant 0 : i32
    return %c0_i32, %c0_i32_0 : i32, i32
  }
  func.func @transform_6(%arg0: i32) -> (i32, i32) {
    %c0_i32 = arith.constant 0 : i32
    %c0_i32_0 = arith.constant 0 : i32
    %c0_i32_1 = arith.constant 0 : i32
    return %c0_i32, %c0_i32_0 : i32, i32
  }
  func.func @transform_7(%arg0: i32) -> (i32, i32) {
    %c0_i32 = arith.constant 0 : i32
    %c0_i32_0 = arith.constant 0 : i32
    %c0_i32_1 = arith.constant 0 : i32
    return %c0_i32, %c0_i32_0 : i32, i32
  }
  func.func @transform_8(%arg0: i32) -> (i32, i32) {
    %c0_i32 = arith.constant 0 : i32
    %c0_i32_0 = arith.constant 0 : i32
    %c0_i32_1 = arith.constant 0 : i32
    return %c0_i32, %c0_i32_0 : i32, i32
  }
  func.func @transform_9(%arg0: i32) -> (i32, i32) {
    %c0_i32 = arith.constant 0 : i32
    %c0_i32_0 = arith.constant 0 : i32
    %c0_i32_1 = arith.constant 0 : i32
    return %c0_i32, %c0_i32_0 : i32, i32
  }
  func.func @transform_10(%arg0: i32) -> (i32, i32) {
    %c0_i32 = arith.constant 0 : i32
    %c0_i32_0 = arith.constant 0 : i32
    %c0_i32_1 = arith.constant 0 : i32
    return %c0_i32, %c0_i32_0 : i32, i32
  }
  func.func @transform_11(%arg0: i32) -> (i32, i32) {
    %c0_i32 = arith.constant 0 : i32
    %c0_i32_0 = arith.constant 0 : i32
    %c0_i32_1 = arith.constant 0 : i32
    return %c0_i32, %c0_i32_0 : i32, i32
  }
  func.func @transform_12(%arg0: i32) -> (i32, i32) {
    %c0_i32 = arith.constant 0 : i32
    %c0_i32_0 = arith.constant 0 : i32
    %c0_i32_1 = arith.constant 0 : i32
    return %c0_i32, %c0_i32_0 : i32, i32
  }
  func.func @transform_13(%arg0: i32) -> (i32, i32) {
    %c0_i32 = arith.constant 0 : i32
    %c0_i32_0 = arith.constant 0 : i32
    %c0_i32_1 = arith.constant 0 : i32
    return %c0_i32, %c0_i32_0 : i32, i32
  }
  func.func @transform_14(%arg0: i32) -> (i32, i32) {
    %c0_i32 = arith.constant 0 : i32
    %c0_i32_0 = arith.constant 0 : i32
    %c0_i32_1 = arith.constant 0 : i32
    return %c0_i32, %c0_i32_0 : i32, i32
  }
  func.func @transform_15(%arg0: i32) -> (i32, i32) {
    %c0_i32 = arith.constant 0 : i32
    %c0_i32_0 = arith.constant 0 : i32
    %c0_i32_1 = arith.constant 0 : i32
    return %c0_i32, %c0_i32_0 : i32, i32
  }
  func.func @transform_16(%arg0: i32) -> (i32, i32) {
    %c0_i32 = arith.constant 0 : i32
    %c0_i32_0 = arith.constant 0 : i32
    %c0_i32_1 = arith.constant 0 : i32
    return %c0_i32, %c0_i32_0 : i32, i32
  }
  func.func @transform_17(%arg0: i32) -> (i32, i32) {
    %c0_i32 = arith.constant 0 : i32
    %c0_i32_0 = arith.constant 0 : i32
    %c0_i32_1 = arith.constant 0 : i32
    return %c0_i32, %c0_i32_0 : i32, i32
  }
  func.func @transform_18(%arg0: i32) -> (i32, i32) {
    %c0_i32 = arith.constant 0 : i32
    %c0_i32_0 = arith.constant 0 : i32
    %c0_i32_1 = arith.constant 0 : i32
    return %c0_i32, %c0_i32_0 : i32, i32
  }
  func.func @transform_19(%arg0: i32) -> (i32, i32, i32) {
    %c0_i32 = arith.constant 0 : i32
    %c0_i32_0 = arith.constant 0 : i32
    %c0_i32_1 = arith.constant 0 : i32
    return %arg0, %c0_i32, %c0_i32_0 : i32, i32, i32
  }
}

</mosaic_0001>

<bundles_post_ra>
// kernel: tpu_custom_call.1
= control target key start
LH: loop header
LB: loop body
LE: loop exit
PB: predicated region body
PF: predicated region fallthrough
CT: control target
= control target key end

     0   :  { %s13209_s0 = inlined_call_operand.vmem [shape: f32[1,16,512], index: 0, kind: input, shape index: {}]   ;;  %s13210_s1 = inlined_call_operand.vmem [shape: f32[9,1,512], index: 1, kind: input, shape index: {}]   ;;  %s13211_s2 = inlined_call_operand.vmem [shape: f32[16,1], index: 2, kind: input, shape index: {}]   ;;  %s13212_s3 = inlined_call_operand.vmem [shape: f32[16,1], index: 3, kind: input, shape index: {}]   ;;  %s13213_s4 = inlined_call_operand.vmem [shape: bf16[48,16], index: 4, kind: input, shape index: {}]   ;;  %s13214_s5 = inlined_call_operand.vmem [shape: f32[48,1], index: 5, kind: input, shape index: {}]   ;;  %s13215_s6 = inlined_call_operand.vmem [shape: f32[48,9], index: 6, kind: input, shape index: {}]   ;;  %s13216_s7 = inlined_call_operand.vmem [shape: f32[48,1], index: 7, kind: input, shape index: {}]   ;;  %s13217_s8 = inlined_call_operand.vmem [shape: bf16[16,16], index: 8, kind: input, shape index: {}]   ;;  %s13218_s9 = inlined_call_operand.vmem [shape: f32[16,1], index: 9, kind: input, shape index: {}]   ;;  %s13219_s10 = inlined_call_operand.vmem [shape: f32[16,1], index: 10, kind: input, shape index: {}]   ;;  %s13220_s11 = inlined_call_operand.vmem [shape: f32[16,1], index: 11, kind: input, shape index: {}]   ;;  %s13221_s12 = inlined_call_operand.vmem [shape: f32[16,1], index: 12, kind: input, shape index: {}]   ;;  %s13222_s13 = inlined_call_operand.vmem [shape: bf16[64,16], index: 13, kind: input, shape index: {}]   ;;  %s13223_s14 = inlined_call_operand.vmem [shape: f32[64,1], index: 14, kind: input, shape index: {}]   ;;  %s13224_s15 = inlined_call_operand.vmem [shape: f32[64,9], index: 15, kind: input, shape index: {}]   ;;  %s13225_s16 = inlined_call_operand.vmem [shape: f32[64,1], index: 16, kind: input, shape index: {}]   ;;  %s13226_s17 = inlined_call_operand.vmem [shape: bf16[16,32], index: 17, kind: input, shape index: {}]   ;;  %s13227_s18 = inlined_call_operand.vmem [shape: f32[16,1], index: 18, kind: input, shape index: {}]   ;;  %s13228_s19 = inlined_call_operand.hbm [shape: f32[1,16,512], index: 19, kind: output, shape index: {}]  }
   0x1   :  { %13839 = sst [smem:[#allocation421_spill]] %s13209_s0 }
   0x2   :  { %13840 = sst [smem:[#allocation422_spill]] %s13210_s1 }
   0x3   :  { %13841 = sst [smem:[#allocation423_spill]] %s13211_s2 }
   0x4   :  { %13842 = sst [smem:[#allocation424_spill]] %s13212_s3 }
   0x5   :  { %13843 = sst [smem:[#allocation425_spill]] %s13222_s13 }
   0x6   :  { %s13844_s20 = sld [smem:[#allocation424_spill]]  ;;  %s13845_s13 = sld [smem:[#allocation423_spill]]  ;;  %v13238_v2 = vmov 0   ;;  %v93_v5 = vld [vmem:[%s13214_s5 + $0x18] sm:$0xff]  ;;  %v13252_v6 = vlaneseq  ;;  %v91_v7 = vld [vmem:[%s13214_s5 + $0x8] sm:$0xff]  ;;  %v13250_v9 = vmov 4  }
   0x7   :  { %5505 = vset.pattern.permute.xlu1 %v13238_v2  ;;  %5504 = vset.pattern.permute.xlu0 %v13238_v2 }
   0x8   :  { %378 = vmatprep.mubr.bf16.mxu0 %v13238_v2  ;;  %441 = vmatprep.mubr.bf16.mxu1 %v13238_v2  ;;  %v5847_v8 = vshrl.u32 %v13252_v6, 7 }
   0xc   :  { %v82_v0 = vld [vmem:[%s13844_s20] sm:$0xff]  ;;  %v83_v3 = vld [vmem:[%s13844_s20 + $0x8] sm:$0xff] }
   0xd   :  { %v80_v1 = vld [vmem:[%s13845_s13] sm:$0xff]  ;;  %271 = vperm.xlu1 %5505, %v82_v0   ;;  %v81_v4 = vld [vmem:[%s13845_s13 + $0x8] sm:$0xff] }
   0xe   :  { %253 = vperm.xlu0 %5504, %v80_v1  }
  0x11   :  { %276 = vperm.xlu1 %5505, %v83_v3  }
  0x12   :  { %258 = vperm.xlu0 %5504, %v81_v4  }
  0x15   :  { %308 = vperm.xlu1 %5505, %v93_v5  }
  0x16   :  { %5506 = vset.pattern.permute.xlu0 %v13250_v9 }
  0x19   :  { %298 = vperm.xlu1 %5505, %v91_v7  }
  0x1a   :  { %24 = vsyncpa [#allocation3], 0  ;;  %v5853_v10 = vld [vmem:[%s13215_s6 + $0x18] sm:$0xff]  ;;  %s13846_s30 = sld [smem:[#allocation422_spill]]  ;;  %v5859_v12 = vsub.s32 2, %v5847_v8  ;;  %v5864_v13 = vld [vmem:[%s13215_s6 + $0x10] sm:$0xff] }
  0x1b   :  { %v5867_v14 = vsub.s32 3, %v5847_v8  ;;  %484 = vperm.xlu0 %5506, %v5864_v13   ;;  %v13248_v17 = vmov 1   ;;  %v5883_v18 = vld [vmem:[%s13215_s6] sm:$0xff]  ;;  %v13244_v19 = vmov 3   ;;  %s13849_s24 = sld [smem:[#allocation421_spill]]  ;;  %v5904_v22 = vld [vmem:[%s13215_s6 + $0x8] sm:$0xff] }
  0x1c   :  { %v13246_v25 = vmov 2   ;;  %v13242_v35 = vmov 5   ;;  %v13240_v45 = vmov 6   ;;  %v13236_v55 = vmov 7   ;;  %s5713_s13 = smov 15   ;;  %s5714_s28 = smov 17  }
  0x1d   :  { %614 = vperm.xlu1 %5505, %v5853_v10   ;;  %v13234_v1 = vmov 8   ;;  %vm336_vm0 = vcmask 130048   ;;  %s5715_s29 = smov 16   ;;  %s5716_s0 = smov 1   ;;  %vm2272_vm9 = vcmask 64512   ;;  %vm2302_vm10 = vcmask 1043456  }
  0x1e   :  { %s5717_s20 = smov 127   ;;  %s5718_s21 = smov 113   ;;  %vm5279_vm11 = vcmask 261120  }
  0x1f   :  { %5509 = vset.pattern.permute.xlu0 %v13248_v17  ;;  %s5719_s1 = smov 112   ;;  %s5720_s22 = smov 111  }
  0x20   :  { %v72_v11 = vld [vmem:[%s13846_s30] sm:$0xf]  ;;  %804 = vperm.xlu0 %5509, %v5853_v10   ;;  %s14449_s2 = sld [smem:[#allocation425_spill]] }
  0x21   :  { %v5872_v15 = vrot.slane %v72_v11, %v5859_v12  ;;  %v5875_v16 = vrot.slane %v72_v11, %v5867_v14  ;;  %5507 = vset.pattern.permute.xlu1 %v13250_v9  ;;  %v5894_v20 = vld [vmem:[%s13849_s24 + $0x8] sm:$0xff]  ;;  %v5909_v23 = vld [vmem:[%s13849_s24 + $0x18] sm:$0xff]  ;;  %v5920_v26 = vld [vmem:[%s13849_s24] sm:$0xff] }
  0x22   :  { %489 = vperm.xlu1 %5507, %v5853_v10   ;;  %v5899_v21 = vld [vmem:[%s13849_s24 + $0x28] sm:$0xff]  ;;  %v5914_v24 = vld [vmem:[%s13849_s24 + $0x38] sm:$0xff]  ;;  %v5925_v27 = vld [vmem:[%s13849_s24 + $0x20] sm:$0xff] }
  0x23   :  { %13847 = vst [vmem:[#allocation5_spill] sm:$0xff] %v5872_v15  ;;  %13848 = vst [vmem:[#allocation6_spill] sm:$0xff] %v5875_v16  ;;  %v161_v28 = vadd.f32 %v5899_v21, %v5894_v20  ;;  %v5933_v29 = vld [vmem:[%s13849_s24 + $0x10] sm:$0xff]  ;;  %v175_v31 = vadd.f32 %v5914_v24, %v5909_v23  ;;  %v154_v32 = vadd.f32 %v5925_v27, %v5920_v26 }
  0x24   :  { %792 = vperm.xlu0 %5509, %v5883_v18   ;;  %v5938_v30 = vld [vmem:[%s13849_s24 + $0x30] sm:$0xff] }
  0x25   :  { %v168_v33 = vadd.f32 %v5938_v30, %v5933_v29  ;;  %v162_v34 = vrot.slane %v161_v28, 4  ;;  %v176_v36 = vrot.slane %v175_v31, 4  ;;  %v155_v37 = vrot.slane %v154_v32, 4 }
  0x26   :  { %5508 = vset.pattern.permute.xlu1 %v13248_v17 }
  0x27   :  { %800 = vperm.xlu1 %5508, %v5864_v13   ;;  %v169_v38 = vrot.slane %v168_v33, 4  ;;  %v163_v39 = vadd.f32 %v162_v34, %v161_v28  ;;  %v177_v40 = vadd.f32 %v176_v36, %v175_v31  ;;  %v156_v41 = vadd.f32 %v155_v37, %v154_v32 }
  0x28   :  { %5514 = vset.pattern.permute.xlu0 %v13244_v19 }
  0x29   :  { %1184 = vperm.xlu0 %5514, %v5853_v10   ;;  %v170_v42 = vadd.f32 %v169_v38, %v168_v33  ;;  %v164_v43 = vrot.slane %v163_v39, 2  ;;  %v178_v44 = vrot.slane %v177_v40, 2  ;;  %v157_v46 = vrot.slane %v156_v41, 2  ;;  %v90_v38 = vld [vmem:[%s13214_s5] sm:$0xff] }
  0x2b   :  { %5510 = vset.pattern.permute.xlu1 %v13246_v25  ;;  %v171_v47 = vrot.slane %v170_v42, 2  ;;  %v165_v48 = vadd.f32 %v164_v43, %v163_v39  ;;  %v179_v49 = vadd.f32 %v178_v44, %v177_v40  ;;  %v158_v50 = vadd.f32 %v157_v46, %v156_v41 }
  0x2c   :  { %990 = vperm.xlu1 %5510, %v5864_v13  }
  0x2d   :  { %1176 = vperm.xlu0 %5514, %v5904_v22   ;;  %v172_v51 = vadd.f32 %v171_v47, %v170_v42  ;;  %v166_v52 = vrot.slane %v165_v48, 1  ;;  %v180_v53 = vrot.slane %v179_v49, 1  ;;  %v159_v54 = vrot.slane %v158_v50, 1 }
  0x2f   :  { %v173_v56 = vrot.slane %v172_v51, 1  ;;  %v167_v57 = vadd.f32 %v166_v52, %v165_v48  ;;  %v181_v58 = vadd.f32 %v180_v53, %v179_v49  ;;  %v160_v59 = vadd.f32 %v159_v54, %v158_v50  ;;  %v104_v52 = vld [vmem:[%s13216_s7 + $0x10] sm:$0xff] }
  0x30   :  { %994 = vperm.xlu1 %5510, %v5853_v10  }
  0x31   :  { %5520 = vset.pattern.permute.xlu0 %v13242_v35  ;;  %v174_v60 = vadd.f32 %v173_v56, %v172_v51  ;;  %v184_v61 = vmul.f32 0.0625, %v167_v57  ;;  %v186_v62 = vmul.f32 0.0625, %v181_v58  ;;  %v183_v63 = vmul.f32 0.0625, %v160_v59  ;;  %v103_v57 = vld [vmem:[%s13216_s7 + $0x8] sm:$0xff] }
  0x32   :  { %1374 = vperm.xlu0 %5520, %v5853_v10  }
  0x33   :  { %v185_v0 = vmul.f32 0.0625, %v174_v60  ;;  %v5969_v3 = vsub.f32 %v5894_v20, %v184_v61  ;;  %v5972_v4 = vsub.f32 %v5899_v21, %v184_v61  ;;  %v5977_v5 = vsub.f32 %v5909_v23, %v186_v62 }
  0x34   :  { %5511 = vset.pattern.permute.xlu1 %v13238_v2  ;;  %v5980_v7 = vsub.f32 %v5914_v24, %v186_v62  ;;  %v5983_v11 = vsub.f32 %v5920_v26, %v183_v63  ;;  %v5986_v28 = vsub.f32 %v5925_v27, %v183_v63 }
  0x35   :  { %606 = vperm.xlu1 %5511, %v5904_v22   ;;  %v5989_v20 = vsub.f32 %v5933_v29, %v185_v0  ;;  %v5992_v21 = vsub.f32 %v5938_v30, %v185_v0  ;;  %v196_v31 = vmul.f32 %v5969_v3, %v5969_v3  ;;  %v200_v23 = vmul.f32 %v5972_v4, %v5972_v4  ;;  %v92_v30 = vld [vmem:[%s13214_s5 + $0x10] sm:$0xff] }
  0x36   :  { %1366 = vperm.xlu0 %5520, %v5904_v22   ;;  %v198_v24 = vmul.f32 %v5977_v5, %v5977_v5  ;;  %v202_v26 = vmul.f32 %v5980_v7, %v5980_v7  ;;  %v195_v27 = vmul.f32 %v5983_v11, %v5983_v11  ;;  %v199_v29 = vmul.f32 %v5986_v28, %v5986_v28 }
  0x37   :  { %v197_v32 = vmul.f32 %v5989_v20, %v5989_v20  ;;  %v201_v33 = vmul.f32 %v5992_v21, %v5992_v21  ;;  %v210_v34 = vadd.f32 %v200_v23, %v196_v31 }
  0x38   :  { %v224_v36 = vadd.f32 %v202_v26, %v198_v24  ;;  %v203_v37 = vadd.f32 %v199_v29, %v195_v27 }
  0x39   :  { %5512 = vset.pattern.permute.xlu1 %v13244_v19  ;;  %v217_v39 = vadd.f32 %v201_v33, %v197_v32  ;;  %v211_v40 = vrot.slane %v210_v34, 4 }
  0x3a   :  { %5523 = vset.pattern.permute.xlu0 %v13240_v45  ;;  %1180 = vperm.xlu1 %5512, %v5864_v13   ;;  %v225_v41 = vrot.slane %v224_v36, 4  ;;  %v204_v42 = vrot.slane %v203_v37, 4 }
  0x3b   :  { %1560 = vperm.xlu0 %5523, %v5864_v13   ;;  %v218_v43 = vrot.slane %v217_v39, 4  ;;  %v212_v44 = vadd.f32 %v211_v40, %v210_v34 }
  0x3c   :  { %v226_v46 = vadd.f32 %v225_v41, %v224_v36  ;;  %v205_v47 = vadd.f32 %v204_v42, %v203_v37 }
  0x3d   :  { %v219_v48 = vadd.f32 %v218_v43, %v217_v39  ;;  %v213_v49 = vrot.slane %v212_v44, 2 }
  0x3e   :  { %5513 = vset.pattern.permute.xlu1 %v13250_v9  ;;  %v227_v50 = vrot.slane %v226_v46, 2  ;;  %v206_v51 = vrot.slane %v205_v47, 2 }
  0x3f   :  { %1556 = vperm.xlu0 %5523, %v5904_v22   ;;  %474 = vperm.xlu1 %5513, %v5883_v18   ;;  %v220_v53 = vrot.slane %v219_v48, 2  ;;  %v214_v54 = vadd.f32 %v213_v49, %v212_v44 }
  0x40   :  { %v207_v56 = vadd.f32 %v206_v51, %v205_v47 }
  0x41   :  { %v221_v58 = vadd.f32 %v220_v53, %v219_v48  ;;  %v215_v59 = vrot.slane %v214_v54, 1 }
  0x42   :  { %v208_v61 = vrot.slane %v207_v56, 1 }
  0x43   :  { %5526 = vset.pattern.permute.xlu0 %v13236_v55  ;;  %479 = vperm.xlu1 %5513, %v5904_v22   ;;  %v222_v62 = vrot.slane %v221_v58, 1  ;;  %v216_v63 = vadd.f32 %v215_v59, %v214_v54 }
  0x44   :  { %1750 = vperm.xlu0 %5526, %v5864_v13   ;;  %v209_v31 = vadd.f32 %v208_v61, %v207_v56 }
  0x45   :  { %v223_v23 = vadd.f32 %v222_v62, %v221_v58  ;;  %v232_v24 = vmul.f32 0.0625, %v216_v63 }
  0x46   :  { %v231_v27 = vmul.f32 0.0625, %v209_v31  ;;  %v5581_v31 = vld [vmem:[%s13213_s4 + $0x8] sm:$0xff]  }
  0x47   :  { %5515 = vset.pattern.permute.xlu1 %v13248_v17  ;;  %v233_v29 = vmul.f32 0.0625, %v223_v23  ;;  %v6077_v23 = vld [vmem:[%s13846_s30 + $0x4] sm:$0xf] }
  0x48   :  { %1742 = vperm.xlu0 %5526, %v5883_v18   ;;  %796 = vperm.xlu1 %5515, %v5904_v22   ;;  %v235_v33 = vadd.f32 1e-05, %v231_v27  ;;  %v6090_v27 = vld [vmem:[%s13846_s30 + $0xc] sm:$0xf] }
  0x49   :  { %v237_v34 = vadd.f32 1e-05, %v233_v29  ;;  %v6094_v29 = vrot.slane %v6090_v27, %v5859_v12 }
  0x4b   :  { %13852 = vst [vmem:[#allocation9_spill] sm:$0xff] %v6094_v29 }
  0x4c   :  { %5527 = vset.pattern.permute.xlu0 %v13234_v1  ;;  %5516 = vset.pattern.permute.xlu1 %v13242_v35 }
  0x4d   :  { %1940 = vperm.xlu0 %5527, %v5864_v13   ;;  %1370 = vperm.xlu1 %5516, %v5864_v13  }
  0x51   :  { %1936 = vperm.xlu0 %5527, %v5904_v22   ;;  %5517 = vset.pattern.permute.xlu1 %v13246_v25 }
  0x52   :  { %982 = vperm.xlu1 %5517, %v5883_v18  }
  0x55   :  { %5530 = vset.pattern.permute.xlu0 %v13238_v2 }
  0x56   :  { %303 = vperm.xlu0 %5530, %v92_v30   ;;  %986 = vperm.xlu1 %5517, %v5904_v22   ;;  %v236_v30 = vadd.f32 1e-05, %v232_v24  ;;  %v6081_v24 = vrot.slane %v6077_v23, %v5859_v12 }
  0x58   :  { %5589 = vrsqrt.f32 %v236_v30  ;;  %13850 = vst [vmem:[#allocation7_spill] sm:$0xff] %v6081_v24  ;;  %v6098_v30 = vrot.slane %v6090_v27, %v5867_v14 }
  0x5a   :  { %293 = vperm.xlu0 %5530, %v90_v38   ;;  %5518 = vset.pattern.permute.xlu1 %v13240_v45  ;;  %13853 = vst [vmem:[#allocation10_spill] sm:$0xff] %v6098_v30 }
  0x5b   :  { %1564 = vperm.xlu1 %5518, %v5853_v10  }
  0x5e   :  { %610 = vperm.xlu0 %5530, %v5864_v13   ;;  %v228_v13 = vadd.f32 %v227_v50, %v226_v46 }
  0x5f   :  { %5519 = vset.pattern.permute.xlu1 %v13244_v19 }
  0x60   :  { %1172 = vperm.xlu1 %5519, %v5883_v18   ;;  %v229_v60 = vrot.slane %v228_v13, 1 }
  0x62   :  { %602 = vperm.xlu0 %5530, %v5883_v18   ;;  %v230_v0 = vadd.f32 %v229_v60, %v228_v13  ;;  %v5590_v36 = vpop.eup %5589 }
  0x63   :  { %v244_v40 = vmul.f32 %v5590_v36, %v5969_v3  ;;  %v248_v46 = vmul.f32 %v5590_v36, %v5972_v4 }
  0x64   :  { %5521 = vset.pattern.permute.xlu1 %v13236_v55  ;;  %v234_v26 = vmul.f32 0.0625, %v230_v0  ;;  %v5580_v0 = vld [vmem:[%s13213_s4] sm:$0xff]  }
  0x65   :  { %1754 = vperm.xlu1 %5521, %v5853_v10  }
  0x66   :  { %2060 = vperm.xlu0 %5530, %v104_v52   ;;  %v238_v32 = vadd.f32 1e-05, %v234_v26  ;;  %v6085_v26 = vrot.slane %v6077_v23, %v5867_v14 }
  0x68   :  { %5591 = vrsqrt.f32 %v238_v32  ;;  %13851 = vst [vmem:[#allocation8_spill] sm:$0xff] %v6085_v26  ;;  %v6103_v32 = vld [vmem:[%s13846_s30 + $0x14] sm:$0xf] }
  0x69   :  { %5522 = vset.pattern.permute.xlu1 %v13242_v35  ;;  %5593 = vrsqrt.f32 %v235_v33  ;;  %v6107_v33 = vrot.slane %v6103_v32, %v5859_v12 }
  0x6a   :  { %2055 = vperm.xlu0 %5530, %v103_v57   ;;  %1362 = vperm.xlu1 %5522, %v5883_v18   ;;  %5595 = vrsqrt.f32 %v237_v34  ;;  %v6111_v34 = vrot.slane %v6103_v32, %v5867_v14 }
  0x6b   :  { %13854 = vst [vmem:[#allocation11_spill] sm:$0xff] %v6107_v33 }
  0x6c   :  { %13855 = vst [vmem:[#allocation12_spill] sm:$0xff] %v6111_v34 }
  0x6e   :  { %5524 = vset.pattern.permute.xlu1 %v13234_v1 }
  0x6f   :  { %1944 = vperm.xlu1 %5524, %v5853_v10   ;;  %v105_v10 = vld [vmem:[%s13216_s7 + $0x18] sm:$0xff] }
  0x72   :  { %v5592_v37 = vpop.eup %5591 }
  0x73   :  { %5525 = vset.pattern.permute.xlu1 %v13240_v45  ;;  %v5594_v38 = vpop.eup %5593  ;;  %v250_v47 = vmul.f32 %v5592_v37, %v5980_v7 }
  0x74   :  { %1552 = vperm.xlu1 %5525, %v5883_v18   ;;  %v5596_v39 = vpop.eup %5595  ;;  %v243_v41 = vmul.f32 %v5594_v38, %v5983_v11  ;;  %v247_v48 = vmul.f32 %v5594_v38, %v5986_v28 }
  0x75   :  { %v245_v42 = vmul.f32 %v5596_v39, %v5989_v20  ;;  %v249_v49 = vmul.f32 %v5596_v39, %v5992_v21 }
  0x78   :  { %5528 = vset.pattern.permute.xlu1 %v13236_v55 }
  0x79   :  { %1746 = vperm.xlu1 %5528, %v5904_v22   ;;  %v102_v22 = vld [vmem:[%s13216_s7] sm:$0xff] }
  0x7d   :  { %5529 = vset.pattern.permute.xlu1 %v13234_v1 }
  0x7e   :  { %1932 = vperm.xlu1 %5529, %v5883_v18   ;;  %v246_v18 = vmul.f32 %v5592_v37, %v5977_v5 }
  0x82   :  { %5531 = vset.pattern.permute.xlu1 %v13238_v2 }
  0x83   :  { %2065 = vperm.xlu1 %5531, %v105_v10   ;;  %v6116_v10 = vld [vmem:[%s13846_s30 + $0x18] sm:$0xf] }
  0x84   :  { %v6120_v36 = vrot.slane %v6116_v10, %v5859_v12  ;;  %v6124_v37 = vrot.slane %v6116_v10, %v5867_v14 }
  0x86   :  { %13856 = vst [vmem:[#allocation13_spill] sm:$0xff] %v6120_v36  ;;  %13857 = vst [vmem:[#allocation14_spill] sm:$0xff] %v6124_v37 }
  0x87   :  { %2050 = vperm.xlu1 %5531, %v102_v22   ;;  %v6129_v22 = vld [vmem:[%s13846_s30 + $0x1c] sm:$0xf] }
  0x88   :  { %v6133_v38 = vrot.slane %v6129_v22, %v5859_v12  ;;  %v6137_v39 = vrot.slane %v6129_v22, %v5867_v14 }
  0x8a   :  { %13858 = vst [vmem:[#allocation15_spill] sm:$0xff] %v6133_v38  ;;  %13859 = vst [vmem:[#allocation16_spill] sm:$0xff] %v6137_v39 }
  0x8c   :  { %v272_v43 = vpop.permute.xlu1 %271 }
  0x8d   :  { %v254_v44 = vpop.permute.xlu0 %253 }
  0x8e   :  { %v262_v50 = vmul.f32 %v254_v44, %v244_v40  ;;  %v264_v51 = vmul.f32 %v254_v44, %v246_v18  ;;  %v261_v52 = vmul.f32 %v254_v44, %v243_v41  ;;  %v263_v3 = vmul.f32 %v254_v44, %v245_v42  ;;  %v6142_v40 = vld [vmem:[%s13846_s30 + $0x20] sm:$0xf]  ;;  %v6155_v42 = vld [vmem:[%s13846_s30 + $0x8] sm:$0xf] }
  0x8f   :  { %13860 = vst [vmem:[#allocation17_spill] sm:$0xff] %v6142_v40  ;;  %v6146_v18 = vrot.slane %v6142_v40, %v5859_v12  ;;  %v6150_v41 = vrot.slane %v6142_v40, %v5867_v14  ;;  %v6163_v44 = vrot.slane %v6155_v42, %v5867_v14 }
  0x90   :  { %v277_v20 = vpop.permute.xlu1 %276  ;;  %v280_v56 = vadd.f32 %v272_v43, %v262_v50  ;;  %v282_v57 = vadd.f32 %v272_v43, %v264_v51  ;;  %v279_v58 = vadd.f32 %v272_v43, %v261_v52  ;;  %v281_v4 = vadd.f32 %v272_v43, %v263_v3 }
  0x91   :  { %v259_v53 = vpop.permute.xlu0 %258  ;;  %13861 = vst [vmem:[#allocation18_spill] sm:$0xff] %v6146_v18  ;;  %13862 = vst [vmem:[#allocation19_spill] sm:$0xff] %v6150_v41  ;;  %v6159_v43 = vrot.slane %v6155_v42, %v5859_v12 }
  0x92   :  { %v266_v5 = vmul.f32 %v259_v53, %v248_v46  ;;  %v268_v54 = vmul.f32 %v259_v53, %v250_v47  ;;  %v265_v11 = vmul.f32 %v259_v53, %v247_v48  ;;  %v267_v13 = vmul.f32 %v259_v53, %v249_v49  ;;  %13864 = vst [vmem:[#allocation21_spill] sm:$0xff] %v6163_v44 }
  0x93   :  { %13863 = vst [vmem:[#allocation20_spill] sm:$0xff] %v6159_v43 }
  0x94   :  { %v284_v59 = vadd.f32 %v277_v20, %v266_v5  ;;  %v286_v7 = vadd.f32 %v277_v20, %v268_v54  ;;  %v283_v60 = vadd.f32 %v277_v20, %v265_v11  ;;  %v285_v28 = vadd.f32 %v277_v20, %v267_v13  ;;  %v6185_v53 = vpop.permute.xlu1 %308 }
  0x96   :  { %v288_v61 = vpack.c.bf16 %v284_v59, %v280_v56  ;;  %v290_v21 = vpack.c.bf16 %v286_v7, %v282_v57  ;;  %v287_v62 = vpack.c.bf16 %v283_v60, %v279_v58  ;;  %v289_v63 = vpack.c.bf16 %v285_v28, %v281_v4 }
  0x98   :  { %346 = vmatprep.subr.bf16.mxu0 %v288_v61  ;;  %409 = vmatprep.subr.bf16.mxu1 %v290_v21  ;;  %v6189_v54 = vpop.permute.xlu1 %298 }
  0x99   :  { %347 = vmatpush1.bf16.msra.mxu0 %v287_v62  ;;  %410 = vmatpush1.bf16.msra.mxu1 %v289_v63 }
  0x9a   :  { %v6165_v46 = vpop.permute.xlu0 %484 }
  0x9b   :  { %13865 = vst [vmem:[#allocation22_spill] sm:$0xff] %v6165_v46 }
  0x9c   :  { %5404 = vmatmul.mubr.msk.bf16.vlgmr.msra.gmra.mrb[0].mxu0 %vm336_vm0, %v5580_v0  ;;  %5407 = vmatmul.mubr.msk.bf16.vlgmr.msra.gmra.mrb[0].mxu1 %vm336_vm0, %v5580_v0  ;;  %v6193_v13 = vpop.permute.xlu1 %614 }
  0x9d   :  { %388 = vmatprep.mubr.bf16.mxu0 %v13238_v2  ;;  %451 = vmatprep.mubr.bf16.mxu1 %v13238_v2  ;;  %13877 = vst [vmem:[#allocation34_spill] sm:$0xff] %v6193_v13 }
  0x9f   :  { %v6167_v47 = vpop.permute.xlu0 %804 }
  0xa0   :  { %13866 = vst [vmem:[#allocation23_spill] sm:$0xff] %v6167_v47 }
  0xa1   :  { %v6197_v56 = vpop.permute.xlu1 %489 }
  0xa2   :  { %13879 = vst [vmem:[#allocation36_spill] sm:$0xff] %v6197_v56 }
  0xa3   :  { %v6169_v48 = vpop.permute.xlu0 %792 }
  0xa4   :  { %5405 = vmatmul.mubr.msk.bf16.gmra.mrb[4].mxu0 %vm336_vm0, %v5581_v31  ;;  %5408 = vmatmul.mubr.msk.bf16.gmra.mrb[4].mxu1 %vm336_vm0, %v5581_v31  ;;  %13867 = vst [vmem:[#allocation24_spill] sm:$0xff] %v6169_v48 }
  0xa5   :  { %398 = vmatprep.mubr.bf16.mxu0 %v13238_v2  ;;  %461 = vmatprep.mubr.bf16.mxu1 %v13238_v2 }
  0xa6   :  { %v6201_v58 = vpop.permute.xlu1 %800 }
  0xa7   :  { %13880 = vst [vmem:[#allocation37_spill] sm:$0xff] %v6201_v58 }
  0xa8   :  { %v6171_v49 = vpop.permute.xlu0 %1184 }
  0xa9   :  { %13868 = vst [vmem:[#allocation25_spill] sm:$0xff] %v6171_v49  ;;  %v5582_v49 = vld [vmem:[%s13213_s4 + $0x10] sm:$0xff]  }
  0xab   :  { %v6203_v59 = vpop.permute.xlu1 %990 }
  0xac   :  { %v6173_v50 = vpop.permute.xlu0 %1176  ;;  %13881 = vst [vmem:[#allocation38_spill] sm:$0xff] %v6203_v59  ;;  %5406 = vmatmul.mubr.msk.bf16.gmra.mrb[8].mxu0 %vm336_vm0, %v5582_v49  ;;  %5409 = vmatmul.mubr.msk.bf16.gmra.mrb[8].mxu1 %vm336_vm0, %v5582_v49 }
  0xad   :  { %13869 = vst [vmem:[#allocation26_spill] sm:$0xff] %v6173_v50 }
  0xaf   :  { %v6213_v55 = vpop.permute.xlu1 %994 }
  0xb0   :  { %13884 = vst [vmem:[#allocation41_spill] sm:$0xff] %v6213_v55 }
  0xb1   :  { %v6175_v51 = vpop.permute.xlu0 %1374 }
  0xb2   :  { %13870 = vst [vmem:[#allocation27_spill] sm:$0xff] %v6175_v51 }
  0xb4   :  { %v6244_v6 = vpop.permute.xlu1 %606 }
  0xb5   :  { %v6177_v52 = vpop.permute.xlu0 %1366  ;;  %13886 = vst [vmem:[#allocation43_spill] sm:$0xff] %v6244_v6 }
  0xb6   :  { %13871 = vst [vmem:[#allocation28_spill] sm:$0xff] %v6177_v52 }
  0xb9   :  { %v6256_v18 = vpop.permute.xlu1 %1180 }
  0xba   :  { %v6179_v12 = vpop.permute.xlu0 %1560  ;;  %13888 = vst [vmem:[#allocation45_spill] sm:$0xff] %v6256_v18 }
  0xbb   :  { %13872 = vst [vmem:[#allocation29_spill] sm:$0xff] %v6179_v12 }
  0xbe   :  { %v6181_v3 = vpop.permute.xlu0 %1556 }
  0xbf   :  { %13873 = vst [vmem:[#allocation30_spill] sm:$0xff] %v6181_v3 }
  0xc3   :  { %v6183_v14 = vpop.permute.xlu0 %1750 }
  0xc4   :  { %13874 = vst [vmem:[#allocation31_spill] sm:$0xff] %v6183_v14 }
  0xc7   :  { %v6187_v5 = vpop.permute.xlu0 %1742 }
  0xc8   :  { %13875 = vst [vmem:[#allocation32_spill] sm:$0xff] %v6187_v5 }
  0xcc   :  { %v6191_v11 = vpop.permute.xlu0 %1940 }
  0xcd   :  { %13876 = vst [vmem:[#allocation33_spill] sm:$0xff] %v6191_v11 }
  0xd0   :  { %v6195_v20 = vpop.permute.xlu0 %1936 }
  0xd1   :  { %13878 = vst [vmem:[#allocation35_spill] sm:$0xff] %v6195_v20 }
  0xd5   :  { %v6199_v57 = vpop.permute.xlu0 %303 }
  0xd9   :  { %v294_v4 = vpop.permute.xlu0 %293 }
  0xdd   :  { %v6371_v26 = vpop.permute.xlu0 %610 }
  0xde   :  { %13904 = vst [vmem:[#allocation61_spill] sm:$0xff] %v6371_v26 }
  0xe1   :  { %v6383_v24 = vpop.permute.xlu0 %602 }
  0xe2   :  { %13906 = vst [vmem:[#allocation63_spill] sm:$0xff] %v6383_v24 }
 0x16f   :  { %v380_v7 = vpop.f32.mrb[0].mxu0  ;;  %v443_v60 = vpop.f32.mrb[0].mxu1 }
 0x170   :  { %v6205_v28 = vadd.f32 %v380_v7, %v294_v4  ;;  %v382_v61 = vpop.f32.mrb[1].mxu0  ;;  %v445_v21 = vpop.f32.mrb[1].mxu1  ;;  %v6250_v41 = vadd.f32 %v443_v60, %v294_v4 }
 0x171   :  { %v384_v62 = vpop.f32.mrb[2].mxu0  ;;  %v447_v63 = vpop.f32.mrb[2].mxu1  ;;  %v6211_v1 = vadd.f32 %v382_v61, %v294_v4  ;;  %v6223_v45 = vadd.f32 %v445_v21, %v294_v4 }
 0x172   :  { %13882 = vst [vmem:[#allocation39_spill] sm:$0xff] %v6205_v28  ;;  %v386_v0 = vpop.f32.mrb[3].mxu0  ;;  %v449_v31 = vpop.f32.mrb[3].mxu1  ;;  %908 = vrot.lane.b32.xlu0 %v6205_v28, %s5713_s13  ;;  %526 = vrot.lane.b32.xlu1 %v6205_v28, %s5714_s28  ;;  %v6242_v21 = vadd.f32 %v384_v62, %v6189_v54  ;;  %13887 = vst [vmem:[#allocation44_spill] sm:$0xff] %v6250_v41  ;;  %v6269_v4 = vadd.f32 %v447_v63, %v6189_v54 }
 0x173   :  { %13883 = vst [vmem:[#allocation40_spill] sm:$0xff] %v6211_v1  ;;  %13885 = vst [vmem:[#allocation42_spill] sm:$0xff] %v6223_v45  ;;  %v6262_v62 = vpop.permute.xlu1 %474  ;;  %v6304_v37 = vadd.f32 %v386_v0, %v6189_v54  ;;  %v6313_v34 = vadd.f32 %v449_v31, %v6189_v54 }
 0x174   :  { %13889 = vst [vmem:[#allocation46_spill] sm:$0xff] %v6262_v62  ;;  %13890 = vst [vmem:[#allocation47_spill] sm:$0xff] %v6269_v4 }
 0x175   :  { %13896 = vst [vmem:[#allocation53_spill] sm:$0xff] %v6313_v34 }
 0x176   :  { %920 = vrot.lane.b32.xlu0 %v6211_v1, %s5713_s13  ;;  %718 = vrot.lane.b32.xlu1 %v6205_v28, %s5715_s29 }
 0x177   :  { %v6219_v7 = vpop.f32.mrb[4].mxu0  ;;  %v6221_v2 = vpop.f32.mrb[4].mxu1 }
 0x178   :  { %v6225_v35 = vpop.f32.mrb[5].mxu0  ;;  %v6227_v19 = vpop.f32.mrb[5].mxu1  ;;  %v6359_v29 = vadd.f32 %v6219_v7, %v6199_v57  ;;  %v6369_v43 = vadd.f32 %v6221_v2, %v6199_v57 }
 0x179   :  { %v6229_v61 = vpop.f32.mrb[6].mxu0  ;;  %v6231_v25 = vpop.f32.mrb[6].mxu1  ;;  %v6387_v2 = vadd.f32 %v6225_v35, %v6199_v57  ;;  %v6397_v15 = vadd.f32 %v6227_v19, %v6199_v57 }
 0x17a   :  { %v6233_v17 = vpop.f32.mrb[7].mxu0  ;;  %v6235_v9 = vpop.f32.mrb[7].mxu1  ;;  %944 = vrot.lane.b32.xlu0 %v6223_v45, %s5713_s13  ;;  %1098 = vrot.lane.b32.xlu1 %v6205_v28, %s5716_s0  ;;  %13903 = vst [vmem:[#allocation60_spill] sm:$0xff] %v6369_v43  ;;  %v6458_v49 = vadd.f32 %v6229_v61, %v6185_v53  ;;  %v6478_v61 = vadd.f32 %v6231_v25, %v6185_v53 }
 0x17b   :  { %v6275_v60 = vpop.permute.xlu1 %479  ;;  %13908 = vst [vmem:[#allocation65_spill] sm:$0xff] %v6397_v15 }
 0x17c   :  { %13891 = vst [vmem:[#allocation48_spill] sm:$0xff] %v6275_v60  ;;  %13920 = vst [vmem:[#allocation77_spill] sm:$0xff] %v6458_v49 }
 0x17d   :  { %13923 = vst [vmem:[#allocation80_spill] sm:$0xff] %v6478_v61 }
 0x17e   :  { %528 = vrot.lane.b32.xlu0 %v6242_v21, %s5714_s28  ;;  %1288 = vrot.lane.b32.xlu1 %v6205_v28, %s5717_s20 }
 0x17f   :  { %v6281_v39 = vpop.permute.xlu1 %796 }
 0x180   :  { %13892 = vst [vmem:[#allocation49_spill] sm:$0xff] %v6281_v39 }
 0x182   :  { %720 = vrot.lane.b32.xlu0 %v6242_v21, %s5715_s29  ;;  %1312 = vrot.lane.b32.xlu1 %v6250_v41, %s5717_s20 }
 0x183   :  { %v6291_v63 = vpop.permute.xlu1 %1370 }
 0x184   :  { %13893 = vst [vmem:[#allocation50_spill] sm:$0xff] %v6291_v63 }
 0x186   :  { %1100 = vrot.lane.b32.xlu0 %v6242_v21, %s5716_s0  ;;  %1478 = vrot.lane.b32.xlu1 %v6205_v28, %s5718_s21 }
 0x187   :  { %v6297_v38 = vpop.permute.xlu1 %982 }
 0x188   :  { %13894 = vst [vmem:[#allocation51_spill] sm:$0xff] %v6297_v38 }
 0x18a   :  { %1290 = vrot.lane.b32.xlu0 %v6242_v21, %s5717_s20  ;;  %1502 = vrot.lane.b32.xlu1 %v6250_v41, %s5718_s21 }
 0x18b   :  { %v6310_v36 = vpop.permute.xlu1 %986 }
 0x18c   :  { %13895 = vst [vmem:[#allocation52_spill] sm:$0xff] %v6310_v36 }
 0x18e   :  { %1314 = vrot.lane.b32.xlu0 %v6269_v4, %s5717_s20  ;;  %1668 = vrot.lane.b32.xlu1 %v6205_v28, %s5719_s1 }
 0x18f   :  { %v6319_v33 = vpop.permute.xlu1 %1564 }
 0x190   :  { %13897 = vst [vmem:[#allocation54_spill] sm:$0xff] %v6319_v33 }
 0x192   :  { %1480 = vrot.lane.b32.xlu0 %v6242_v21, %s5718_s21  ;;  %1692 = vrot.lane.b32.xlu1 %v6250_v41, %s5719_s1 }
 0x193   :  { %v6325_v0 = vpop.permute.xlu1 %1172 }
 0x194   :  { %13898 = vst [vmem:[#allocation55_spill] sm:$0xff] %v6325_v0 }
 0x196   :  { %1504 = vrot.lane.b32.xlu0 %v6269_v4, %s5718_s21  ;;  %1858 = vrot.lane.b32.xlu1 %v6205_v28, %s5720_s22 }
 0x197   :  { %v6335_v54 = vpop.permute.xlu1 %1754 }
 0x198   :  { %13899 = vst [vmem:[#allocation56_spill] sm:$0xff] %v6335_v54 }
 0x19a   :  { %1670 = vrot.lane.b32.xlu0 %v6242_v21, %s5719_s1  ;;  %538 = vrot.lane.b32.xlu1 %v6211_v1, %s5714_s28 }
 0x19b   :  { %v6341_v31 = vpop.permute.xlu1 %1362 }
 0x19c   :  { %13900 = vst [vmem:[#allocation57_spill] sm:$0xff] %v6341_v31 }
 0x19e   :  { %1694 = vrot.lane.b32.xlu0 %v6269_v4, %s5719_s1  ;;  %562 = vrot.lane.b32.xlu1 %v6223_v45, %s5714_s28 }
 0x19f   :  { %v6351_v30 = vpop.permute.xlu1 %1944 }
 0x1a0   :  { %13901 = vst [vmem:[#allocation58_spill] sm:$0xff] %v6351_v30  ;;  %v6399_v30 = vpop.permute.xlu0 %2060 }
 0x1a1   :  { %13909 = vst [vmem:[#allocation66_spill] sm:$0xff] %v6399_v30 }
 0x1a2   :  { %1860 = vrot.lane.b32.xlu0 %v6242_v21, %s5720_s22  ;;  %730 = vrot.lane.b32.xlu1 %v6211_v1, %s5715_s29 }
 0x1a3   :  { %v6361_v44 = vpop.permute.xlu1 %1552 }
 0x1a4   :  { %13902 = vst [vmem:[#allocation59_spill] sm:$0xff] %v6361_v44  ;;  %v6411_v35 = vpop.permute.xlu0 %2055 }
 0x1a5   :  { %13911 = vst [vmem:[#allocation68_spill] sm:$0xff] %v6411_v35  ;;  %v113_v35 = vld [vmem:[%s13219_s10 + $0x8] sm:$0xff] }
 0x1a6   :  { %540 = vrot.lane.b32.xlu0 %v6304_v37, %s5714_s28  ;;  %754 = vrot.lane.b32.xlu1 %v6223_v45, %s5715_s29 }
 0x1a7   :  { %v6377_v7 = vpop.permute.xlu1 %1746 }
 0x1a8   :  { %13905 = vst [vmem:[#allocation62_spill] sm:$0xff] %v6377_v7 }
 0x1aa   :  { %564 = vrot.lane.b32.xlu0 %v6313_v34, %s5714_s28  ;;  %1110 = vrot.lane.b32.xlu1 %v6211_v1, %s5716_s0 }
 0x1ab   :  { %v6389_v16 = vpop.permute.xlu1 %1932 }
 0x1ac   :  { %13907 = vst [vmem:[#allocation64_spill] sm:$0xff] %v6389_v16 }
 0x1ae   :  { %732 = vrot.lane.b32.xlu0 %v6304_v37, %s5715_s29  ;;  %1134 = vrot.lane.b32.xlu1 %v6223_v45, %s5716_s0 }
 0x1af   :  { %v6401_v54 = vpop.permute.xlu1 %2065 }
 0x1b0   :  { %13910 = vst [vmem:[#allocation67_spill] sm:$0xff] %v6401_v54 }
 0x1b2   :  { %756 = vrot.lane.b32.xlu0 %v6313_v34, %s5715_s29  ;;  %1300 = vrot.lane.b32.xlu1 %v6211_v1, %s5717_s20 }
 0x1b3   :  { %v6413_v19 = vpop.permute.xlu1 %2050 }
 0x1b4   :  { %13912 = vst [vmem:[#allocation69_spill] sm:$0xff] %v6413_v19 }
 0x1b6   :  { %1112 = vrot.lane.b32.xlu0 %v6304_v37, %s5716_s0  ;;  %1490 = vrot.lane.b32.xlu1 %v6211_v1, %s5718_s21 }
 0x1ba   :  { %1136 = vrot.lane.b32.xlu0 %v6313_v34, %s5716_s0  ;;  %1680 = vrot.lane.b32.xlu1 %v6211_v1, %s5719_s1 }
 0x1be   :  { %1302 = vrot.lane.b32.xlu0 %v6304_v37, %s5717_s20  ;;  %910 = vrot.lane.b32.xlu1 %v6242_v21, %s5713_s13 }
 0x1c2   :  { %1492 = vrot.lane.b32.xlu0 %v6304_v37, %s5718_s21  ;;  %922 = vrot.lane.b32.xlu1 %v6304_v37, %s5713_s13 }
 0x1c6   :  { %1682 = vrot.lane.b32.xlu0 %v6304_v37, %s5719_s1  ;;  %946 = vrot.lane.b32.xlu1 %v6313_v34, %s5713_s13 }
 0x1ca   :  { %722 = vrot.lane.b32.xlu0 %v6359_v29, %s5715_s29  ;;  %530 = vrot.lane.b32.xlu1 %v6359_v29, %s5714_s28 }
 0x1ce   :  { %1316 = vrot.lane.b32.xlu0 %v6369_v43, %s5717_s20  ;;  %912 = vrot.lane.b32.xlu1 %v6359_v29, %s5713_s13 }
 0x1d2   :  { %1696 = vrot.lane.b32.xlu0 %v6369_v43, %s5719_s1  ;;  %1102 = vrot.lane.b32.xlu1 %v6359_v29, %s5716_s0 }
 0x1d6   :  { %734 = vrot.lane.b32.xlu0 %v6387_v2, %s5715_s29  ;;  %1292 = vrot.lane.b32.xlu1 %v6359_v29, %s5717_s20 }
 0x1da   :  { %758 = vrot.lane.b32.xlu0 %v6397_v15, %s5715_s29  ;;  %1482 = vrot.lane.b32.xlu1 %v6359_v29, %s5718_s21 }
 0x1de   :  { %924 = vrot.lane.b32.xlu0 %v6387_v2, %s5713_s13  ;;  %1506 = vrot.lane.b32.xlu1 %v6369_v43, %s5718_s21 }
 0x1e2   :  { %948 = vrot.lane.b32.xlu0 %v6397_v15, %s5713_s13  ;;  %1672 = vrot.lane.b32.xlu1 %v6359_v29, %s5719_s1 }
 0x1e4   :  { %v6419_v57 = vpop.permute.xlu0 %908  ;;  %v6421_v54 = vpop.permute.xlu1 %526 }
 0x1e5   :  { %13913 = vst [vmem:[#allocation70_spill] sm:$0xff] %v6419_v57  ;;  %13914 = vst [vmem:[#allocation71_spill] sm:$0xff] %v6421_v54 }
 0x1e6   :  { %1114 = vrot.lane.b32.xlu0 %v6387_v2, %s5716_s0  ;;  %1862 = vrot.lane.b32.xlu1 %v6359_v29, %s5720_s22 }
 0x1e8   :  { %v6427_v33 = vpop.permute.xlu0 %920  ;;  %v6429_v51 = vpop.permute.xlu1 %718 }
 0x1e9   :  { %13915 = vst [vmem:[#allocation72_spill] sm:$0xff] %v6427_v33  ;;  %13916 = vst [vmem:[#allocation73_spill] sm:$0xff] %v6429_v51 }
 0x1ea   :  { %1138 = vrot.lane.b32.xlu0 %v6397_v15, %s5716_s0  ;;  %1886 = vrot.lane.b32.xlu1 %v6369_v43, %s5720_s22 }
 0x1ec   :  { %v6440_v56 = vpop.permute.xlu0 %944  ;;  %v6442_v55 = vpop.permute.xlu1 %1098 }
 0x1ed   :  { %13917 = vst [vmem:[#allocation74_spill] sm:$0xff] %v6440_v56  ;;  %13918 = vst [vmem:[#allocation75_spill] sm:$0xff] %v6442_v55 }
 0x1ee   :  { %1304 = vrot.lane.b32.xlu0 %v6387_v2, %s5717_s20  ;;  %542 = vrot.lane.b32.xlu1 %v6387_v2, %s5714_s28 }
 0x1f0   :  { %v6448_v47 = vpop.permute.xlu0 %528  ;;  %v6450_v13 = vpop.permute.xlu1 %1288 }
 0x1f1   :  { %13919 = vst [vmem:[#allocation76_spill] sm:$0xff] %v6450_v13 }
 0x1f2   :  { %1684 = vrot.lane.b32.xlu0 %v6387_v2, %s5719_s1  ;;  %566 = vrot.lane.b32.xlu1 %v6397_v15, %s5714_s28 }
 0x1f4   :  { %v6460_v34 = vpop.permute.xlu0 %720  ;;  %v6462_v19 = vpop.permute.xlu1 %1312 }
 0x1f5   :  { %13921 = vst [vmem:[#allocation78_spill] sm:$0xff] %v6462_v19 }
 0x1f6   :  { %532 = vrot.lane.b32.xlu0 %v6458_v49, %s5714_s28  ;;  %1494 = vrot.lane.b32.xlu1 %v6387_v2, %s5718_s21 }
 0x1f8   :  { %v6468_v45 = vpop.permute.xlu0 %1100  ;;  %v6470_v16 = vpop.permute.xlu1 %1478 }
 0x1f9   :  { %13922 = vst [vmem:[#allocation79_spill] sm:$0xff] %v6470_v16 }
 0x1fa   :  { %1484 = vrot.lane.b32.xlu0 %v6458_v49, %s5718_s21  ;;  %1874 = vrot.lane.b32.xlu1 %v6387_v2, %s5720_s22 }
 0x1fc   :  { %v6480_v5 = vpop.permute.xlu0 %1290  ;;  %v6482_v19 = vpop.permute.xlu1 %1502 }
 0x1fd   :  { %13924 = vst [vmem:[#allocation81_spill] sm:$0xff] %v6480_v5  ;;  %13925 = vst [vmem:[#allocation82_spill] sm:$0xff] %v6482_v19  ;;  %v6506_v19 = vadd.f32 %v6233_v17, %v6185_v53 }
 0x1fe   :  { %1508 = vrot.lane.b32.xlu0 %v6478_v61, %s5718_s21  ;;  %724 = vrot.lane.b32.xlu1 %v6458_v49, %s5715_s29 }
 0x1ff   :  { %13930 = vst [vmem:[#allocation87_spill] sm:$0xff] %v6506_v19 }
 0x200   :  { %v6488_v44 = vpop.permute.xlu0 %1314  ;;  %v6490_v16 = vpop.permute.xlu1 %1668 }
 0x201   :  { %13926 = vst [vmem:[#allocation83_spill] sm:$0xff] %v6488_v44  ;;  %13927 = vst [vmem:[#allocation84_spill] sm:$0xff] %v6490_v16 }
 0x202   :  { %1864 = vrot.lane.b32.xlu0 %v6458_v49, %s5720_s22  ;;  %914 = vrot.lane.b32.xlu1 %v6458_v49, %s5713_s13 }
 0x204   :  { %v6496_v25 = vpop.permute.xlu0 %1480  ;;  %v6498_v33 = vpop.permute.xlu1 %1692 }
 0x205   :  { %13928 = vst [vmem:[#allocation85_spill] sm:$0xff] %v6496_v25  ;;  %13929 = vst [vmem:[#allocation86_spill] sm:$0xff] %v6498_v33  ;;  %v6518_v33 = vadd.f32 %v6235_v9, %v6185_v53 }
 0x206   :  { %1888 = vrot.lane.b32.xlu0 %v6478_v61, %s5720_s22  ;;  %1104 = vrot.lane.b32.xlu1 %v6458_v49, %s5716_s0 }
 0x207   :  { %13933 = vst [vmem:[#allocation90_spill] sm:$0xff] %v6518_v33 }
 0x208   :  { %v6508_v16 = vpop.permute.xlu0 %1504  ;;  %v6510_v31 = vpop.permute.xlu1 %1858 }
 0x209   :  { %13931 = vst [vmem:[#allocation88_spill] sm:$0xff] %v6508_v16  ;;  %13932 = vst [vmem:[#allocation89_spill] sm:$0xff] %v6510_v31 }
 0x20a   :  { %544 = vrot.lane.b32.xlu0 %v6506_v19, %s5714_s28  ;;  %1294 = vrot.lane.b32.xlu1 %v6458_v49, %s5717_s20 }
 0x20c   :  { %v6520_v13 = vpop.permute.xlu0 %1670  ;;  %v6522_v0 = vpop.permute.xlu1 %538 }
 0x20d   :  { %13934 = vst [vmem:[#allocation91_spill] sm:$0xff] %v6520_v13  ;;  %13935 = vst [vmem:[#allocation92_spill] sm:$0xff] %v6522_v0 }
 0x20e   :  { %568 = vrot.lane.b32.xlu0 %v6518_v33, %s5714_s28  ;;  %1318 = vrot.lane.b32.xlu1 %v6478_v61, %s5717_s20 }
 0x210   :  { %v6528_v17 = vpop.permute.xlu0 %1694  ;;  %v6530_v31 = vpop.permute.xlu1 %562 }
 0x211   :  { %13936 = vst [vmem:[#allocation93_spill] sm:$0xff] %v6528_v17  ;;  %13937 = vst [vmem:[#allocation94_spill] sm:$0xff] %v6530_v31 }
 0x212   :  { %1496 = vrot.lane.b32.xlu0 %v6506_v19, %s5718_s21  ;;  %1674 = vrot.lane.b32.xlu1 %v6458_v49, %s5719_s1  ;;  %v112_v49 = vld [vmem:[%s13219_s10] sm:$0xff] }
 0x214   :  { %v6536_v9 = vpop.permute.xlu0 %1860  ;;  %v6538_v53 = vpop.permute.xlu1 %730 }
 0x215   :  { %13938 = vst [vmem:[#allocation95_spill] sm:$0xff] %v6536_v9  ;;  %13939 = vst [vmem:[#allocation96_spill] sm:$0xff] %v6538_v53 }
 0x216   :  { %1872 = vrot.lane.b32.xlu0 %v6304_v37, %s5720_s22  ;;  %1698 = vrot.lane.b32.xlu1 %v6478_v61, %s5719_s1 }
 0x218   :  { %v6544_v55 = vpop.permute.xlu0 %540  ;;  %v6546_v56 = vpop.permute.xlu1 %754 }
 0x219   :  { %13940 = vst [vmem:[#allocation97_spill] sm:$0xff] %v6544_v55  ;;  %13941 = vst [vmem:[#allocation98_spill] sm:$0xff] %v6546_v56 }
 0x21a   :  { %1884 = vrot.lane.b32.xlu0 %v6269_v4, %s5720_s22  ;;  %736 = vrot.lane.b32.xlu1 %v6506_v19, %s5715_s29 }
 0x21c   :  { %v6555_v57 = vpop.permute.xlu0 %564  ;;  %v6557_v38 = vpop.permute.xlu1 %1110 }
 0x21d   :  { %13942 = vst [vmem:[#allocation99_spill] sm:$0xff] %v6555_v57  ;;  %13943 = vst [vmem:[#allocation100_spill] sm:$0xff] %v6557_v38 }
 0x21e   :  { %2122 = vperm.xlu0 %5530, %v112_v49   ;;  %760 = vrot.lane.b32.xlu1 %v6518_v33, %s5715_s29 }
 0x220   :  { %v6561_v53 = vpop.permute.xlu0 %732  ;;  %v6563_v62 = vpop.permute.xlu1 %1134 }
 0x221   :  { %13944 = vst [vmem:[#allocation101_spill] sm:$0xff] %v6561_v53  ;;  %13945 = vst [vmem:[#allocation102_spill] sm:$0xff] %v6563_v62 }
 0x222   :  { %554 = vrot.lane.b32.xlu0 %v6369_v43, %s5714_s28  ;;  %926 = vrot.lane.b32.xlu1 %v6506_v19, %s5713_s13 }
 0x224   :  { %v6569_v28 = vpop.permute.xlu0 %756  ;;  %v6571_v0 = vpop.permute.xlu1 %1300 }
 0x225   :  { %13946 = vst [vmem:[#allocation103_spill] sm:$0xff] %v6569_v28  ;;  %13947 = vst [vmem:[#allocation104_spill] sm:$0xff] %v6571_v0 }
 0x226   :  { %748 = vrot.lane.b32.xlu0 %v6478_v61, %s5715_s29  ;;  %950 = vrot.lane.b32.xlu1 %v6518_v33, %s5713_s13 }
 0x228   :  { %v6577_v49 = vpop.permute.xlu0 %1112  ;;  %v6579_v38 = vpop.permute.xlu1 %1490 }
 0x229   :  { %13948 = vst [vmem:[#allocation105_spill] sm:$0xff] %v6577_v49  ;;  %13949 = vst [vmem:[#allocation106_spill] sm:$0xff] %v6579_v38 }
 0x22a   :  { %1876 = vrot.lane.b32.xlu0 %v6506_v19, %s5720_s22  ;;  %1116 = vrot.lane.b32.xlu1 %v6506_v19, %s5716_s0 }
 0x22c   :  { %v6585_v62 = vpop.permute.xlu0 %1136  ;;  %v6587_v48 = vpop.permute.xlu1 %1680 }
 0x22d   :  { %13950 = vst [vmem:[#allocation107_spill] sm:$0xff] %v6585_v62  ;;  %13951 = vst [vmem:[#allocation108_spill] sm:$0xff] %v6587_v48 }
 0x22e   :  { %938 = vrot.lane.b32.xlu0 %v6478_v61, %s5713_s13  ;;  %1140 = vrot.lane.b32.xlu1 %v6518_v33, %s5716_s0 }
 0x230   :  { %v6593_v0 = vpop.permute.xlu0 %1302  ;;  %v6595_v56 = vpop.permute.xlu1 %910 }
 0x232   :  { %552 = vrot.lane.b32.xlu0 %v6269_v4, %s5714_s28  ;;  %1306 = vrot.lane.b32.xlu1 %v6506_v19, %s5717_s20 }
 0x234   :  { %v6601_v38 = vpop.permute.xlu0 %1492  ;;  %v6603_v51 = vpop.permute.xlu1 %922 }
 0x235   :  { %13952 = vst [vmem:[#allocation109_spill] sm:$0xff] %v6601_v38  ;;  %13953 = vst [vmem:[#allocation110_spill] sm:$0xff] %v6603_v51 }
 0x236   :  { %1128 = vrot.lane.b32.xlu0 %v6478_v61, %s5716_s0  ;;  %1686 = vrot.lane.b32.xlu1 %v6506_v19, %s5719_s1 }
 0x238   :  { %v6609_v48 = vpop.permute.xlu0 %1682  ;;  %v6611_v24 = vpop.permute.xlu1 %946 }
 0x239   :  { %13954 = vst [vmem:[#allocation111_spill] sm:$0xff] %v6609_v48  ;;  %13955 = vst [vmem:[#allocation112_spill] sm:$0xff] %v6611_v24 }
 0x23a   :  { %744 = vrot.lane.b32.xlu0 %v6269_v4, %s5715_s29  ;;  %1870 = vrot.lane.b32.xlu1 %v6211_v1, %s5720_s22 }
 0x23c   :  { %v6617_v31 = vpop.permute.xlu0 %722  ;;  %v6619_v54 = vpop.permute.xlu1 %530 }
 0x23e   :  { %1330 = vrot.lane.b32.xlu0 %v6518_v33, %s5717_s20  ;;  %1882 = vrot.lane.b32.xlu1 %v6250_v41, %s5720_s22 }
 0x240   :  { %v6625_v19 = vpop.permute.xlu0 %1316  ;;  %v6627_v30 = vpop.permute.xlu1 %912 }
 0x241   :  { %13956 = vst [vmem:[#allocation113_spill] sm:$0xff] %v6625_v19 }
 0x242   :  { %934 = vrot.lane.b32.xlu0 %v6269_v4, %s5713_s13  ;;  %2127 = vperm.xlu1 %5531, %v113_v35  }
 0x244   :  { %v6634_v1 = vpop.permute.xlu0 %1696  ;;  %v6636_v9 = vpop.permute.xlu1 %1102 }
 0x245   :  { %13957 = vst [vmem:[#allocation114_spill] sm:$0xff] %v6634_v1 }
 0x246   :  { %1520 = vrot.lane.b32.xlu0 %v6518_v33, %s5718_s21  ;;  %556 = vrot.lane.b32.xlu1 %v6478_v61, %s5714_s28 }
 0x248   :  { %v6642_v17 = vpop.permute.xlu0 %734  ;;  %v6644_v20 = vpop.permute.xlu1 %1292 }
 0x249   :  { %13958 = vst [vmem:[#allocation115_spill] sm:$0xff] %v6642_v17  ;;  %13959 = vst [vmem:[#allocation116_spill] sm:$0xff] %v6644_v20 }
 0x24a   :  { %746 = vrot.lane.b32.xlu1 %v6369_v43, %s5715_s29 }
 0x24c   :  { %v6648_v11 = vpop.permute.xlu0 %758  ;;  %v6650_v35 = vpop.permute.xlu1 %1482 }
 0x24d   :  { %13960 = vst [vmem:[#allocation117_spill] sm:$0xff] %v6648_v11  ;;  %13961 = vst [vmem:[#allocation118_spill] sm:$0xff] %v6650_v35 }
 0x24e   :  { %936 = vrot.lane.b32.xlu1 %v6369_v43, %s5713_s13 }
 0x250   :  { %v6654_v4 = vpop.permute.xlu0 %924  ;;  %v6656_v33 = vpop.permute.xlu1 %1506 }
 0x251   :  { %13962 = vst [vmem:[#allocation119_spill] sm:$0xff] %v6654_v4  ;;  %13963 = vst [vmem:[#allocation120_spill] sm:$0xff] %v6656_v33 }
 0x252   :  { %550 = vrot.lane.b32.xlu1 %v6250_v41, %s5714_s28 }
 0x254   :  { %v6660_v61 = vpop.permute.xlu0 %948  ;;  %v6662_v1 = vpop.permute.xlu1 %1672 }
 0x255   :  { %13964 = vst [vmem:[#allocation121_spill] sm:$0xff] %v6660_v61  ;;  %13965 = vst [vmem:[#allocation122_spill] sm:$0xff] %v6662_v1 }
 0x256   :  { %1126 = vrot.lane.b32.xlu1 %v6369_v43, %s5716_s0  ;;  %v6685_v43 = vsub.s32 1, %v5847_v8 }
 0x258   :  { %v6666_v13 = vpop.permute.xlu0 %1114  ;;  %v6668_v48 = vpop.permute.xlu1 %1862  ;;  %v6738_v14 = vrot.slane %v6077_v23, %v6685_v43  ;;  %v6759_v20 = vrot.slane %v6155_v42, %v6685_v43 }
 0x259   :  { %13966 = vst [vmem:[#allocation123_spill] sm:$0xff] %v6666_v13  ;;  %13967 = vst [vmem:[#allocation124_spill] sm:$0xff] %v6668_v48  ;;  %v6688_v48 = vsub.s32 0, %v5847_v8  ;;  %v6708_v8 = vrot.slane %v6103_v32, %v6685_v43 }
 0x25a   :  { %742 = vrot.lane.b32.xlu1 %v6250_v41, %s5715_s29  ;;  %13986 = vst [vmem:[#allocation142_spill] sm:$0xff] %v6738_v14  ;;  %13990 = vst [vmem:[#allocation146_spill] sm:$0xff] %v6759_v20 }
 0x25b   :  { %v6700_v25 = vrot.slane %v6090_v27, %v6688_v48  ;;  %13977 = vst [vmem:[#allocation134_spill] sm:$0xff] %v6708_v8  ;;  %v6717_v44 = vrot.slane %v6116_v10, %v6688_v48 }
 0x25c   :  { %v6672_v7 = vpop.permute.xlu0 %1138  ;;  %v6674_v16 = vpop.permute.xlu1 %1886 }
 0x25d   :  { %13968 = vst [vmem:[#allocation125_spill] sm:$0xff] %v6672_v7  ;;  %13969 = vst [vmem:[#allocation126_spill] sm:$0xff] %v6674_v16  ;;  %v6696_v16 = vrot.slane %v6090_v27, %v6685_v43  ;;  %v6721_v27 = vrot.slane %v6116_v10, %v6685_v43  ;;  %v6742_v10 = vrot.slane %v6077_v23, %v6688_v48 }
 0x25e   :  { %1328 = vrot.lane.b32.xlu1 %v6397_v15, %s5717_s20  ;;  %13975 = vst [vmem:[#allocation132_spill] sm:$0xff] %v6700_v25  ;;  %13980 = vst [vmem:[#allocation136_spill] sm:$0xff] %v6717_v44  ;;  %v6763_v23 = vrot.slane %v6155_v42, %v6688_v48 }
 0x25f   :  { %13974 = vst [vmem:[#allocation131_spill] sm:$0xff] %v6696_v16  ;;  %13981 = vst [vmem:[#allocation137_spill] sm:$0xff] %v6721_v27 }
 0x260   :  { %v6678_v33 = vpop.permute.xlu0 %1304  ;;  %v6680_v1 = vpop.permute.xlu1 %542  ;;  %13987 = vst [vmem:[#allocation143_spill] sm:$0xff] %v6742_v10  ;;  %13991 = vst [vmem:[#allocation147_spill] sm:$0xff] %v6763_v23 }
 0x261   :  { %13970 = vst [vmem:[#allocation127_spill] sm:$0xff] %v6678_v33  ;;  %13971 = vst [vmem:[#allocation128_spill] sm:$0xff] %v6680_v1  ;;  %v6767_v33 = vmul.f32 %v6708_v8, %v6177_v52 }
 0x262   :  { %932 = vrot.lane.b32.xlu1 %v6250_v41, %s5713_s13  ;;  %v6704_v41 = vrot.slane %v6103_v32, %v6688_v48  ;;  %v5669_v32 = vld [vmem:[%s13846_s30] sm:$0xf] }
 0x263   :  { %13992 = vst [vmem:[#allocation148_spill] sm:$0xff] %v6767_v33 }
 0x264   :  { %v6690_v40 = vpop.permute.xlu0 %1684  ;;  %v6692_v35 = vpop.permute.xlu1 %566  ;;  %13976 = vst [vmem:[#allocation133_spill] sm:$0xff] %v6704_v41 }
 0x265   :  { %13972 = vst [vmem:[#allocation129_spill] sm:$0xff] %v6690_v40  ;;  %13973 = vst [vmem:[#allocation130_spill] sm:$0xff] %v6692_v35  ;;  %v13978_v40 = vlaneseq }
 0x266   :  { %1518 = vrot.lane.b32.xlu1 %v6397_v15, %s5718_s21  ;;  %v6731_v15 = vrot.slane %v5669_v32, %v6685_v43 }
 0x267   :  { %v6713_v38 = vand.u32 127, %v13978_v40  ;;  %v6734_v40 = vrot.slane %v5669_v32, %v6688_v48  ;;  %v6755_v32 = vmul.f32 %v6704_v41, %v6177_v52  ;;  %v6785_v52 = vmul.f32 %v6717_v44, %v6179_v12 }
 0x268   :  { %v6723_v19 = vpop.permute.xlu0 %532  ;;  %v6725_v63 = vpop.permute.xlu1 %1494  ;;  %13984 = vst [vmem:[#allocation140_spill] sm:$0xff] %v6731_v15 }
 0x269   :  { %13979 = vst [vmem:[#allocation135_spill] sm:$0xff] %v6713_v38  ;;  %13982 = vst [vmem:[#allocation138_spill] sm:$0xff] %v6723_v19  ;;  %vm576_vm1 = vcmp.lt.s32.totalorder %v6713_v38, 17  ;;  %v6747_v19 = vmul.f32 %v6696_v16, %v6173_v50  ;;  %v654_v42 = vmul.f32 %v6734_v40, %v6371_v26  ;;  %vm766_vm2 = vcmp.lt.s32.totalorder %v6713_v38, 16 }
 0x26a   :  { %13983 = vst [vmem:[#allocation139_spill] sm:$0xff] %v6725_v63  ;;  %13985 = vst [vmem:[#allocation141_spill] sm:$0xff] %v6734_v40  ;;  %v6751_v63 = vmul.f32 %v6700_v25, %v6173_v50  ;;  %v597_v50 = vsel %vm576_vm1, %v6692_v35, %v6619_v54  ;;  %v6793_v35 = vrot.slane %v6129_v22, %v6688_v48  ;;  %vm956_vm3 = vcmp.lt.s32.totalorder %v6713_v38, 15 }
 0x26b   :  { %13988 = vst [vmem:[#allocation144_spill] sm:$0xff] %v6747_v19  ;;  %13989 = vst [vmem:[#allocation145_spill] sm:$0xff] %v6755_v32  ;;  %v6775_v32 = vmul.f32 %v6717_v44, %v6181_v3  ;;  %v6779_v19 = vmul.f32 %v6721_v27, %v6181_v3  ;;  %v591_v3 = vsel %vm576_vm1, %v6619_v54, %v6680_v1  ;;  %vm1146_vm4 = vcmp.lt.s32.totalorder %v6713_v38, 1 }
 0x26c   :  { %13995 = vst [vmem:[#allocation151_spill] sm:$0xff] %v6785_v52  ;;  %v6787_v33 = vpop.permute.xlu0 %1484  ;;  %v6789_v8 = vpop.permute.xlu1 %1874  ;;  %13998 = vst [vmem:[#allocation154_spill] sm:$0xff] %v6793_v35  ;;  %v6805_v44 = vmul.f32 %v6721_v27, %v6179_v12  ;;  %v650_v52 = vmul.f32 %v6734_v40, %v6244_v6  ;;  %v844_v54 = vmul.f32 %v6742_v10, %v6201_v58  ;;  %vm1336_vm5 = vcmp.lt.s32.totalorder %v6713_v38, 127 }
 0x26d   :  { %13993 = vst [vmem:[#allocation149_spill] sm:$0xff] %v6775_v32  ;;  %13994 = vst [vmem:[#allocation150_spill] sm:$0xff] %v6779_v19  ;;  %v6797_v32 = vrot.slane %v6129_v22, %v6685_v43  ;;  %v655_v22 = vmul.f32 %v6731_v15, %v6371_v26  ;;  %v678_v19 = vmul.f32 %v654_v42, %v597_v50  ;;  %vm1526_vm6 = vcmp.lt.s32.totalorder %v6713_v38, 113 }
 0x26e   :  { %13996 = vst [vmem:[#allocation152_spill] sm:$0xff] %v6787_v33  ;;  %13997 = vst [vmem:[#allocation153_spill] sm:$0xff] %v6789_v8  ;;  %v596_v33 = vsel %vm576_vm1, %v6555_v57, %v6448_v47  ;;  %v845_v8 = vmul.f32 %v6738_v14, %v6201_v58  ;;  %v1035_v12 = vmul.f32 %v6759_v20, %v6203_v59  ;;  %vm1716_vm7 = vcmp.lt.s32.totalorder %v6713_v38, 112 }
 0x26f   :  { %13999 = vst [vmem:[#allocation155_spill] sm:$0xff] %v6797_v32  ;;  %v1034_v1 = vmul.f32 %v6763_v23, %v6203_v59  ;;  %v651_v57 = vmul.f32 %v6731_v15, %v6244_v6  ;;  %v679_v27 = vmul.f32 %v655_v22, %v591_v3  ;;  %v510_v50 = vmul.f32 %v6165_v46, %v6359_v29 }
 0x270   :  { %v6828_v42 = vpop.permute.xlu0 %1508  ;;  %v6830_v26 = vpop.permute.xlu1 %724  ;;  %v674_v58 = vmul.f32 %v650_v52, %v596_v33  ;;  %v840_v40 = vmul.f32 %v6742_v10, %v6281_v39  ;;  %v786_v59 = vsel %vm766_vm2, %v6569_v28, %v6460_v34  ;;  %v787_v3 = vsel %vm766_vm2, %v6648_v11, %v6617_v31 }
 0x271   :  { %14000 = vst [vmem:[#allocation156_spill] sm:$0xff] %v6828_v42  ;;  %v590_v29 = vsel %vm576_vm1, %v6448_v47, %v6544_v55  ;;  %v511_v33 = vmul.f32 %v6165_v46, %v6387_v2  ;;  %v702_v52 = vadd.f32 %v678_v19, %v510_v50  ;;  %v506_v22 = vmul.f32 %v6275_v60, %v6242_v21 }
 0x272   :  { %v1030_v28 = vmul.f32 %v6763_v23, %v6310_v36  ;;  %v976_v6 = vsel %vm956_vm3, %v6611_v24, %v6595_v56  ;;  %v781_v47 = vsel %vm766_vm2, %v6617_v31, %v6642_v17  ;;  %v780_v2 = vsel %vm766_vm2, %v6460_v34, %v6561_v53 }
 0x273   :  { %v864_v19 = vmul.f32 %v840_v40, %v786_v59  ;;  %v868_v21 = vmul.f32 %v844_v54, %v787_v3  ;;  %v703_v50 = vadd.f32 %v679_v27, %v511_v33  ;;  %v675_v11 = vmul.f32 %v651_v57, %v590_v29 }
 0x274   :  { %v6865_v55 = vpop.permute.xlu0 %1864  ;;  %v6867_v46 = vpop.permute.xlu1 %914  ;;  %v698_v42 = vadd.f32 %v674_v58, %v506_v22  ;;  %v841_v24 = vmul.f32 %v6738_v14, %v6281_v39  ;;  %v977_v31 = vsel %vm956_vm3, %v6660_v61, %v6627_v30  ;;  %v970_v34 = vsel %vm956_vm3, %v6595_v56, %v6603_v51  ;;  %v14025_v51 = vld [vmem:[#allocation62_spill] sm:$0xff]  ;;  %v14028_v39 = vld [vmem:[#allocation129_spill] sm:$0xff] }
 0x275   :  { %14001 = vst [vmem:[#allocation157_spill] sm:$0xff] %v6865_v55  ;;  %v1054_v59 = vmul.f32 %v1030_v28, %v976_v6  ;;  %v869_v27 = vmul.f32 %v845_v8, %v781_v47  ;;  %v892_v40 = vadd.f32 %v868_v21, %v702_v52  ;;  %v507_v57 = vmul.f32 %v6275_v60, %v6304_v37  ;;  %v14015_v60 = vld [vmem:[#allocation118_spill] sm:$0xff]  ;;  %v14066_v61 = vld [vmem:[#allocation57_spill] sm:$0xff] }
 0x276   :  { %v865_v58 = vmul.f32 %v841_v24, %v780_v2  ;;  %v1031_v54 = vmul.f32 %v6759_v20, %v6310_v36  ;;  %v971_v3 = vsel %vm956_vm3, %v6627_v30, %v6654_v4  ;;  %v888_v29 = vadd.f32 %v864_v19, %v698_v42 }
 0x277   :  { %v1058_v33 = vmul.f32 %v1034_v1, %v977_v31  ;;  %v893_v56 = vadd.f32 %v869_v27, %v703_v50  ;;  %v699_v8 = vadd.f32 %v675_v11, %v507_v57  ;;  %v1166_v24 = vsel %vm1146_vm4, %v6585_v62, %v6468_v45 }
 0x278   :  { %v6888_v6 = vpop.permute.xlu0 %1888  ;;  %v6890_v28 = vpop.permute.xlu1 %1104  ;;  %v1055_v37 = vmul.f32 %v1031_v54, %v970_v34  ;;  %v1167_v30 = vsel %vm1146_vm4, %v6672_v7, %v6636_v9  ;;  %v1078_v52 = vadd.f32 %v1054_v59, %v888_v29  ;;  %v1059_v42 = vmul.f32 %v1035_v12, %v971_v3  ;;  %v14006_v3 = vld [vmem:[#allocation50_spill] sm:$0xff] }
 0x279   :  { %14002 = vst [vmem:[#allocation158_spill] sm:$0xff] %v6888_v6  ;;  %v1224_v1 = vmul.f32 %v6700_v25, %v6256_v18  ;;  %v1082_v22 = vadd.f32 %v1058_v33, %v892_v40  ;;  %v889_v11 = vadd.f32 %v865_v58, %v699_v8  ;;  %v1225_v47 = vmul.f32 %v6696_v16, %v6256_v18  ;;  %v14004_v40 = vld [vmem:[#allocation116_spill] sm:$0xff] }
 0x27a   :  { %v1161_v2 = vsel %vm1146_vm4, %v6636_v9, %v6666_v13  ;;  %v1160_v12 = vsel %vm1146_vm4, %v6468_v45, %v6577_v49  ;;  %v1244_v19 = vmul.f32 %v6751_v63, %v1166_v24  ;;  %v1083_v50 = vadd.f32 %v1059_v42, %v893_v56  ;;  %v14003_v9 = vld [vmem:[#allocation127_spill] sm:$0xff]  ;;  %v14007_v56 = vld [vmem:[#allocation144_spill] sm:$0xff]  ;;  %v14008_v24 = vld [vmem:[#allocation134_spill] sm:$0xff] }
 0x27b   :  { %v1248_v21 = vmul.f32 %v1224_v1, %v1167_v30  ;;  %v1350_v59 = vsel %vm1336_vm5, %v6480_v5, %v6593_v0  ;;  %v1079_v27 = vadd.f32 %v1055_v37, %v889_v11  ;;  %v1351_v57 = vsel %vm1336_vm5, %v14004_v40, %v14003_v9  ;;  %v14005_v45 = vld [vmem:[#allocation31_spill] sm:$0xff]  ;;  %v14009_v30 = vld [vmem:[#allocation113_spill] sm:$0xff]  ;;  %v14065_v13 = vld [vmem:[#allocation76_spill] sm:$0xff] }
 0x27c   :  { %v6914_v31 = vpop.permute.xlu0 %544  ;;  %v6916_v34 = vpop.permute.xlu1 %1294  ;;  %v1794_v63 = vmul.f32 %v6793_v35, %v14005_v45  ;;  %v1268_v58 = vadd.f32 %v1244_v19, %v1078_v52  ;;  %v1249_v54 = vmul.f32 %v1225_v47, %v1161_v2  ;;  %v1414_v29 = vmul.f32 %v6704_v41, %v14006_v3  ;;  %v14010_v1 = vld [vmem:[#allocation83_spill] sm:$0xff]  ;;  %v14011_v11 = vld [vmem:[#allocation145_spill] sm:$0xff] }
 0x27d   :  { %v1272_v33 = vadd.f32 %v1248_v21, %v1082_v22  ;;  %v1245_v8 = vmul.f32 %v14007_v56, %v1160_v12  ;;  %v1415_v37 = vmul.f32 %v14008_v24, %v14006_v3  ;;  %v1345_v42 = vsel %vm1336_vm5, %v14003_v9, %v14009_v30  ;;  %v14012_v21 = vld [vmem:[#allocation109_spill] sm:$0xff]  ;;  %v14014_v49 = vld [vmem:[#allocation139_spill] sm:$0xff]  ;;  %v14064_v3 = vld [vmem:[#allocation104_spill] sm:$0xff] }
 0x27e   :  { %v1344_v52 = vsel %vm1336_vm5, %v6593_v0, %v14010_v1  ;;  %v1434_v47 = vmul.f32 %v14011_v11, %v1350_v59  ;;  %v1438_v22 = vmul.f32 %v1414_v29, %v1351_v57  ;;  %v1273_v2 = vadd.f32 %v1249_v54, %v1083_v50  ;;  %v14013_v56 = vld [vmem:[#allocation85_spill] sm:$0xff]  ;;  %v14018_v11 = vld [vmem:[#allocation148_spill] sm:$0xff]  ;;  %v14037_v40 = vld [vmem:[#allocation95_spill] sm:$0xff] }
 0x27f   :  { %v1540_v5 = vsel %vm1526_vm6, %v14013_v56, %v14012_v21  ;;  %v1269_v62 = vadd.f32 %v1245_v8, %v1079_v27  ;;  %v1795_v9 = vmul.f32 %v6797_v32, %v14005_v45  ;;  %v1541_v0 = vsel %vm1526_vm6, %v14015_v60, %v14014_v49  ;;  %v14016_v54 = vld [vmem:[#allocation17_spill] sm:$0xff]  ;;  %v14019_v27 = vld [vmem:[#allocation120_spill] sm:$0xff]  ;;  %v14033_v45 = vld [vmem:[#allocation35_spill] sm:$0xff] }
 0x280   :  { %v6943_v19 = vpop.permute.xlu0 %568  ;;  %v6945_v12 = vpop.permute.xlu1 %1318  ;;  %v1458_v59 = vadd.f32 %v1434_v47, %v1268_v58  ;;  %v1439_v50 = vmul.f32 %v1415_v37, %v1345_v42  ;;  %v1462_v57 = vadd.f32 %v1438_v22, %v1272_v33  ;;  %v6959_v29 = vrot.slane %v14016_v54, %v6688_v48  ;;  %v14021_v58 = vld [vmem:[#allocation88_spill] sm:$0xff]  ;;  %v14022_v48 = vld [vmem:[#allocation149_spill] sm:$0xff]  ;;  %v14023_v47 = vld [vmem:[#allocation151_spill] sm:$0xff] }
 0x281   :  { %v1435_v56 = vmul.f32 %v14018_v11, %v1344_v52  ;;  %v1535_v8 = vsel %vm1526_vm6, %v14014_v49, %v14019_v27  ;;  %v6969_v1 = vrot.slane %v14016_v54, %v6685_v43  ;;  %v1534_v33 = vsel %vm1526_vm6, %v14012_v21, %v14021_v58  ;;  %v14026_v43 = vld [vmem:[#allocation111_spill] sm:$0xff]  ;;  %v14029_v21 = vld [vmem:[#allocation122_spill] sm:$0xff] }
 0x282   :  { %14017 = vst [vmem:[#allocation127_spill] sm:$0xff] %v6959_v29  ;;  %v1624_v37 = vmul.f32 %v14022_v48, %v1540_v5  ;;  %v1463_v42 = vadd.f32 %v1439_v50, %v1273_v2  ;;  %v1628_v22 = vmul.f32 %v14023_v47, %v1541_v0  ;;  %v1790_v49 = vmul.f32 %v6793_v35, %v14025_v51  ;;  %v14027_v54 = vld [vmem:[#allocation91_spill] sm:$0xff]  ;;  %v14030_v48 = vld [vmem:[#allocation150_spill] sm:$0xff] }
 0x283   :  { %14020 = vst [vmem:[#allocation144_spill] sm:$0xff] %v6969_v1  ;;  %v1459_v36 = vadd.f32 %v1435_v56, %v1269_v62  ;;  %v1730_v53 = vsel %vm1716_vm7, %v14027_v54, %v14026_v43  ;;  %v1731_v5 = vsel %vm1716_vm7, %v14029_v21, %v14028_v39  ;;  %vm1906_vm8 = vcmp.lt.s32.totalorder %v6713_v38, 111  ;;  %v14031_v58 = vld [vmem:[#allocation114_spill] sm:$0xff]  ;;  %v14032_v56 = vld [vmem:[#allocation33_spill] sm:$0xff] }
 0x284   :  { %v6977_v52 = vpop.permute.xlu0 %1496  ;;  %v6979_v11 = vpop.permute.xlu1 %1674  ;;  %v1629_v2 = vmul.f32 %v6805_v44, %v1535_v8  ;;  %v1652_v0 = vadd.f32 %v1628_v22, %v1462_v57  ;;  %v1648_v50 = vadd.f32 %v1624_v37, %v1458_v59  ;;  %v1625_v47 = vmul.f32 %v14030_v48, %v1534_v33  ;;  %v14034_v37 = vld [vmem:[#allocation93_spill] sm:$0xff]  ;;  %v14036_v48 = vld [vmem:[#allocation124_spill] sm:$0xff] }
 0x285   :  { %14024 = vst [vmem:[#allocation145_spill] sm:$0xff] %v6979_v11  ;;  %v1725_v62 = vsel %vm1716_vm7, %v14028_v39, %v14031_v58  ;;  %v1984_v54 = vmul.f32 %v6959_v29, %v14032_v56  ;;  %v1980_v60 = vmul.f32 %v6959_v29, %v14033_v45  ;;  %v1791_v21 = vmul.f32 %v6797_v32, %v14025_v51  ;;  %v14035_v22 = vld [vmem:[#allocation153_spill] sm:$0xff]  ;;  %v14079_v11 = vld [vmem:[#allocation86_spill] sm:$0xff] }
 0x286   :  { %v1814_v27 = vmul.f32 %v1790_v49, %v1730_v53  ;;  %v1818_v44 = vmul.f32 %v1794_v63, %v1731_v5  ;;  %v1653_v57 = vadd.f32 %v1629_v2, %v1463_v42  ;;  %v1649_v33 = vadd.f32 %v1625_v47, %v1459_v36  ;;  %v14038_v2 = vld [vmem:[#allocation126_spill] sm:$0xff] }
 0x287   :  { %v1724_v39 = vsel %vm1716_vm7, %v14026_v43, %v14034_v37  ;;  %v1921_v58 = vsel %vm1906_vm8, %v14036_v48, %v14035_v22  ;;  %v1819_v63 = vmul.f32 %v1795_v9, %v1725_v62  ;;  %v1985_v36 = vmul.f32 %v6969_v1, %v14032_v56 }
 0x288   :  { %v1873_v59 = vpop.permute.xlu0 %1872  ;;  %v7004_v8 = vpop.permute.xlu1 %1698  ;;  %v1842_v42 = vadd.f32 %v1818_v44, %v1652_v0  ;;  %v1838_v49 = vadd.f32 %v1814_v27, %v1648_v50  ;;  %v1915_v43 = vsel %vm1906_vm8, %v14035_v22, %v14038_v2  ;;  %v1981_v47 = vmul.f32 %v6969_v1, %v14033_v45  ;;  %v14059_v2 = vld [vmem:[#allocation74_spill] sm:$0xff] }
 0x289   :  { %v1920_v53 = vsel %vm1906_vm8, %v14037_v40, %v1873_v59  ;;  %v1815_v51 = vmul.f32 %v1791_v21, %v1724_v39  ;;  %v1843_v37 = vadd.f32 %v1819_v63, %v1653_v57  ;;  %v2008_v48 = vmul.f32 %v1984_v54, %v1921_v58  ;;  %v14040_v21 = vld [vmem:[#allocation68_spill] sm:$0xff]  ;;  %v14043_v54 = vld [vmem:[#allocation66_spill] sm:$0xff] }
 0x28a   :  { %v2004_v5 = vmul.f32 %v1980_v60, %v1920_v53  ;;  %v2009_v0 = vmul.f32 %v1985_v36, %v1915_v43 }
 0x28b   :  { %v1839_v27 = vadd.f32 %v1815_v51, %v1649_v33  ;;  %v2032_v50 = vadd.f32 %v2008_v48, %v1842_v42 }
 0x28c   :  { %v2028_v30 = vadd.f32 %v2004_v5, %v1838_v49  ;;  %v7025_v40 = vpop.permute.xlu0 %1884  ;;  %v7027_v9 = vpop.permute.xlu1 %736  ;;  %v2033_v44 = vadd.f32 %v2009_v0, %v1843_v37  ;;  %v14046_v49 = vld [vmem:[#allocation71_spill] sm:$0xff]  ;;  %v14047_v5 = vld [vmem:[#allocation94_spill] sm:$0xff]  ;;  %v14050_v0 = vld [vmem:[#allocation73_spill] sm:$0xff] }
 0x28d   :  { %14039 = vst [vmem:[#allocation109_spill] sm:$0xff] %v7025_v40  ;;  %v1914_v60 = vsel %vm1906_vm8, %v1873_v59, %v7025_v40  ;;  %v7041_v39 = vadd.f32 %v14043_v54, %v2032_v50  ;;  %v595_v36 = vsel %vm576_vm1, %v14047_v5, %v14046_v49  ;;  %v14051_v50 = vld [vmem:[#allocation98_spill] sm:$0xff]  ;;  %v14054_v5 = vld [vmem:[#allocation39_spill] sm:$0xff] }
 0x28e   :  { %v2005_v62 = vmul.f32 %v1981_v47, %v1914_v60  ;;  %v7035_v57 = vadd.f32 %v14040_v21, %v2028_v30  ;;  %v7050_v33 = vadd.f32 %v14043_v54, %v2033_v44  ;;  %v14048_v47 = vld [vmem:[#allocation63_spill] sm:$0xff]  ;;  %v14049_v60 = vld [vmem:[#allocation141_spill] sm:$0xff] }
 0x28f   :  { %14044 = vst [vmem:[#allocation148_spill] sm:$0xff] %v7041_v39  ;;  %v2142_v30 = vmul.f32 %v7041_v39, %v7041_v39  ;;  %v14075_v39 = vld [vmem:[#allocation108_spill] sm:$0xff] }
 0x290   :  { %v2029_v22 = vadd.f32 %v2005_v62, %v1839_v27  ;;  %v7032_v53 = vpop.permute.xlu1 %760  ;;  %14041 = vst [vmem:[#allocation139_spill] sm:$0xff] %v7035_v57  ;;  %v2104_v51 = vmul.f32 %v7035_v57, %v7035_v57  ;;  %14045 = vst [vmem:[#allocation149_spill] sm:$0xff] %v7050_v33  ;;  %v2143_v42 = vmul.f32 %v7050_v33, %v7050_v33  ;;  %v14076_v33 = vld [vmem:[#allocation84_spill] sm:$0xff] }
 0x291   :  { %v646_v27 = vmul.f32 %v14049_v60, %v14048_v47  ;;  %v785_v62 = vsel %vm766_vm2, %v14051_v50, %v14050_v0  ;;  %v14056_v50 = vld [vmem:[#allocation96_spill] sm:$0xff] }
 0x292   :  { %v7038_v58 = vadd.f32 %v14040_v21, %v2029_v22  ;;  %v2146_v43 = vadd.f32 %v2143_v42, %v2142_v30  ;;  %v647_v42 = vmul.f32 %v6731_v15, %v14048_v47  ;;  %v14055_v21 = vld [vmem:[#allocation46_spill] sm:$0xff] }
 0x293   :  { %v670_v22 = vmul.f32 %v646_v27, %v595_v36  ;;  %v502_v40 = vmul.f32 %v14055_v21, %v14054_v5  ;;  %v779_v36 = vsel %vm766_vm2, %v14050_v0, %v14056_v50  ;;  %v14058_v47 = vld [vmem:[#allocation70_spill] sm:$0xff]  ;;  %v14062_v50 = vld [vmem:[#allocation40_spill] sm:$0xff] }
 0x294   :  { %14042 = vst [vmem:[#allocation17_spill] sm:$0xff] %v7038_v58  ;;  %v7043_v63 = vpop.permute.xlu1 %926  ;;  %v2105_v59 = vmul.f32 %v7038_v58, %v7038_v58  ;;  %v975_v5 = vsel %vm956_vm3, %v14059_v2, %v14058_v47  ;;  %v1349_v2 = vsel %vm1336_vm5, %v14065_v13, %v14064_v3  ;;  %v14078_v58 = vld [vmem:[#allocation82_spill] sm:$0xff] }
 0x295   :  { %v694_v57 = vadd.f32 %v670_v22, %v502_v40 }
 0x296   :  { %v2109_v37 = vadd.f32 %v2105_v59, %v2104_v51  ;;  %v14052_v51 = vld [vmem:[#allocation24_spill] sm:$0xff] }
 0x297   :  { %v836_v59 = vmul.f32 %v6742_v10, %v14052_v51  ;;  %v837_v54 = vmul.f32 %v6738_v14, %v14052_v51 }
 0x298   :  { %2110 = vadd.xlane.f32.xlu1 %v2109_v37  ;;  %v7054_v48 = vpop.permute.xlu1 %950  ;;  %v14053_v37 = vld [vmem:[#allocation92_spill] sm:$0xff] }
 0x299   :  { %v589_v30 = vsel %vm576_vm1, %v14046_v49, %v14053_v37  ;;  %v860_v45 = vmul.f32 %v836_v59, %v785_v62  ;;  %v14057_v49 = vld [vmem:[#allocation51_spill] sm:$0xff]  ;;  %v14061_v59 = vld [vmem:[#allocation102_spill] sm:$0xff]  ;;  %v861_v40 = vmul.f32 %v837_v54, %v779_v36  ;;  %v1406_v54 = vmul.f32 %v6704_v41, %v14066_v61  ;;  %v14068_v36 = vld [vmem:[#allocation100_spill] sm:$0xff] }
 0x29a   :  { %v671_v27 = vmul.f32 %v647_v42, %v589_v30  ;;  %v1026_v37 = vmul.f32 %v6763_v23, %v14057_v49  ;;  %v14060_v62 = vld [vmem:[#allocation75_spill] sm:$0xff]  ;;  %v503_v30 = vmul.f32 %v14055_v21, %v14062_v50  ;;  %v1027_v56 = vmul.f32 %v6759_v20, %v14057_v49  ;;  %v14069_v21 = vld [vmem:[#allocation106_spill] sm:$0xff]  ;;  %v14072_v49 = vld [vmem:[#allocation136_spill] sm:$0xff] }
 0x29b   :  { %v1165_v0 = vsel %vm1146_vm4, %v14061_v59, %v14060_v62  ;;  %v884_v22 = vadd.f32 %v860_v45, %v694_v57  ;;  %v14063_v42 = vld [vmem:[#allocation55_spill] sm:$0xff]  ;;  %v14067_v45 = vld [vmem:[#allocation72_spill] sm:$0xff]  ;;  %v1159_v13 = vsel %vm1146_vm4, %v14060_v62, %v14068_v36 }
 0x29c   :  { %2147 = vadd.xlane.f32.xlu1 %v2146_v43  ;;  %v7068_v44 = vpop.permute.xlu1 %1116  ;;  %v1216_v51 = vmul.f32 %v6700_v25, %v14063_v42  ;;  %v1050_v18 = vmul.f32 %v1026_v37, %v975_v5  ;;  %v695_v59 = vadd.f32 %v671_v27, %v503_v30  ;;  %v969_v57 = vsel %vm956_vm3, %v14058_v47, %v14067_v45  ;;  %v14070_v37 = vld [vmem:[#allocation79_spill] sm:$0xff]  ;;  %v14074_v62 = vld [vmem:[#allocation32_spill] sm:$0xff] }
 0x29d   :  { %v1217_v50 = vmul.f32 %v6696_v16, %v14063_v42  ;;  %v14071_v30 = vld [vmem:[#allocation59_spill] sm:$0xff]  ;;  %v1407_v47 = vmul.f32 %v14008_v24, %v14066_v61  ;;  %v14073_v42 = vld [vmem:[#allocation78_spill] sm:$0xff]  ;;  %v1786_v36 = vmul.f32 %v6793_v35, %v14074_v62 }
 0x29e   :  { %v1240_v4 = vmul.f32 %v1216_v51, %v1165_v0  ;;  %v1539_v51 = vsel %vm1526_vm6, %v14070_v37, %v14069_v21  ;;  %v885_v27 = vadd.f32 %v861_v40, %v695_v59  ;;  %v1074_v5 = vadd.f32 %v1050_v18, %v884_v22  ;;  %v14077_v37 = vld [vmem:[#allocation137_spill] sm:$0xff] }
 0x29f   :  { %v1430_v0 = vmul.f32 %v1406_v54, %v1349_v2  ;;  %v1596_v17 = vmul.f32 %v14072_v49, %v14071_v30  ;;  %v1343_v45 = vsel %vm1336_vm5, %v14064_v3, %v14073_v42  ;;  %v1729_v18 = vsel %vm1716_vm7, %v14076_v33, %v14075_v39 }
 0x2a0   :  { %v7084_v43 = vpop.permute.xlu1 %1140  ;;  %v1051_v59 = vmul.f32 %v1027_v56, %v969_v57  ;;  %v1241_v40 = vmul.f32 %v1217_v50, %v1159_v13  ;;  %v1264_v22 = vadd.f32 %v1240_v4, %v1074_v5  ;;  %v1597_v61 = vmul.f32 %v14077_v37, %v14071_v30  ;;  %v14080_v57 = vld [vmem:[#allocation64_spill] sm:$0xff] }
 0x2a1   :  { %v1620_v54 = vmul.f32 %v1596_v17, %v1539_v51  ;;  %v1533_v3 = vsel %vm1526_vm6, %v14069_v21, %v14078_v58  ;;  %v1431_v55 = vmul.f32 %v1407_v47, %v1343_v45  ;;  %v1810_v35 = vmul.f32 %v1786_v36, %v1729_v18  ;;  %v14081_v21 = vld [vmem:[#allocation44_spill] sm:$0xff]  ;;  %v14082_v45 = vld [vmem:[#allocation89_spill] sm:$0xff] }
 0x2a2   :  { %v1075_v42 = vadd.f32 %v1051_v59, %v885_v27  ;;  %v1454_v6 = vadd.f32 %v1430_v0, %v1264_v22  ;;  %v1787_v33 = vmul.f32 %v6797_v32, %v14074_v62  ;;  %v1723_v13 = vsel %vm1716_vm7, %v14075_v39, %v14079_v11 }
 0x2a3   :  { %v1621_v17 = vmul.f32 %v1597_v61, %v1533_v3  ;;  %v1976_v50 = vmul.f32 %v6959_v29, %v14080_v57  ;;  %v1977_v61 = vmul.f32 %v6969_v1, %v14080_v57  ;;  %v782_v11 = vsel %vm766_vm2, %v6830_v26, %v7027_v9 }
 0x2a4   :  { %v7108_v7 = vpop.permute.xlu1 %1306  ;;  %v1265_v4 = vadd.f32 %v1241_v40, %v1075_v42  ;;  %v1644_v56 = vadd.f32 %v1620_v54, %v1454_v6  ;;  %v1811_v5 = vmul.f32 %v1787_v33, %v1723_v13  ;;  %v14084_v42 = vld [vmem:[#allocation65_spill] sm:$0xff]  ;;  %v788_v62 = vsel %vm766_vm2, %v7032_v53, %v6830_v26 }
 0x2a5   :  { %v14086_v33 = vld [vmem:[#allocation69_spill] sm:$0xff] }
 0x2a6   :  { %v1455_v27 = vadd.f32 %v1431_v55, %v1265_v4  ;;  %v1834_v0 = vadd.f32 %v1810_v35, %v1644_v56  ;;  %v14085_v35 = vld [vmem:[#allocation42_spill] sm:$0xff] }
 0x2a8   :  { %v7140_v2 = vpop.permute.xlu1 %1686  ;;  %v1645_v18 = vadd.f32 %v1621_v17, %v1455_v27  ;;  %v94_v17 = vld [vmem:[%s13214_s5 + $0x20] sm:$0xff] }
 0x2aa   :  { %v1835_v40 = vadd.f32 %v1811_v5, %v1645_v18  ;;  %v14088_v5 = vmov 4   ;;  %v14090_v18 = vld [vmem:[#allocation47_spill] sm:$0xff] }
 0x2ac   :  { %v1871_v51 = vpop.permute.xlu1 %1870 }
 0x2ad   :  { %1122 = vrot.lane.b32.xlu1 %v14081_v21, %s5716_s0  ;;  %v1919_v36 = vsel %vm1906_vm8, %v14082_v45, %v1871_v51  ;;  %v14101_v45 = vld [vmem:[#allocation34_spill] sm:$0xff] }
 0x2ae   :  { %v2000_v47 = vmul.f32 %v1976_v50, %v1919_v36  ;;  %v7187_v50 = vpop.f32.mrb[8].mxu0  ;;  %v658_v57 = vmul.f32 %v14049_v60, %v14101_v45  ;;  %v14103_v60 = vmov 5  }
 0x2af   :  { %v7191_v36 = vpop.f32.mrb[9].mxu0 }
 0x2b0   :  { %v2024_v39 = vadd.f32 %v2000_v47, %v1834_v0  ;;  %v7163_v6 = vpop.permute.xlu1 %1882  ;;  %v7205_v0 = vld [vmem:[%s13215_s6 + $0x20] sm:$0xff]  ;;  %v14089_v47 = vmov 1  }
 0x2b1   :  { %14083 = vst [vmem:[#allocation151_spill] sm:$0xff] %v7163_v6  ;;  %1708 = vrot.lane.b32.xlu1 %v14084_v42, %s5719_s1  ;;  %v1913_v59 = vsel %vm1906_vm8, %v1871_v51, %v7163_v6  ;;  %v7189_v51 = vpop.f32.mrb[8].mxu1  ;;  %v659_v6 = vmul.f32 %v6731_v15, %v14101_v45 }
 0x2b2   :  { %v2001_v22 = vmul.f32 %v1977_v61, %v1913_v59  ;;  %v7173_v54 = vadd.f32 %v14086_v33, %v2024_v39  ;;  %14087 = vst [vmem:[#allocation111_spill] sm:$0xff] %v7189_v51  ;;  %v7193_v27 = vpop.f32.mrb[9].mxu1  ;;  %v7215_v39 = vld [vmem:[%s13215_s6 + $0x28] sm:$0xff]  ;;  %v14092_v59 = vmov 2  }
 0x2b3   :  { %v14091_v61 = vld [vmem:[#allocation90_spill] sm:$0xff] }
 0x2b4   :  { %v2025_v55 = vadd.f32 %v2001_v22, %v1835_v40  ;;  %v2102_v13 = vmul.f32 %v7173_v54, %v7173_v54  ;;  %v14093_v40 = vld [vmem:[#allocation53_spill] sm:$0xff]  ;;  %v7224_v22 = vpop.permute.xlu0 %2122 }
 0x2b5   :  { %1324 = vrot.lane.b32.xlu1 %v14085_v35, %s5717_s20  ;;  %14094 = vst [vmem:[#allocation129_spill] sm:$0xff] %v7224_v22  ;;  %v14112_v22 = vld [vmem:[#allocation156_spill] sm:$0xff] }
 0x2b6   :  { %v7176_v3 = vadd.f32 %v14086_v33, %v2025_v55  ;;  %v14095_v55 = vmov 3  }
 0x2b8   :  { %v2103_v4 = vmul.f32 %v7176_v3, %v7176_v3 }
 0x2b9   :  { %1898 = vrot.lane.b32.xlu1 %v14084_v42, %s5720_s22  ;;  %v7282_v42 = vpop.permute.xlu0 %554 }
 0x2ba   :  { %v2106_v56 = vadd.f32 %v2103_v4, %v2102_v13  ;;  %v7229_v13 = vpop.f32.mrb[10].mxu0  ;;  %v7231_v4 = vpop.f32.mrb[10].mxu1  ;;  %14108 = vst [vmem:[#allocation39_spill] sm:$0xff] %v7282_v42 }
 0x2bb   :  { %14096 = vst [vmem:[#allocation150_spill] sm:$0xff] %v7229_v13  ;;  %14097 = vst [vmem:[#allocation153_spill] sm:$0xff] %v7231_v4 }
 0x2bc   :  { %2107 = vadd.xlane.f32.xlu0 %v2106_v56  ;;  %v7237_v56 = vpop.f32.mrb[11].mxu0 }
 0x2bd   :  { %313 = vperm.xlu1 %5531, %v94_v17   ;;  %v95_v17 = vld [vmem:[%s13214_s5 + $0x28] sm:$0xff]  ;;  %14098 = vst [vmem:[#allocation71_spill] sm:$0xff] %v7237_v56 }
 0x2c1   :  { %1514 = vrot.lane.b32.xlu1 %v14085_v35, %s5718_s21 }
 0x2c2   :  { %5532 = vset.pattern.permute.xlu1 %v14088_v5  ;;  %v14100_v5 = vld [vmem:[#allocation138_spill] sm:$0xff] }
 0x2c3   :  { %v592_v33 = vsel %vm576_vm1, %v14100_v5, %v6914_v31  ;;  %v598_v4 = vsel %vm576_vm1, %v6943_v19, %v14100_v5  ;;  %v14102_v5 = vld [vmem:[#allocation23_spill] sm:$0xff] }
 0x2c4   :  { %v683_v58 = vmul.f32 %v659_v6, %v592_v33  ;;  %v682_v30 = vmul.f32 %v658_v57, %v598_v4  ;;  %v849_v51 = vmul.f32 %v6738_v14, %v14102_v5  ;;  %v848_v15 = vmul.f32 %v6742_v10, %v14102_v5  ;;  %v14105_v6 = vld [vmem:[#allocation87_spill] sm:$0xff]  ;;  %v14106_v33 = vld [vmem:[#allocation36_spill] sm:$0xff] }
 0x2c5   :  { %1704 = vrot.lane.b32.xlu1 %v14085_v35, %s5719_s1  ;;  %v978_v57 = vsel %vm956_vm3, %v7054_v48, %v6867_v46  ;;  %v515_v4 = vmul.f32 %v14106_v33, %v14105_v6  ;;  %v1168_v6 = vsel %vm1146_vm4, %v7084_v43, %v6890_v28 }
 0x2c6   :  { %v872_v10 = vmul.f32 %v848_v15, %v788_v62 }
 0x2c7   :  { %v707_v15 = vadd.f32 %v683_v58, %v515_v4 }
 0x2c9   :  { %1894 = vrot.lane.b32.xlu1 %v14085_v35, %s5720_s22  ;;  %v14104_v35 = vld [vmem:[#allocation41_spill] sm:$0xff] }
 0x2ca   :  { %v1039_v21 = vmul.f32 %v6759_v20, %v14104_v35  ;;  %v1038_v26 = vmul.f32 %v6763_v23, %v14104_v35  ;;  %v873_v20 = vmul.f32 %v849_v51, %v782_v11  ;;  %v1162_v23 = vsel %vm1146_vm4, %v6890_v28, %v7068_v44 }
 0x2cb   :  { %v1346_v28 = vsel %vm1336_vm5, %v7108_v7, %v6945_v12 }
 0x2cc   :  { %v1062_v51 = vmul.f32 %v1038_v26, %v978_v57  ;;  %v897_v58 = vadd.f32 %v873_v20, %v707_v15  ;;  %v7311_v26 = vpop.permute.xlu1 %2127  ;;  %v1536_v20 = vsel %vm1526_vm6, %v6977_v52, %v14112_v22  ;;  %v14115_v15 = vld [vmem:[#allocation145_spill] sm:$0xff] }
 0x2cd   :  { %494 = vperm.xlu1 %5532, %v7205_v0   ;;  %14111 = vst [vmem:[#allocation70_spill] sm:$0xff] %v7311_v26 }
 0x2d1   :  { %5533 = vset.pattern.permute.xlu1 %v14089_v47  ;;  %v7239_v47 = vpop.f32.mrb[11].mxu1 }
 0x2d2   :  { %808 = vperm.xlu1 %5533, %v7205_v0   ;;  %1124 = vrot.lane.b32.xlu0 %v14090_v18, %s5716_s0  ;;  %14099 = vst [vmem:[#allocation73_spill] sm:$0xff] %v7239_v47  ;;  %v972_v18 = vsel %vm956_vm3, %v6867_v46, %v7043_v63  ;;  %v14109_v47 = vld [vmem:[#allocation25_spill] sm:$0xff] }
 0x2d3   :  { %v1229_v56 = vmul.f32 %v6696_v16, %v14109_v47  ;;  %v1228_v46 = vmul.f32 %v6700_v25, %v14109_v47  ;;  %v1063_v62 = vmul.f32 %v1039_v21, %v972_v18 }
 0x2d5   :  { %v1253_v21 = vmul.f32 %v1229_v56, %v1162_v23  ;;  %v1252_v18 = vmul.f32 %v1228_v46, %v1168_v6  ;;  %v1087_v57 = vadd.f32 %v1063_v62, %v897_v58  ;;  %v14114_v23 = vld [vmem:[#allocation54_spill] sm:$0xff]  ;;  %v1726_v6 = vsel %vm1716_vm7, %v7140_v2, %v7004_v8  ;;  %v7337_v62 = vpop.permute.xlu1 %556 }
 0x2d6   :  { %812 = vperm.xlu1 %5533, %v7215_v39   ;;  %1710 = vrot.lane.b32.xlu0 %v14091_v61, %s5719_s1  ;;  %v1608_v56 = vmul.f32 %v14072_v49, %v14114_v23  ;;  %v14131_v49 = vld [vmem:[#allocation149_spill] sm:$0xff] }
 0x2d7   :  { %v1277_v42 = vadd.f32 %v1253_v21, %v1087_v57 }
 0x2da   :  { %5535 = vset.pattern.permute.xlu1 %v14092_v59  ;;  %1326 = vrot.lane.b32.xlu0 %v14093_v40, %s5717_s20 }
 0x2db   :  { %1002 = vperm.xlu1 %5535, %v7215_v39  }
 0x2de   :  { %1900 = vrot.lane.b32.xlu0 %v14091_v61, %s5720_s22 }
 0x2df   :  { %5536 = vset.pattern.permute.xlu1 %v14095_v55 }
 0x2e0   :  { %1188 = vperm.xlu1 %5536, %v7205_v0  }
 0x2e2   :  { %318 = vperm.xlu0 %5530, %v95_v17   ;;  %v14107_v17 = vld [vmem:[#allocation77_spill] sm:$0xff] }
 0x2e3   :  { %v514_v14 = vmul.f32 %v14106_v33, %v14107_v17  ;;  %v14110_v17 = vld [vmem:[#allocation27_spill] sm:$0xff] }
 0x2e4   :  { %5539 = vset.pattern.permute.xlu1 %v14103_v60  ;;  %v1418_v16 = vmul.f32 %v6704_v41, %v14110_v17  ;;  %v1419_v25 = vmul.f32 %v14008_v24, %v14110_v17  ;;  %v7315_v41 = vpop.permute.xlu0 %748 }
 0x2e5   :  { %v706_v11 = vadd.f32 %v682_v30, %v514_v14  ;;  %v1352_v14 = vsel %vm1336_vm5, %v6916_v34, %v7108_v7  ;;  %v14113_v7 = vld [vmem:[#allocation152_spill] sm:$0xff] }
 0x2e6   :  { %1516 = vrot.lane.b32.xlu0 %v14093_v40, %s5718_s21  ;;  %v1443_v24 = vmul.f32 %v1419_v25, %v1346_v28  ;;  %v14116_v28 = vld [vmem:[#allocation56_spill] sm:$0xff] }
 0x2e7   :  { %5534 = vset.pattern.permute.xlu0 %v14092_v59  ;;  %v896_v30 = vadd.f32 %v872_v10, %v706_v11  ;;  %v1442_v59 = vmul.f32 %v1418_v16, %v1352_v14  ;;  %v1542_v10 = vsel %vm1526_vm6, %v14113_v7, %v6977_v52  ;;  %v1609_v16 = vmul.f32 %v14077_v37, %v14114_v23  ;;  %v14117_v14 = vld [vmem:[#allocation154_spill] sm:$0xff] }
 0x2e8   :  { %v1467_v46 = vadd.f32 %v1443_v24, %v1277_v42  ;;  %v1732_v11 = vsel %vm1716_vm7, %v14115_v15, %v7140_v2  ;;  %v1632_v52 = vmul.f32 %v1608_v56, %v1542_v10  ;;  %v1798_v58 = vmul.f32 %v14117_v14, %v14116_v28  ;;  %v1877_v42 = vpop.permute.xlu0 %1876  ;;  %v14119_v2 = vld [vmem:[#allocation157_spill] sm:$0xff] }
 0x2e9   :  { %v1086_v4 = vadd.f32 %v1062_v51, %v896_v30  ;;  %v1633_v51 = vmul.f32 %v1609_v16, %v1536_v20  ;;  %v1799_v24 = vmul.f32 %v6797_v32, %v14116_v28  ;;  %v14120_v20 = vld [vmem:[#allocation58_spill] sm:$0xff]  ;;  %v7353_v16 = vpop.permute.xlu1 %746 }
 0x2ea   :  { %1706 = vrot.lane.b32.xlu0 %v14093_v40, %s5719_s1  ;;  %v1822_v30 = vmul.f32 %v1798_v58, %v1732_v11  ;;  %v1988_v10 = vmul.f32 %v6959_v29, %v14120_v20  ;;  %v1989_v56 = vmul.f32 %v6969_v1, %v14120_v20 }
 0x2eb   :  { %v1276_v13 = vadd.f32 %v1252_v18, %v1086_v4  ;;  %v1823_v21 = vmul.f32 %v1799_v24, %v1726_v6  ;;  %v14118_v18 = vld [vmem:[#allocation158_spill] sm:$0xff]  ;;  %v1922_v4 = vsel %vm1906_vm8, %v14119_v2, %v1877_v42  ;;  %v14121_v24 = vld [vmem:[#allocation67_spill] sm:$0xff] }
 0x2ec   :  { %v1916_v57 = vsel %vm1906_vm8, %v1877_v42, %v14118_v18  ;;  %v2012_v11 = vmul.f32 %v1988_v10, %v1922_v4 }
 0x2ed   :  { %v1466_v25 = vadd.f32 %v1442_v59, %v1276_v13  ;;  %v1657_v13 = vadd.f32 %v1633_v51, %v1467_v46  ;;  %v2013_v6 = vmul.f32 %v1989_v56, %v1916_v57  ;;  %v7355_v58 = vpop.permute.xlu1 %936  ;;  %v939_v56 = vpop.permute.xlu0 %938 }
 0x2ef   :  { %v1656_v59 = vadd.f32 %v1632_v52, %v1466_v25  ;;  %v1847_v46 = vadd.f32 %v1823_v21, %v1657_v13 }
 0x2f1   :  { %v1846_v25 = vadd.f32 %v1822_v30, %v1656_v59  ;;  %v2037_v51 = vadd.f32 %v2013_v6, %v1847_v46  ;;  %v7363_v29 = vpop.permute.xlu1 %550 }
 0x2f2   :  { %14124 = vst [vmem:[#allocation104_spill] sm:$0xff] %v7363_v29 }
 0x2f3   :  { %v2036_v52 = vadd.f32 %v2012_v11, %v1846_v25  ;;  %v7361_v42 = vadd.f32 %v14121_v24, %v2037_v51 }
 0x2f5   :  { %v7358_v32 = vadd.f32 %v14121_v24, %v2036_v52  ;;  %14123 = vst [vmem:[#allocation40_spill] sm:$0xff] %v7361_v42  ;;  %v2145_v59 = vmul.f32 %v7361_v42, %v7361_v42  ;;  %v7369_v30 = vpop.permute.xlu1 %1126 }
 0x2f7   :  { %14122 = vst [vmem:[#allocation75_spill] sm:$0xff] %v7358_v32  ;;  %v2144_v1 = vmul.f32 %v7358_v32, %v7358_v32 }
 0x2f9   :  { %v2149_v13 = vadd.f32 %v2145_v59, %v2144_v1  ;;  %v7371_v21 = vpop.permute.xlu1 %742  ;;  %v7382_v1 = vpop.permute.xlu0 %552 }
 0x2fa   :  { %14125 = vst [vmem:[#allocation106_spill] sm:$0xff] %v7371_v21 }
 0x2fd   :  { %v7373_v57 = vpop.permute.xlu1 %1328  ;;  %v1129_v51 = vpop.permute.xlu0 %1128 }
 0x301   :  { %v7375_v4 = vpop.permute.xlu1 %932 }
 0x302   :  { %14126 = vst [vmem:[#allocation108_spill] sm:$0xff] %v7375_v4  ;;  %v14132_v4 = vld [vmem:[#allocation148_spill] sm:$0xff] }
 0x305   :  { %v7379_v10 = vpop.permute.xlu1 %1518 }
 0x309   :  { %2150 = vadd.xlane.f32.xlu0 %v2149_v13 }
 0x31f   :  { %1896 = vrot.lane.b32.xlu0 %v14093_v40, %s5720_s22 }
 0x323   :  { %998 = vperm.xlu0 %5534, %v7205_v0  }
 0x325   :  { %v2111_v25 = vpop.xlane.xlu1 %2110 }
 0x326   :  { %v2113_v46 = vmax.f32 %v2111_v25, 1e-24  ;;  %v14129_v25 = vld [vmem:[#allocation17_spill] sm:$0xff] }
 0x327   :  { %5537 = vset.pattern.permute.xlu0 %v14095_v55 }
 0x328   :  { %5597 = vrsqrt.f32 %v2113_v46  ;;  %1192 = vperm.xlu0 %5537, %v7215_v39   ;;  %v7395_v46 = vpop.permute.xlu0 %744 }
 0x329   :  { %v2148_v11 = vpop.xlane.xlu1 %2147 }
 0x32a   :  { %v2152_v6 = vmax.f32 %v2148_v11, 1e-24 }
 0x32c   :  { %5599 = vrsqrt.f32 %v2152_v6  ;;  %5538 = vset.pattern.permute.xlu0 %v14103_v60  ;;  %v1331_v32 = vpop.permute.xlu0 %1330 }
 0x32d   :  { %v7386_v52 = vpop.permute.xlu1 %1122 }
 0x32e   :  { %14127 = vst [vmem:[#allocation90_spill] sm:$0xff] %v7386_v52 }
 0x331   :  { %v7389_v59 = vpop.permute.xlu1 %1708 }
 0x332   :  { %v7391_v13 = vpop.eup %5597 }
 0x333   :  { %14128 = vst [vmem:[#allocation53_spill] sm:$0xff] %v7391_v13  ;;  %v2119_v37 = vmul.f32 %v7391_v13, %v14129_v25  ;;  %v14155_v13 = vld [vmem:[#allocation129_spill] sm:$0xff] }
 0x335   :  { %v7397_v55 = vpop.permute.xlu1 %1324  ;;  %v2133_v14 = vmul.f32 %v7311_v26, %v2119_v37  ;;  %v580_v37 = vsel %vm576_vm1, %v7337_v62, %v6943_v19  ;;  %v7426_v19 = vpop.permute.xlu0 %934 }
 0x336   :  { %14130 = vst [vmem:[#allocation138_spill] sm:$0xff] %v7397_v55  ;;  %v5600_v11 = vpop.eup %5599 }
 0x337   :  { %v5465_v6 = vpack.c.bf16 %v2133_v14, %v2133_v14  ;;  %v2157_v52 = vmul.f32 %v5600_v11, %v14131_v49  ;;  %v2156_v60 = vmul.f32 %v5600_v11, %v14132_v4  ;;  %v586_v49 = vsel %vm576_vm1, %v6914_v31, %v7337_v62  ;;  %v14136_v4 = vld [vmem:[#allocation6_spill] sm:$0xff]  ;;  %v14138_v62 = vld [vmem:[#allocation80_spill] sm:$0xff] }
 0x338   :  { %v516_v11 = vmul.f32 %v14106_v33, %v14138_v62 }
 0x339   :  { %2264 = vmatprep.mubr.bf16.mxu1 %v5465_v6  ;;  %v7402_v21 = vpop.permute.xlu1 %1898  ;;  %v5463_v29 = vpack.c.bf16 %v2157_v52, %v2157_v52  ;;  %v5462_v42 = vpack.c.bf16 %v2156_v60, %v2156_v60  ;;  %v14135_v60 = vld [vmem:[#allocation5_spill] sm:$0xff]  ;;  %v661_v52 = vmul.f32 %v14136_v4, %v14101_v45  ;;  %v770_v6 = vsel %vm766_vm2, %v7315_v41, %v7032_v53  ;;  %v1521_v62 = vpop.permute.xlu0 %1520 }
 0x33a   :  { %v960_v53 = vsel %vm956_vm3, %v939_v56, %v7054_v48  ;;  %v14143_v48 = vld [vmem:[#allocation9_spill] sm:$0xff] }
 0x33b   :  { %2184 = vmatprep.subr.bf16.mxu0 %v5463_v29 }
 0x33c   :  { %2185 = vmatpush1.bf16.xpose.msra.mxu0 %v5462_v42  ;;  %v660_v42 = vmul.f32 %v14135_v60, %v14101_v45  ;;  %v517_v45 = vmul.f32 %v14106_v33, %v14091_v61 }
 0x33d   :  { %v7404_v25 = vpop.permute.xlu1 %313 }
 0x33e   :  { %14133 = vst [vmem:[#allocation34_spill] sm:$0xff] %v7404_v25  ;;  %v7416_v14 = vadd.f32 %v7187_v50, %v7404_v25  ;;  %v7420_v29 = vadd.f32 %v7191_v36, %v7404_v25  ;;  %v684_v31 = vmul.f32 %v660_v42, %v586_v49  ;;  %v685_v50 = vmul.f32 %v661_v52, %v580_v37  ;;  %v14140_v42 = vld [vmem:[#allocation8_spill] sm:$0xff] }
 0x33f   :  { %v7434_v36 = vadd.f32 %v7193_v27, %v7404_v25  ;;  %v776_v37 = vsel %vm766_vm2, %v7027_v9, %v7315_v41  ;;  %v14139_v27 = vld [vmem:[#allocation7_spill] sm:$0xff]  ;;  %v851_v52 = vmul.f32 %v14140_v42, %v14102_v5  ;;  %v966_v41 = vsel %vm956_vm3, %v7043_v63, %v939_v56  ;;  %v14141_v9 = vld [vmem:[#allocation20_spill] sm:$0xff] }
 0x340   :  { %14134 = vst [vmem:[#allocation23_spill] sm:$0xff] %v7420_v29  ;;  %534 = vrot.lane.b32.xlu1 %v7416_v14, %s5714_s28  ;;  %546 = vrot.lane.b32.xlu0 %v7420_v29, %s5714_s28  ;;  %v850_v49 = vmul.f32 %v14139_v27, %v14102_v5  ;;  %v708_v61 = vadd.f32 %v684_v31, %v516_v11  ;;  %v14142_v5 = vld [vmem:[#allocation21_spill] sm:$0xff]  ;;  %v14144_v29 = vmov 6  }
 0x341   :  { %14137 = vst [vmem:[#allocation41_spill] sm:$0xff] %v7434_v36  ;;  %v709_v33 = vadd.f32 %v685_v50, %v517_v45  ;;  %v875_v55 = vmul.f32 %v851_v52, %v770_v6  ;;  %v1040_v26 = vmul.f32 %v14141_v9, %v14104_v35  ;;  %v1041_v31 = vmul.f32 %v14142_v5, %v14104_v35  ;;  %v14145_v35 = vld [vmem:[#allocation10_spill] sm:$0xff] }
 0x342   :  { %v874_v25 = vmul.f32 %v850_v49, %v776_v37  ;;  %v1230_v52 = vmul.f32 %v14143_v48, %v14109_v47  ;;  %v1150_v63 = vsel %vm1146_vm4, %v1129_v51, %v7084_v43  ;;  %v1156_v56 = vsel %vm1146_vm4, %v7068_v44, %v1129_v51  ;;  %v14146_v51 = vld [vmem:[#allocation11_spill] sm:$0xff] }
 0x343   :  { %v899_v11 = vadd.f32 %v875_v55, %v709_v33  ;;  %v1064_v6 = vmul.f32 %v1040_v26, %v966_v41  ;;  %v1065_v37 = vmul.f32 %v1041_v31, %v960_v53  ;;  %v1231_v55 = vmul.f32 %v14145_v35, %v14109_v47  ;;  %v14147_v47 = vld [vmem:[#allocation12_spill] sm:$0xff] }
 0x344   :  { %570 = vrot.lane.b32.xlu0 %v7434_v36, %s5714_s28  ;;  %v898_v50 = vadd.f32 %v874_v25, %v708_v61  ;;  %v1254_v33 = vmul.f32 %v1230_v52, %v1156_v56  ;;  %v1340_v43 = vsel %vm1336_vm5, %v6945_v12, %v1331_v32  ;;  %v1358_v44 = vsel %vm1336_vm5, %v1331_v32, %v6916_v34  ;;  %v14149_v12 = vld [vmem:[#allocation14_spill] sm:$0xff] }
 0x345   :  { %v1089_v26 = vadd.f32 %v1065_v37, %v899_v11  ;;  %v1255_v53 = vmul.f32 %v1231_v55, %v1150_v63  ;;  %v1420_v41 = vmul.f32 %v14146_v51, %v14110_v17  ;;  %v1421_v31 = vmul.f32 %v14147_v47, %v14110_v17 }
 0x346   :  { %v1088_v25 = vadd.f32 %v1064_v6, %v898_v50  ;;  %v1611_v63 = vmul.f32 %v14149_v12, %v14114_v23  ;;  %v1530_v32 = vsel %vm1526_vm6, %v14112_v22, %v1521_v62  ;;  %v1548_v34 = vsel %vm1526_vm6, %v1521_v62, %v14113_v7 }
 0x347   :  { %v1279_v11 = vadd.f32 %v1255_v53, %v1089_v26  ;;  %v1444_v6 = vmul.f32 %v1420_v41, %v1340_v43  ;;  %v1445_v37 = vmul.f32 %v1421_v31, %v1358_v44 }
 0x348   :  { %1378 = vperm.xlu0 %5538, %v7205_v0   ;;  %v1278_v50 = vadd.f32 %v1254_v33, %v1088_v25  ;;  %v14151_v33 = vld [vmem:[#allocation16_spill] sm:$0xff]  ;;  %v1635_v62 = vmul.f32 %v1611_v63, %v1548_v34 }
 0x349   :  { %v2108_v45 = vpop.xlane.xlu0 %2107  ;;  %v1469_v25 = vadd.f32 %v1445_v37, %v1279_v11  ;;  %v1801_v22 = vmul.f32 %v14151_v33, %v14116_v28  ;;  %v14153_v11 = vld [vmem:[#allocation18_spill] sm:$0xff] }
 0x34a   :  { %v2112_v49 = vmax.f32 %v2108_v45, 1e-24  ;;  %v1468_v55 = vadd.f32 %v1444_v6, %v1278_v50  ;;  %v14154_v6 = vld [vmem:[#allocation19_spill] sm:$0xff] }
 0x34b   :  { %v1659_v50 = vadd.f32 %v1635_v62, %v1469_v25  ;;  %v1991_v37 = vmul.f32 %v14154_v6, %v14120_v20 }
 0x34c   :  { %5541 = vset.pattern.permute.xlu0 %v14144_v29  ;;  %5601 = vrsqrt.f32 %v2112_v49  ;;  %v14148_v49 = vld [vmem:[#allocation13_spill] sm:$0xff] }
 0x34d   :  { %v7476_v61 = vpop.permute.xlu0 %1124  ;;  %v1610_v52 = vmul.f32 %v14148_v49, %v14114_v23  ;;  %v14150_v23 = vld [vmem:[#allocation15_spill] sm:$0xff] }
 0x34e   :  { %v1800_v26 = vmul.f32 %v14150_v23, %v14116_v28 }
 0x34f   :  { %v1634_v7 = vmul.f32 %v1610_v52, %v1530_v32 }
 0x351   :  { %v1711_v45 = vpop.permute.xlu0 %1710 }
 0x352   :  { %v1720_v17 = vsel %vm1716_vm7, %v7004_v8, %v1711_v45  ;;  %v1738_v56 = vsel %vm1716_vm7, %v1711_v45, %v14115_v15  ;;  %v1658_v15 = vadd.f32 %v1634_v7, %v1468_v55  ;;  %v1990_v45 = vmul.f32 %v14153_v11, %v14120_v20  ;;  %v14159_v7 = vld [vmem:[#allocation150_spill] sm:$0xff] }
 0x353   :  { %v1824_v44 = vmul.f32 %v1800_v26, %v1720_v17  ;;  %v1825_v41 = vmul.f32 %v1801_v22, %v1738_v56 }
 0x355   :  { %v7508_v53 = vpop.permute.xlu0 %1326  ;;  %v1848_v63 = vadd.f32 %v1824_v44, %v1658_v15  ;;  %v1849_v32 = vadd.f32 %v1825_v41, %v1659_v50  ;;  %v14163_v15 = vld [vmem:[#allocation130_spill] sm:$0xff]  ;;  %v14164_v50 = vld [vmem:[#allocation39_spill] sm:$0xff] }
 0x356   :  { %14152 = vst [vmem:[#allocation87_spill] sm:$0xff] %v7508_v53  ;;  %v5602_v43 = vpop.eup %5601 }
 0x357   :  { %v2116_v8 = vmul.f32 %v5602_v43, %v7173_v54  ;;  %v2117_v31 = vmul.f32 %v5602_v43, %v7176_v3  ;;  %v14158_v43 = vmov 0  }
 0x359   :  { %v1901_v28 = vpop.permute.xlu0 %1900  ;;  %v2131_v53 = vmul.f32 %v14155_v13, %v2117_v31  ;;  %v2130_v52 = vmul.f32 %v14155_v13, %v2116_v8  ;;  %v14161_v8 = vld [vmem:[#allocation73_spill] sm:$0xff] }
 0x35a   :  { %v1910_v54 = vsel %vm1906_vm8, %v14118_v18, %v1901_v28  ;;  %v1928_v3 = vsel %vm1906_vm8, %v1901_v28, %v14119_v2 }
 0x35b   :  { %v2014_v34 = vmul.f32 %v1990_v45, %v1910_v54  ;;  %v2015_v17 = vmul.f32 %v1991_v37, %v1928_v3  ;;  %v5461_v56 = vpack.c.bf16 %v2131_v53, %v2131_v53  ;;  %v5460_v55 = vpack.c.bf16 %v2130_v52, %v2130_v52  ;;  %v14165_v37 = vld [vmem:[#allocation128_spill] sm:$0xff]  ;;  %v14166_v52 = vld [vmem:[#allocation61_spill] sm:$0xff] }
 0x35c   :  { %v579_v45 = vsel %vm576_vm1, %v14164_v50, %v14163_v15  ;;  %v585_v28 = vsel %vm576_vm1, %v14165_v37, %v14164_v50  ;;  %v14167_v54 = vld [vmem:[#allocation117_spill] sm:$0xff]  ;;  %v14173_v50 = vld [vmem:[#allocation60_spill] sm:$0xff] }
 0x35d   :  { %v2038_v20 = vadd.f32 %v2014_v34, %v1848_v63  ;;  %v2039_v25 = vadd.f32 %v2015_v17, %v1849_v32  ;;  %2216 = vmatprep.mubr.bf16.mxu0 %v5461_v56  ;;  %v656_v63 = vmul.f32 %v14135_v60, %v14166_v52  ;;  %v657_v32 = vmul.f32 %v14136_v4, %v14166_v52  ;;  %v14168_v34 = vld [vmem:[#allocation115_spill] sm:$0xff] }
 0x35e   :  { %2217 = vmatmul.mubr.bf16.vlgmr.msra.gmra.mrb[12].mxu0 %v5460_v55  ;;  %v769_v3 = vsel %vm766_vm2, %v7353_v16, %v14167_v54  ;;  %v775_v17 = vsel %vm766_vm2, %v14168_v34, %v7353_v16  ;;  %v14176_v54 = vld [vmem:[#allocation45_spill] sm:$0xff] }
 0x35f   :  { %v7525_v26 = vadd.f32 %v14121_v24, %v2038_v20  ;;  %v7528_v22 = vadd.f32 %v14121_v24, %v2039_v25  ;;  %2341 = vmatprep.mubr.bf16.mxu0 %v14158_v43  ;;  %v14160_v24 = vld [vmem:[#allocation71_spill] sm:$0xff]  ;;  %v680_v56 = vmul.f32 %v656_v63, %v585_v28  ;;  %v681_v55 = vmul.f32 %v657_v32, %v579_v45  ;;  %v14169_v20 = vld [vmem:[#allocation37_spill] sm:$0xff]  ;;  %v14174_v45 = vld [vmem:[#allocation22_spill] sm:$0xff] }
 0x360   :  { %v846_v25 = vmul.f32 %v14139_v27, %v14169_v20  ;;  %v512_v37 = vmul.f32 %v14174_v45, %v14173_v50  ;;  %v14175_v28 = vld [vmem:[#allocation65_spill] sm:$0xff]  ;;  %v1226_v34 = vmul.f32 %v14143_v48, %v14176_v54 }
 0x361   :  { %14156 = vst [vmem:[#allocation36_spill] sm:$0xff] %v7525_v26  ;;  %14157 = vst [vmem:[#allocation77_spill] sm:$0xff] %v7528_v22  ;;  %v7531_v18 = vpop.permute.xlu0 %318  ;;  %v2434_v2 = vmul.f32 %v7525_v26, %v7525_v26  ;;  %v2435_v53 = vmul.f32 %v7528_v22, %v7528_v22  ;;  %v513_v52 = vmul.f32 %v14174_v45, %v14175_v28  ;;  %v14209_v26 = vld [vmem:[#allocation75_spill] sm:$0xff] }
 0x362   :  { %v7539_v62 = vadd.f32 %v14159_v7, %v7531_v18  ;;  %v7545_v41 = vadd.f32 %v14160_v24, %v7531_v18  ;;  %v7551_v31 = vadd.f32 %v14161_v8, %v7531_v18  ;;  %v14171_v24 = vld [vmem:[#allocation121_spill] sm:$0xff]  ;;  %v14172_v8 = vld [vmem:[#allocation119_spill] sm:$0xff]  ;;  %v870_v63 = vmul.f32 %v846_v25, %v775_v17  ;;  %v14179_v25 = vld [vmem:[#allocation50_spill] sm:$0xff] }
 0x363   :  { %v2439_v44 = vadd.f32 %v2435_v53, %v2434_v2  ;;  %v847_v2 = vmul.f32 %v14140_v42, %v14169_v20  ;;  %v14170_v53 = vld [vmem:[#allocation38_spill] sm:$0xff]  ;;  %v959_v16 = vsel %vm956_vm3, %v7355_v58, %v14171_v24  ;;  %v965_v15 = vsel %vm956_vm3, %v14172_v8, %v7355_v58  ;;  %v14178_v58 = vld [vmem:[#allocation123_spill] sm:$0xff] }
 0x364   :  { %536 = vrot.lane.b32.xlu1 %v7539_v62, %s5714_s28  ;;  %14162 = vst [vmem:[#allocation25_spill] sm:$0xff] %v7551_v31  ;;  %v1036_v7 = vmul.f32 %v14141_v9, %v14170_v53  ;;  %v1227_v20 = vmul.f32 %v14145_v35, %v14176_v54  ;;  %v1155_v8 = vsel %vm1146_vm4, %v14178_v58, %v7369_v30  ;;  %v14180_v54 = vld [vmem:[#allocation113_spill] sm:$0xff] }
 0x365   :  { %v871_v32 = vmul.f32 %v847_v2, %v769_v3  ;;  %v704_v50 = vadd.f32 %v680_v56, %v512_v37  ;;  %v705_v45 = vadd.f32 %v681_v55, %v513_v52  ;;  %v1416_v2 = vmul.f32 %v14146_v51, %v14179_v25  ;;  %v14183_v52 = vld [vmem:[#allocation120_spill] sm:$0xff] }
 0x366   :  { %v1060_v17 = vmul.f32 %v1036_v7, %v965_v15  ;;  %v1417_v28 = vmul.f32 %v14147_v47, %v14179_v25  ;;  %v1250_v7 = vmul.f32 %v1226_v34, %v1155_v8  ;;  %v1529_v58 = vsel %vm1526_vm6, %v14183_v52, %v7379_v10  ;;  %v14184_v25 = vld [vmem:[#allocation118_spill] sm:$0xff]  ;;  %v14190_v52 = vld [vmem:[#allocation124_spill] sm:$0xff] }
 0x367   :  { %2440 = vadd.xlane.f32.xlu0 %v2439_v44  ;;  %v1037_v44 = vmul.f32 %v14142_v5, %v14170_v53  ;;  %v14177_v53 = vld [vmem:[#allocation125_spill] sm:$0xff]  ;;  %v894_v56 = vadd.f32 %v870_v63, %v704_v50  ;;  %v895_v55 = vadd.f32 %v871_v32, %v705_v45  ;;  %v14186_v50 = vld [vmem:[#allocation114_spill] sm:$0xff] }
 0x368   :  { %548 = vrot.lane.b32.xlu1 %v7545_v41, %s5714_s28  ;;  %v1149_v24 = vsel %vm1146_vm4, %v7369_v30, %v14177_v53  ;;  %v1339_v53 = vsel %vm1336_vm5, %v14180_v54, %v7373_v57  ;;  %v1719_v45 = vsel %vm1716_vm7, %v14186_v50, %v7389_v59  ;;  %v14187_v54 = vld [vmem:[#allocation122_spill] sm:$0xff] }
 0x369   :  { %v1061_v3 = vmul.f32 %v1037_v44, %v959_v16  ;;  %v1251_v44 = vmul.f32 %v1227_v20, %v1149_v24  ;;  %v14182_v16 = vld [vmem:[#allocation29_spill] sm:$0xff]  ;;  %v1440_v32 = vmul.f32 %v1416_v2, %v1339_v53  ;;  %v14185_v20 = vld [vmem:[#allocation31_spill] sm:$0xff] }
 0x36a   :  { %v1606_v15 = vmul.f32 %v14148_v49, %v14182_v16  ;;  %v1607_v37 = vmul.f32 %v14149_v12, %v14182_v16  ;;  %v1796_v24 = vmul.f32 %v14150_v23, %v14185_v20  ;;  %v1797_v8 = vmul.f32 %v14151_v33, %v14185_v20  ;;  %v14188_v53 = vld [vmem:[#allocation33_spill] sm:$0xff] }
 0x36b   :  { %v1085_v63 = vadd.f32 %v1061_v3, %v895_v55  ;;  %v14189_v55 = vld [vmem:[#allocation126_spill] sm:$0xff] }
 0x36c   :  { %572 = vrot.lane.b32.xlu1 %v7551_v31, %s5714_s28  ;;  %v1630_v2 = vmul.f32 %v1606_v15, %v1529_v58  ;;  %v1909_v16 = vsel %vm1906_vm8, %v14189_v55, %v7402_v21  ;;  %v1820_v15 = vmul.f32 %v1796_v24, %v1719_v45  ;;  %v7670_v24 = vpop.permute.xlu0 %1516  ;;  %v14196_v55 = vld [vmem:[#allocation43_spill] sm:$0xff] }
 0x36d   :  { %v1275_v3 = vadd.f32 %v1251_v44, %v1085_v63 }
 0x370   :  { %1382 = vperm.xlu1 %5539, %v7215_v39  }
 0x374   :  { %5540 = vset.pattern.permute.xlu1 %v14144_v29  ;;  %v14181_v29 = vld [vmem:[#allocation116_spill] sm:$0xff] }
 0x375   :  { %v1357_v30 = vsel %vm1336_vm5, %v7373_v57, %v14181_v29  ;;  %v1547_v57 = vsel %vm1526_vm6, %v7379_v10, %v14184_v25  ;;  %v1084_v29 = vadd.f32 %v1060_v17, %v894_v56  ;;  %v1737_v10 = vsel %vm1716_vm7, %v7389_v59, %v14187_v54 }
 0x376   :  { %v1441_v34 = vmul.f32 %v1417_v28, %v1357_v30  ;;  %v1631_v28 = vmul.f32 %v1607_v37, %v1547_v57  ;;  %v1986_v30 = vmul.f32 %v14153_v11, %v14188_v53  ;;  %v1987_v56 = vmul.f32 %v14154_v6, %v14188_v53 }
 0x377   :  { %v1274_v17 = vadd.f32 %v1250_v7, %v1084_v29  ;;  %v1927_v59 = vsel %vm1906_vm8, %v7402_v21, %v14190_v52  ;;  %v1821_v37 = vmul.f32 %v1797_v8, %v1737_v10  ;;  %v14191_v21 = vld [vmem:[#allocation66_spill] sm:$0xff]  ;;  %v14193_v8 = vmov 7  }
 0x378   :  { %v1465_v44 = vadd.f32 %v1441_v34, %v1275_v3  ;;  %v2010_v57 = vmul.f32 %v1986_v30, %v1909_v16  ;;  %v2011_v29 = vmul.f32 %v1987_v56, %v1927_v59  ;;  %v14194_v53 = vmov 8   ;;  %v14195_v30 = vld [vmem:[#allocation97_spill] sm:$0xff]  ;;  %v14197_v52 = vld [vmem:[#allocation26_spill] sm:$0xff] }
 0x379   :  { %v1464_v7 = vadd.f32 %v1440_v32, %v1274_v17  ;;  %v7681_v17 = vpop.permute.xlu0 %1706  ;;  %v584_v56 = vsel %vm576_vm1, %v14195_v30, %v7382_v1  ;;  %v652_v16 = vmul.f32 %v14135_v60, %v14196_v55  ;;  %v1222_v59 = vmul.f32 %v14143_v48, %v14197_v52 }
 0x37a   :  { %v1655_v25 = vadd.f32 %v1631_v28, %v1465_v44 }
 0x37b   :  { %v1654_v58 = vadd.f32 %v1630_v2, %v1464_v7  ;;  %v14198_v7 = vld [vmem:[#allocation99_spill] sm:$0xff] }
 0x37c   :  { %v1845_v20 = vadd.f32 %v1821_v37, %v1655_v25  ;;  %v578_v44 = vsel %vm576_vm1, %v7382_v1, %v14198_v7  ;;  %v14199_v37 = vld [vmem:[#allocation28_spill] sm:$0xff]  ;;  %v14201_v1 = vld [vmem:[#allocation101_spill] sm:$0xff] }
 0x37d   :  { %726 = vrot.lane.b32.xlu0 %v7416_v14, %s5715_s29  ;;  %v1844_v63 = vadd.f32 %v1820_v15, %v1654_v58  ;;  %v1223_v15 = vmul.f32 %v14145_v35, %v14197_v52  ;;  %v1412_v58 = vmul.f32 %v14146_v51, %v14199_v37  ;;  %v1413_v25 = vmul.f32 %v14147_v47, %v14199_v37 }
 0x37e   :  { %v2035_v54 = vadd.f32 %v2011_v29, %v1845_v20  ;;  %v676_v29 = vmul.f32 %v652_v16, %v584_v56  ;;  %v14205_v56 = vld [vmem:[#allocation47_spill] sm:$0xff] }
 0x37f   :  { %v2034_v50 = vadd.f32 %v2010_v57, %v1844_v63  ;;  %v653_v57 = vmul.f32 %v14136_v4, %v14196_v55  ;;  %v14200_v63 = vld [vmem:[#allocation49_spill] sm:$0xff]  ;;  %v14206_v55 = vld [vmem:[#allocation48_spill] sm:$0xff] }
 0x380   :  { %v7668_v34 = vadd.f32 %v14191_v21, %v2035_v54  ;;  %v842_v20 = vmul.f32 %v14139_v27, %v14200_v63  ;;  %v843_v54 = vmul.f32 %v14140_v42, %v14200_v63  ;;  %v508_v16 = vmul.f32 %v14206_v55, %v14205_v56  ;;  %v14207_v63 = vld [vmem:[#allocation112_spill] sm:$0xff] }
 0x381   :  { %740 = vrot.lane.b32.xlu0 %v7545_v41, %s5715_s29  ;;  %v7665_v32 = vadd.f32 %v14191_v21, %v2034_v50  ;;  %v774_v50 = vsel %vm766_vm2, %v14201_v1, %v7395_v46  ;;  %v14202_v21 = vld [vmem:[#allocation103_spill] sm:$0xff]  ;;  %v509_v52 = vmul.f32 %v14206_v55, %v14093_v40  ;;  %v677_v7 = vmul.f32 %v653_v57, %v578_v44  ;;  %v14210_v40 = vld [vmem:[#allocation105_spill] sm:$0xff]  ;;  %v14216_v55 = vld [vmem:[#allocation30_spill] sm:$0xff] }
 0x382   :  { %v2433_v10 = vmul.f32 %v7668_v34, %v7668_v34  ;;  %v958_v1 = vsel %vm956_vm3, %v7426_v19, %v14207_v63  ;;  %v700_v56 = vadd.f32 %v676_v29, %v508_v16  ;;  %v1154_v44 = vsel %vm1146_vm4, %v14210_v40, %v7476_v61  ;;  %v14211_v57 = vld [vmem:[#allocation139_spill] sm:$0xff]  ;;  %v14217_v40 = vld [vmem:[#allocation81_spill] sm:$0xff] }
 0x383   :  { %14192 = vst [vmem:[#allocation27_spill] sm:$0xff] %v7665_v32  ;;  %v2432_v45 = vmul.f32 %v7665_v32, %v7665_v32  ;;  %v1602_v16 = vmul.f32 %v14148_v49, %v14216_v55 }
 0x385   :  { %764 = vrot.lane.b32.xlu0 %v7551_v31, %s5715_s29  ;;  %v2436_v3 = vadd.f32 %v2433_v10, %v2432_v45  ;;  %v768_v45 = vsel %vm766_vm2, %v7395_v46, %v14202_v21  ;;  %v14203_v10 = vld [vmem:[#allocation52_spill] sm:$0xff]  ;;  %v866_v46 = vmul.f32 %v842_v20, %v774_v50  ;;  %v14212_v20 = vld [vmem:[#allocation53_spill] sm:$0xff]  ;;  %v14213_v50 = vld [vmem:[#allocation107_spill] sm:$0xff] }
 0x386   :  { %v1033_v37 = vmul.f32 %v14142_v5, %v14203_v10  ;;  %v14208_v21 = vld [vmem:[#allocation40_spill] sm:$0xff]  ;;  %v867_v32 = vmul.f32 %v843_v54, %v768_v45  ;;  %v701_v54 = vadd.f32 %v677_v7, %v509_v52 }
 0x387   :  { %v890_v63 = vadd.f32 %v866_v46, %v700_v56  ;;  %v14218_v52 = vld [vmem:[#allocation88_spill] sm:$0xff]  ;;  %v14221_v56 = vld [vmem:[#allocation70_spill] sm:$0xff] }
 0x388   :  { %v1057_v45 = vmul.f32 %v1033_v37, %v958_v1  ;;  %v1528_v7 = vsel %vm1526_vm6, %v14218_v52, %v7670_v24  ;;  %v14219_v37 = vld [vmem:[#allocation23_spill] sm:$0xff]  ;;  %v14220_v1 = vld [vmem:[#allocation85_spill] sm:$0xff] }
 0x389   :  { %1572 = vperm.xlu0 %5541, %v7215_v39  }
 0x38d   :  { %918 = vrot.lane.b32.xlu0 %v7539_v62, %s5713_s13 }
 0x38e   :  { %5542 = vset.pattern.permute.xlu0 %v14193_v8 }
 0x391   :  { %952 = vrot.lane.b32.xlu0 %v7434_v36, %s5713_s13 }
 0x394   :  { %2437 = vadd.xlane.f32.xlu1 %v2436_v3  ;;  %v1032_v3 = vmul.f32 %v14141_v9, %v14203_v10  ;;  %v1148_v10 = vsel %vm1146_vm4, %v7476_v61, %v14213_v50  ;;  %v891_v61 = vadd.f32 %v867_v32, %v701_v54  ;;  %v14222_v50 = vld [vmem:[#allocation35_spill] sm:$0xff] }
 0x395   :  { %1758 = vperm.xlu0 %5542, %v7205_v0   ;;  %v1983_v52 = vmul.f32 %v14154_v6, %v14222_v50 }
 0x396   :  { %v2151_v2 = vpop.xlane.xlu0 %2150  ;;  %v1081_v32 = vadd.f32 %v1057_v45, %v891_v61  ;;  %v14225_v45 = vld [vmem:[#allocation62_spill] sm:$0xff] }
 0x397   :  { %v2153_v28 = vmax.f32 %v2151_v2, 1e-24  ;;  %v14204_v2 = vld [vmem:[#allocation110_spill] sm:$0xff] }
 0x399   :  { %1108 = vrot.lane.b32.xlu0 %v7539_v62, %s5716_s0  ;;  %5603 = vrsqrt.f32 %v2153_v28  ;;  %v964_v28 = vsel %vm956_vm3, %v14204_v2, %v7426_v19  ;;  %v2118_v19 = vmul.f32 %v14212_v20, %v14211_v57  ;;  %v1603_v20 = vmul.f32 %v14149_v12, %v14216_v55 }
 0x39a   :  { %5545 = vset.pattern.permute.xlu0 %v14194_v53  ;;  %v1056_v13 = vmul.f32 %v1032_v3, %v964_v28  ;;  %v14214_v3 = vld [vmem:[#allocation87_spill] sm:$0xff] }
 0x39b   :  { %v14215_v28 = vld [vmem:[#allocation83_spill] sm:$0xff]  ;;  %v1356_v57 = vsel %vm1336_vm5, %v14214_v3, %v14217_v40 }
 0x39d   :  { %1120 = vrot.lane.b32.xlu0 %v7545_v41, %s5716_s0 }
 0x3a1   :  { %1144 = vrot.lane.b32.xlu0 %v7551_v31, %s5716_s0 }
 0x3a3   :  { %v5604_v30 = vpop.eup %5603 }
 0x3a4   :  { %v2159_v2 = vmul.f32 %v5604_v30, %v14208_v21  ;;  %v2158_v22 = vmul.f32 %v5604_v30, %v14209_v26  ;;  %v1338_v30 = vsel %vm1336_vm5, %v14215_v28, %v14214_v3  ;;  %v1246_v21 = vmul.f32 %v1222_v59, %v1154_v44  ;;  %v14224_v3 = vld [vmem:[#allocation91_spill] sm:$0xff] }
 0x3a5   :  { %1952 = vperm.xlu0 %5545, %v7215_v39   ;;  %728 = vrot.lane.b32.xlu1 %v7539_v62, %s5715_s29  ;;  %v1080_v59 = vadd.f32 %v1056_v13, %v890_v63  ;;  %v1436_v46 = vmul.f32 %v1412_v58, %v1338_v30  ;;  %v2132_v44 = vmul.f32 %v14221_v56, %v2118_v19  ;;  %v14223_v13 = vld [vmem:[#allocation93_spill] sm:$0xff] }
 0x3a6   :  { %v5467_v26 = vpack.c.bf16 %v2159_v2, %v2159_v2  ;;  %v5466_v29 = vpack.c.bf16 %v2158_v22, %v2158_v22  ;;  %v1247_v22 = vmul.f32 %v1223_v15, %v1148_v10  ;;  %v1546_v2 = vsel %vm1526_vm6, %v7670_v24, %v14220_v1 }
 0x3a7   :  { %v1437_v15 = vmul.f32 %v1413_v25, %v1356_v57  ;;  %v1982_v10 = vmul.f32 %v14153_v11, %v14222_v50  ;;  %v1270_v54 = vadd.f32 %v1246_v21, %v1080_v59  ;;  %v1718_v58 = vsel %vm1716_vm7, %v14223_v13, %v7681_v17  ;;  %v14227_v21 = vld [vmem:[#allocation95_spill] sm:$0xff]  ;;  %v14231_v13 = vld [vmem:[#allocation104_spill] sm:$0xff] }
 0x3a8   :  { %2232 = vmatprep.subr.bf16.mxu1 %v5467_v26  ;;  %v1897_v26 = vpop.permute.xlu0 %1896  ;;  %v1736_v24 = vsel %vm1716_vm7, %v7681_v17, %v14224_v3  ;;  %v1271_v25 = vadd.f32 %v1247_v22, %v1081_v32  ;;  %v1627_v19 = vmul.f32 %v1603_v20, %v1546_v2  ;;  %v1792_v28 = vmul.f32 %v14150_v23, %v14225_v45 }
 0x3a9   :  { %5547 = vset.pattern.permute.xlu0 %v14158_v43  ;;  %738 = vrot.lane.b32.xlu1 %v14219_v37, %s5715_s29  ;;  %v1793_v30 = vmul.f32 %v14151_v33, %v14225_v45  ;;  %v1460_v55 = vadd.f32 %v1436_v46, %v1270_v54  ;;  %v1926_v17 = vsel %vm1906_vm8, %v1897_v26, %v14227_v21  ;;  %v14234_v45 = vld [vmem:[#allocation94_spill] sm:$0xff] }
 0x3aa   :  { %2233 = vmatpush1.bf16.xpose.msra.mxu1 %v5466_v29  ;;  %v1626_v29 = vmul.f32 %v1602_v16, %v1528_v7  ;;  %v14226_v16 = vld [vmem:[#allocation109_spill] sm:$0xff]  ;;  %v5464_v40 = vpack.c.bf16 %v2132_v44, %v2132_v44  ;;  %v1461_v57 = vadd.f32 %v1437_v15, %v1271_v25  ;;  %v1816_v61 = vmul.f32 %v1792_v28, %v1718_v58  ;;  %v14228_v44 = vld [vmem:[#allocation68_spill] sm:$0xff]  ;;  %v14233_v25 = vld [vmem:[#allocation63_spill] sm:$0xff] }
 0x3ab   :  { %v1908_v63 = vsel %vm1906_vm8, %v14226_v16, %v1897_v26  ;;  %v1817_v22 = vmul.f32 %v1793_v30, %v1736_v24  ;;  %v2007_v46 = vmul.f32 %v1983_v52, %v1926_v17  ;;  %v14232_v58 = vld [vmem:[#allocation92_spill] sm:$0xff]  ;;  %v1515_v24 = vpop.permute.xlu1 %1514  ;;  %v577_v28 = vsel %vm576_vm1, %v14231_v13, %v14234_v45  ;;  %v14239_v52 = vld [vmem:[#allocation51_spill] sm:$0xff] }
 0x3ac   :  { %v1650_v7 = vadd.f32 %v1626_v29, %v1460_v55  ;;  %v1651_v59 = vadd.f32 %v1627_v19, %v1461_v57  ;;  %v2006_v1 = vmul.f32 %v1982_v10, %v1908_v63  ;;  %v583_v3 = vsel %vm576_vm1, %v14232_v58, %v14231_v13  ;;  %v14235_v55 = vld [vmem:[#allocation106_spill] sm:$0xff]  ;;  %v14236_v16 = vld [vmem:[#allocation96_spill] sm:$0xff]  ;;  %v14246_v58 = vld [vmem:[#allocation55_spill] sm:$0xff] }
 0x3ad   :  { %762 = vrot.lane.b32.xlu1 %v7434_v36, %s5715_s29  ;;  %v648_v19 = vmul.f32 %v14135_v60, %v14233_v25  ;;  %v649_v30 = vmul.f32 %v14136_v4, %v14233_v25  ;;  %v773_v63 = vsel %vm766_vm2, %v14236_v16, %v14235_v55  ;;  %v14237_v17 = vld [vmem:[#allocation24_spill] sm:$0xff]  ;;  %v1029_v13 = vmul.f32 %v14142_v5, %v14239_v52 }
 0x3ae   :  { %v1840_v2 = vadd.f32 %v1816_v61, %v1650_v7  ;;  %v1841_v32 = vadd.f32 %v1817_v22, %v1651_v59  ;;  %v839_v22 = vmul.f32 %v14140_v42, %v14237_v17  ;;  %v1028_v7 = vmul.f32 %v14141_v9, %v14239_v52  ;;  %v14240_v59 = vld [vmem:[#allocation44_spill] sm:$0xff] }
 0x3af   :  { %v672_v21 = vmul.f32 %v648_v19, %v583_v3  ;;  %v673_v61 = vmul.f32 %v649_v30, %v577_v28  ;;  %v1218_v3 = vmul.f32 %v14143_v48, %v14246_v58  ;;  %v1705_v25 = vpop.permute.xlu1 %1704  ;;  %v1219_v45 = vmul.f32 %v14145_v35, %v14246_v58  ;;  %v14247_v28 = vld [vmem:[#allocation102_spill] sm:$0xff]  ;;  %v14249_v16 = vld [vmem:[#allocation100_spill] sm:$0xff] }
 0x3b0   :  { %v2030_v20 = vadd.f32 %v2006_v1, %v1840_v2  ;;  %v2031_v26 = vadd.f32 %v2007_v46, %v1841_v32  ;;  %v14241_v1 = vld [vmem:[#allocation46_spill] sm:$0xff] }
 0x3b1   :  { %2265 = vmatmul.mubr.bf16.vlgmr.msra.gmra.mrb[12].mxu1 %v5464_v40  ;;  %1568 = vperm.xlu1 %5540, %v7205_v0   ;;  %v14238_v40 = vld [vmem:[#allocation98_spill] sm:$0xff]  ;;  %v504_v46 = vmul.f32 %v14241_v1, %v14240_v59 }
 0x3b2   :  { %2393 = vmatprep.mubr.bf16.mxu1 %v14158_v43  ;;  %v7810_v15 = vadd.f32 %v14228_v44, %v2030_v20  ;;  %v7813_v50 = vadd.f32 %v14228_v44, %v2031_v26  ;;  %v767_v57 = vsel %vm766_vm2, %v14235_v55, %v14238_v40  ;;  %v14242_v32 = vld [vmem:[#allocation74_spill] sm:$0xff]  ;;  %v14243_v20 = vld [vmem:[#allocation108_spill] sm:$0xff] }
 0x3b3   :  { %v957_v26 = vsel %vm956_vm3, %v14243_v20, %v14242_v32  ;;  %v14244_v44 = vld [vmem:[#allocation72_spill] sm:$0xff]  ;;  %v696_v19 = vadd.f32 %v672_v21, %v504_v46  ;;  %v14248_v30 = vld [vmem:[#allocation90_spill] sm:$0xff] }
 0x3b4   :  { %14229 = vst [vmem:[#allocation156_spill] sm:$0xff] %v7810_v15  ;;  %14230 = vst [vmem:[#allocation152_spill] sm:$0xff] %v7813_v50  ;;  %v2404_v10 = vmul.f32 %v7810_v15, %v7810_v15  ;;  %v2405_v54 = vmul.f32 %v7813_v50, %v7813_v50  ;;  %v1147_v55 = vsel %vm1146_vm4, %v14248_v30, %v14247_v28  ;;  %v14251_v59 = vld [vmem:[#allocation138_spill] sm:$0xff]  ;;  %v14253_v32 = vld [vmem:[#allocation76_spill] sm:$0xff] }
 0x3b5   :  { %916 = vrot.lane.b32.xlu1 %v7416_v14, %s5713_s13  ;;  %v1053_v40 = vmul.f32 %v1029_v13, %v957_v26  ;;  %v1243_v26 = vmul.f32 %v1219_v45, %v1147_v55  ;;  %v14258_v58 = vld [vmem:[#allocation82_spill] sm:$0xff]  ;;  %v14259_v28 = vld [vmem:[#allocation79_spill] sm:$0xff] }
 0x3b6   :  { %5543 = vset.pattern.permute.xlu1 %v14193_v8  ;;  %v2409_v29 = vadd.f32 %v2405_v54, %v2404_v10  ;;  %v963_v10 = vsel %vm956_vm3, %v14244_v44, %v14243_v20  ;;  %v14245_v54 = vld [vmem:[#allocation42_spill] sm:$0xff] }
 0x3b7   :  { %v14254_v44 = vld [vmem:[#allocation34_spill] sm:$0xff] }
 0x3b9   :  { %928 = vrot.lane.b32.xlu1 %v14219_v37, %s5713_s13 }
 0x3bd   :  { %930 = vrot.lane.b32.xlu1 %v7545_v41, %s5713_s13 }
 0x3c1   :  { %954 = vrot.lane.b32.xlu1 %v7551_v31, %s5713_s13 }
 0x3c4   :  { %2410 = vadd.xlane.f32.xlu0 %v2409_v29  ;;  %v505_v29 = vmul.f32 %v14241_v1, %v14245_v54  ;;  %v14252_v1 = vld [vmem:[#allocation78_spill] sm:$0xff] }
 0x3c5   :  { %1762 = vperm.xlu1 %5543, %v7215_v39   ;;  %v1337_v46 = vsel %vm1336_vm5, %v14252_v1, %v14251_v59 }
 0x3c9   :  { %1106 = vrot.lane.b32.xlu1 %v7416_v14, %s5716_s0 }
 0x3ca   :  { %5544 = vset.pattern.permute.xlu1 %v14194_v53 }
 0x3cd   :  { %1118 = vrot.lane.b32.xlu1 %v14219_v37, %s5716_s0 }
 0x3d1   :  { %1142 = vrot.lane.b32.xlu1 %v7434_v36, %s5716_s0 }
 0x3d5   :  { %1948 = vperm.xlu1 %5544, %v7205_v0   ;;  %v838_v0 = vmul.f32 %v14139_v27, %v14237_v17  ;;  %v697_v17 = vadd.f32 %v673_v61, %v505_v29  ;;  %v1355_v61 = vsel %vm1336_vm5, %v14251_v59, %v14253_v32  ;;  %v14261_v59 = vld [vmem:[#allocation86_spill] sm:$0xff]  ;;  %v14262_v32 = vld [vmem:[#allocation84_spill] sm:$0xff] }
 0x3d6   :  { %v1717_v1 = vsel %vm1716_vm7, %v14261_v59, %v1705_v25 }
 0x3d7   :  { %v862_v2 = vmul.f32 %v838_v0, %v773_v63  ;;  %v1153_v63 = vsel %vm1146_vm4, %v14249_v16, %v14248_v30  ;;  %v1052_v0 = vmul.f32 %v1028_v7, %v963_v10  ;;  %v14255_v10 = vld [vmem:[#allocation111_spill] sm:$0xff]  ;;  %v1895_v16 = vpop.permute.xlu1 %1894 }
 0x3d8   :  { %v1242_v20 = vmul.f32 %v1218_v3, %v1153_v63  ;;  %v7902_v54 = vadd.f32 %v14255_v10, %v14254_v44  ;;  %v14260_v63 = vld [vmem:[#allocation32_spill] sm:$0xff]  ;;  %v14265_v10 = vld [vmem:[#allocation89_spill] sm:$0xff] }
 0x3d9   :  { %5546 = vset.pattern.permute.xlu1 %v14158_v43  ;;  %v886_v21 = vadd.f32 %v862_v2, %v696_v19  ;;  %v14257_v2 = vld [vmem:[#allocation59_spill] sm:$0xff]  ;;  %v1527_v19 = vsel %vm1526_vm6, %v14258_v58, %v1515_v24  ;;  %v14312_v43 = vld [vmem:[#allocation141_spill] sm:$0xff] }
 0x3da   :  { %622 = vperm.xlu0 %5547, %v7215_v39   ;;  %v863_v39 = vmul.f32 %v839_v22, %v767_v57  ;;  %v14250_v57 = vld [vmem:[#allocation57_spill] sm:$0xff]  ;;  %14256 = vst [vmem:[#allocation54_spill] sm:$0xff] %v7902_v54  ;;  %v1598_v29 = vmul.f32 %v14148_v49, %v14257_v2  ;;  %v1599_v13 = vmul.f32 %v14149_v12, %v14257_v2  ;;  %v14287_v49 = vmov 4  }
 0x3db   :  { %v1408_v22 = vmul.f32 %v14146_v51, %v14250_v57  ;;  %v1409_v52 = vmul.f32 %v14147_v47, %v14250_v57  ;;  %v1076_v3 = vadd.f32 %v1052_v0, %v886_v21  ;;  %v1789_v57 = vmul.f32 %v14151_v33, %v14260_v63  ;;  %v5671_v47 = vld [vmem:[%s13215_s6 + $0x28] sm:$0xff] }
 0x3dc   :  { %v887_v7 = vadd.f32 %v863_v39, %v697_v17  ;;  %v1545_v39 = vsel %vm1526_vm6, %v1515_v24, %v14259_v28  ;;  %v1788_v17 = vmul.f32 %v14150_v23, %v14260_v63  ;;  %v1735_v24 = vsel %vm1716_vm7, %v1705_v25, %v14262_v32  ;;  %v7967_v32 = vpop.permute.xlu1 %494 }
 0x3dd   :  { %v1432_v30 = vmul.f32 %v1408_v22, %v1337_v46  ;;  %v1433_v55 = vmul.f32 %v1409_v52, %v1355_v61  ;;  %v1266_v0 = vadd.f32 %v1242_v20, %v1076_v3  ;;  %v1622_v22 = vmul.f32 %v1598_v29, %v1527_v19  ;;  %v14263_v52 = vld [vmem:[#allocation64_spill] sm:$0xff]  ;;  %14267 = vst [vmem:[#allocation145_spill] sm:$0xff] %v7967_v32 }
 0x3de   :  { %1298 = vrot.lane.b32.xlu0 %v7539_v62, %s5717_s20  ;;  %v1077_v45 = vadd.f32 %v1053_v40, %v887_v7  ;;  %v1623_v21 = vmul.f32 %v1599_v13, %v1545_v39  ;;  %v1978_v46 = vmul.f32 %v14153_v11, %v14263_v52  ;;  %v1979_v61 = vmul.f32 %v14154_v6, %v14263_v52  ;;  %v14264_v7 = vld [vmem:[#allocation151_spill] sm:$0xff] }
 0x3df   :  { %v1907_v44 = vsel %vm1906_vm8, %v14264_v7, %v1895_v16  ;;  %v1925_v2 = vsel %vm1906_vm8, %v1895_v16, %v14265_v10  ;;  %v1456_v58 = vadd.f32 %v1432_v30, %v1266_v0  ;;  %v1812_v20 = vmul.f32 %v1788_v17, %v1717_v1  ;;  %v14266_v30 = vld [vmem:[#allocation69_spill] sm:$0xff] }
 0x3e0   :  { %v1267_v40 = vadd.f32 %v1243_v26, %v1077_v45  ;;  %v1813_v26 = vmul.f32 %v1789_v57, %v1735_v24  ;;  %v2002_v19 = vmul.f32 %v1978_v46, %v1907_v44  ;;  %v2003_v28 = vmul.f32 %v1979_v61, %v1925_v2  ;;  %v5670_v1 = vld [vmem:[%s13215_s6 + $0x20] sm:$0xff] }
 0x3e1   :  { %v1646_v29 = vadd.f32 %v1622_v22, %v1456_v58  ;;  %v14268_v24 = vld [vmem:[#allocation153_spill] sm:$0xff] }
 0x3e2   :  { %1320 = vrot.lane.b32.xlu0 %v7902_v54, %s5717_s20  ;;  %v1457_v25 = vadd.f32 %v1433_v55, %v1267_v40  ;;  %v7971_v0 = vadd.f32 %v14268_v24, %v7531_v18  ;;  %v7975_v40 = vpop.permute.xlu1 %808 }
 0x3e3   :  { %v1836_v39 = vadd.f32 %v1812_v20, %v1646_v29  ;;  %14270 = vst [vmem:[#allocation158_spill] sm:$0xff] %v7975_v40 }
 0x3e4   :  { %v1647_v13 = vadd.f32 %v1623_v21, %v1457_v25  ;;  %14269 = vst [vmem:[#allocation56_spill] sm:$0xff] %v7971_v0 }
 0x3e5   :  { %v2026_v45 = vadd.f32 %v2002_v19, %v1836_v39 }
 0x3e6   :  { %1486 = vrot.lane.b32.xlu0 %v7416_v14, %s5718_s21  ;;  %v1837_v3 = vadd.f32 %v1813_v26, %v1647_v13  ;;  %v7979_v22 = vpop.permute.xlu1 %812 }
 0x3e7   :  { %v7943_v55 = vadd.f32 %v14266_v30, %v2026_v45 }
 0x3e8   :  { %v2027_v63 = vadd.f32 %v2003_v28, %v1837_v3  ;;  %v107_v28 = vld [vmem:[%s13216_s7 + $0x28] sm:$0xff] }
 0x3e9   :  { %v2402_v17 = vmul.f32 %v7943_v55, %v7943_v55 }
 0x3ea   :  { %1498 = vrot.lane.b32.xlu0 %v14219_v37, %s5718_s21  ;;  %v7946_v16 = vadd.f32 %v14266_v30, %v2027_v63  ;;  %v7985_v21 = vpop.permute.xlu1 %1002  ;;  %v8032_v30 = vpop.permute.xlu0 %998 }
 0x3eb   :  { %14278 = vst [vmem:[#allocation150_spill] sm:$0xff] %v8032_v30 }
 0x3ec   :  { %v2403_v57 = vmul.f32 %v7946_v16, %v7946_v16 }
 0x3ee   :  { %1510 = vrot.lane.b32.xlu0 %v7902_v54, %s5718_s21  ;;  %v2406_v59 = vadd.f32 %v2403_v57, %v2402_v17  ;;  %v7989_v18 = vpop.permute.xlu1 %1188  ;;  %v8036_v57 = vpop.permute.xlu0 %1192 }
 0x3ef   :  { %14271 = vst [vmem:[#allocation157_spill] sm:$0xff] %v7989_v18 }
 0x3f2   :  { %1676 = vrot.lane.b32.xlu0 %v7416_v14, %s5719_s1  ;;  %v7995_v61 = vpop.permute.xlu1 %534 }
 0x3f6   :  { %1688 = vrot.lane.b32.xlu0 %v14219_v37, %s5719_s1  ;;  %v7997_v10 = vpop.permute.xlu1 %536 }
 0x3f9   :  { %2407 = vadd.xlane.f32.xlu1 %v2406_v59 }
 0x3fa   :  { %1700 = vrot.lane.b32.xlu0 %v7902_v54, %s5719_s1  ;;  %v7999_v2 = vpop.permute.xlu1 %548 }
 0x3fe   :  { %v8001_v58 = vpop.permute.xlu1 %572 }
 0x402   :  { %v8003_v25 = vpop.permute.xlu1 %1382 }
 0x403   :  { %14272 = vst [vmem:[#allocation58_spill] sm:$0xff] %v8003_v25 }
 0x40a   :  { %618 = vperm.xlu1 %5546, %v5670_v1  }
 0x40e   :  { %1296 = vrot.lane.b32.xlu1 %v7416_v14, %s5717_s20 }
 0x412   :  { %1308 = vrot.lane.b32.xlu1 %v14219_v37, %s5717_s20 }
 0x416   :  { %1310 = vrot.lane.b32.xlu1 %v7545_v41, %s5717_s20 }
 0x41a   :  { %1322 = vrot.lane.b32.xlu1 %v7971_v0, %s5717_s20 }
 0x41e   :  { %1488 = vrot.lane.b32.xlu1 %v7539_v62, %s5718_s21 }
 0x421   :  { %v8005_v20 = vpop.xlane.xlu1 %2437 }
 0x422   :  { %1500 = vrot.lane.b32.xlu1 %v7545_v41, %s5718_s21 }
 0x425   :  { %v8009_v29 = vpop.permute.xlu1 %728 }
 0x426   :  { %1512 = vrot.lane.b32.xlu1 %v7971_v0, %s5718_s21 }
 0x429   :  { %v8011_v13 = vpop.permute.xlu1 %738 }
 0x42a   :  { %1678 = vrot.lane.b32.xlu1 %v7539_v62, %s5719_s1  ;;  %14273 = vst [vmem:[#allocation67_spill] sm:$0xff] %v8011_v13 }
 0x42d   :  { %v8013_v19 = vpop.permute.xlu1 %762 }
 0x42e   :  { %1690 = vrot.lane.b32.xlu1 %v7545_v41, %s5719_s1  ;;  %14274 = vst [vmem:[#allocation17_spill] sm:$0xff] %v8013_v19 }
 0x431   :  { %v7993_v52 = vpop.f32.mrb[12].mxu0  ;;  %v8020_v39 = vpop.permute.xlu1 %1568 }
 0x432   :  { %v2220_v46 = vpop.f32.mrb[13].mxu0  ;;  %v2273_v26 = vsel %vm2272_vm9, %v7993_v52, -inf  ;;  %14275 = vst [vmem:[#allocation149_spill] sm:$0xff] %v8020_v39 }
 0x433   :  { %v2221_v7 = vpop.f32.mrb[14].mxu0 }
 0x434   :  { %v2222_v44 = vpop.f32.mrb[15].mxu0 }
 0x435   :  { %v8022_v3 = vpop.permute.xlu1 %916  ;;  %v8044_v44 = vpop.permute.xlu0 %546 }
 0x436   :  { %14280 = vst [vmem:[#allocation73_spill] sm:$0xff] %v8044_v44 }
 0x439   :  { %v8028_v45 = vpop.permute.xlu1 %928  ;;  %v8048_v6 = vpop.permute.xlu0 %570 }
 0x43a   :  { %14276 = vst [vmem:[#allocation148_spill] sm:$0xff] %v8028_v45  ;;  %14281 = vst [vmem:[#allocation130_spill] sm:$0xff] %v8048_v6 }
 0x43d   :  { %v8030_v63 = vpop.permute.xlu1 %930  ;;  %v8052_v33 = vpop.permute.xlu0 %1378 }
 0x43e   :  { %14277 = vst [vmem:[#allocation80_spill] sm:$0xff] %v8030_v63  ;;  %14283 = vst [vmem:[#allocation128_spill] sm:$0xff] %v8052_v33 }
 0x441   :  { %v8034_v17 = vpop.permute.xlu1 %954  ;;  %v8056_v12 = vpop.xlane.xlu0 %2440 }
 0x442   :  { %14285 = vst [vmem:[#allocation117_spill] sm:$0xff] %v8056_v12 }
 0x445   :  { %v8038_v59 = vpop.permute.xlu1 %1762 }
 0x446   :  { %14279 = vst [vmem:[#allocation71_spill] sm:$0xff] %v8038_v59 }
 0x452   :  { %2274 = vmax.xlane.f32.xlu1 %v2273_v26 }
 0x463   :  { %1702 = vrot.lane.b32.xlu1 %v7971_v0, %s5719_s1 }
 0x467   :  { %2075 = vperm.xlu1 %5546, %v107_v28   ;;  %v8046_v28 = vpop.permute.xlu1 %1106 }
 0x46b   :  { %1866 = vrot.lane.b32.xlu1 %v7416_v14, %s5720_s22  ;;  %v8050_v11 = vpop.permute.xlu1 %1118 }
 0x46c   :  { %14282 = vst [vmem:[#allocation39_spill] sm:$0xff] %v8050_v11 }
 0x46f   :  { %1878 = vrot.lane.b32.xlu1 %v14219_v37, %s5720_s22  ;;  %v8054_v23 = vpop.permute.xlu1 %1142 }
 0x470   :  { %14284 = vst [vmem:[#allocation61_spill] sm:$0xff] %v8054_v23 }
 0x484   :  { %v8040_v1 = vpop.f32.mrb[12].mxu1 }
 0x485   :  { %v2268_v24 = vpop.f32.mrb[13].mxu1  ;;  %v2276_v46 = vsel %vm2272_vm9, %v8040_v1, -inf }
 0x486   :  { %v2269_v7 = vpop.f32.mrb[14].mxu1  ;;  %2277 = vmax.xlane.f32.xlu0 %v2276_v46  ;;  %v106_v24 = vld [vmem:[%s13216_s7 + $0x20] sm:$0xff]  ;;  %v8061_v46 = vpop.permute.xlu1 %1948 }
 0x487   :  { %v2270_v26 = vpop.f32.mrb[15].mxu1  ;;  %14286 = vst [vmem:[#allocation115_spill] sm:$0xff] %v8061_v46  ;;  %v8063_v7 = vpop.permute.xlu0 %726 }
 0x48a   :  { %v8065_v26 = vpop.xlane.xlu1 %2407 }
 0x48b   :  { %v8071_v51 = vpop.permute.xlu0 %740 }
 0x48c   :  { %14288 = vst [vmem:[#allocation37_spill] sm:$0xff] %v8071_v51 }
 0x48e   :  { %v8075_v35 = vpop.permute.xlu1 %618 }
 0x48f   :  { %14289 = vst [vmem:[#allocation38_spill] sm:$0xff] %v8075_v35  ;;  %v8077_v48 = vpop.permute.xlu0 %764  ;;  %v662_v51 = vmul.f32 %v14312_v43, %v8075_v35 }
 0x493   :  { %v8083_v5 = vpop.permute.xlu0 %1572 }
 0x494   :  { %14291 = vst [vmem:[#allocation119_spill] sm:$0xff] %v8083_v5 }
 0x497   :  { %v8087_v42 = vpop.permute.xlu0 %918 }
 0x49b   :  { %v8091_v27 = vpop.permute.xlu0 %952 }
 0x49c   :  { %2070 = vperm.xlu0 %5547, %v106_v24   ;;  %v8081_v24 = vpop.permute.xlu1 %1296  ;;  %14293 = vst [vmem:[#allocation22_spill] sm:$0xff] %v8091_v27 }
 0x49d   :  { %14290 = vst [vmem:[#allocation121_spill] sm:$0xff] %v8081_v24 }
 0x49f   :  { %v8095_v60 = vpop.permute.xlu0 %1758 }
 0x4a0   :  { %5548 = vset.pattern.permute.xlu0 %v14287_v49  ;;  %v8085_v9 = vpop.permute.xlu1 %1308  ;;  %14295 = vst [vmem:[#allocation45_spill] sm:$0xff] %v8095_v60 }
 0x4a1   :  { %499 = vperm.xlu0 %5548, %v5671_v47  }
 0x4a3   :  { %v8099_v8 = vpop.permute.xlu0 %1108 }
 0x4a4   :  { %v8089_v47 = vpop.permute.xlu1 %1310 }
 0x4a5   :  { %1868 = vrot.lane.b32.xlu0 %v7539_v62, %s5720_s22  ;;  %14292 = vst [vmem:[#allocation60_spill] sm:$0xff] %v8089_v47 }
 0x4a7   :  { %v8103_v31 = vpop.permute.xlu0 %1120 }
 0x4a8   :  { %v8093_v4 = vpop.permute.xlu1 %1322  ;;  %14298 = vst [vmem:[#allocation50_spill] sm:$0xff] %v8103_v31 }
 0x4a9   :  { %1880 = vrot.lane.b32.xlu0 %v7545_v41, %s5720_s22  ;;  %14294 = vst [vmem:[#allocation65_spill] sm:$0xff] %v8093_v4 }
 0x4ab   :  { %v8107_v15 = vpop.permute.xlu0 %1144 }
 0x4ac   :  { %v8097_v53 = vpop.permute.xlu1 %1488  ;;  %14300 = vst [vmem:[#allocation116_spill] sm:$0xff] %v8107_v15 }
 0x4ad   :  { %14296 = vst [vmem:[#allocation125_spill] sm:$0xff] %v8097_v53 }
 0x4af   :  { %v8109_v56 = vpop.permute.xlu0 %1952 }
 0x4b0   :  { %v8101_v49 = vpop.permute.xlu1 %1500  ;;  %14301 = vst [vmem:[#allocation29_spill] sm:$0xff] %v8109_v56 }
 0x4b1   :  { %14297 = vst [vmem:[#allocation123_spill] sm:$0xff] %v8101_v49 }
 0x4b3   :  { %v8113_v59 = vpop.xlane.xlu0 %2410 }
 0x4b4   :  { %v8105_v36 = vpop.permute.xlu1 %1512  ;;  %14303 = vst [vmem:[#allocation118_spill] sm:$0xff] %v8113_v59 }
 0x4b5   :  { %14299 = vst [vmem:[#allocation113_spill] sm:$0xff] %v8105_v36 }
 0x4b7   :  { %v8117_v12 = vpop.permute.xlu0 %622 }
 0x4b8   :  { %v8111_v50 = vpop.permute.xlu1 %1678 }
 0x4b9   :  { %14302 = vst [vmem:[#allocation120_spill] sm:$0xff] %v8111_v50 }
 0x4bb   :  { %v8120_v25 = vpop.permute.xlu0 %1298 }
 0x4bc   :  { %v8115_v4 = vpop.permute.xlu1 %1690  ;;  %14305 = vst [vmem:[#allocation114_spill] sm:$0xff] %v8120_v25 }
 0x4bd   :  { %14304 = vst [vmem:[#allocation31_spill] sm:$0xff] %v8115_v4 }
 0x4bf   :  { %v8122_v36 = vpop.permute.xlu0 %1320 }
 0x4c0   :  { %14306 = vst [vmem:[#allocation122_spill] sm:$0xff] %v8122_v36 }
 0x4c3   :  { %v8128_v50 = vpop.permute.xlu0 %1486 }
 0x4c4   :  { %14307 = vst [vmem:[#allocation33_spill] sm:$0xff] %v8128_v50 }
 0x4c7   :  { %v8130_v4 = vpop.permute.xlu0 %1498 }
 0x4cb   :  { %v8132_v59 = vpop.permute.xlu0 %1510 }
 0x4cc   :  { %14308 = vst [vmem:[#allocation126_spill] sm:$0xff] %v8132_v59 }
 0x4df   :  { %v2275_v5 = vpop.xlane.xlu1 %2274 }
 0x4e0   :  { %v2279_v53 = vsub.f32 %v7993_v52, %v2275_v5  ;;  %v8136_v5 = vpop.permute.xlu0 %1676 }
 0x4e1   :  { %14309 = vst [vmem:[#allocation124_spill] sm:$0xff] %v8136_v5 }
 0x4e2   :  { %v2281_v49 = vmul.f32 1.442695, %v2279_v53 }
 0x4e4   :  { %5605 = vpow2.f32 %v2281_v49  ;;  %v8140_v49 = vpop.permute.xlu0 %1688 }
 0x4e8   :  { %v8144_v53 = vpop.permute.xlu0 %1700 }
 0x4e9   :  { %14310 = vst [vmem:[#allocation66_spill] sm:$0xff] %v8144_v53 }
 0x4ee   :  { %v8124_v31 = vpop.eup %5605 }
 0x4ef   :  { %v2285_v56 = vsel %vm2272_vm9, %v8124_v31, 0.0 }
 0x4f0   :  { %2286 = vadd.xlane.f32.xlu1 %v2285_v56 }
 0x501   :  { %1890 = vrot.lane.b32.xlu1 %v7902_v54, %s5720_s22 }
 0x505   :  { %560 = vrot.lane.b32.xlu1 %v7971_v0, %s5714_s28 }
 0x509   :  { %750 = vrot.lane.b32.xlu1 %v7902_v54, %s5715_s29 }
 0x513   :  { %v2278_v56 = vpop.xlane.xlu0 %2277 }
 0x514   :  { %v2280_v52 = vsub.f32 %v8040_v1, %v2278_v56  ;;  %v14313_v1 = vld [vmem:[#allocation140_spill] sm:$0xff] }
 0x515   :  { %v663_v56 = vmul.f32 %v14313_v1, %v8075_v35 }
 0x516   :  { %v2283_v25 = vmul.f32 1.442695, %v2280_v52 }
 0x518   :  { %5607 = vpow2.f32 %v2283_v25  ;;  %v599_v25 = vsel %vm576_vm1, %v8048_v6, %v7995_v61  ;;  %v14315_v6 = vld [vmem:[#allocation143_spill] sm:$0xff] }
 0x519   :  { %v686_v52 = vmul.f32 %v662_v51, %v599_v25  ;;  %v852_v15 = vmul.f32 %v14315_v6, %v7975_v40 }
 0x522   :  { %v8147_v47 = vpop.eup %5607 }
 0x523   :  { %14311 = vst [vmem:[#allocation97_spill] sm:$0xff] %v8147_v47  ;;  %v2288_v63 = vsel %vm2272_vm9, %v8147_v47, 0.0  ;;  %v8165_v47 = vpop.permute.xlu1 %1702 }
 0x524   :  { %2289 = vadd.xlane.f32.xlu0 %v2288_v63  ;;  %v518_v63 = vmul.f32 %v7967_v32, %v7416_v14  ;;  %14314 = vst [vmem:[#allocation43_spill] sm:$0xff] %v8165_v47  ;;  %v519_v14 = vmul.f32 %v7967_v32, %v14219_v37  ;;  %v783_v47 = vsel %vm766_vm2, %v8063_v7, %v8011_v13  ;;  %v14318_v13 = vld [vmem:[#allocation146_spill] sm:$0xff]  ;;  %v2442_v32 = vmax.f32 %v8005_v20, 1e-24 }
 0x525   :  { %v1537_v20 = vsel %vm1526_vm6, %v8130_v4, %v8132_v59 }
 0x526   :  { %v710_v51 = vadd.f32 %v686_v52, %v518_v63 }
 0x527   :  { %v8191_v37 = vpop.permute.xlu1 %2075 }
 0x53a   :  { %1892 = vrot.lane.b32.xlu0 %v7971_v0, %s5720_s22  ;;  %v593_v0 = vsel %vm576_vm1, %v7995_v61, %v8044_v44  ;;  %v979_v61 = vsel %vm956_vm3, %v8091_v27, %v8022_v3  ;;  %v1169_v27 = vsel %vm1146_vm4, %v8054_v23, %v8046_v28  ;;  %v1163_v23 = vsel %vm1146_vm4, %v8046_v28, %v8050_v11  ;;  %v14384_v11 = vld [vmem:[#allocation21_spill] sm:$0xff] }
 0x53b   :  { %v687_v35 = vmul.f32 %v663_v56, %v593_v0  ;;  %v14317_v0 = vld [vmem:[#allocation147_spill] sm:$0xff]  ;;  %v1543_v28 = vsel %vm1526_vm6, %v8128_v50, %v8130_v4 }
 0x53c   :  { %v1042_v56 = vmul.f32 %v14317_v0, %v8032_v30  ;;  %v14328_v4 = vld [vmem:[#allocation155_spill] sm:$0xff] }
 0x53d   :  { %v711_v52 = vadd.f32 %v687_v35, %v519_v14  ;;  %v14319_v35 = vld [vmem:[#allocation132_spill] sm:$0xff] }
 0x53e   :  { %558 = vrot.lane.b32.xlu0 %v7902_v54, %s5714_s28  ;;  %v789_v54 = vsel %vm766_vm2, %v8013_v19, %v8063_v7  ;;  %v14316_v19 = vld [vmem:[#allocation142_spill] sm:$0xff]  ;;  %v973_v7 = vsel %vm956_vm3, %v8022_v3, %v8028_v45  ;;  %v8211_v45 = vpop.permute.xlu1 %1866 }
 0x53f   :  { %v876_v25 = vmul.f32 %v852_v15, %v789_v54  ;;  %v853_v44 = vmul.f32 %v14316_v19, %v7975_v40  ;;  %v1066_v54 = vmul.f32 %v1042_v56, %v979_v61  ;;  %v1043_v40 = vmul.f32 %v14318_v13, %v8032_v30  ;;  %v14320_v61 = vld [vmem:[#allocation133_spill] sm:$0xff]  ;;  %14321 = vst [vmem:[#allocation26_spill] sm:$0xff] %v8211_v45 }
 0x540   :  { %v1422_v56 = vmul.f32 %v14320_v61, %v8052_v33 }
 0x541   :  { %v900_v63 = vadd.f32 %v876_v25, %v710_v51  ;;  %v877_v15 = vmul.f32 %v853_v44, %v783_v47  ;;  %v1232_v51 = vmul.f32 %v14319_v35, %v7989_v18  ;;  %v1353_v44 = vsel %vm1336_vm5, %v8081_v24, %v8085_v9 }
 0x542   :  { %v1067_v47 = vmul.f32 %v1043_v40, %v973_v7  ;;  %v1446_v30 = vmul.f32 %v1422_v56, %v1353_v44  ;;  %v2412_v7 = vmax.f32 %v8065_v26, 1e-24  ;;  %v14325_v26 = vld [vmem:[#allocation154_spill] sm:$0xff] }
 0x543   :  { %v901_v14 = vadd.f32 %v877_v15, %v711_v52  ;;  %v1090_v25 = vadd.f32 %v1066_v54, %v900_v63  ;;  %v1256_v3 = vmul.f32 %v1232_v51, %v1169_v27  ;;  %v14322_v52 = vld [vmem:[#allocation131_spill] sm:$0xff]  ;;  %v1347_v27 = vsel %vm1336_vm5, %v8085_v9, %v8122_v36  ;;  %v14323_v51 = vld [vmem:[#allocation134_spill] sm:$0xff]  ;;  %v1879_v9 = vpop.permute.xlu1 %1878  ;;  %v14383_v36 = vld [vmem:[#allocation20_spill] sm:$0xff] }
 0x544   :  { %v1233_v63 = vmul.f32 %v14322_v52, %v7989_v18  ;;  %v1423_v24 = vmul.f32 %v14323_v51, %v8052_v33  ;;  %v1802_v56 = vmul.f32 %v14325_v26, %v8095_v60  ;;  %5609 = vrsqrt.f32 %v2412_v7 }
 0x545   :  { %v1091_v15 = vadd.f32 %v1067_v47, %v901_v14  ;;  %v1280_v54 = vadd.f32 %v1256_v3, %v1090_v25  ;;  %v14324_v14 = vld [vmem:[#allocation136_spill] sm:$0xff]  ;;  %5611 = vrsqrt.f32 %v2442_v32  ;;  %v14327_v32 = vld [vmem:[#allocation127_spill] sm:$0xff]  ;;  %v1048_v33 = vmul.f32 %v14383_v36, %v7985_v21 }
 0x546   :  { %v1257_v40 = vmul.f32 %v1233_v63, %v1163_v23  ;;  %v1612_v25 = vmul.f32 %v14324_v14, %v8020_v39  ;;  %v1447_v47 = vmul.f32 %v1423_v24, %v1347_v27  ;;  %v1733_v63 = vsel %vm1716_vm7, %v8136_v5, %v8140_v49  ;;  %v14326_v24 = vld [vmem:[#allocation137_spill] sm:$0xff] }
 0x547   :  { %v1470_v3 = vadd.f32 %v1446_v30, %v1280_v54  ;;  %v1923_v30 = vsel %vm1906_vm8, %v8211_v45, %v1879_v9  ;;  %v1727_v45 = vsel %vm1716_vm7, %v8140_v49, %v8144_v53  ;;  %v14382_v53 = vld [vmem:[#allocation8_spill] sm:$0xff] }
 0x548   :  { %v1281_v44 = vadd.f32 %v1257_v40, %v1091_v15  ;;  %v1636_v23 = vmul.f32 %v1612_v25, %v1543_v28  ;;  %v1613_v15 = vmul.f32 %v14326_v24, %v8020_v39  ;;  %v1992_v40 = vmul.f32 %v14327_v32, %v8061_v46 }
 0x549   :  { %v1826_v28 = vmul.f32 %v1802_v56, %v1733_v63  ;;  %v1803_v25 = vmul.f32 %v14328_v4, %v8095_v60  ;;  %v859_v60 = vmul.f32 %v14382_v53, %v7979_v22 }
 0x54a   :  { %v1471_v54 = vadd.f32 %v1447_v47, %v1281_v44  ;;  %v1660_v27 = vadd.f32 %v1636_v23, %v1470_v3  ;;  %v1637_v7 = vmul.f32 %v1613_v15, %v1537_v20  ;;  %v2016_v50 = vmul.f32 %v1992_v40, %v1923_v30  ;;  %v8256_v44 = vpop.permute.xlu0 %2070  ;;  %v14330_v23 = vld [vmem:[#allocation144_spill] sm:$0xff] }
 0x54b   :  { %14329 = vst [vmem:[#allocation99_spill] sm:$0xff] %v8256_v44  ;;  %v1827_v47 = vmul.f32 %v1803_v25, %v1727_v45  ;;  %v1993_v56 = vmul.f32 %v14330_v23, %v8061_v46 }
 0x54c   :  { %v1661_v5 = vadd.f32 %v1637_v7, %v1471_v54  ;;  %v1850_v39 = vadd.f32 %v1826_v28, %v1660_v27 }
 0x54e   :  { %v2040_v3 = vadd.f32 %v2016_v50, %v1850_v39  ;;  %v5610_v30 = vpop.eup %5609  ;;  %v1851_v15 = vadd.f32 %v1827_v47, %v1661_v5 }
 0x54f   :  { %v5612_v49 = vpop.eup %5611  ;;  %v2417_v27 = vmul.f32 %v5610_v30, %v7946_v16 }
 0x550   :  { %v2447_v45 = vmul.f32 %v5612_v49, %v7668_v34  ;;  %v14333_v34 = vld [vmem:[#allocation27_spill] sm:$0xff] }
 0x552   :  { %v5475_v47 = vpack.c.bf16 %v2447_v45, %v2447_v45  ;;  %v1046_v45 = vmul.f32 %v14317_v0, %v7985_v21  ;;  %v114_v0 = vld [vmem:[%s13220_s11] sm:$0xff] }
 0x57d   :  { %v2287_v59 = vpop.xlane.xlu1 %2286 }
 0x57e   :  { %5613 = vrcp.f32 %v2287_v59  ;;  %v2094_v59 = vadd.f32 %v8256_v44, %v2040_v3 }
 0x580   :  { %v5468_v39 = vpack.c.bf16 %v2094_v59, %v2094_v59 }
 0x581   :  { %v8260_v20 = vpop.permute.xlu1 %1890 }
 0x582   :  { %14331 = vst [vmem:[#allocation28_spill] sm:$0xff] %v8260_v20  ;;  %v1917_v63 = vsel %vm1906_vm8, %v1879_v9, %v8260_v20  ;;  %v14332_v9 = vld [vmem:[#allocation129_spill] sm:$0xff]  ;;  %v2304_v5 = vsel %vm2302_vm10, %v5468_v39, 0  ;;  %v980_v39 = vsel %vm956_vm3, %v8034_v17, %v8087_v42 }
 0x583   :  { %v2017_v40 = vmul.f32 %v1993_v56, %v1917_v63  ;;  %v2421_v20 = vmul.f32 %v2417_v27, %v14332_v9  ;;  %v8273_v56 = vpop.permute.xlu0 %499  ;;  %v2446_v63 = vmul.f32 %v5612_v49, %v14333_v34  ;;  %v790_v49 = vsel %vm766_vm2, %v8077_v48, %v8009_v29 }
 0x584   :  { %v856_v27 = vmul.f32 %v14315_v6, %v7979_v22  ;;  %v126_v6 = vld [vmem:[%s13223_s14] sm:$0xff] }
 0x585   :  { %v2041_v54 = vadd.f32 %v2017_v40, %v1851_v15  ;;  %v5473_v3 = vpack.c.bf16 %v2421_v20, %v2421_v20  ;;  %v522_v15 = vmul.f32 %v8273_v56, %v7539_v62  ;;  %v2416_v40 = vmul.f32 %v5610_v30, %v7943_v55 }
 0x586   :  { %v600_v20 = vsel %vm576_vm1, %v8001_v58, %v7997_v10  ;;  %v5474_v59 = vpack.c.bf16 %v2446_v63, %v2446_v63  ;;  %v880_v55 = vmul.f32 %v856_v27, %v790_v49  ;;  %v667_v30 = vmul.f32 %v14313_v1, %v8117_v12  ;;  %v14335_v63 = vld [vmem:[#allocation37_spill] sm:$0xff]  ;;  %v14338_v27 = vld [vmem:[#allocation60_spill] sm:$0xff]  ;;  %v14348_v1 = vld [vmem:[#allocation31_spill] sm:$0xff] }
 0x587   :  { %v2095_v50 = vadd.f32 %v8256_v44, %v2041_v54  ;;  %v2420_v62 = vmul.f32 %v2416_v40, %v14332_v9  ;;  %v594_v9 = vsel %vm576_vm1, %v7997_v10, %v7999_v2  ;;  %v857_v10 = vmul.f32 %v14316_v19, %v7979_v22 }
 0x588   :  { %v5614_v7 = vpop.eup %5613  ;;  %v14374_v19 = vmov 5  }
 0x589   :  { %v5469_v28 = vpack.c.bf16 %v2095_v50, %v2095_v50  ;;  %v2293_v25 = vmul.f32 %v5614_v7, %v8124_v31  ;;  %v666_v31 = vmul.f32 %v14312_v43, %v8117_v12  ;;  %v523_v7 = vmul.f32 %v8273_v56, %v7545_v41  ;;  %v14347_v43 = vld [vmem:[#allocation65_spill] sm:$0xff] }
 0x58a   :  { %v784_v41 = vsel %vm766_vm2, %v8009_v29, %v14335_v63  ;;  %v1047_v29 = vmul.f32 %v14318_v13, %v7985_v21  ;;  %v116_v13 = vld [vmem:[%s13221_s12] sm:$0xff] }
 0x58b   :  { %5420 = vmatprep.subr.msk.bf16.mxu0 %vm2302_vm10, %v5469_v28  ;;  %v2295_v16 = vpack.c.bf16 %v2293_v25, %v2293_v25  ;;  %v690_v54 = vmul.f32 %v666_v31, %v600_v20  ;;  %v5472_v25 = vpack.c.bf16 %v2420_v62, %v2420_v62  ;;  %v14336_v31 = vmov 0  }
 0x58c   :  { %2310 = vmatpush1.bf16.msra.mxu0 %v2304_v5  ;;  %v1236_v5 = vmul.f32 %v14319_v35, %v8036_v57 }
 0x58d   :  { %2474 = vmatprep.subr.bf16.mxu0 %v5475_v47  ;;  %v714_v50 = vadd.f32 %v690_v54, %v522_v15  ;;  %v1070_v47 = vmul.f32 %v1046_v45, %v980_v39  ;;  %v14337_v54 = vld [vmem:[#allocation80_spill] sm:$0xff] }
 0x58e   :  { %v974_v49 = vsel %vm956_vm3, %v8087_v42, %v14337_v54  ;;  %v14341_v42 = vld [vmem:[#allocation50_spill] sm:$0xff] }
 0x58f   :  { %5421 = vmatmul.mubr.msk.bf16.vlgmr.msra.gmra.mrb[16].mxu0 %vm2272_vm9, %v2295_v16  ;;  %v904_v28 = vadd.f32 %v880_v55, %v714_v50  ;;  %v691_v16 = vmul.f32 %v667_v30, %v594_v9  ;;  %v14339_v50 = vld [vmem:[#allocation114_spill] sm:$0xff]  ;;  %v8334_v9 = vpop.permute.xlu0 %1868 }
 0x590   :  { %2506 = vmatprep.mubr.bf16.mxu0 %v5473_v3  ;;  %v14334_v3 = vld [vmem:[#allocation116_spill] sm:$0xff]  ;;  %v1354_v62 = vsel %vm1336_vm5, %v14339_v50, %v14338_v27  ;;  %v14340_v55 = vld [vmem:[#allocation58_spill] sm:$0xff] }
 0x591   :  { %v1170_v34 = vsel %vm1146_vm4, %v14334_v3, %v8099_v8  ;;  %v715_v15 = vadd.f32 %v691_v16, %v523_v7  ;;  %v1094_v40 = vadd.f32 %v1070_v47, %v904_v28  ;;  %v1426_v30 = vmul.f32 %v14320_v61, %v14340_v55  ;;  %v14342_v47 = vld [vmem:[#allocation123_spill] sm:$0xff]  ;;  %v14343_v16 = vld [vmem:[#allocation125_spill] sm:$0xff]  ;;  %v14349_v61 = vld [vmem:[#allocation120_spill] sm:$0xff] }
 0x592   :  { %v1260_v20 = vmul.f32 %v1236_v5, %v1170_v34  ;;  %v1237_v7 = vmul.f32 %v14322_v52, %v8036_v57  ;;  %v1071_v28 = vmul.f32 %v1047_v29, %v974_v49  ;;  %v1164_v5 = vsel %vm1146_vm4, %v8099_v8, %v14341_v42  ;;  %v14346_v29 = vld [vmem:[#allocation117_spill] sm:$0xff] }
 0x593   :  { %v1544_v34 = vsel %vm1526_vm6, %v14343_v16, %v14342_v47  ;;  %v1348_v8 = vsel %vm1336_vm5, %v14338_v27, %v14347_v43  ;;  %v1734_v35 = vsel %vm1716_vm7, %v14349_v61, %v14348_v1  ;;  %v110_v52 = vld [vmem:[%s13218_s9] sm:$0xff] }
 0x594   :  { %v1284_v45 = vadd.f32 %v1260_v20, %v1094_v40  ;;  %v1261_v20 = vmul.f32 %v1237_v7, %v1164_v5 }
 0x595   :  { %2475 = vmatpush1.bf16.xpose.msra.mxu0 %v5474_v59  ;;  %v881_v59 = vmul.f32 %v857_v10, %v784_v41  ;;  %v14344_v41 = vld [vmem:[#allocation119_spill] sm:$0xff] }
 0x596   :  { %v1616_v10 = vmul.f32 %v14324_v14, %v14344_v41  ;;  %v1617_v14 = vmul.f32 %v14326_v24, %v14344_v41 }
 0x597   :  { %v905_v39 = vadd.f32 %v881_v59, %v715_v15  ;;  %v14345_v59 = vld [vmem:[#allocation118_spill] sm:$0xff] }
 0x598   :  { %v2413_v49 = vmax.f32 %v14345_v59, 1e-24  ;;  %v14351_v59 = vld [vmem:[#allocation113_spill] sm:$0xff] }
 0x599   :  { %v1095_v15 = vadd.f32 %v1071_v28, %v905_v39  ;;  %v1427_v39 = vmul.f32 %v14323_v51, %v14340_v55  ;;  %v1538_v27 = vsel %vm1526_vm6, %v14342_v47, %v14351_v59  ;;  %v14357_v51 = vld [vmem:[#allocation70_spill] sm:$0xff] }
 0x59a   :  { %5615 = vrsqrt.f32 %v2413_v49  ;;  %v1641_v49 = vmul.f32 %v1617_v14, %v1538_v27 }
 0x59b   :  { %v1285_v5 = vadd.f32 %v1261_v20, %v1095_v15 }
 0x59c   :  { %2507 = vmatmul.mubr.bf16.vlgmr.msra.gmra.mrb[20].mxu0 %v5472_v25  ;;  %v1450_v25 = vmul.f32 %v1426_v30, %v1354_v62  ;;  %v1640_v62 = vmul.f32 %v1616_v10, %v1544_v34  ;;  %v2443_v30 = vmax.f32 %v14346_v29, 1e-24  ;;  %v1451_v34 = vmul.f32 %v1427_v39, %v1348_v8 }
 0x59d   :  { %2629 = vmatprep.mubr.bf16.mxu0 %v14336_v31 }
 0x59e   :  { %v1474_v40 = vadd.f32 %v1450_v25, %v1284_v45  ;;  %v14350_v45 = vld [vmem:[#allocation71_spill] sm:$0xff]  ;;  %v1881_v25 = vpop.permute.xlu0 %1880  ;;  %5617 = vrsqrt.f32 %v2443_v30  ;;  %v1475_v20 = vadd.f32 %v1451_v34, %v1285_v5 }
 0x59f   :  { %v1806_v7 = vmul.f32 %v14325_v26, %v14350_v45  ;;  %v1924_v29 = vsel %vm1906_vm8, %v8334_v9, %v1881_v25  ;;  %v14353_v30 = vld [vmem:[#allocation43_spill] sm:$0xff]  ;;  %v1807_v8 = vmul.f32 %v14328_v4, %v14350_v45 }
 0x5a0   :  { %v1664_v28 = vadd.f32 %v1640_v62, %v1474_v40  ;;  %v14352_v40 = vld [vmem:[#allocation29_spill] sm:$0xff]  ;;  %v1728_v47 = vsel %vm1716_vm7, %v14348_v1, %v14353_v30 }
 0x5a1   :  { %v1830_v10 = vmul.f32 %v1806_v7, %v1734_v35  ;;  %v1996_v15 = vmul.f32 %v14327_v32, %v14352_v40  ;;  %v1665_v7 = vadd.f32 %v1641_v49, %v1475_v20  ;;  %v1831_v24 = vmul.f32 %v1807_v8, %v1728_v47  ;;  %v14356_v32 = vld [vmem:[#allocation97_spill] sm:$0xff] }
 0x5a3   :  { %v1854_v26 = vadd.f32 %v1830_v10, %v1664_v28  ;;  %v2020_v35 = vmul.f32 %v1996_v15, %v1924_v29  ;;  %v1997_v28 = vmul.f32 %v14330_v23, %v14352_v40  ;;  %v1855_v34 = vadd.f32 %v1831_v24, %v1665_v7 }
 0x5a4   :  { %v5616_v5 = vpop.eup %5615 }
 0x5a5   :  { %v2044_v39 = vadd.f32 %v2020_v35, %v1854_v26  ;;  %v14355_v35 = vld [vmem:[#allocation77_spill] sm:$0xff] }
 0x5a7   :  { %v2098_v1 = vadd.f32 %v8191_v37, %v2044_v39 }
 0x5a8   :  { %v5618_v29 = vpop.eup %5617 }
 0x5a9   :  { %v5470_v49 = vpack.c.bf16 %v2098_v1, %v2098_v1  ;;  %v2449_v47 = vmul.f32 %v5618_v29, %v14355_v35 }
 0x5ab   :  { %v2356_v24 = vsel %vm2302_vm10, %v5470_v49, 0  ;;  %v5479_v39 = vpack.c.bf16 %v2449_v47, %v2449_v47 }
 0x5b1   :  { %v2290_v62 = vpop.xlane.xlu0 %2289 }
 0x5b2   :  { %5619 = vrcp.f32 %v2290_v62  ;;  %v14354_v62 = vld [vmem:[#allocation152_spill] sm:$0xff] }
 0x5b3   :  { %v2419_v26 = vmul.f32 %v5616_v5, %v14354_v62 }
 0x5b5   :  { %v8379_v10 = vpop.permute.xlu0 %1892 }
 0x5b6   :  { %v1918_v14 = vsel %vm1906_vm8, %v1881_v25, %v8379_v10  ;;  %v2423_v25 = vmul.f32 %v2419_v26, %v14357_v51 }
 0x5b7   :  { %v2021_v27 = vmul.f32 %v1997_v28, %v1918_v14  ;;  %v14358_v14 = vld [vmem:[#allocation36_spill] sm:$0xff] }
 0x5b8   :  { %v5477_v28 = vpack.c.bf16 %v2423_v25, %v2423_v25 }
 0x5b9   :  { %v2045_v15 = vadd.f32 %v2021_v27, %v1855_v34  ;;  %v2448_v34 = vmul.f32 %v5618_v29, %v14358_v14  ;;  %v14359_v27 = vld [vmem:[#allocation156_spill] sm:$0xff] }
 0x5ba   :  { %v2418_v1 = vmul.f32 %v5616_v5, %v14359_v27 }
 0x5bb   :  { %v2099_v20 = vadd.f32 %v8191_v37, %v2045_v15  ;;  %v5478_v15 = vpack.c.bf16 %v2448_v34, %v2448_v34 }
 0x5bc   :  { %v5620_v8 = vpop.eup %5619 }
 0x5bd   :  { %v5471_v23 = vpack.c.bf16 %v2099_v20, %v2099_v20  ;;  %v2294_v4 = vmul.f32 %v5620_v8, %v14356_v32  ;;  %v2422_v32 = vmul.f32 %v2418_v1, %v14357_v51  ;;  %v14362_v8 = vld [vmem:[#allocation54_spill] sm:$0xff]  ;;  %v14363_v51 = vld [vmem:[#allocation41_spill] sm:$0xff] }
 0x5bf   :  { %5424 = vmatprep.subr.msk.bf16.mxu1 %vm2302_vm10, %v5471_v23  ;;  %v2296_v7 = vpack.c.bf16 %v2294_v4, %v2294_v4  ;;  %v5476_v62 = vpack.c.bf16 %v2422_v32, %v2422_v32 }
 0x5c0   :  { %2362 = vmatpush1.bf16.msra.mxu1 %v2356_v24  ;;  %v8472_v24 = vld [vmem:[%s13224_s15] sm:$0xff] }
 0x5c1   :  { %2522 = vmatprep.subr.bf16.mxu1 %v5479_v39 }
 0x5c3   :  { %5425 = vmatmul.mubr.msk.bf16.vlgmr.msra.gmra.mrb[16].mxu1 %vm2272_vm9, %v2296_v7  ;;  %v14373_v7 = vmov 3  }
 0x5c4   :  { %2554 = vmatprep.mubr.bf16.mxu1 %v5477_v28 }
 0x5c9   :  { %2523 = vmatpush1.bf16.xpose.msra.mxu1 %v5478_v15 }
 0x5d0   :  { %2555 = vmatmul.mubr.bf16.vlgmr.msra.gmra.mrb[20].mxu1 %v5476_v62  ;;  %v14366_v62 = vld [vmem:[#allocation56_spill] sm:$0xff] }
 0x5d1   :  { %2681 = vmatprep.mubr.bf16.mxu1 %v14336_v31 }
 0x662   :  { %v8397_v23 = vpop.f32.mrb[16].mxu0 }
 0x663   :  { %14360 = vst [vmem:[#allocation49_spill] sm:$0xff] %v8397_v23  ;;  %v8399_v26 = vpop.f32.mrb[17].mxu0  ;;  %v14375_v23 = vmov 6  }
 0x664   :  { %14361 = vst [vmem:[#allocation101_spill] sm:$0xff] %v8399_v26  ;;  %v2347_v4 = vpop.f32.mrb[18].mxu0 }
 0x665   :  { %v2348_v20 = vpop.f32.mrb[19].mxu0  ;;  %v14367_v4 = vld [vmem:[#allocation25_spill] sm:$0xff] }
 0x666   :  { %v8433_v20 = vpop.permute.xlu1 %560 }
 0x66f   :  { %v2508_v49 = vpop.f32.mrb[20].mxu0 }
 0x670   :  { %v2510_v35 = vpop.f32.mrb[21].mxu0  ;;  %v2562_v29 = vsel %vm2272_vm9, %v2508_v49, -inf }
 0x671   :  { %2563 = vmax.xlane.f32.xlu1 %v2562_v29  ;;  %v2511_v5 = vpop.f32.mrb[22].mxu0  ;;  %v8435_v35 = vpop.permute.xlu1 %750 }
 0x672   :  { %v2512_v47 = vpop.f32.mrb[23].mxu0  ;;  %14368 = vst [vmem:[#allocation110_spill] sm:$0xff] %v8435_v35  ;;  %v1049_v35 = vmul.f32 %v14384_v11, %v7985_v21  ;;  %v524_v21 = vmul.f32 %v8273_v56, %v14366_v62 }
 0x682   :  { %940 = vrot.lane.b32.xlu1 %v14362_v8, %s5713_s13 }
 0x686   :  { %1130 = vrot.lane.b32.xlu1 %v14362_v8, %s5716_s0 }
 0x68a   :  { %1332 = vrot.lane.b32.xlu1 %v14363_v51, %s5717_s20 }
 0x68e   :  { %1522 = vrot.lane.b32.xlu1 %v14363_v51, %s5718_s21 }
 0x692   :  { %1712 = vrot.lane.b32.xlu1 %v14363_v51, %s5719_s1 }
 0x696   :  { %v8412_v25 = vpop.f32.mrb[16].mxu1 }
 0x697   :  { %14364 = vst [vmem:[#allocation103_spill] sm:$0xff] %v8412_v25  ;;  %v8416_v39 = vpop.f32.mrb[17].mxu1  ;;  %v14377_v25 = vmov 7  }
 0x698   :  { %14365 = vst [vmem:[#allocation52_spill] sm:$0xff] %v8416_v39  ;;  %v2399_v28 = vpop.f32.mrb[18].mxu1  ;;  %v582_v39 = vsel %vm576_vm1, %v8433_v20, %v8001_v58 }
 0x699   :  { %v2400_v14 = vpop.f32.mrb[19].mxu1 }
 0x6a3   :  { %v2556_v34 = vpop.f32.mrb[20].mxu1 }
 0x6a4   :  { %v2558_v27 = vpop.f32.mrb[21].mxu1  ;;  %v2565_v1 = vsel %vm2272_vm9, %v2556_v34, -inf }
 0x6a5   :  { %2566 = vmax.xlane.f32.xlu0 %v2565_v1  ;;  %v2559_v15 = vpop.f32.mrb[22].mxu1  ;;  %v8446_v27 = vld [vmem:[%s13224_s15 + $0x8] sm:$0xff]  ;;  %v8454_v1 = vpop.permute.xlu0 %558 }
 0x6a6   :  { %v2560_v32 = vpop.f32.mrb[23].mxu1  ;;  %v8460_v15 = vld [vmem:[%s13224_s15 + $0x30] sm:$0xff] }
 0x6bb   :  { %752 = vrot.lane.b32.xlu0 %v14366_v62, %s5715_s29 }
 0x6bf   :  { %942 = vrot.lane.b32.xlu0 %v14366_v62, %s5713_s13 }
 0x6c3   :  { %1132 = vrot.lane.b32.xlu0 %v14366_v62, %s5716_s0 }
 0x6c7   :  { %1334 = vrot.lane.b32.xlu0 %v14367_v4, %s5717_s20 }
 0x6cb   :  { %1524 = vrot.lane.b32.xlu0 %v14367_v4, %s5718_s21 }
 0x6cf   :  { %1714 = vrot.lane.b32.xlu0 %v14367_v4, %s5719_s1 }
 0x6fe   :  { %v2564_v29 = vpop.xlane.xlu1 %2563 }
 0x6ff   :  { %v2568_v5 = vsub.f32 %v2508_v49, %v2564_v29  ;;  %v8452_v49 = vld [vmem:[%s13224_s15 + $0x20] sm:$0xff] }
 0x701   :  { %v2570_v47 = vmul.f32 1.442695, %v2568_v5 }
 0x703   :  { %5621 = vpow2.f32 %v2570_v47  ;;  %v14370_v47 = vmov 1  }
 0x70d   :  { %v8437_v28 = vpop.eup %5621 }
 0x70e   :  { %14369 = vst [vmem:[#allocation47_spill] sm:$0xff] %v8437_v28  ;;  %v2574_v14 = vsel %vm2272_vm9, %v8437_v28, 0.0  ;;  %v588_v28 = vsel %vm576_vm1, %v7999_v2, %v8433_v20 }
 0x70f   :  { %2575 = vadd.xlane.f32.xlu0 %v2574_v14 }
 0x725   :  { %1904 = vrot.lane.b32.xlu0 %v14367_v4, %s5720_s22 }
 0x729   :  { %3167 = vperm.xlu0 %5548, %v8446_v27  }
 0x72d   :  { %3182 = vperm.xlu0 %5548, %v8452_v49  }
 0x731   :  { %3192 = vperm.xlu0 %5548, %v8460_v15  }
 0x732   :  { %v2567_v32 = vpop.xlane.xlu0 %2566 }
 0x733   :  { %v2569_v29 = vsub.f32 %v2556_v34, %v2567_v32  ;;  %v14372_v32 = vmov 2  }
 0x735   :  { %v2572_v5 = vmul.f32 1.442695, %v2569_v29  ;;  %5552 = vset.pattern.permute.xlu0 %v14370_v47  ;;  %v8481_v29 = vld [vmem:[%s13224_s15 + $0x18] sm:$0xff] }
 0x736   :  { %3557 = vperm.xlu0 %5552, %v8446_v27  }
 0x737   :  { %5623 = vpow2.f32 %v2572_v5  ;;  %v8487_v5 = vld [vmem:[%s13224_s15 + $0x28] sm:$0xff] }
 0x73a   :  { %3569 = vperm.xlu0 %5552, %v8452_v49  }
 0x73e   :  { %3577 = vperm.xlu0 %5552, %v8460_v15  }
 0x741   :  { %v8467_v14 = vpop.eup %5623 }
 0x742   :  { %14371 = vst [vmem:[#allocation48_spill] sm:$0xff] %v8467_v14  ;;  %v2577_v34 = vsel %vm2272_vm9, %v8467_v14, 0.0  ;;  %5553 = vset.pattern.permute.xlu0 %v14372_v32  ;;  %v14379_v14 = vld [vmem:[#allocation5_spill] sm:$0xff] }
 0x743   :  { %2578 = vadd.xlane.f32.xlu1 %v2577_v34  ;;  %3777 = vperm.xlu0 %5553, %v8472_v24   ;;  %v8493_v34 = vld [vmem:[%s13224_s15 + $0x38] sm:$0xff] }
 0x747   :  { %3789 = vperm.xlu0 %5553, %v8481_v29  }
 0x74b   :  { %3797 = vperm.xlu0 %5553, %v8487_v5  }
 0x74f   :  { %3805 = vperm.xlu0 %5553, %v8493_v34  }
 0x753   :  { %5556 = vset.pattern.permute.xlu0 %v14373_v7 }
 0x754   :  { %1902 = vrot.lane.b32.xlu1 %v14363_v51, %s5720_s22  ;;  %4005 = vperm.xlu0 %5556, %v8446_v27  }
 0x758   :  { %2696 = vperm.xlu1 %5546, %v110_v52   ;;  %4017 = vperm.xlu0 %5556, %v8452_v49   ;;  %v132_v52 = vld [vmem:[%s13223_s14 + $0x30] sm:$0xff] }
 0x75c   :  { %2904 = vperm.xlu1 %5546, %v114_v0   ;;  %4025 = vperm.xlu0 %5556, %v8460_v15   ;;  %v128_v0 = vld [vmem:[%s13223_s14 + $0x10] sm:$0xff] }
 0x760   :  { %2922 = vperm.xlu1 %5546, %v116_v13   ;;  %5557 = vset.pattern.permute.xlu0 %v14374_v19  ;;  %v130_v13 = vld [vmem:[%s13223_s14 + $0x20] sm:$0xff]  ;;  %v14381_v19 = vld [vmem:[#allocation7_spill] sm:$0xff] }
 0x761   :  { %4225 = vperm.xlu0 %5557, %v8472_v24   ;;  %v858_v46 = vmul.f32 %v14381_v19, %v7979_v22  ;;  %v111_v22 = vld [vmem:[%s13218_s9 + $0x8] sm:$0xff] }
 0x764   :  { %2944 = vperm.xlu1 %5546, %v126_v6   ;;  %v14376_v6 = vmov 4  }
 0x765   :  { %4245 = vperm.xlu0 %5557, %v8487_v5  }
 0x768   :  { %2954 = vperm.xlu1 %5546, %v128_v0   ;;  %v8536_v0 = vld [vmem:[%s13224_s15 + $0x10] sm:$0xff] }
 0x769   :  { %4249 = vperm.xlu0 %5557, %v8460_v15  }
 0x76c   :  { %2964 = vperm.xlu1 %5546, %v130_v13   ;;  %v753_v13 = vpop.permute.xlu0 %752 }
 0x76d   :  { %5569 = vset.pattern.permute.xlu0 %v14375_v23  ;;  %v668_v23 = vmul.f32 %v14379_v14, %v8117_v12  ;;  %v772_v58 = vsel %vm766_vm2, %v753_v13, %v8077_v48  ;;  %v778_v2 = vsel %vm766_vm2, %v14335_v63, %v753_v13  ;;  %v525_v13 = vmul.f32 %v8273_v56, %v14367_v4  ;;  %v115_v4 = vld [vmem:[%s13220_s11 + $0x8] sm:$0xff] }
 0x76e   :  { %4453 = vperm.xlu0 %5569, %v8446_v27   ;;  %v882_v11 = vmul.f32 %v858_v46, %v778_v2  ;;  %v883_v36 = vmul.f32 %v859_v60, %v772_v58  ;;  %v14389_v2 = vld [vmem:[#allocation13_spill] sm:$0xff] }
 0x76f   :  { %v692_v20 = vmul.f32 %v668_v23, %v588_v28 }
 0x770   :  { %2974 = vperm.xlu1 %5546, %v132_v52   ;;  %v943_v52 = vpop.permute.xlu0 %942 }
 0x771   :  { %v962_v48 = vsel %vm956_vm3, %v943_v52, %v8034_v17  ;;  %v968_v63 = vsel %vm956_vm3, %v14337_v54, %v943_v52  ;;  %v716_v62 = vadd.f32 %v692_v20, %v524_v21  ;;  %v1618_v20 = vmul.f32 %v14389_v2, %v14344_v41 }
 0x772   :  { %4461 = vperm.xlu0 %5569, %v8481_v29   ;;  %v1072_v46 = vmul.f32 %v1048_v33, %v968_v63  ;;  %v1073_v60 = vmul.f32 %v1049_v35, %v962_v48  ;;  %v14390_v63 = vld [vmem:[#allocation14_spill] sm:$0xff] }
 0x773   :  { %v906_v33 = vadd.f32 %v882_v11, %v716_v62  ;;  %v1619_v21 = vmul.f32 %v14390_v63, %v14344_v41  ;;  %v14391_v41 = vld [vmem:[#allocation15_spill] sm:$0xff] }
 0x774   :  { %5549 = vset.pattern.permute.xlu1 %v14376_v6  ;;  %v1133_v6 = vpop.permute.xlu0 %1132 }
 0x775   :  { %3162 = vperm.xlu1 %5549, %v8472_v24   ;;  %v1152_v17 = vsel %vm1146_vm4, %v1133_v6, %v14334_v3  ;;  %v1158_v54 = vsel %vm1146_vm4, %v14341_v42, %v1133_v6  ;;  %v14388_v3 = vld [vmem:[#allocation12_spill] sm:$0xff] }
 0x776   :  { %4477 = vperm.xlu0 %5569, %v8493_v34   ;;  %v1429_v58 = vmul.f32 %v14388_v3, %v14340_v55 }
 0x778   :  { %v1335_v26 = vpop.permute.xlu0 %1334 }
 0x779   :  { %3172 = vperm.xlu1 %5549, %v8536_v0   ;;  %v1342_v42 = vsel %vm1336_vm5, %v14347_v43, %v1335_v26  ;;  %v1360_v6 = vsel %vm1336_vm5, %v1335_v26, %v14339_v50  ;;  %v1096_v50 = vadd.f32 %v1072_v46, %v906_v33 }
 0x77a   :  { %5573 = vset.pattern.permute.xlu0 %v14377_v25  ;;  %v14378_v25 = vmov 8   ;;  %v1453_v26 = vmul.f32 %v1429_v58, %v1360_v6  ;;  %v14394_v6 = vld [vmem:[#allocation19_spill] sm:$0xff] }
 0x77b   :  { %4673 = vperm.xlu0 %5573, %v8472_v24  }
 0x77c   :  { %v1525_v18 = vpop.permute.xlu0 %1524 }
 0x77d   :  { %3177 = vperm.xlu1 %5549, %v8481_v29   ;;  %v1550_v43 = vsel %vm1526_vm6, %v1525_v18, %v14343_v16 }
 0x77f   :  { %4681 = vperm.xlu0 %5573, %v8536_v0  }
 0x780   :  { %v1715_v48 = vpop.permute.xlu0 %1714 }
 0x781   :  { %3187 = vperm.xlu1 %5549, %v8487_v5   ;;  %v1740_v16 = vsel %vm1716_vm7, %v1715_v48, %v14349_v61  ;;  %v14393_v61 = vld [vmem:[#allocation18_spill] sm:$0xff] }
 0x783   :  { %4689 = vperm.xlu0 %5573, %v8452_v49  }
 0x785   :  { %3197 = vperm.xlu1 %5549, %v8493_v34  }
 0x787   :  { %4697 = vperm.xlu0 %5573, %v8460_v15  }
 0x789   :  { %5550 = vset.pattern.permute.xlu1 %v14336_v31 }
 0x78a   :  { %3333 = vperm.xlu1 %5550, %v8446_v27  }
 0x78b   :  { %5575 = vset.pattern.permute.xlu0 %v14378_v25  ;;  %v14380_v25 = vld [vmem:[#allocation6_spill] sm:$0xff] }
 0x78c   :  { %4909 = vperm.xlu0 %5575, %v8481_v29   ;;  %v669_v44 = vmul.f32 %v14380_v25, %v8117_v12 }
 0x78e   :  { %3337 = vperm.xlu1 %5550, %v8536_v0   ;;  %v693_v12 = vmul.f32 %v669_v44, %v582_v39  ;;  %v14385_v44 = vld [vmem:[#allocation9_spill] sm:$0xff]  ;;  %v14386_v39 = vld [vmem:[#allocation10_spill] sm:$0xff] }
 0x78f   :  { %v1238_v23 = vmul.f32 %v14385_v44, %v8036_v57  ;;  %v1239_v28 = vmul.f32 %v14386_v39, %v8036_v57  ;;  %v14387_v57 = vld [vmem:[#allocation11_spill] sm:$0xff] }
 0x790   :  { %4925 = vperm.xlu0 %5575, %v8493_v34   ;;  %v1428_v52 = vmul.f32 %v14387_v57, %v14340_v55  ;;  %v717_v56 = vadd.f32 %v693_v12, %v525_v13  ;;  %v1532_v55 = vsel %vm1526_vm6, %v14351_v59, %v1525_v18  ;;  %v1808_v59 = vmul.f32 %v14391_v41, %v14350_v45 }
 0x791   :  { %v1262_v12 = vmul.f32 %v1238_v23, %v1158_v54  ;;  %v117_v23 = vld [vmem:[%s13221_s12 + $0x8] sm:$0xff]  ;;  %v1722_v18 = vsel %vm1716_vm7, %v14353_v30, %v1715_v48  ;;  %v1642_v54 = vmul.f32 %v1618_v20, %v1532_v55  ;;  %v1999_v20 = vmul.f32 %v14394_v6, %v14352_v40 }
 0x792   :  { %3345 = vperm.xlu1 %5550, %v8452_v49   ;;  %v907_v35 = vadd.f32 %v883_v36, %v717_v56  ;;  %v1452_v36 = vmul.f32 %v1428_v52, %v1342_v42  ;;  %v1643_v52 = vmul.f32 %v1619_v21, %v1550_v43  ;;  %v1998_v42 = vmul.f32 %v14393_v61, %v14352_v40  ;;  %v129_v43 = vld [vmem:[%s13223_s14 + $0x18] sm:$0xff] }
 0x794   :  { %5578 = vset.pattern.permute.xlu0 %v14336_v31  ;;  %v1097_v11 = vadd.f32 %v1073_v60, %v907_v35  ;;  %v1832_v60 = vmul.f32 %v1808_v59, %v1722_v18  ;;  %v133_v59 = vld [vmem:[%s13223_s14 + $0x38] sm:$0xff] }
 0x795   :  { %2701 = vperm.xlu0 %5578, %v111_v22   ;;  %v1263_v22 = vmul.f32 %v1239_v28, %v1152_v17  ;;  %v14392_v28 = vld [vmem:[#allocation16_spill] sm:$0xff] }
 0x796   :  { %3353 = vperm.xlu1 %5550, %v8460_v15   ;;  %v1809_v13 = vmul.f32 %v14392_v28, %v14350_v45  ;;  %v127_v45 = vld [vmem:[%s13223_s14 + $0x8] sm:$0xff] }
 0x797   :  { %v1287_v17 = vadd.f32 %v1263_v22, %v1097_v11 }
 0x799   :  { %2909 = vperm.xlu0 %5578, %v115_v4   ;;  %v1477_v46 = vadd.f32 %v1453_v26, %v1287_v17  ;;  %v1833_v4 = vmul.f32 %v1809_v13, %v1740_v16  ;;  %v14395_v16 = vld [vmem:[#allocation130_spill] sm:$0xff]  ;;  %v14396_v17 = vld [vmem:[#allocation73_spill] sm:$0xff] }
 0x79a   :  { %5551 = vset.pattern.permute.xlu1 %v14370_v47  ;;  %v1286_v47 = vadd.f32 %v1262_v12, %v1096_v50 }
 0x79b   :  { %3553 = vperm.xlu1 %5551, %v8472_v24   ;;  %v1667_v58 = vadd.f32 %v1643_v52, %v1477_v46  ;;  %v14397_v52 = vld [vmem:[#allocation38_spill] sm:$0xff] }
 0x79c   :  { %v8643_v62 = vpop.xlane.xlu0 %2575  ;;  %v1476_v56 = vadd.f32 %v1452_v36, %v1286_v47  ;;  %v581_v47 = vsel %vm576_vm1, %v8454_v1, %v14395_v16  ;;  %v665_v46 = vmul.f32 %v14380_v25, %v14397_v52 }
 0x79d   :  { %2927 = vperm.xlu0 %5578, %v117_v23   ;;  %v1857_v48 = vadd.f32 %v1833_v4, %v1667_v58  ;;  %5625 = vrcp.f32 %v8643_v62 }
 0x79e   :  { %v1666_v30 = vadd.f32 %v1642_v54, %v1476_v56  ;;  %v587_v54 = vsel %vm576_vm1, %v14396_v17, %v8454_v1  ;;  %v664_v56 = vmul.f32 %v14379_v14, %v14397_v52  ;;  %v689_v4 = vmul.f32 %v665_v46, %v581_v47  ;;  %v14399_v1 = vld [vmem:[#allocation158_spill] sm:$0xff]  ;;  %v14409_v47 = vld [vmem:[#allocation61_spill] sm:$0xff]  ;;  %v14411_v52 = vld [vmem:[#allocation128_spill] sm:$0xff] }
 0x79f   :  { %3561 = vperm.xlu1 %5551, %v8536_v0   ;;  %v854_v58 = vmul.f32 %v14381_v19, %v14399_v1 }
 0x7a0   :  { %v1905_v33 = vpop.permute.xlu0 %1904  ;;  %v1856_v22 = vadd.f32 %v1832_v60, %v1666_v30  ;;  %v688_v60 = vmul.f32 %v664_v56, %v587_v54  ;;  %v1424_v56 = vmul.f32 %v14387_v57, %v14411_v52 }
 0x7a1   :  { %v1912_v35 = vsel %vm1906_vm8, %v8379_v10, %v1905_v33  ;;  %v1930_v12 = vsel %vm1906_vm8, %v1905_v33, %v8334_v9  ;;  %2949 = vperm.xlu0 %5578, %v127_v45   ;;  %v131_v9 = vld [vmem:[%s13223_s14 + $0x28] sm:$0xff]  ;;  %v14398_v45 = vld [vmem:[#allocation145_spill] sm:$0xff] }
 0x7a2   :  { %v2022_v21 = vmul.f32 %v1998_v42, %v1912_v35  ;;  %v2023_v55 = vmul.f32 %v1999_v20, %v1930_v12  ;;  %v520_v30 = vmul.f32 %v14398_v45, %v14362_v8  ;;  %v855_v42 = vmul.f32 %v14382_v53, %v14399_v1  ;;  %v14400_v33 = vld [vmem:[#allocation157_spill] sm:$0xff] }
 0x7a3   :  { %3565 = vperm.xlu1 %5551, %v8481_v29   ;;  %v521_v20 = vmul.f32 %v14398_v45, %v14363_v51  ;;  %v1234_v35 = vmul.f32 %v14385_v44, %v14400_v33  ;;  %v14405_v51 = vld [vmem:[#allocation148_spill] sm:$0xff]  ;;  %v1235_v16 = vmul.f32 %v14386_v39, %v14400_v33  ;;  %v1425_v45 = vmul.f32 %v14388_v3, %v14411_v52  ;;  %v14414_v33 = vld [vmem:[#allocation45_spill] sm:$0xff] }
 0x7a4   :  { %v2046_v40 = vadd.f32 %v2022_v21, %v1856_v22  ;;  %v2047_v50 = vadd.f32 %v2023_v55, %v1857_v48  ;;  %v14401_v22 = vld [vmem:[#allocation17_spill] sm:$0xff]  ;;  %v14402_v48 = vld [vmem:[#allocation110_spill] sm:$0xff]  ;;  %v14403_v21 = vld [vmem:[#allocation67_spill] sm:$0xff] }
 0x7a5   :  { %2959 = vperm.xlu0 %5578, %v129_v43   ;;  %v771_v8 = vsel %vm766_vm2, %v14402_v48, %v14401_v22  ;;  %v777_v55 = vsel %vm766_vm2, %v14403_v21, %v14402_v48  ;;  %v14404_v43 = vld [vmem:[#allocation22_spill] sm:$0xff]  ;;  %v1804_v22 = vmul.f32 %v14391_v41, %v14414_v33 }
 0x7a6   :  { %v2101_v10 = vadd.f32 %v8191_v37, %v2047_v50  ;;  %v2100_v11 = vadd.f32 %v8191_v37, %v2046_v40  ;;  %v941_v37 = vpop.permute.xlu1 %940  ;;  %v878_v46 = vmul.f32 %v854_v58, %v777_v55  ;;  %v149_v58 = vld [vmem:[%s13225_s16 + $0x38] sm:$0xff] }
 0x7a7   :  { %3573 = vperm.xlu1 %5551, %v8487_v5   ;;  %v961_v40 = vsel %vm956_vm3, %v941_v37, %v14404_v43  ;;  %v967_v50 = vsel %vm956_vm3, %v14405_v51, %v941_v37  ;;  %v14410_v37 = vld [vmem:[#allocation39_spill] sm:$0xff]  ;;  %v14415_v43 = vld [vmem:[#allocation149_spill] sm:$0xff] }
 0x7a8   :  { %v5483_v36 = vpack.c.bf16 %v2101_v10, %v2101_v10  ;;  %v5482_v26 = vpack.c.bf16 %v2100_v11, %v2100_v11  ;;  %v146_v10 = vld [vmem:[%s13225_s16 + $0x20] sm:$0xff]  ;;  %v712_v11 = vadd.f32 %v688_v60, %v520_v30  ;;  %v14412_v30 = vld [vmem:[#allocation122_spill] sm:$0xff]  ;;  %v1615_v51 = vmul.f32 %v14390_v63, %v14415_v43 }
 0x7a9   :  { %2969 = vperm.xlu0 %5578, %v131_v9   ;;  %v713_v9 = vadd.f32 %v689_v4, %v521_v20  ;;  %v14413_v20 = vld [vmem:[#allocation121_spill] sm:$0xff] }
 0x7aa   :  { %5440 = vmatprep.subr.msk.bf16.mxu1 %vm2302_vm10, %v5483_v36  ;;  %v2644_v23 = vsel %vm2302_vm10, %v5482_v26, 0  ;;  %v1131_v13 = vpop.permute.xlu1 %1130  ;;  %v14406_v36 = vld [vmem:[#allocation150_spill] sm:$0xff]  ;;  %v14407_v26 = vld [vmem:[#allocation20_spill] sm:$0xff] }
 0x7ab   :  { %3581 = vperm.xlu1 %5551, %v8493_v34   ;;  %2650 = vmatpush1.bf16.msra.mxu1 %v2644_v23  ;;  %v1044_v23 = vmul.f32 %v14407_v26, %v14406_v36  ;;  %v1151_v17 = vsel %vm1146_vm4, %v1131_v13, %v14409_v47  ;;  %v1157_v54 = vsel %vm1146_vm4, %v14410_v37, %v1131_v13 }
 0x7ac   :  { %v1259_v21 = vmul.f32 %v1235_v16, %v1151_v17  ;;  %v14418_v16 = vld [vmem:[#allocation66_spill] sm:$0xff]  ;;  %v14419_v17 = vld [vmem:[#allocation124_spill] sm:$0xff] }
 0x7ad   :  { %2979 = vperm.xlu0 %5578, %v133_v59   ;;  %v14408_v59 = vld [vmem:[#allocation21_spill] sm:$0xff]  ;;  %v1068_v60 = vmul.f32 %v1044_v23, %v967_v50  ;;  %v14416_v50 = vld [vmem:[#allocation126_spill] sm:$0xff] }
 0x7ae   :  { %v1333_v18 = vpop.permute.xlu1 %1332 }
 0x7af   :  { %5554 = vset.pattern.permute.xlu1 %v14372_v32  ;;  %v142_v32 = vld [vmem:[%s13225_s16] sm:$0xff]  ;;  %v1341_v1 = vsel %vm1336_vm5, %v14412_v30, %v1333_v18  ;;  %v1359_v13 = vsel %vm1336_vm5, %v1333_v18, %v14413_v20  ;;  %v14420_v20 = vld [vmem:[#allocation115_spill] sm:$0xff] }
 0x7b0   :  { %3781 = vperm.xlu1 %5554, %v8446_v27   ;;  %v1449_v23 = vmul.f32 %v1425_v45, %v1359_v13  ;;  %v1994_v13 = vmul.f32 %v14393_v61, %v14420_v20  ;;  %v1995_v62 = vmul.f32 %v14394_v6, %v14420_v20  ;;  %v14435_v20 = vmov 8  }
 0x7b1   :  { %3329 = vperm.xlu0 %5578, %v8472_v24  }
 0x7b2   :  { %v1523_v12 = vpop.permute.xlu1 %1522 }
 0x7b3   :  { %v1531_v18 = vsel %vm1526_vm6, %v14416_v50, %v1523_v12 }
 0x7b4   :  { %3785 = vperm.xlu1 %5554, %v8536_v0  }
 0x7b5   :  { %3341 = vperm.xlu0 %5578, %v8481_v29  }
 0x7b6   :  { %v1713_v55 = vpop.permute.xlu1 %1712 }
 0x7b7   :  { %v1721_v47 = vsel %vm1716_vm7, %v14418_v16, %v1713_v55  ;;  %v1739_v37 = vsel %vm1716_vm7, %v1713_v55, %v14419_v17  ;;  %v14426_v16 = vld [vmem:[#allocation48_spill] sm:$0xff]  ;;  %v14427_v17 = vld [vmem:[#allocation47_spill] sm:$0xff] }
 0x7b8   :  { %3793 = vperm.xlu1 %5554, %v8452_v49  }
 0x7b9   :  { %3349 = vperm.xlu0 %5578, %v8487_v5  }
 0x7bc   :  { %3801 = vperm.xlu1 %5554, %v8460_v15  }
 0x7bd   :  { %3357 = vperm.xlu0 %5578, %v8493_v34  }
 0x7c0   :  { %5555 = vset.pattern.permute.xlu1 %v14373_v7  ;;  %v145_v7 = vld [vmem:[%s13225_s16 + $0x18] sm:$0xff] }
 0x7c1   :  { %4001 = vperm.xlu1 %5555, %v8472_v24   ;;  %5026 = vperm.xlu0 %5578, %v142_v32   ;;  %v1045_v32 = vmul.f32 %v14408_v59, %v14406_v36 }
 0x7c3   :  { %v1069_v4 = vmul.f32 %v1045_v32, %v961_v40  ;;  %v1614_v40 = vmul.f32 %v14389_v2, %v14415_v43  ;;  %v1805_v32 = vmul.f32 %v14392_v28, %v14414_v33 }
 0x7c5   :  { %4009 = vperm.xlu1 %5555, %v8536_v0   ;;  %5041 = vperm.xlu0 %5578, %v145_v7   ;;  %v879_v7 = vmul.f32 %v855_v42, %v771_v8  ;;  %v902_v42 = vadd.f32 %v878_v46, %v712_v11  ;;  %v1258_v8 = vmul.f32 %v1234_v35, %v1157_v54 }
 0x7c6   :  { %v1638_v52 = vmul.f32 %v1614_v40, %v1531_v18  ;;  %v1829_v45 = vmul.f32 %v1805_v32, %v1739_v37  ;;  %v5626_v18 = vpop.eup %5625 }
 0x7c7   :  { %v903_v48 = vadd.f32 %v879_v7, %v713_v9  ;;  %v1092_v11 = vadd.f32 %v1068_v60, %v902_v42  ;;  %v1448_v9 = vmul.f32 %v1424_v56, %v1341_v1  ;;  %v2582_v37 = vmul.f32 %v5626_v18, %v14427_v17 }
 0x7c9   :  { %4013 = vperm.xlu1 %5555, %v8481_v29   ;;  %5046 = vperm.xlu0 %5578, %v146_v10   ;;  %v14417_v10 = vld [vmem:[#allocation33_spill] sm:$0xff]  ;;  %v1093_v35 = vadd.f32 %v1069_v4, %v903_v48  ;;  %v1828_v4 = vmul.f32 %v1804_v22, %v1721_v47  ;;  %v14422_v48 = vld [vmem:[#allocation26_spill] sm:$0xff] }
 0x7ca   :  { %v1549_v36 = vsel %vm1526_vm6, %v1523_v12, %v14417_v10  ;;  %v1282_v12 = vadd.f32 %v1258_v8, %v1092_v11  ;;  %v14424_v10 = vld [vmem:[#allocation99_spill] sm:$0xff] }
 0x7cb   :  { %v1283_v54 = vadd.f32 %v1259_v21, %v1093_v35  ;;  %v1639_v46 = vmul.f32 %v1615_v51, %v1549_v36  ;;  %v14423_v21 = vmov 5   ;;  %v14425_v35 = vmov 6  }
 0x7cc   :  { %v1472_v7 = vadd.f32 %v1448_v9, %v1282_v12 }
 0x7cd   :  { %4021 = vperm.xlu1 %5555, %v8487_v5   ;;  %5061 = vperm.xlu0 %5578, %v149_v58   ;;  %v1473_v60 = vadd.f32 %v1449_v23, %v1283_v54  ;;  %v14421_v58 = vld [vmem:[#allocation28_spill] sm:$0xff] }
 0x7ce   :  { %v1662_v30 = vadd.f32 %v1638_v52, %v1472_v7  ;;  %v14428_v52 = vld [vmem:[#allocation52_spill] sm:$0xff]  ;;  %v2584_v7 = vpack.c.bf16 %v2582_v37, %v2582_v37 }
 0x7cf   :  { %v1663_v1 = vadd.f32 %v1639_v46, %v1473_v60  ;;  %v14429_v46 = vld [vmem:[#allocation101_spill] sm:$0xff]  ;;  %v14431_v60 = vld [vmem:[#allocation103_spill] sm:$0xff] }
 0x7d0   :  { %v2579_v56 = vpop.xlane.xlu1 %2578  ;;  %v1852_v22 = vadd.f32 %v1828_v4, %v1662_v30  ;;  %v14432_v4 = vld [vmem:[#allocation49_spill] sm:$0xff] }
 0x7d1   :  { %5627 = vrcp.f32 %v2579_v56  ;;  %4029 = vperm.xlu1 %5555, %v8493_v34   ;;  %v1853_v55 = vadd.f32 %v1829_v45, %v1663_v1  ;;  %v14430_v56 = vpack.c.bf16 %v14428_v52, %v14429_v46  ;;  %v14433_v45 = vpack.c.bf16 %v14431_v60, %v14432_v4  ;;  %v8817_v30 = vld [vmem:[%s13217_s8] sm:$0xff]  }
 0x7d2   :  { %v14434_v1 = vmov 7  }
 0x7d4   :  { %v1903_v33 = vpop.permute.xlu1 %1902 }
 0x7d5   :  { %v1911_v42 = vsel %vm1906_vm8, %v14421_v58, %v1903_v33  ;;  %v1929_v8 = vsel %vm1906_vm8, %v1903_v33, %v14422_v48  ;;  %5558 = vset.pattern.permute.xlu1 %v14423_v21 }
 0x7d6   :  { %v2018_v43 = vmul.f32 %v1994_v13, %v1911_v42  ;;  %v2019_v40 = vmul.f32 %v1995_v62, %v1929_v8  ;;  %4229 = vperm.xlu1 %5558, %v8446_v27   ;;  %v8834_v13 = vpop.permute.xlu0 %3167 }
 0x7d7   :  { %14436 = vst [vmem:[#allocation112_spill] sm:$0xff] %v8834_v13 }
 0x7d8   :  { %v2042_v51 = vadd.f32 %v2018_v43, %v1852_v22  ;;  %v2043_v50 = vadd.f32 %v2019_v40, %v1853_v55 }
 0x7da   :  { %v2097_v36 = vadd.f32 %v14424_v10, %v2043_v50  ;;  %v2096_v11 = vadd.f32 %v14424_v10, %v2042_v51  ;;  %5559 = vset.pattern.permute.xlu1 %v14425_v35  ;;  %v8836_v62 = vpop.permute.xlu0 %3182 }
 0x7db   :  { %v5628_v9 = vpop.eup %5627  ;;  %4449 = vperm.xlu1 %5559, %v8472_v24   ;;  %14437 = vst [vmem:[#allocation40_spill] sm:$0xff] %v8836_v62 }
 0x7dc   :  { %v5481_v23 = vpack.c.bf16 %v2097_v36, %v2097_v36  ;;  %v5480_v32 = vpack.c.bf16 %v2096_v11, %v2096_v11  ;;  %v2583_v47 = vmul.f32 %v5628_v9, %v14426_v16  ;;  %v143_v36 = vld [vmem:[%s13225_s16 + $0x8] sm:$0xff]  ;;  %v144_v9 = vld [vmem:[%s13225_s16 + $0x10] sm:$0xff] }
 0x7de   :  { %5436 = vmatprep.subr.msk.bf16.mxu0 %vm2302_vm10, %v5481_v23  ;;  %v2592_v12 = vsel %vm2302_vm10, %v5480_v32, 0  ;;  %v2585_v54 = vpack.c.bf16 %v2583_v47, %v2583_v47  ;;  %v8838_v33 = vpop.permute.xlu0 %3192 }
 0x7df   :  { %2598 = vmatpush1.bf16.msra.mxu0 %v2592_v12  ;;  %5560 = vset.pattern.permute.xlu1 %v14423_v21  ;;  %14438 = vst [vmem:[#allocation75_spill] sm:$0xff] %v8838_v33 }
 0x7e0   :  { %2712 = vmatprep.subr.bf16.mxu0 %v14430_v56  ;;  %5441 = vmatmul.mubr.msk.bf16.vlgmr.msra.gmra.mrb[24].mxu1 %vm2272_vm9, %v2585_v54 }
 0x7e1   :  { %2787 = vmatprep.mubr.bf16.mxu1 %v14336_v31  ;;  %4233 = vperm.xlu1 %5560, %v8536_v0  }
 0x7e2   :  { %5437 = vmatmul.mubr.msk.bf16.vlgmr.msra.gmra.mrb[24].mxu0 %vm2272_vm9, %v2584_v7  ;;  %v8840_v58 = vpop.permute.xlu0 %3557 }
 0x7e3   :  { %2713 = vmatpush1.bf16.msra.mxu0 %v14433_v45  ;;  %2744 = vmatprep.mubr.bf16.mxu0 %v14336_v31 }
 0x7e5   :  { %4237 = vperm.xlu1 %5560, %v8481_v29  }
 0x7e9   :  { %5561 = vset.pattern.permute.xlu1 %v14434_v1 }
 0x7ea   :  { %5443 = vmatmul.mubr.msk.bf16.vlgmr.msra.gmra.mrb[28].mxu0 %vm336_vm0, %v8817_v30  ;;  %4677 = vperm.xlu1 %5561, %v8446_v27  }
 0x7eb   :  { %3046 = vmatprep.mubr.bf16.mxu0 %v14336_v31 }
 0x7ee   :  { %5562 = vset.pattern.permute.xlu1 %v14425_v35 }
 0x7ef   :  { %4457 = vperm.xlu1 %5562, %v8536_v0  }
 0x7f3   :  { %5563 = vset.pattern.permute.xlu1 %v14435_v20 }
 0x7f4   :  { %4897 = vperm.xlu1 %5563, %v8472_v24   ;;  %v8842_v24 = vpop.permute.xlu0 %3569 }
 0x7f8   :  { %4901 = vperm.xlu1 %5563, %v8446_v27   ;;  %v8844_v27 = vpop.permute.xlu0 %3577 }
 0x7fc   :  { %5564 = vset.pattern.permute.xlu1 %v14434_v1  ;;  %v8846_v42 = vpop.permute.xlu0 %3777 }
 0x7fd   :  { %4685 = vperm.xlu1 %5564, %v8481_v29  }
 0x800   :  { %v8848_v29 = vpop.permute.xlu0 %3789 }
 0x801   :  { %5565 = vset.pattern.permute.xlu1 %v14435_v20 }
 0x802   :  { %4905 = vperm.xlu1 %5565, %v8536_v0  }
 0x804   :  { %v8850_v48 = vpop.permute.xlu0 %3797 }
 0x806   :  { %5566 = vset.pattern.permute.xlu1 %v14336_v31 }
 0x807   :  { %5031 = vperm.xlu1 %5566, %v143_v36  }
 0x808   :  { %v8852_v0 = vpop.permute.xlu0 %3805 }
 0x80b   :  { %5036 = vperm.xlu1 %5566, %v144_v9  }
 0x80c   :  { %v8854_v8 = vpop.permute.xlu0 %4005 }
 0x80f   :  { %5567 = vset.pattern.permute.xlu1 %v14423_v21 }
 0x810   :  { %v8856_v22 = vpop.permute.xlu0 %4017  ;;  %4241 = vperm.xlu1 %5567, %v8452_v49  }
 0x814   :  { %v8858_v55 = vpop.permute.xlu0 %4025  ;;  %5568 = vset.pattern.permute.xlu1 %v14425_v35 }
 0x815   :  { %4465 = vperm.xlu1 %5568, %v8452_v49  }
 0x818   :  { %v8860_v43 = vpop.permute.xlu0 %4225 }
 0x819   :  { %4469 = vperm.xlu1 %5568, %v8487_v5  }
 0x81c   :  { %v8862_v40 = vpop.permute.xlu0 %4245 }
 0x81d   :  { %5570 = vset.pattern.permute.xlu1 %v14423_v21  ;;  %v8901_v21 = vpop.permute.xlu1 %2696 }
 0x81e   :  { %4253 = vperm.xlu1 %5570, %v8493_v34  }
 0x820   :  { %v8864_v51 = vpop.permute.xlu0 %4249 }
 0x822   :  { %5571 = vset.pattern.permute.xlu1 %v14434_v1 }
 0x823   :  { %4693 = vperm.xlu1 %5571, %v8487_v5  }
 0x824   :  { %v8866_v50 = vpop.permute.xlu0 %4453 }
 0x827   :  { %5572 = vset.pattern.permute.xlu1 %v14425_v35 }
 0x828   :  { %v8868_v18 = vpop.permute.xlu0 %4461  ;;  %4473 = vperm.xlu1 %5572, %v8460_v15  }
 0x82c   :  { %v8870_v10 = vpop.permute.xlu0 %4477  ;;  %5574 = vset.pattern.permute.xlu1 %v14435_v20 }
 0x82d   :  { %4913 = vperm.xlu1 %5574, %v8452_v49   ;;  %v5675_v49 = vld [vmem:[%s13849_s24 + $0x28] sm:$0xff] }
 0x830   :  { %v8875_v11 = vpop.permute.xlu0 %4673 }
 0x831   :  { %14439 = vst [vmem:[#allocation105_spill] sm:$0xff] %v8875_v11  ;;  %4917 = vperm.xlu1 %5574, %v8487_v5  }
 0x834   :  { %v8880_v23 = vpop.permute.xlu0 %4681 }
 0x835   :  { %14440 = vst [vmem:[#allocation139_spill] sm:$0xff] %v8880_v23  ;;  %5576 = vset.pattern.permute.xlu1 %v14434_v1 }
 0x838   :  { %v8884_v32 = vpop.permute.xlu0 %4689 }
 0x839   :  { %14441 = vst [vmem:[#allocation53_spill] sm:$0xff] %v8884_v32 }
 0x83c   :  { %v8888_v16 = vpop.permute.xlu0 %4697 }
 0x83d   :  { %14442 = vst [vmem:[#allocation107_spill] sm:$0xff] %v8888_v16 }
 0x840   :  { %v8893_v47 = vpop.permute.xlu0 %4909 }
 0x841   :  { %14443 = vst [vmem:[#allocation87_spill] sm:$0xff] %v8893_v47 }
 0x844   :  { %v8897_v45 = vpop.permute.xlu0 %4925 }
 0x845   :  { %14444 = vst [vmem:[#allocation83_spill] sm:$0xff] %v8897_v45 }
 0x8b3   :  { %v2683_v17 = vpop.f32.mrb[24].mxu1 }
 0x8b4   :  { %v2685_v37 = vpop.f32.mrb[25].mxu1 }
 0x8b5   :  { %v2631_v12 = vpop.f32.mrb[24].mxu0  ;;  %v2687_v54 = vpop.f32.mrb[26].mxu1 }
 0x8b6   :  { %v2692_v52 = vpack.c.bf16 %v2683_v17, %v2631_v12  ;;  %v2633_v46 = vpop.f32.mrb[25].mxu0  ;;  %v2688_v56 = vpop.f32.mrb[27].mxu1 }
 0x8b7   :  { %v2693_v7 = vpack.c.bf16 %v2685_v37, %v2633_v46  ;;  %v2635_v60 = vpop.f32.mrb[26].mxu0  ;;  %v8907_v37 = vpop.permute.xlu0 %2701 }
 0x8b8   :  { %v2636_v4 = vpop.f32.mrb[27].mxu0 }
 0x8b9   :  { %2755 = vmatprep.subr.bf16.mxu1 %v2693_v7  ;;  %v5673_v7 = vld [vmem:[%s13849_s24 + $0x20] sm:$0xff]  ;;  %v5674_v4 = vld [vmem:[%s13849_s24 + $0x8] sm:$0xff] }
 0x8ba   :  { %2756 = vmatpush1.bf16.msra.mxu1 %v2692_v52 }
 0x8bd   :  { %v2746_v36 = vpop.f32.mrb[28].mxu0  ;;  %5444 = vmatmul.mubr.msk.bf16.vlgmr.msra.gmra.mrb[28].mxu1 %vm336_vm0, %v8817_v30  ;;  %v5672_v30 = vld [vmem:[%s13849_s24] sm:$0xff] }
 0x8be   :  { %v2747_v9 = vadd.f32 %v2746_v36, %v8901_v21  ;;  %v2748_v17 = vpop.f32.mrb[29].mxu0  ;;  %3119 = vmatprep.mubr.bf16.mxu1 %v14336_v31 }
 0x8bf   :  { %v2749_v12 = vadd.f32 %v2748_v17, %v8901_v21  ;;  %v2750_v54 = vpop.f32.mrb[30].mxu0 }
 0x8c0   :  { %v2751_v35 = vadd.f32 %v2750_v54, %v8907_v37  ;;  %v2752_v52 = vpop.f32.mrb[31].mxu0  ;;  %v8917_v56 = vadd.f32 %v5672_v30, %v2747_v9 }
 0x8c1   :  { %v2753_v46 = vadd.f32 %v2752_v52, %v8907_v37  ;;  %v8927_v36 = vadd.f32 %v5674_v4, %v2749_v12 }
 0x8c2   :  { %14445 = vst [vmem:[#allocation30_spill] sm:$0xff] %v8917_v56  ;;  %v8922_v60 = vadd.f32 %v5673_v7, %v2751_v35  ;;  %v8939_v7 = vpop.permute.xlu1 %2904  ;;  %4701 = vperm.xlu1 %5576, %v8493_v34  }
 0x8c3   :  { %14447 = vst [vmem:[#allocation88_spill] sm:$0xff] %v8927_v36  ;;  %v8932_v17 = vadd.f32 %v5675_v49, %v2753_v46 }
 0x8c4   :  { %14446 = vst [vmem:[#allocation81_spill] sm:$0xff] %v8922_v60  ;;  %v2806_v9 = vadd.f32 %v8922_v60, %v8917_v56 }
 0x8c5   :  { %14448 = vst [vmem:[#allocation23_spill] sm:$0xff] %v8932_v17  ;;  %v2813_v54 = vadd.f32 %v8932_v17, %v8927_v36 }
 0x8c6   :  { %v2807_v35 = vrot.slane %v2806_v9, 4  ;;  %5577 = vset.pattern.permute.xlu1 %v14435_v20  ;;  %v8944_v13 = vpop.permute.xlu1 %2922 }
 0x8c7   :  { %v2814_v52 = vrot.slane %v2813_v54, 4  ;;  %4921 = vperm.xlu1 %5577, %v8460_v15  }
 0x8c8   :  { %v2808_v30 = vadd.f32 %v2807_v35, %v2806_v9 }
 0x8c9   :  { %v2815_v12 = vadd.f32 %v2814_v52, %v2813_v54 }
 0x8ca   :  { %v2809_v4 = vrot.slane %v2808_v30, 2 }
 0x8cb   :  { %v2816_v46 = vrot.slane %v2815_v12, 2  ;;  %5579 = vset.pattern.permute.xlu1 %v14336_v31 }
 0x8cc   :  { %v2810_v49 = vadd.f32 %v2809_v4, %v2808_v30 }
 0x8cd   :  { %v2817_v33 = vadd.f32 %v2816_v46, %v2815_v12 }
 0x8ce   :  { %v2811_v62 = vrot.slane %v2810_v49, 1 }
 0x8cf   :  { %v2818_v5 = vrot.slane %v2817_v33, 1 }
 0x8d0   :  { %v2812_v9 = vadd.f32 %v2811_v62, %v2810_v49 }
 0x8d1   :  { %v2819_v35 = vadd.f32 %v2818_v5, %v2817_v33 }
 0x8d2   :  { %v2834_v38 = vmul.f32 0.0625, %v2812_v9 }
 0x8d3   :  { %v2835_v54 = vmul.f32 0.0625, %v2819_v35 }
 0x8d4   :  { %v2838_v1 = vsub.f32 %v8917_v56, %v2834_v38  ;;  %v2842_v34 = vsub.f32 %v8922_v60, %v2834_v38 }
 0x8d5   :  { %v2839_v52 = vsub.f32 %v8927_v36, %v2835_v54  ;;  %v2843_v30 = vsub.f32 %v8932_v17, %v2835_v54 }
 0x8d6   :  { %v2846_v20 = vmul.f32 %v2838_v1, %v2838_v1  ;;  %v2850_v12 = vmul.f32 %v2842_v34, %v2842_v34 }
 0x8d7   :  { %v2847_v4 = vmul.f32 %v2839_v52, %v2839_v52  ;;  %v2851_v46 = vmul.f32 %v2843_v30, %v2843_v30 }
 0x8d8   :  { %v2854_v25 = vadd.f32 %v2850_v12, %v2846_v20  ;;  %v8952_v20 = vpop.permute.xlu0 %2909 }
 0x8d9   :  { %v2861_v15 = vadd.f32 %v2851_v46, %v2847_v4 }
 0x8da   :  { %v2855_v62 = vrot.slane %v2854_v25, 4 }
 0x8db   :  { %v2862_v33 = vrot.slane %v2861_v15, 4 }
 0x8dc   :  { %v2856_v49 = vadd.f32 %v2855_v62, %v2854_v25 }
 0x8dd   :  { %v2863_v5 = vadd.f32 %v2862_v33, %v2861_v15 }
 0x8de   :  { %v2857_v9 = vrot.slane %v2856_v49, 2 }
 0x8df   :  { %v2864_v35 = vrot.slane %v2863_v5, 2 }
 0x8e0   :  { %v2858_v14 = vadd.f32 %v2857_v9, %v2856_v49  ;;  %v8996_v9 = vpop.permute.xlu1 %2944 }
 0x8e1   :  { %v2865_v56 = vadd.f32 %v2864_v35, %v2863_v5  ;;  %v8991_v5 = vld [vmem:[%s14449_s2 + $0x18] sm:$0xff]  }
 0x8e2   :  { %v2859_v6 = vrot.slane %v2858_v14, 1 }
 0x8e3   :  { %v2866_v38 = vrot.slane %v2865_v56, 1 }
 0x8e4   :  { %v2860_v60 = vadd.f32 %v2859_v6, %v2858_v14  ;;  %v8956_v14 = vpop.permute.xlu0 %2927  ;;  %v8998_v35 = vpop.permute.xlu1 %2954 }
 0x8e5   :  { %v2867_v36 = vadd.f32 %v2866_v38, %v2865_v56 }
 0x8e6   :  { %v2882_v61 = vmul.f32 0.0625, %v2860_v60 }
 0x8e7   :  { %v2883_v54 = vmul.f32 0.0625, %v2867_v36 }
 0x8e8   :  { %v2886_v17 = vadd.f32 1e-05, %v2882_v61  ;;  %v9000_v38 = vpop.permute.xlu1 %2964 }
 0x8e9   :  { %v2887_v45 = vadd.f32 1e-05, %v2883_v54 }
 0x8ea   :  { %5629 = vrsqrt.f32 %v2886_v17 }
 0x8eb   :  { %5631 = vrsqrt.f32 %v2887_v45 }
 0x8ec   :  { %v9002_v54 = vpop.permute.xlu1 %2974 }
 0x8ed   :  { %14450 = vst [vmem:[#allocation85_spill] sm:$0xff] %v9002_v54 }
 0x8f4   :  { %v5630_v12 = vpop.eup %5629 }
 0x8f5   :  { %v5632_v4 = vpop.eup %5631  ;;  %v2894_v25 = vmul.f32 %v5630_v12, %v2838_v1  ;;  %v2898_v46 = vmul.f32 %v5630_v12, %v2842_v34  ;;  %v8967_v34 = vld [vmem:[%s14449_s2] sm:$0xff]   ;;  %v147_v12 = vld [vmem:[%s13225_s16 + $0x28] sm:$0xff] }
 0x8f6   :  { %v2899_v15 = vmul.f32 %v5632_v4, %v2843_v30  ;;  %v2895_v62 = vmul.f32 %v5632_v4, %v2839_v52  ;;  %v8975_v52 = vld [vmem:[%s14449_s2 + $0x8] sm:$0xff]   ;;  %v8983_v30 = vld [vmem:[%s14449_s2 + $0x10] sm:$0xff]   ;;  %5051 = vperm.xlu1 %5579, %v147_v12   ;;  %v9007_v4 = vpop.permute.xlu1 %3162 }
 0x8f7   :  { %v2916_v33 = vmul.f32 %v8952_v20, %v2898_v46  ;;  %v2912_v49 = vmul.f32 %v8939_v7, %v2894_v25  ;;  %14451 = vst [vmem:[#allocation35_spill] sm:$0xff] %v9007_v4  ;;  %v148_v25 = vld [vmem:[%s13225_s16 + $0x30] sm:$0xff] }
 0x8f8   :  { %v2913_v6 = vmul.f32 %v8939_v7, %v2895_v62  ;;  %v2917_v61 = vmul.f32 %v8952_v20, %v2899_v15 }
 0x8f9   :  { %v2930_v45 = vadd.f32 %v8944_v13, %v2912_v49  ;;  %v2934_v56 = vadd.f32 %v8956_v14, %v2916_v33 }
 0x8fa   :  { %v2931_v60 = vadd.f32 %v8944_v13, %v2913_v6  ;;  %v2935_v36 = vadd.f32 %v8956_v14, %v2917_v61  ;;  %5056 = vperm.xlu1 %5579, %v148_v25   ;;  %v9012_v46 = vpop.permute.xlu1 %3172 }
 0x8fb   :  { %v2938_v1 = vpack.c.bf16 %v2934_v56, %v2930_v45  ;;  %14452 = vst [vmem:[#allocation93_spill] sm:$0xff] %v9012_v46 }
 0x8fc   :  { %v2939_v17 = vpack.c.bf16 %v2935_v36, %v2931_v60 }
 0x8fe   :  { %3014 = vmatprep.subr.bf16.mxu0 %v2939_v17  ;;  %v9014_v15 = vpop.permute.xlu1 %3177 }
 0x8ff   :  { %3015 = vmatpush1.bf16.msra.mxu0 %v2938_v1  ;;  %14453 = vst [vmem:[#allocation91_spill] sm:$0xff] %v9014_v15 }
 0x902   :  { %5449 = vmatmul.mubr.msk.bf16.vlgmr.msra.gmra.mrb[32].mxu0 %vm336_vm0, %v8967_v34  ;;  %v9016_v62 = vpop.permute.xlu1 %3187 }
 0x903   :  { %3056 = vmatprep.mubr.bf16.mxu0 %v14336_v31  ;;  %14454 = vst [vmem:[#allocation62_spill] sm:$0xff] %v9016_v62 }
 0x906   :  { %v9018_v33 = vpop.permute.xlu1 %3197 }
 0x907   :  { %14455 = vst [vmem:[#allocation109_spill] sm:$0xff] %v9018_v33 }
 0x90a   :  { %5450 = vmatmul.mubr.msk.bf16.gmra.mrb[36].mxu0 %vm336_vm0, %v8975_v52  ;;  %v9020_v49 = vpop.permute.xlu1 %3333 }
 0x90b   :  { %3066 = vmatprep.mubr.bf16.mxu0 %v14336_v31  ;;  %14456 = vst [vmem:[#allocation95_spill] sm:$0xff] %v9020_v49 }
 0x90e   :  { %v9022_v6 = vpop.permute.xlu1 %3337 }
 0x90f   :  { %14457 = vst [vmem:[#allocation68_spill] sm:$0xff] %v9022_v6 }
 0x912   :  { %5451 = vmatmul.mubr.msk.bf16.gmra.mrb[40].mxu0 %vm336_vm0, %v8983_v30  ;;  %v9024_v61 = vpop.permute.xlu1 %3345 }
 0x913   :  { %3076 = vmatprep.mubr.bf16.mxu0 %v14336_v31  ;;  %14458 = vst [vmem:[#allocation104_spill] sm:$0xff] %v9024_v61 }
 0x916   :  { %v9026_v45 = vpop.permute.xlu1 %3353 }
 0x917   :  { %14459 = vst [vmem:[#allocation92_spill] sm:$0xff] %v9026_v45 }
 0x91a   :  { %5452 = vmatmul.mubr.msk.bf16.gmra.mrb[44].mxu0 %vm336_vm0, %v8991_v5  ;;  %v9028_v56 = vpop.permute.xlu1 %3553 }
 0x91b   :  { %5315 = vmatprep.mubr.bf16.mxu0 %v14336_v31  ;;  %14460 = vst [vmem:[#allocation63_spill] sm:$0xff] %v9028_v56 }
 0x91e   :  { %v9030_v60 = vpop.permute.xlu1 %3561 }
 0x91f   :  { %14461 = vst [vmem:[#allocation94_spill] sm:$0xff] %v9030_v60 }
 0x922   :  { %v9032_v36 = vpop.permute.xlu1 %3565 }
 0x923   :  { %14462 = vst [vmem:[#allocation106_spill] sm:$0xff] %v9032_v36 }
 0x926   :  { %v9034_v17 = vpop.permute.xlu1 %3573 }
 0x927   :  { %14463 = vst [vmem:[#allocation96_spill] sm:$0xff] %v9034_v17  ;;  %v5676_v17 = vld [vmem:[%s13849_s24 + $0x10] sm:$0xff] }
 0x92a   :  { %v9036_v1 = vpop.permute.xlu1 %3581 }
 0x92b   :  { %14464 = vst [vmem:[#allocation24_spill] sm:$0xff] %v9036_v1 }
 0x92e   :  { %v9040_v46 = vpop.permute.xlu1 %3781 }
 0x92f   :  { %14465 = vst [vmem:[#allocation98_spill] sm:$0xff] %v9040_v46 }
 0x990   :  { %v2789_v12 = vpop.f32.mrb[28].mxu1 }
 0x991   :  { %v2790_v25 = vadd.f32 %v2789_v12, %v8901_v21  ;;  %v2791_v33 = vpop.f32.mrb[29].mxu1  ;;  %v5677_v12 = vld [vmem:[%s13849_s24 + $0x30] sm:$0xff] }
 0x992   :  { %v2792_v62 = vadd.f32 %v2791_v33, %v8901_v21  ;;  %v2793_v15 = vpop.f32.mrb[30].mxu1  ;;  %v5678_v21 = vld [vmem:[%s13849_s24 + $0x18] sm:$0xff] }
 0x993   :  { %v2794_v4 = vadd.f32 %v2793_v15, %v8907_v37  ;;  %v2795_v56 = vpop.f32.mrb[31].mxu1  ;;  %v9047_v36 = vadd.f32 %v5676_v17, %v2790_v25 }
 0x994   :  { %v2796_v60 = vadd.f32 %v2795_v56, %v8907_v37  ;;  %v9057_v15 = vadd.f32 %v5678_v21, %v2792_v62  ;;  %v5679_v37 = vld [vmem:[%s13849_s24 + $0x38] sm:$0xff] }
 0x995   :  { %14466 = vst [vmem:[#allocation51_spill] sm:$0xff] %v9047_v36  ;;  %v9052_v1 = vadd.f32 %v5677_v12, %v2794_v4  ;;  %v9068_v4 = vpop.permute.xlu1 %3785 }
 0x996   :  { %14468 = vst [vmem:[#allocation46_spill] sm:$0xff] %v9057_v15  ;;  %v9062_v33 = vadd.f32 %v5679_v37, %v2796_v60  ;;  %14470 = vst [vmem:[#allocation108_spill] sm:$0xff] %v9068_v4 }
 0x997   :  { %14467 = vst [vmem:[#allocation44_spill] sm:$0xff] %v9052_v1  ;;  %v2820_v56 = vadd.f32 %v9052_v1, %v9047_v36 }
 0x998   :  { %14469 = vst [vmem:[#allocation74_spill] sm:$0xff] %v9062_v33  ;;  %v2827_v17 = vadd.f32 %v9062_v33, %v9057_v15 }
 0x999   :  { %v2821_v25 = vrot.slane %v2820_v56, 4  ;;  %v9070_v61 = vpop.permute.xlu1 %3793 }
 0x99a   :  { %v2828_v12 = vrot.slane %v2827_v17, 4  ;;  %14471 = vst [vmem:[#allocation72_spill] sm:$0xff] %v9070_v61 }
 0x99b   :  { %v2822_v46 = vadd.f32 %v2821_v25, %v2820_v56 }
 0x99c   :  { %v2829_v45 = vadd.f32 %v2828_v12, %v2827_v17 }
 0x99d   :  { %v2823_v62 = vrot.slane %v2822_v46, 2  ;;  %v9072_v41 = vpop.permute.xlu1 %3801 }
 0x99e   :  { %v2830_v21 = vrot.slane %v2829_v45, 2  ;;  %14472 = vst [vmem:[#allocation42_spill] sm:$0xff] %v9072_v41 }
 0x99f   :  { %v2824_v6 = vadd.f32 %v2823_v62, %v2822_v46 }
 0x9a0   :  { %v2831_v49 = vadd.f32 %v2830_v21, %v2829_v45 }
 0x9a1   :  { %v2825_v60 = vrot.slane %v2824_v6, 1  ;;  %v9078_v62 = vpop.permute.xlu1 %4001 }
 0x9a2   :  { %v2832_v37 = vrot.slane %v2831_v49, 1  ;;  %14473 = vst [vmem:[#allocation55_spill] sm:$0xff] %v9078_v62 }
 0x9a3   :  { %v2826_v47 = vadd.f32 %v2825_v60, %v2824_v6 }
 0x9a4   :  { %v2833_v28 = vadd.f32 %v2832_v37, %v2831_v49 }
 0x9a5   :  { %v2836_v16 = vmul.f32 0.0625, %v2826_v47  ;;  %v9080_v37 = vpop.permute.xlu1 %4009 }
 0x9a6   :  { %v2837_v32 = vmul.f32 0.0625, %v2833_v28 }
 0x9a7   :  { %v2840_v4 = vsub.f32 %v9047_v36, %v2836_v16  ;;  %v2844_v23 = vsub.f32 %v9052_v1, %v2836_v16 }
 0x9a8   :  { %v2841_v56 = vsub.f32 %v9057_v15, %v2837_v32  ;;  %v2845_v17 = vsub.f32 %v9062_v33, %v2837_v32 }
 0x9a9   :  { %v2848_v25 = vmul.f32 %v2840_v4, %v2840_v4  ;;  %v2852_v12 = vmul.f32 %v2844_v23, %v2844_v23  ;;  %v9082_v33 = vpop.permute.xlu1 %4013 }
 0x9aa   :  { %v2849_v46 = vmul.f32 %v2841_v56, %v2841_v56  ;;  %v2853_v45 = vmul.f32 %v2845_v17, %v2845_v17 }
 0x9ab   :  { %v2868_v6 = vadd.f32 %v2852_v12, %v2848_v25 }
 0x9ac   :  { %v2875_v49 = vadd.f32 %v2853_v45, %v2849_v46 }
 0x9ad   :  { %v2869_v21 = vrot.slane %v2868_v6, 4  ;;  %v9084_v46 = vpop.permute.xlu1 %4021 }
 0x9ae   :  { %v2876_v60 = vrot.slane %v2875_v49, 4 }
 0x9af   :  { %v2870_v47 = vadd.f32 %v2869_v21, %v2868_v6 }
 0x9b0   :  { %v2877_v28 = vadd.f32 %v2876_v60, %v2875_v49 }
 0x9b1   :  { %v2871_v36 = vrot.slane %v2870_v47, 2  ;;  %v9086_v45 = vpop.permute.xlu1 %4029 }
 0x9b2   :  { %v2878_v16 = vrot.slane %v2877_v28, 2 }
 0x9b3   :  { %v2872_v1 = vadd.f32 %v2871_v36, %v2870_v47 }
 0x9b4   :  { %v2879_v15 = vadd.f32 %v2878_v16, %v2877_v28 }
 0x9b5   :  { %v2873_v41 = vrot.slane %v2872_v1, 1  ;;  %v9088_v6 = vpop.permute.xlu1 %4229 }
 0x9b6   :  { %v2880_v32 = vrot.slane %v2879_v15, 1 }
 0x9b7   :  { %v2874_v61 = vadd.f32 %v2873_v41, %v2872_v1 }
 0x9b8   :  { %v2881_v11 = vadd.f32 %v2880_v32, %v2879_v15 }
 0x9b9   :  { %v2884_v63 = vmul.f32 0.0625, %v2874_v61 }
 0x9ba   :  { %v2885_v62 = vmul.f32 0.0625, %v2881_v11 }
 0x9bb   :  { %v2888_v25 = vadd.f32 1e-05, %v2884_v63 }
 0x9bc   :  { %v2889_v12 = vadd.f32 1e-05, %v2885_v62  ;;  %v9096_v62 = vpop.permute.xlu1 %4449 }
 0x9bd   :  { %5633 = vrsqrt.f32 %v2888_v25 }
 0x9be   :  { %5635 = vrsqrt.f32 %v2889_v12 }
 0x9c7   :  { %v5634_v36 = vpop.eup %5633 }
 0x9c8   :  { %v5636_v49 = vpop.eup %5635  ;;  %v2896_v21 = vmul.f32 %v5634_v36, %v2840_v4  ;;  %v2900_v60 = vmul.f32 %v5634_v36, %v2844_v23 }
 0x9c9   :  { %v2901_v47 = vmul.f32 %v5636_v49, %v2845_v17  ;;  %v2897_v28 = vmul.f32 %v5636_v49, %v2841_v56  ;;  %v9100_v17 = vpop.permute.xlu1 %4233 }
 0x9ca   :  { %v2918_v41 = vmul.f32 %v8952_v20, %v2900_v60  ;;  %v2914_v11 = vmul.f32 %v8939_v7, %v2896_v21 }
 0x9cb   :  { %v2915_v63 = vmul.f32 %v8939_v7, %v2897_v28  ;;  %v2919_v61 = vmul.f32 %v8952_v20, %v2901_v47 }
 0x9cc   :  { %v2932_v1 = vadd.f32 %v8944_v13, %v2914_v11  ;;  %v2936_v15 = vadd.f32 %v8956_v14, %v2918_v41 }
 0x9cd   :  { %v2933_v16 = vadd.f32 %v8944_v13, %v2915_v63  ;;  %v2937_v23 = vadd.f32 %v8956_v14, %v2919_v61  ;;  %v9112_v14 = vpop.permute.xlu1 %4237 }
 0x9ce   :  { %v2940_v56 = vpack.c.bf16 %v2936_v15, %v2932_v1 }
 0x9cf   :  { %v2941_v4 = vpack.c.bf16 %v2937_v23, %v2933_v16 }
 0x9d1   :  { %3087 = vmatprep.subr.bf16.mxu1 %v2941_v4 }
 0x9d2   :  { %3088 = vmatpush1.bf16.msra.mxu1 %v2940_v56 }
 0x9d5   :  { %v3048_v32 = vpop.f32.mrb[32].mxu0  ;;  %5453 = vmatmul.mubr.msk.bf16.vlgmr.msra.gmra.mrb[32].mxu1 %vm336_vm0, %v8967_v34  ;;  %v9118_v34 = vpop.permute.xlu1 %4677 }
 0x9d6   :  { %v9105_v7 = vadd.f32 %v3048_v32, %v8996_v9  ;;  %v3050_v20 = vpop.f32.mrb[33].mxu0  ;;  %3129 = vmatprep.mubr.bf16.mxu1 %v14336_v31 }
 0x9d7   :  { %v3052_v25 = vpop.f32.mrb[34].mxu0  ;;  %v9146_v47 = vadd.f32 %v3050_v20, %v8996_v9 }
 0x9d8   :  { %14474 = vst [vmem:[#allocation102_spill] sm:$0xff] %v9105_v7  ;;  %v3054_v13 = vpop.f32.mrb[35].mxu0  ;;  %3456 = vrot.lane.b32.xlu1 %v9105_v7, %s5715_s29  ;;  %3232 = vrot.lane.b32.xlu0 %v9105_v7, %s5714_s28 }
 0x9d9   :  { %v9135_v60 = vpop.permute.xlu1 %4457  ;;  %14475 = vst [vmem:[#allocation90_spill] sm:$0xff] %v9146_v47 }
 0x9dc   :  { %3904 = vrot.lane.b32.xlu1 %v9105_v7, %s5716_s0  ;;  %3680 = vrot.lane.b32.xlu0 %v9105_v7, %s5713_s13 }
 0x9dd   :  { %v9120_v12 = vpop.f32.mrb[36].mxu0  ;;  %5454 = vmatmul.mubr.msk.bf16.gmra.mrb[36].mxu1 %vm336_vm0, %v8975_v52  ;;  %v9159_v63 = vpop.permute.xlu1 %4897 }
 0x9de   :  { %v9124_v36 = vpop.f32.mrb[37].mxu0  ;;  %3139 = vmatprep.mubr.bf16.mxu1 %v14336_v31 }
 0x9df   :  { %v9127_v49 = vpop.f32.mrb[38].mxu0 }
 0x9e0   :  { %v9129_v21 = vpop.f32.mrb[39].mxu0  ;;  %4352 = vrot.lane.b32.xlu1 %v9105_v7, %s5718_s21  ;;  %4128 = vrot.lane.b32.xlu0 %v9105_v7, %s5717_s20 }
 0x9e1   :  { %v9171_v1 = vpop.permute.xlu1 %4901 }
 0x9e2   :  { %14476 = vst [vmem:[#allocation100_spill] sm:$0xff] %v9171_v1 }
 0x9e4   :  { %4800 = vrot.lane.b32.xlu1 %v9105_v7, %s5720_s22  ;;  %4576 = vrot.lane.b32.xlu0 %v9105_v7, %s5719_s1 }
 0x9e5   :  { %v9141_v52 = vpop.f32.mrb[40].mxu0  ;;  %5455 = vmatmul.mubr.msk.bf16.gmra.mrb[40].mxu1 %vm336_vm0, %v8983_v30  ;;  %v9182_v23 = vpop.permute.xlu1 %4685 }
 0x9e6   :  { %v9148_v28 = vpop.f32.mrb[41].mxu0  ;;  %3149 = vmatprep.mubr.bf16.mxu1 %v14336_v31  ;;  %14477 = vst [vmem:[#allocation57_spill] sm:$0xff] %v9182_v23 }
 0x9e7   :  { %v9151_v41 = vpop.f32.mrb[42].mxu0 }
 0x9e8   :  { %v9153_v11 = vpop.f32.mrb[43].mxu0  ;;  %3472 = vrot.lane.b32.xlu1 %v9146_v47, %s5715_s29  ;;  %3248 = vrot.lane.b32.xlu0 %v9146_v47, %s5714_s28 }
 0x9e9   :  { %v9197_v4 = vpop.permute.xlu1 %4905 }
 0x9ea   :  { %14479 = vst [vmem:[#allocation78_spill] sm:$0xff] %v9197_v4 }
 0x9ec   :  { %3920 = vrot.lane.b32.xlu1 %v9146_v47, %s5716_s0  ;;  %3696 = vrot.lane.b32.xlu0 %v9146_v47, %s5713_s13 }
 0x9ed   :  { %v9165_v30 = vpop.f32.mrb[44].mxu0  ;;  %5456 = vmatmul.mubr.msk.bf16.gmra.mrb[44].mxu1 %vm336_vm0, %v8991_v5  ;;  %v9188_v5 = vpop.permute.xlu0 %2949 }
 0x9ee   :  { %v9169_v61 = vpop.f32.mrb[45].mxu0  ;;  %5358 = vmatprep.mubr.bf16.mxu1 %v14336_v31  ;;  %v9191_v31 = vadd.f32 %v3052_v25, %v9188_v5  ;;  %v9203_v56 = vpop.permute.xlu1 %5031  ;;  %v9216_v20 = vadd.f32 %v3054_v13, %v9188_v5 }
 0x9ef   :  { %v9174_v15 = vpop.f32.mrb[46].mxu0  ;;  %14480 = vst [vmem:[#allocation76_spill] sm:$0xff] %v9203_v56 }
 0x9f0   :  { %v9176_v16 = vpop.f32.mrb[47].mxu0  ;;  %4368 = vrot.lane.b32.xlu1 %v9146_v47, %s5718_s21  ;;  %4144 = vrot.lane.b32.xlu0 %v9146_v47, %s5717_s20  ;;  %14478 = vst [vmem:[#allocation138_spill] sm:$0xff] %v9191_v31  ;;  %14482 = vst [vmem:[#allocation111_spill] sm:$0xff] %v9216_v20 }
 0x9f1   :  { %v9224_v56 = vpop.permute.xlu0 %2959 }
 0x9f2   :  { %v9213_v32 = vpop.permute.xlu1 %5036 }
 0x9f3   :  { %14481 = vst [vmem:[#allocation34_spill] sm:$0xff] %v9213_v32 }
 0x9f4   :  { %4816 = vrot.lane.b32.xlu1 %v9146_v47, %s5720_s22  ;;  %4592 = vrot.lane.b32.xlu0 %v9146_v47, %s5719_s1  ;;  %v9248_v47 = vadd.f32 %v9120_v12, %v8998_v35  ;;  %v9264_v12 = vadd.f32 %v9124_v36, %v8998_v35 }
 0x9f5   :  { %v9232_v13 = vpop.permute.xlu0 %2969 }
 0x9f6   :  { %v9222_v25 = vpop.permute.xlu1 %4241  ;;  %14485 = vst [vmem:[#allocation79_spill] sm:$0xff] %v9232_v13  ;;  %14488 = vst [vmem:[#allocation84_spill] sm:$0xff] %v9248_v47 }
 0x9f7   :  { %14483 = vst [vmem:[#allocation59_spill] sm:$0xff] %v9222_v25  ;;  %14490 = vst [vmem:[#allocation151_spill] sm:$0xff] %v9264_v12 }
 0x9f8   :  { %3458 = vrot.lane.b32.xlu0 %v9191_v31, %s5715_s29  ;;  %3234 = vrot.lane.b32.xlu1 %v9191_v31, %s5714_s28 }
 0x9f9   :  { %v9244_v7 = vpop.permute.xlu0 %2979 }
 0x9fa   :  { %v9230_v32 = vpop.permute.xlu1 %4465  ;;  %14487 = vst [vmem:[#allocation86_spill] sm:$0xff] %v9244_v7 }
 0x9fb   :  { %14484 = vst [vmem:[#allocation82_spill] sm:$0xff] %v9230_v32 }
 0x9fc   :  { %3906 = vrot.lane.b32.xlu0 %v9191_v31, %s5716_s0  ;;  %3682 = vrot.lane.b32.xlu1 %v9191_v31, %s5713_s13 }
 0x9fd   :  { %v9256_v25 = vpop.permute.xlu0 %3329 }
 0xa00   :  { %4354 = vrot.lane.b32.xlu0 %v9191_v31, %s5718_s21  ;;  %4130 = vrot.lane.b32.xlu1 %v9191_v31, %s5717_s20 }
 0xa04   :  { %4802 = vrot.lane.b32.xlu0 %v9191_v31, %s5720_s22  ;;  %4578 = vrot.lane.b32.xlu1 %v9191_v31, %s5719_s1  ;;  %v9242_v31 = vpop.permute.xlu1 %4469 }
 0xa05   :  { %14486 = vst [vmem:[#allocation32_spill] sm:$0xff] %v9242_v31 }
 0xa08   :  { %3474 = vrot.lane.b32.xlu0 %v9216_v20, %s5715_s29  ;;  %3250 = vrot.lane.b32.xlu1 %v9216_v20, %s5714_s28  ;;  %v9254_v32 = vpop.permute.xlu1 %4253 }
 0xa09   :  { %14489 = vst [vmem:[#allocation64_spill] sm:$0xff] %v9254_v32  ;;  %v9272_v32 = vpop.permute.xlu0 %3341 }
 0xa0c   :  { %3922 = vrot.lane.b32.xlu0 %v9216_v20, %s5716_s0  ;;  %3698 = vrot.lane.b32.xlu1 %v9216_v20, %s5713_s13 }
 0xa0d   :  { %v9280_v36 = vpop.permute.xlu0 %3349 }
 0xa10   :  { %4370 = vrot.lane.b32.xlu0 %v9216_v20, %s5718_s21  ;;  %4146 = vrot.lane.b32.xlu1 %v9216_v20, %s5717_s20 }
 0xa14   :  { %4818 = vrot.lane.b32.xlu0 %v9216_v20, %s5720_s22  ;;  %4594 = vrot.lane.b32.xlu1 %v9216_v20, %s5719_s1  ;;  %v9266_v20 = vpop.permute.xlu1 %4693 }
 0xa15   :  { %14491 = vst [vmem:[#allocation89_spill] sm:$0xff] %v9266_v20  ;;  %v9288_v20 = vadd.f32 %v9127_v49, %v9224_v56 }
 0xa17   :  { %14493 = vst [vmem:[#allocation153_spill] sm:$0xff] %v9288_v20 }
 0xa18   :  { %3236 = vrot.lane.b32.xlu0 %v9248_v47, %s5714_s28  ;;  %3460 = vrot.lane.b32.xlu1 %v9248_v47, %s5715_s29  ;;  %v9278_v31 = vpop.permute.xlu1 %4473 }
 0xa19   :  { %14492 = vst [vmem:[#allocation69_spill] sm:$0xff] %v9278_v31  ;;  %v9296_v31 = vpop.permute.xlu0 %3357 }
 0xa1c   :  { %3684 = vrot.lane.b32.xlu0 %v9248_v47, %s5713_s13  ;;  %3908 = vrot.lane.b32.xlu1 %v9248_v47, %s5716_s0  ;;  %v9290_v4 = vpop.permute.xlu1 %4913 }
 0xa1d   :  { %14494 = vst [vmem:[#allocation129_spill] sm:$0xff] %v9290_v4  ;;  %v9304_v49 = vpop.permute.xlu0 %5026 }
 0xa1e   :  { %14496 = vst [vmem:[#allocation116_spill] sm:$0xff] %v9304_v49  ;;  %v9326_v49 = vadd.f32 %v9129_v21, %v9224_v56 }
 0xa20   :  { %3252 = vrot.lane.b32.xlu0 %v9264_v12, %s5714_s28  ;;  %4132 = vrot.lane.b32.xlu1 %v9248_v47, %s5717_s20  ;;  %v9302_v23 = vpop.permute.xlu1 %4917  ;;  %14500 = vst [vmem:[#allocation114_spill] sm:$0xff] %v9326_v49 }
 0xa21   :  { %14495 = vst [vmem:[#allocation27_spill] sm:$0xff] %v9302_v23  ;;  %v9316_v4 = vpop.permute.xlu0 %5041 }
 0xa22   :  { %14498 = vst [vmem:[#allocation80_spill] sm:$0xff] %v9316_v4 }
 0xa24   :  { %3700 = vrot.lane.b32.xlu0 %v9264_v12, %s5713_s13  ;;  %4356 = vrot.lane.b32.xlu1 %v9248_v47, %s5718_s21 }
 0xa28   :  { %4148 = vrot.lane.b32.xlu0 %v9264_v12, %s5717_s20  ;;  %4580 = vrot.lane.b32.xlu1 %v9248_v47, %s5719_s1 }
 0xa2c   :  { %4804 = vrot.lane.b32.xlu1 %v9248_v47, %s5720_s22  ;;  %3462 = vrot.lane.b32.xlu0 %v9288_v20, %s5715_s29  ;;  %v9310_v47 = vpop.permute.xlu1 %4701 }
 0xa2d   :  { %14497 = vst [vmem:[#allocation37_spill] sm:$0xff] %v9310_v47  ;;  %v9328_v47 = vpop.permute.xlu0 %5046 }
 0xa2e   :  { %14501 = vst [vmem:[#allocation58_spill] sm:$0xff] %v9328_v47 }
 0xa30   :  { %3476 = vrot.lane.b32.xlu1 %v9264_v12, %s5715_s29  ;;  %3910 = vrot.lane.b32.xlu0 %v9288_v20, %s5716_s0  ;;  %v9318_v1 = vpop.permute.xlu1 %4921 }
 0xa31   :  { %14499 = vst [vmem:[#allocation60_spill] sm:$0xff] %v9318_v1  ;;  %v9340_v1 = vpop.permute.xlu0 %5061 }
 0xa32   :  { %14503 = vst [vmem:[#allocation123_spill] sm:$0xff] %v9340_v1 }
 0xa34   :  { %3924 = vrot.lane.b32.xlu1 %v9264_v12, %s5716_s0  ;;  %4358 = vrot.lane.b32.xlu0 %v9288_v20, %s5718_s21  ;;  %v9334_v4 = vpop.permute.xlu1 %5051 }
 0xa35   :  { %14502 = vst [vmem:[#allocation50_spill] sm:$0xff] %v9334_v4 }
 0xa38   :  { %4372 = vrot.lane.b32.xlu1 %v9264_v12, %s5718_s21  ;;  %4582 = vrot.lane.b32.xlu0 %v9288_v20, %s5719_s1  ;;  %v9342_v21 = vpop.permute.xlu1 %5056 }
 0xa39   :  { %14504 = vst [vmem:[#allocation125_spill] sm:$0xff] %v9342_v21  ;;  %v9366_v21 = vadd.f32 %v9141_v52, %v9000_v38 }
 0xa3b   :  { %14509 = vst [vmem:[#allocation31_spill] sm:$0xff] %v9366_v21 }
 0xa3c   :  { %4596 = vrot.lane.b32.xlu1 %v9264_v12, %s5719_s1  ;;  %4806 = vrot.lane.b32.xlu0 %v9288_v20, %s5720_s22 }
 0xa40   :  { %4820 = vrot.lane.b32.xlu1 %v9264_v12, %s5720_s22  ;;  %3478 = vrot.lane.b32.xlu0 %v9326_v49, %s5715_s29 }
 0xa44   :  { %3926 = vrot.lane.b32.xlu0 %v9326_v49, %s5716_s0  ;;  %3238 = vrot.lane.b32.xlu1 %v9288_v20, %s5714_s28 }
 0xa48   :  { %4374 = vrot.lane.b32.xlu0 %v9326_v49, %s5718_s21  ;;  %3686 = vrot.lane.b32.xlu1 %v9288_v20, %s5713_s13 }
 0xa4a   :  { %v9348_v47 = vpop.permute.xlu1 %3456  ;;  %v9350_v12 = vpop.permute.xlu0 %3232 }
 0xa4b   :  { %14505 = vst [vmem:[#allocation119_spill] sm:$0xff] %v9348_v47  ;;  %14506 = vst [vmem:[#allocation118_spill] sm:$0xff] %v9350_v12 }
 0xa4c   :  { %4598 = vrot.lane.b32.xlu0 %v9326_v49, %s5719_s1  ;;  %4134 = vrot.lane.b32.xlu1 %v9288_v20, %s5717_s20 }
 0xa4e   :  { %v9356_v4 = vpop.permute.xlu1 %3904  ;;  %v9358_v1 = vpop.permute.xlu0 %3680 }
 0xa4f   :  { %14507 = vst [vmem:[#allocation117_spill] sm:$0xff] %v9356_v4  ;;  %14508 = vst [vmem:[#allocation65_spill] sm:$0xff] %v9358_v1 }
 0xa50   :  { %4822 = vrot.lane.b32.xlu0 %v9326_v49, %s5720_s22  ;;  %3254 = vrot.lane.b32.xlu1 %v9326_v49, %s5714_s28 }
 0xa52   :  { %v9368_v47 = vpop.permute.xlu1 %4352  ;;  %v9370_v12 = vpop.permute.xlu0 %4128 }
 0xa53   :  { %14510 = vst [vmem:[#allocation120_spill] sm:$0xff] %v9368_v47  ;;  %14511 = vst [vmem:[#allocation71_spill] sm:$0xff] %v9370_v12 }
 0xa54   :  { %3240 = vrot.lane.b32.xlu0 %v9366_v21, %s5714_s28  ;;  %3702 = vrot.lane.b32.xlu1 %v9326_v49, %s5713_s13 }
 0xa56   :  { %v9376_v4 = vpop.permute.xlu1 %4800  ;;  %v9378_v20 = vpop.permute.xlu0 %4576 }
 0xa57   :  { %14512 = vst [vmem:[#allocation113_spill] sm:$0xff] %v9376_v4  ;;  %14513 = vst [vmem:[#allocation29_spill] sm:$0xff] %v9378_v20  ;;  %v9402_v20 = vadd.f32 %v9148_v28, %v9000_v38 }
 0xa58   :  { %3688 = vrot.lane.b32.xlu0 %v9366_v21, %s5713_s13  ;;  %4150 = vrot.lane.b32.xlu1 %v9326_v49, %s5717_s20 }
 0xa59   :  { %14518 = vst [vmem:[#allocation70_spill] sm:$0xff] %v9402_v20 }
 0xa5a   :  { %v9384_v52 = vpop.permute.xlu1 %3472  ;;  %v9386_v47 = vpop.permute.xlu0 %3248 }
 0xa5b   :  { %14514 = vst [vmem:[#allocation43_spill] sm:$0xff] %v9384_v52  ;;  %14515 = vst [vmem:[#allocation152_spill] sm:$0xff] %v9386_v47 }
 0xa5c   :  { %4136 = vrot.lane.b32.xlu0 %v9366_v21, %s5717_s20  ;;  %3464 = vrot.lane.b32.xlu1 %v9366_v21, %s5715_s29 }
 0xa5e   :  { %v9392_v12 = vpop.permute.xlu1 %3920  ;;  %v9394_v4 = vpop.permute.xlu0 %3696 }
 0xa5f   :  { %14516 = vst [vmem:[#allocation77_spill] sm:$0xff] %v9392_v12  ;;  %14517 = vst [vmem:[#allocation97_spill] sm:$0xff] %v9394_v4 }
 0xa60   :  { %4584 = vrot.lane.b32.xlu0 %v9366_v21, %s5719_s1  ;;  %3912 = vrot.lane.b32.xlu1 %v9366_v21, %s5716_s0 }
 0xa62   :  { %v9404_v49 = vpop.permute.xlu1 %4368  ;;  %v9406_v1 = vpop.permute.xlu0 %4144 }
 0xa63   :  { %14519 = vst [vmem:[#allocation36_spill] sm:$0xff] %v9404_v49  ;;  %14520 = vst [vmem:[#allocation156_spill] sm:$0xff] %v9406_v1 }
 0xa64   :  { %3256 = vrot.lane.b32.xlu0 %v9402_v20, %s5714_s28  ;;  %4360 = vrot.lane.b32.xlu1 %v9366_v21, %s5718_s21 }
 0xa66   :  { %v9412_v12 = vpop.permute.xlu1 %4816  ;;  %v9414_v4 = vpop.permute.xlu0 %4592 }
 0xa67   :  { %14521 = vst [vmem:[#allocation54_spill] sm:$0xff] %v9412_v12  ;;  %14522 = vst [vmem:[#allocation41_spill] sm:$0xff] %v9414_v4  ;;  %v9438_v4 = vadd.f32 %v9151_v41, %v9232_v13 }
 0xa68   :  { %3704 = vrot.lane.b32.xlu0 %v9402_v20, %s5713_s13  ;;  %4808 = vrot.lane.b32.xlu1 %v9366_v21, %s5720_s22 }
 0xa69   :  { %14527 = vst [vmem:[#allocation9_spill] sm:$0xff] %v9438_v4 }
 0xa6a   :  { %v9420_v28 = vpop.permute.xlu1 %3234  ;;  %v9422_v49 = vpop.permute.xlu0 %3458 }
 0xa6b   :  { %14523 = vst [vmem:[#allocation56_spill] sm:$0xff] %v9420_v28  ;;  %14524 = vst [vmem:[#allocation25_spill] sm:$0xff] %v9422_v49 }
 0xa6c   :  { %4152 = vrot.lane.b32.xlu0 %v9402_v20, %s5717_s20  ;;  %3480 = vrot.lane.b32.xlu1 %v9402_v20, %s5715_s29 }
 0xa6e   :  { %v9428_v1 = vpop.permute.xlu1 %3682  ;;  %v9430_v12 = vpop.permute.xlu0 %3906 }
 0xa6f   :  { %14525 = vst [vmem:[#allocation7_spill] sm:$0xff] %v9428_v1  ;;  %14526 = vst [vmem:[#allocation8_spill] sm:$0xff] %v9430_v12 }
 0xa70   :  { %4600 = vrot.lane.b32.xlu0 %v9402_v20, %s5719_s1  ;;  %3928 = vrot.lane.b32.xlu1 %v9402_v20, %s5716_s0 }
 0xa72   :  { %v9440_v21 = vpop.permute.xlu1 %4130  ;;  %v9442_v49 = vpop.permute.xlu0 %4354 }
 0xa73   :  { %14528 = vst [vmem:[#allocation10_spill] sm:$0xff] %v9440_v21  ;;  %14529 = vst [vmem:[#allocation11_spill] sm:$0xff] %v9442_v49 }
 0xa74   :  { %4376 = vrot.lane.b32.xlu1 %v9402_v20, %s5718_s21  ;;  %3466 = vrot.lane.b32.xlu0 %v9438_v4, %s5715_s29 }
 0xa76   :  { %v9448_v12 = vpop.permute.xlu1 %4578  ;;  %v9450_v1 = vpop.permute.xlu0 %4802 }
 0xa77   :  { %14530 = vst [vmem:[#allocation12_spill] sm:$0xff] %v9448_v12  ;;  %14531 = vst [vmem:[#allocation13_spill] sm:$0xff] %v9450_v1  ;;  %v9474_v1 = vadd.f32 %v9153_v11, %v9232_v13 }
 0xa78   :  { %4824 = vrot.lane.b32.xlu1 %v9402_v20, %s5720_s22  ;;  %3914 = vrot.lane.b32.xlu0 %v9438_v4, %s5716_s0 }
 0xa79   :  { %14536 = vst [vmem:[#allocation158_spill] sm:$0xff] %v9474_v1 }
 0xa7a   :  { %v9456_v41 = vpop.permute.xlu1 %3250  ;;  %v9458_v21 = vpop.permute.xlu0 %3474 }
 0xa7b   :  { %14532 = vst [vmem:[#allocation130_spill] sm:$0xff] %v9456_v41  ;;  %14533 = vst [vmem:[#allocation73_spill] sm:$0xff] %v9458_v21 }
 0xa7c   :  { %3242 = vrot.lane.b32.xlu1 %v9438_v4, %s5714_s28  ;;  %4362 = vrot.lane.b32.xlu0 %v9438_v4, %s5718_s21 }
 0xa7e   :  { %v9464_v49 = vpop.permute.xlu1 %3698  ;;  %v9466_v12 = vpop.permute.xlu0 %3922 }
 0xa7f   :  { %14534 = vst [vmem:[#allocation38_spill] sm:$0xff] %v9464_v49  ;;  %14535 = vst [vmem:[#allocation145_spill] sm:$0xff] %v9466_v12 }
 0xa80   :  { %3690 = vrot.lane.b32.xlu1 %v9438_v4, %s5713_s13  ;;  %4810 = vrot.lane.b32.xlu0 %v9438_v4, %s5720_s22 }
 0xa82   :  { %v9476_v20 = vpop.permute.xlu1 %4146  ;;  %v9478_v21 = vpop.permute.xlu0 %4370 }
 0xa83   :  { %14537 = vst [vmem:[#allocation157_spill] sm:$0xff] %v9476_v20  ;;  %14538 = vst [vmem:[#allocation17_spill] sm:$0xff] %v9478_v21 }
 0xa84   :  { %4138 = vrot.lane.b32.xlu1 %v9438_v4, %s5717_s20  ;;  %3482 = vrot.lane.b32.xlu0 %v9474_v1, %s5715_s29 }
 0xa86   :  { %v9484_v12 = vpop.permute.xlu1 %4594  ;;  %v9486_v49 = vpop.permute.xlu0 %4818 }
 0xa87   :  { %14539 = vst [vmem:[#allocation110_spill] sm:$0xff] %v9484_v12  ;;  %14540 = vst [vmem:[#allocation67_spill] sm:$0xff] %v9486_v49  ;;  %v9510_v49 = vadd.f32 %v9165_v30, %v9002_v54  ;;  %v9530_v30 = vadd.f32 %v9169_v61, %v9002_v54 }
 0xa88   :  { %4586 = vrot.lane.b32.xlu1 %v9438_v4, %s5719_s1  ;;  %3930 = vrot.lane.b32.xlu0 %v9474_v1, %s5716_s0 }
 0xa89   :  { %14545 = vst [vmem:[#allocation21_spill] sm:$0xff] %v9510_v49  ;;  %14550 = vst [vmem:[#allocation121_spill] sm:$0xff] %v9530_v30 }
 0xa8a   :  { %v9492_v11 = vpop.permute.xlu1 %3460  ;;  %v9494_v13 = vpop.permute.xlu0 %3236 }
 0xa8b   :  { %14541 = vst [vmem:[#allocation22_spill] sm:$0xff] %v9492_v11  ;;  %14542 = vst [vmem:[#allocation148_spill] sm:$0xff] %v9494_v13 }
 0xa8c   :  { %3258 = vrot.lane.b32.xlu1 %v9474_v1, %s5714_s28  ;;  %4378 = vrot.lane.b32.xlu0 %v9474_v1, %s5718_s21 }
 0xa8e   :  { %v9500_v21 = vpop.permute.xlu1 %3908  ;;  %v9502_v12 = vpop.permute.xlu0 %3684 }
 0xa8f   :  { %14543 = vst [vmem:[#allocation150_spill] sm:$0xff] %v9500_v21  ;;  %14544 = vst [vmem:[#allocation20_spill] sm:$0xff] %v9502_v12 }
 0xa90   :  { %3706 = vrot.lane.b32.xlu1 %v9474_v1, %s5713_s13  ;;  %4826 = vrot.lane.b32.xlu0 %v9474_v1, %s5720_s22 }
 0xa92   :  { %v9512_v20 = vpop.permute.xlu1 %4132  ;;  %v9514_v4 = vpop.permute.xlu0 %3252 }
 0xa93   :  { %14546 = vst [vmem:[#allocation61_spill] sm:$0xff] %v9512_v20  ;;  %14547 = vst [vmem:[#allocation39_spill] sm:$0xff] %v9514_v4 }
 0xa94   :  { %4154 = vrot.lane.b32.xlu1 %v9474_v1, %s5717_s20  ;;  %3244 = vrot.lane.b32.xlu0 %v9510_v49, %s5714_s28 }
 0xa96   :  { %v9520_v21 = vpop.permute.xlu1 %4356  ;;  %v9522_v12 = vpop.permute.xlu0 %3700 }
 0xa97   :  { %14548 = vst [vmem:[#allocation128_spill] sm:$0xff] %v9520_v21  ;;  %14549 = vst [vmem:[#allocation122_spill] sm:$0xff] %v9522_v12 }
 0xa98   :  { %4602 = vrot.lane.b32.xlu1 %v9474_v1, %s5719_s1  ;;  %3692 = vrot.lane.b32.xlu0 %v9510_v49, %s5713_s13 }
 0xa9a   :  { %v9532_v20 = vpop.permute.xlu1 %4580  ;;  %v9534_v11 = vpop.permute.xlu0 %4148 }
 0xa9b   :  { %14551 = vst [vmem:[#allocation45_spill] sm:$0xff] %v9532_v20  ;;  %14552 = vst [vmem:[#allocation149_spill] sm:$0xff] %v9534_v11 }
 0xa9c   :  { %3468 = vrot.lane.b32.xlu1 %v9510_v49, %s5715_s29  ;;  %3260 = vrot.lane.b32.xlu0 %v9530_v30, %s5714_s28 }
 0xa9e   :  { %v9540_v21 = vpop.permute.xlu1 %4804  ;;  %v9542_v12 = vpop.permute.xlu0 %3462 }
 0xa9f   :  { %14553 = vst [vmem:[#allocation126_spill] sm:$0xff] %v9540_v21  ;;  %14554 = vst [vmem:[#allocation33_spill] sm:$0xff] %v9542_v12  ;;  %v9558_v21 = vadd.f32 %v9174_v15, %v9244_v7 }
 0xaa0   :  { %3916 = vrot.lane.b32.xlu1 %v9510_v49, %s5716_s0  ;;  %3708 = vrot.lane.b32.xlu0 %v9530_v30, %s5713_s13 }
 0xaa1   :  { %14557 = vst [vmem:[#allocation115_spill] sm:$0xff] %v9558_v21 }
 0xaa2   :  { %v9548_v61 = vpop.permute.xlu1 %3476  ;;  %v9550_v54 = vpop.permute.xlu0 %3910 }
 0xaa3   :  { %14555 = vst [vmem:[#allocation66_spill] sm:$0xff] %v9548_v61  ;;  %14556 = vst [vmem:[#allocation124_spill] sm:$0xff] %v9550_v54 }
 0xaa4   :  { %4140 = vrot.lane.b32.xlu1 %v9510_v49, %s5717_s20  ;;  %4156 = vrot.lane.b32.xlu0 %v9530_v30, %s5717_s20 }
 0xaa6   :  { %v9560_v12 = vpop.permute.xlu1 %3924  ;;  %v9562_v20 = vpop.permute.xlu0 %4358 }
 0xaa7   :  { %14558 = vst [vmem:[#allocation28_spill] sm:$0xff] %v9560_v12  ;;  %14559 = vst [vmem:[#allocation26_spill] sm:$0xff] %v9562_v20 }
 0xaa8   :  { %v3121_v11 = vpop.f32.mrb[32].mxu1  ;;  %4364 = vrot.lane.b32.xlu1 %v9510_v49, %s5718_s21  ;;  %3470 = vrot.lane.b32.xlu0 %v9558_v21, %s5715_s29 }
 0xaa9   :  { %v9568_v54 = vpop.f32.mrb[33].mxu1 }
 0xaaa   :  { %v9570_v1 = vpop.f32.mrb[34].mxu1  ;;  %v9572_v61 = vpop.permute.xlu1 %4372 }
 0xaab   :  { %14560 = vst [vmem:[#allocation99_spill] sm:$0xff] %v9572_v61  ;;  %v9574_v13 = vpop.permute.xlu0 %4582  ;;  %v9576_v15 = vpop.f32.mrb[35].mxu1 }
 0xaac   :  { %14561 = vst [vmem:[#allocation48_spill] sm:$0xff] %v9574_v13  ;;  %4588 = vrot.lane.b32.xlu1 %v9510_v49, %s5719_s1  ;;  %3918 = vrot.lane.b32.xlu0 %v9558_v21, %s5716_s0 }
 0xaae   :  { %v9582_v20 = vpop.permute.xlu1 %4596 }
 0xaaf   :  { %14562 = vst [vmem:[#allocation47_spill] sm:$0xff] %v9582_v20  ;;  %v9584_v12 = vpop.permute.xlu0 %4806 }
 0xab0   :  { %14563 = vst [vmem:[#allocation52_spill] sm:$0xff] %v9584_v12  ;;  %v9586_v4 = vpop.f32.mrb[36].mxu1  ;;  %4812 = vrot.lane.b32.xlu1 %v9510_v49, %s5720_s22  ;;  %4366 = vrot.lane.b32.xlu0 %v9558_v21, %s5718_s21 }
 0xab1   :  { %v9592_v13 = vpop.f32.mrb[37].mxu1 }
 0xab2   :  { %v9594_v61 = vpop.f32.mrb[38].mxu1  ;;  %v9596_v52 = vpop.permute.xlu1 %4820 }
 0xab3   :  { %14564 = vst [vmem:[#allocation101_spill] sm:$0xff] %v9596_v52  ;;  %v9598_v28 = vpop.permute.xlu0 %3478  ;;  %v9600_v41 = vpop.f32.mrb[39].mxu1  ;;  %v9620_v52 = vadd.f32 %v9176_v16, %v9244_v7 }
 0xab4   :  { %14565 = vst [vmem:[#allocation103_spill] sm:$0xff] %v9598_v28  ;;  %3484 = vrot.lane.b32.xlu1 %v9530_v30, %s5715_s29  ;;  %4590 = vrot.lane.b32.xlu0 %v9558_v21, %s5719_s1 }
 0xab5   :  { %14570 = vst [vmem:[#allocation162_spill] sm:$0xff] %v9620_v52 }
 0xab6   :  { %v9606_v12 = vpop.permute.xlu1 %3238 }
 0xab7   :  { %14566 = vst [vmem:[#allocation49_spill] sm:$0xff] %v9606_v12  ;;  %v9608_v20 = vpop.permute.xlu0 %3926 }
 0xab8   :  { %14567 = vst [vmem:[#allocation159_spill] sm:$0xff] %v9608_v20  ;;  %v9610_v49 = vpop.f32.mrb[40].mxu1  ;;  %3932 = vrot.lane.b32.xlu1 %v9530_v30, %s5716_s0  ;;  %4814 = vrot.lane.b32.xlu0 %v9558_v21, %s5720_s22 }
 0xab9   :  { %14568 = vst [vmem:[#allocation160_spill] sm:$0xff] %v9610_v49  ;;  %v9616_v28 = vpop.f32.mrb[41].mxu1 }
 0xaba   :  { %14569 = vst [vmem:[#allocation161_spill] sm:$0xff] %v9616_v28  ;;  %v9622_v47 = vpop.f32.mrb[42].mxu1  ;;  %v9624_v23 = vpop.permute.xlu1 %3686 }
 0xabb   :  { %14571 = vst [vmem:[#allocation163_spill] sm:$0xff] %v9622_v47  ;;  %14572 = vst [vmem:[#allocation164_spill] sm:$0xff] %v9624_v23  ;;  %v9626_v12 = vpop.permute.xlu0 %4374  ;;  %v9628_v20 = vpop.f32.mrb[43].mxu1 }
 0xabc   :  { %14573 = vst [vmem:[#allocation165_spill] sm:$0xff] %v9626_v12  ;;  %14574 = vst [vmem:[#allocation166_spill] sm:$0xff] %v9628_v20  ;;  %4380 = vrot.lane.b32.xlu1 %v9530_v30, %s5718_s21  ;;  %3486 = vrot.lane.b32.xlu0 %v9620_v52, %s5715_s29 }
 0xabe   :  { %v9634_v49 = vpop.permute.xlu1 %4134 }
 0xabf   :  { %14575 = vst [vmem:[#allocation167_spill] sm:$0xff] %v9634_v49  ;;  %v9636_v28 = vpop.permute.xlu0 %4598 }
 0xac0   :  { %14576 = vst [vmem:[#allocation168_spill] sm:$0xff] %v9636_v28  ;;  %v9638_v16 = vpop.f32.mrb[44].mxu1  ;;  %4604 = vrot.lane.b32.xlu1 %v9530_v30, %s5719_s1  ;;  %3934 = vrot.lane.b32.xlu0 %v9620_v52, %s5716_s0 }
 0xac1   :  { %14577 = vst [vmem:[#allocation169_spill] sm:$0xff] %v9638_v16  ;;  %v9644_v23 = vpop.f32.mrb[45].mxu1 }
 0xac2   :  { %14578 = vst [vmem:[#allocation170_spill] sm:$0xff] %v9644_v23  ;;  %v9646_v7 = vpop.f32.mrb[46].mxu1  ;;  %v9648_v20 = vpop.permute.xlu1 %3254  ;;  %v14633_v23 = vld [vmem:[#allocation143_spill] sm:$0xff] }
 0xac3   :  { %14579 = vst [vmem:[#allocation171_spill] sm:$0xff] %v9646_v7  ;;  %14580 = vst [vmem:[#allocation172_spill] sm:$0xff] %v9648_v20  ;;  %v9650_v12 = vpop.permute.xlu0 %4822  ;;  %v9652_v47 = vpop.f32.mrb[47].mxu1  ;;  %v9859_v28 = vmul.f32 %v8840_v58, %v14633_v23  ;;  %v9863_v20 = vmul.f32 %v8840_v58, %v14382_v53 }
 0xac4   :  { %14581 = vst [vmem:[#allocation173_spill] sm:$0xff] %v9650_v12  ;;  %14582 = vst [vmem:[#allocation174_spill] sm:$0xff] %v9652_v47  ;;  %4828 = vrot.lane.b32.xlu1 %v9530_v30, %s5720_s22  ;;  %4382 = vrot.lane.b32.xlu0 %v9620_v52, %s5718_s21  ;;  %v9675_v47 = vadd.f32 %v3121_v11, %v8996_v9 }
 0xac5   :  { %14634 = vst [vmem:[#allocation143_spill] sm:$0xff] %v9859_v28  ;;  %14635 = vst [vmem:[#allocation223_spill] sm:$0xff] %v9863_v20 }
 0xac6   :  { %v9658_v49 = vpop.permute.xlu1 %3702  ;;  %14587 = vst [vmem:[#allocation179_spill] sm:$0xff] %v9675_v47 }
 0xac7   :  { %14583 = vst [vmem:[#allocation175_spill] sm:$0xff] %v9658_v49  ;;  %v9660_v16 = vpop.permute.xlu0 %3240 }
 0xac8   :  { %14584 = vst [vmem:[#allocation176_spill] sm:$0xff] %v9660_v16  ;;  %3246 = vrot.lane.b32.xlu1 %v9558_v21, %s5714_s28  ;;  %4606 = vrot.lane.b32.xlu0 %v9620_v52, %s5719_s1 }
 0xaca   :  { %v9666_v7 = vpop.permute.xlu1 %4150 }
 0xacb   :  { %14585 = vst [vmem:[#allocation177_spill] sm:$0xff] %v9666_v7  ;;  %v9668_v12 = vpop.permute.xlu0 %3688 }
 0xacc   :  { %14586 = vst [vmem:[#allocation178_spill] sm:$0xff] %v9668_v12  ;;  %3694 = vrot.lane.b32.xlu1 %v9558_v21, %s5713_s13  ;;  %4830 = vrot.lane.b32.xlu0 %v9620_v52, %s5720_s22 }
 0xace   :  { %v9677_v16 = vpop.permute.xlu1 %3464 }
 0xacf   :  { %14588 = vst [vmem:[#allocation180_spill] sm:$0xff] %v9677_v16  ;;  %v9679_v49 = vpop.permute.xlu0 %4136 }
 0xad0   :  { %14589 = vst [vmem:[#allocation181_spill] sm:$0xff] %v9679_v49  ;;  %4142 = vrot.lane.b32.xlu1 %v9558_v21, %s5717_s20  ;;  %3264 = vrot.lane.b32.xlu0 %v9675_v47, %s5714_s28 }
 0xad2   :  { %v9685_v12 = vpop.permute.xlu1 %3912 }
 0xad3   :  { %14590 = vst [vmem:[#allocation182_spill] sm:$0xff] %v9685_v12  ;;  %v9687_v7 = vpop.permute.xlu0 %4584 }
 0xad4   :  { %14591 = vst [vmem:[#allocation183_spill] sm:$0xff] %v9687_v7  ;;  %3262 = vrot.lane.b32.xlu1 %v9620_v52, %s5714_s28  ;;  %3712 = vrot.lane.b32.xlu0 %v9675_v47, %s5713_s13 }
 0xad6   :  { %v9693_v11 = vpop.permute.xlu1 %4360 }
 0xad7   :  { %14592 = vst [vmem:[#allocation184_spill] sm:$0xff] %v9693_v11  ;;  %v9695_v16 = vpop.permute.xlu0 %3256  ;;  %v9711_v11 = vadd.f32 %v9568_v54, %v8996_v9 }
 0xad8   :  { %14593 = vst [vmem:[#allocation185_spill] sm:$0xff] %v9695_v16  ;;  %3710 = vrot.lane.b32.xlu1 %v9620_v52, %s5713_s13  ;;  %4160 = vrot.lane.b32.xlu0 %v9675_v47, %s5717_s20 }
 0xad9   :  { %14596 = vst [vmem:[#allocation188_spill] sm:$0xff] %v9711_v11 }
 0xada   :  { %v9701_v49 = vpop.permute.xlu1 %4808 }
 0xadb   :  { %14594 = vst [vmem:[#allocation186_spill] sm:$0xff] %v9701_v49  ;;  %v9703_v12 = vpop.permute.xlu0 %3704 }
 0xadc   :  { %14595 = vst [vmem:[#allocation187_spill] sm:$0xff] %v9703_v12  ;;  %4158 = vrot.lane.b32.xlu1 %v9620_v52, %s5717_s20  ;;  %4608 = vrot.lane.b32.xlu0 %v9675_v47, %s5719_s1  ;;  %v14751_v52 = vld [vmem:[#allocation5_spill] sm:$0xff] }
 0xade   :  { %v9713_v7 = vpop.permute.xlu1 %3480 }
 0xadf   :  { %14597 = vst [vmem:[#allocation189_spill] sm:$0xff] %v9713_v7  ;;  %v9715_v16 = vpop.permute.xlu0 %4152 }
 0xae0   :  { %14598 = vst [vmem:[#allocation190_spill] sm:$0xff] %v9715_v16  ;;  %3488 = vrot.lane.b32.xlu1 %v9675_v47, %s5715_s29  ;;  %3280 = vrot.lane.b32.xlu0 %v9711_v11, %s5714_s28 }
 0xae2   :  { %v9721_v49 = vpop.permute.xlu1 %3928 }
 0xae3   :  { %14599 = vst [vmem:[#allocation191_spill] sm:$0xff] %v9721_v49  ;;  %v9723_v12 = vpop.permute.xlu0 %4600 }
 0xae4   :  { %14600 = vst [vmem:[#allocation192_spill] sm:$0xff] %v9723_v12  ;;  %3936 = vrot.lane.b32.xlu1 %v9675_v47, %s5716_s0  ;;  %3728 = vrot.lane.b32.xlu0 %v9711_v11, %s5713_s13 }
 0xae6   :  { %v9729_v9 = vpop.permute.xlu1 %4376 }
 0xae7   :  { %14601 = vst [vmem:[#allocation193_spill] sm:$0xff] %v9729_v9  ;;  %v9731_v54 = vpop.permute.xlu0 %3466  ;;  %v9747_v9 = vadd.f32 %v9570_v1, %v9188_v5 }
 0xae8   :  { %14602 = vst [vmem:[#allocation194_spill] sm:$0xff] %v9731_v54  ;;  %4384 = vrot.lane.b32.xlu1 %v9675_v47, %s5718_s21  ;;  %4176 = vrot.lane.b32.xlu0 %v9711_v11, %s5717_s20 }
 0xae9   :  { %14605 = vst [vmem:[#allocation197_spill] sm:$0xff] %v9747_v9 }
 0xaea   :  { %v9737_v16 = vpop.permute.xlu1 %4824 }
 0xaeb   :  { %14603 = vst [vmem:[#allocation195_spill] sm:$0xff] %v9737_v16  ;;  %v9739_v49 = vpop.permute.xlu0 %3914 }
 0xaec   :  { %14604 = vst [vmem:[#allocation196_spill] sm:$0xff] %v9739_v49  ;;  %4832 = vrot.lane.b32.xlu1 %v9675_v47, %s5720_s22  ;;  %4624 = vrot.lane.b32.xlu0 %v9711_v11, %s5719_s1 }
 0xaee   :  { %v9749_v54 = vpop.permute.xlu1 %3242 }
 0xaef   :  { %14606 = vst [vmem:[#allocation198_spill] sm:$0xff] %v9749_v54  ;;  %v9751_v12 = vpop.permute.xlu0 %4362 }
 0xaf0   :  { %14607 = vst [vmem:[#allocation199_spill] sm:$0xff] %v9751_v12  ;;  %3504 = vrot.lane.b32.xlu1 %v9711_v11, %s5715_s29  ;;  %3490 = vrot.lane.b32.xlu0 %v9747_v9, %s5715_s29 }
 0xaf2   :  { %v9757_v49 = vpop.permute.xlu1 %3690 }
 0xaf3   :  { %14608 = vst [vmem:[#allocation200_spill] sm:$0xff] %v9757_v49  ;;  %v9759_v16 = vpop.permute.xlu0 %4810 }
 0xaf4   :  { %14609 = vst [vmem:[#allocation201_spill] sm:$0xff] %v9759_v16  ;;  %3952 = vrot.lane.b32.xlu1 %v9711_v11, %s5716_s0  ;;  %3938 = vrot.lane.b32.xlu0 %v9747_v9, %s5716_s0 }
 0xaf6   :  { %v9765_v1 = vpop.permute.xlu1 %4138 }
 0xaf7   :  { %14610 = vst [vmem:[#allocation202_spill] sm:$0xff] %v9765_v1  ;;  %v9767_v54 = vpop.permute.xlu0 %3482  ;;  %v9783_v1 = vadd.f32 %v9576_v15, %v9188_v5 }
 0xaf8   :  { %14611 = vst [vmem:[#allocation203_spill] sm:$0xff] %v9767_v54  ;;  %4400 = vrot.lane.b32.xlu1 %v9711_v11, %s5718_s21  ;;  %4386 = vrot.lane.b32.xlu0 %v9747_v9, %s5718_s21 }
 0xaf9   :  { %14614 = vst [vmem:[#allocation206_spill] sm:$0xff] %v9783_v1 }
 0xafa   :  { %v9773_v12 = vpop.permute.xlu1 %4586 }
 0xafb   :  { %14612 = vst [vmem:[#allocation204_spill] sm:$0xff] %v9773_v12  ;;  %v9775_v49 = vpop.permute.xlu0 %3930 }
 0xafc   :  { %14613 = vst [vmem:[#allocation205_spill] sm:$0xff] %v9775_v49  ;;  %4848 = vrot.lane.b32.xlu1 %v9711_v11, %s5720_s22  ;;  %4834 = vrot.lane.b32.xlu0 %v9747_v9, %s5720_s22 }
 0xafe   :  { %v9785_v16 = vpop.permute.xlu1 %3258 }
 0xaff   :  { %14615 = vst [vmem:[#allocation207_spill] sm:$0xff] %v9785_v16  ;;  %v9787_v54 = vpop.permute.xlu0 %4378 }
 0xb00   :  { %14616 = vst [vmem:[#allocation208_spill] sm:$0xff] %v9787_v54  ;;  %3266 = vrot.lane.b32.xlu1 %v9747_v9, %s5714_s28  ;;  %3506 = vrot.lane.b32.xlu0 %v9783_v1, %s5715_s29 }
 0xb02   :  { %v9793_v12 = vpop.permute.xlu1 %3706 }
 0xb03   :  { %14617 = vst [vmem:[#allocation209_spill] sm:$0xff] %v9793_v12  ;;  %v9795_v49 = vpop.permute.xlu0 %4826 }
 0xb04   :  { %14618 = vst [vmem:[#allocation210_spill] sm:$0xff] %v9795_v49  ;;  %3714 = vrot.lane.b32.xlu1 %v9747_v9, %s5713_s13  ;;  %3954 = vrot.lane.b32.xlu0 %v9783_v1, %s5716_s0 }
 0xb06   :  { %v9801_v5 = vpop.permute.xlu1 %4154 }
 0xb07   :  { %14619 = vst [vmem:[#allocation211_spill] sm:$0xff] %v9801_v5  ;;  %v9803_v15 = vpop.permute.xlu0 %3244  ;;  %v9819_v5 = vadd.f32 %v9586_v4, %v8998_v35  ;;  %v14627_v4 = vld [vmem:[#allocation142_spill] sm:$0xff] }
 0xb08   :  { %14620 = vst [vmem:[#allocation212_spill] sm:$0xff] %v9803_v15  ;;  %4162 = vrot.lane.b32.xlu1 %v9747_v9, %s5717_s20  ;;  %4402 = vrot.lane.b32.xlu0 %v9783_v1, %s5718_s21 }
 0xb0a   :  { %v9809_v54 = vpop.permute.xlu1 %4602 }
 0xb0b   :  { %14621 = vst [vmem:[#allocation213_spill] sm:$0xff] %v9809_v54  ;;  %v9811_v12 = vpop.permute.xlu0 %3692 }
 0xb0c   :  { %14622 = vst [vmem:[#allocation214_spill] sm:$0xff] %v9811_v12  ;;  %4610 = vrot.lane.b32.xlu1 %v9747_v9, %s5719_s1  ;;  %4850 = vrot.lane.b32.xlu0 %v9783_v1, %s5720_s22 }
 0xb0e   :  { %v9821_v15 = vpop.permute.xlu1 %3468 }
 0xb0f   :  { %14623 = vst [vmem:[#allocation215_spill] sm:$0xff] %v9821_v15  ;;  %v9823_v49 = vpop.permute.xlu0 %3260  ;;  %v9839_v15 = vmul.f32 %v8840_v58, %v14627_v4 }
 0xb10   :  { %14624 = vst [vmem:[#allocation216_spill] sm:$0xff] %v9823_v49  ;;  %3282 = vrot.lane.b32.xlu1 %v9783_v1, %s5714_s28  ;;  %3268 = vrot.lane.b32.xlu0 %v9819_v5, %s5714_s28  ;;  %v9843_v49 = vmul.f32 %v8842_v24, %v14627_v4 }
 0xb12   :  { %v9829_v12 = vpop.permute.xlu1 %3916  ;;  %14628 = vst [vmem:[#allocation142_spill] sm:$0xff] %v9843_v49 }
 0xb13   :  { %14625 = vst [vmem:[#allocation217_spill] sm:$0xff] %v9829_v12  ;;  %v9831_v54 = vpop.permute.xlu0 %3708  ;;  %v9851_v12 = vmul.f32 %v8844_v27, %v14627_v4 }
 0xb14   :  { %14626 = vst [vmem:[#allocation218_spill] sm:$0xff] %v9831_v54  ;;  %3730 = vrot.lane.b32.xlu1 %v9783_v1, %s5713_s13  ;;  %3716 = vrot.lane.b32.xlu0 %v9819_v5, %s5713_s13  ;;  %v9855_v54 = vmul.f32 %v8840_v58, %v14381_v19  ;;  %v14639_v58 = vld [vmem:[#allocation146_spill] sm:$0xff] }
 0xb15   :  { %14631 = vst [vmem:[#allocation221_spill] sm:$0xff] %v9851_v12  ;;  %v9879_v12 = vmul.f32 %v8842_v24, %v14382_v53  ;;  %v9883_v28 = vmul.f32 %v8846_v42, %v14639_v58  ;;  %v9887_v20 = vmul.f32 %v8848_v29, %v14639_v58  ;;  %v9909_v49 = vmul.f32 %v8852_v0, %v14639_v58 }
 0xb16   :  { %v9845_v16 = vpop.permute.xlu1 %4140  ;;  %14632 = vst [vmem:[#allocation222_spill] sm:$0xff] %v9855_v54  ;;  %v9891_v54 = vmul.f32 %v8850_v48, %v14639_v58 }
 0xb17   :  { %14629 = vst [vmem:[#allocation219_spill] sm:$0xff] %v9845_v16  ;;  %v9847_v7 = vpop.permute.xlu0 %4156  ;;  %v9871_v16 = vmul.f32 %v8842_v24, %v14381_v19  ;;  %14638 = vst [vmem:[#allocation226_spill] sm:$0xff] %v9879_v12 }
 0xb18   :  { %14630 = vst [vmem:[#allocation220_spill] sm:$0xff] %v9847_v7  ;;  %4178 = vrot.lane.b32.xlu1 %v9783_v1, %s5717_s20  ;;  %4164 = vrot.lane.b32.xlu0 %v9819_v5, %s5717_s20  ;;  %v9875_v7 = vmul.f32 %v8842_v24, %v14633_v23  ;;  %14640 = vst [vmem:[#allocation146_spill] sm:$0xff] %v9887_v20  ;;  %v9899_v24 = vadd.f32 %v9592_v13, %v8998_v35  ;;  %v14646_v20 = vld [vmem:[#allocation147_spill] sm:$0xff] }
 0xb19   :  { %14636 = vst [vmem:[#allocation224_spill] sm:$0xff] %v9871_v16  ;;  %14641 = vst [vmem:[#allocation227_spill] sm:$0xff] %v9891_v54  ;;  %v9895_v16 = vmul.f32 %v8844_v27, %v14381_v19  ;;  %v9913_v54 = vmul.f32 %v8846_v42, %v14646_v20  ;;  %v9919_v35 = vmul.f32 %v8846_v42, %v14408_v59 }
 0xb1a   :  { %14637 = vst [vmem:[#allocation225_spill] sm:$0xff] %v9875_v7  ;;  %v9901_v12 = vpop.permute.xlu1 %4364  ;;  %v9905_v7 = vmul.f32 %v8846_v42, %v14407_v26  ;;  %14645 = vst [vmem:[#allocation231_spill] sm:$0xff] %v9909_v49  ;;  %v9923_v13 = vmul.f32 %v8848_v29, %v14407_v26  ;;  %v9931_v49 = vmul.f32 %v8848_v29, %v14408_v59 }
 0xb1b   :  { %14642 = vst [vmem:[#allocation228_spill] sm:$0xff] %v9895_v16  ;;  %14643 = vst [vmem:[#allocation229_spill] sm:$0xff] %v9901_v12  ;;  %v9915_v9 = vpop.permute.xlu0 %3470  ;;  %v9927_v16 = vmul.f32 %v8848_v29, %v14646_v20  ;;  %v9939_v42 = vmul.f32 %v8850_v48, %v14407_v26  ;;  %v9943_v12 = vmul.f32 %v8850_v48, %v14646_v20 }
 0xb1c   :  { %14644 = vst [vmem:[#allocation230_spill] sm:$0xff] %v9905_v7  ;;  %14647 = vst [vmem:[#allocation147_spill] sm:$0xff] %v9913_v54  ;;  %4626 = vrot.lane.b32.xlu1 %v9783_v1, %s5719_s1  ;;  %3284 = vrot.lane.b32.xlu0 %v9899_v24, %s5714_s28  ;;  %v9951_v29 = vmul.f32 %v8844_v27, %v14633_v23  ;;  %v14705_v54 = vld [vmem:[#allocation154_spill] sm:$0xff] }
 0xb1d   :  { %14648 = vst [vmem:[#allocation232_spill] sm:$0xff] %v9915_v9  ;;  %14649 = vst [vmem:[#allocation233_spill] sm:$0xff] %v9919_v35  ;;  %v9947_v9 = vmul.f32 %v8850_v48, %v14408_v59 }
 0xb1e   :  { %14650 = vst [vmem:[#allocation234_spill] sm:$0xff] %v9923_v13  ;;  %14651 = vst [vmem:[#allocation235_spill] sm:$0xff] %v9927_v16  ;;  %v9959_v16 = vmul.f32 %v8852_v0, %v14407_v26  ;;  %v14668_v13 = vld [vmem:[#allocation132_spill] sm:$0xff] }
 0xb1f   :  { %14652 = vst [vmem:[#allocation236_spill] sm:$0xff] %v9931_v49  ;;  %14653 = vst [vmem:[#allocation237_spill] sm:$0xff] %v9939_v42  ;;  %v9955_v49 = vmul.f32 %v8844_v27, %v14382_v53  ;;  %v9963_v42 = vmul.f32 %v8852_v0, %v14646_v20  ;;  %v9991_v7 = vmul.f32 %v8854_v8, %v14668_v13 }
 0xb20   :  { %14654 = vst [vmem:[#allocation238_spill] sm:$0xff] %v9943_v12  ;;  %14655 = vst [vmem:[#allocation239_spill] sm:$0xff] %v9947_v9  ;;  %v14660_v12 = vld [vmem:[#allocation131_spill] sm:$0xff]  ;;  %3492 = vrot.lane.b32.xlu1 %v9819_v5, %s5715_s29  ;;  %3732 = vrot.lane.b32.xlu0 %v9899_v24, %s5713_s13 }
 0xb21   :  { %14656 = vst [vmem:[#allocation240_spill] sm:$0xff] %v9951_v29  ;;  %14657 = vst [vmem:[#allocation241_spill] sm:$0xff] %v9955_v49  ;;  %v9967_v48 = vmul.f32 %v8854_v8, %v14660_v12  ;;  %v9971_v9 = vmul.f32 %v8856_v22, %v14660_v12  ;;  %v9973_v29 = vpop.permute.xlu1 %4588  ;;  %v9977_v27 = vmul.f32 %v8858_v55, %v14660_v12  ;;  %v9983_v49 = vpop.permute.xlu0 %3918 }
 0xb22   :  { %14658 = vst [vmem:[#allocation242_spill] sm:$0xff] %v9959_v16  ;;  %14659 = vst [vmem:[#allocation243_spill] sm:$0xff] %v9963_v42  ;;  %v9981_v16 = vmul.f32 %v8852_v0, %v14408_v59  ;;  %v9987_v42 = vmul.f32 %v8854_v8, %v14385_v44  ;;  %v10007_v0 = vmul.f32 %v8856_v22, %v14668_v13 }
 0xb23   :  { %14661 = vst [vmem:[#allocation131_spill] sm:$0xff] %v9967_v48  ;;  %14662 = vst [vmem:[#allocation244_spill] sm:$0xff] %v9971_v9  ;;  %v14746_v48 = vld [vmem:[#allocation19_spill] sm:$0xff] }
 0xb24   :  { %14663 = vst [vmem:[#allocation245_spill] sm:$0xff] %v9973_v29  ;;  %14664 = vst [vmem:[#allocation246_spill] sm:$0xff] %v9977_v27  ;;  %v9995_v29 = vmul.f32 %v8854_v8, %v14386_v39  ;;  %v9999_v27 = vmul.f32 %v8856_v22, %v14385_v44  ;;  %v10015_v8 = vmul.f32 %v8858_v55, %v14385_v44  ;;  %3940 = vrot.lane.b32.xlu1 %v9819_v5, %s5716_s0 }
 0xb25   :  { %14665 = vst [vmem:[#allocation247_spill] sm:$0xff] %v9981_v16  ;;  %14666 = vst [vmem:[#allocation248_spill] sm:$0xff] %v9983_v49  ;;  %v10011_v16 = vmul.f32 %v8856_v22, %v14386_v39  ;;  %v14675_v49 = vld [vmem:[#allocation133_spill] sm:$0xff]  ;;  %v10051_v9 = vpop.permute.xlu0 %4366  ;;  %4180 = vrot.lane.b32.xlu0 %v9899_v24, %s5717_s20 }
 0xb26   :  { %14667 = vst [vmem:[#allocation249_spill] sm:$0xff] %v9987_v42  ;;  %14669 = vst [vmem:[#allocation132_spill] sm:$0xff] %v9991_v7  ;;  %v10023_v7 = vmul.f32 %v8862_v40, %v14675_v49  ;;  %v10041_v42 = vmul.f32 %v8860_v43, %v14388_v3 }
 0xb27   :  { %14670 = vst [vmem:[#allocation250_spill] sm:$0xff] %v9995_v29  ;;  %14671 = vst [vmem:[#allocation251_spill] sm:$0xff] %v9999_v27  ;;  %v10019_v27 = vmul.f32 %v8860_v43, %v14675_v49  ;;  %v10027_v29 = vmul.f32 %v8864_v51, %v14675_v49 }
 0xb28   :  { %14672 = vst [vmem:[#allocation252_spill] sm:$0xff] %v10007_v0  ;;  %14673 = vst [vmem:[#allocation253_spill] sm:$0xff] %v10011_v16  ;;  %v14679_v0 = vld [vmem:[#allocation134_spill] sm:$0xff]  ;;  %v10033_v16 = vpop.permute.xlu1 %4812  ;;  %4388 = vrot.lane.b32.xlu1 %v9819_v5, %s5718_s21 }
 0xb29   :  { %14674 = vst [vmem:[#allocation254_spill] sm:$0xff] %v10015_v8  ;;  %14676 = vst [vmem:[#allocation133_spill] sm:$0xff] %v10019_v27  ;;  %v10031_v22 = vmul.f32 %v8860_v43, %v14679_v0  ;;  %v10037_v8 = vmul.f32 %v8860_v43, %v14387_v57  ;;  %v10063_v43 = vmul.f32 %v8858_v55, %v14668_v13 }
 0xb2a   :  { %14677 = vst [vmem:[#allocation255_spill] sm:$0xff] %v10023_v7  ;;  %14678 = vst [vmem:[#allocation256_spill] sm:$0xff] %v10027_v29  ;;  %v10045_v7 = vmul.f32 %v8862_v40, %v14679_v0  ;;  %v10049_v29 = vmul.f32 %v8862_v40, %v14387_v57 }
 0xb2b   :  { %14680 = vst [vmem:[#allocation134_spill] sm:$0xff] %v10031_v22  ;;  %14681 = vst [vmem:[#allocation257_spill] sm:$0xff] %v10033_v16  ;;  %v10055_v16 = vmul.f32 %v8862_v40, %v14388_v3  ;;  %v10079_v40 = vmul.f32 %v8864_v51, %v14387_v57 }
 0xb2c   :  { %14682 = vst [vmem:[#allocation258_spill] sm:$0xff] %v10037_v8  ;;  %14683 = vst [vmem:[#allocation259_spill] sm:$0xff] %v10041_v42  ;;  %v10059_v8 = vmul.f32 %v8864_v51, %v14679_v0  ;;  %v14691_v42 = vld [vmem:[#allocation136_spill] sm:$0xff]  ;;  %4612 = vrot.lane.b32.xlu1 %v9819_v5, %s5719_s1 }
 0xb2d   :  { %14684 = vst [vmem:[#allocation260_spill] sm:$0xff] %v10045_v7  ;;  %14685 = vst [vmem:[#allocation261_spill] sm:$0xff] %v10049_v29  ;;  %v10067_v7 = vmul.f32 %v8858_v55, %v14386_v39  ;;  %v10071_v29 = vmul.f32 %v8866_v50, %v14691_v42  ;;  %v10087_v55 = vmul.f32 %v8868_v18, %v14691_v42 }
 0xb2e   :  { %14686 = vst [vmem:[#allocation262_spill] sm:$0xff] %v10051_v9  ;;  %14687 = vst [vmem:[#allocation263_spill] sm:$0xff] %v10055_v16  ;;  %v10099_v16 = vmul.f32 %v8866_v50, %v14389_v2 }
 0xb2f   :  { %14688 = vst [vmem:[#allocation264_spill] sm:$0xff] %v10059_v8  ;;  %14689 = vst [vmem:[#allocation265_spill] sm:$0xff] %v10063_v43  ;;  %v10083_v8 = vmul.f32 %v8864_v51, %v14388_v3  ;;  %v14697_v43 = vld [vmem:[#allocation137_spill] sm:$0xff]  ;;  %v10103_v51 = vadd.f32 %v9594_v61, %v9224_v56  ;;  %v14708_v61 = vld [vmem:[#allocation139_spill] sm:$0xff] }
 0xb30   :  { %14690 = vst [vmem:[#allocation266_spill] sm:$0xff] %v10067_v7  ;;  %14692 = vst [vmem:[#allocation136_spill] sm:$0xff] %v10071_v29  ;;  %v10091_v7 = vmul.f32 %v8870_v10, %v14691_v42  ;;  %v10095_v9 = vmul.f32 %v8866_v50, %v14697_v43  ;;  %4836 = vrot.lane.b32.xlu1 %v9819_v5, %s5720_s22 }
 0xb31   :  { %14693 = vst [vmem:[#allocation267_spill] sm:$0xff] %v10079_v40  ;;  %14694 = vst [vmem:[#allocation268_spill] sm:$0xff] %v10083_v8  ;;  %v10105_v8 = vpop.permute.xlu1 %3484  ;;  %v14701_v40 = vld [vmem:[#allocation14_spill] sm:$0xff]  ;;  %3494 = vrot.lane.b32.xlu0 %v10103_v51, %s5715_s29 }
 0xb32   :  { %14695 = vst [vmem:[#allocation269_spill] sm:$0xff] %v10087_v55  ;;  %14696 = vst [vmem:[#allocation270_spill] sm:$0xff] %v10091_v7  ;;  %v10109_v35 = vmul.f32 %v8866_v50, %v14701_v40  ;;  %v10113_v7 = vmul.f32 %v8868_v18, %v14697_v43  ;;  %v10125_v55 = vmul.f32 %v14708_v61, %v14705_v54 }
 0xb33   :  { %14698 = vst [vmem:[#allocation137_spill] sm:$0xff] %v10095_v9  ;;  %14699 = vst [vmem:[#allocation271_spill] sm:$0xff] %v10099_v16  ;;  %v10117_v9 = vmul.f32 %v8868_v18, %v14389_v2  ;;  %v14706_v16 = vld [vmem:[#allocation105_spill] sm:$0xff] }
 0xb34   :  { %14700 = vst [vmem:[#allocation272_spill] sm:$0xff] %v10105_v8  ;;  %14702 = vst [vmem:[#allocation14_spill] sm:$0xff] %v10109_v35  ;;  %v10121_v22 = vmul.f32 %v14706_v16, %v14705_v54  ;;  %v14710_v8 = vld [vmem:[#allocation53_spill] sm:$0xff]  ;;  %v10131_v35 = vpop.permute.xlu0 %4590  ;;  %3508 = vrot.lane.b32.xlu1 %v9899_v24, %s5715_s29 }
 0xb35   :  { %14703 = vst [vmem:[#allocation273_spill] sm:$0xff] %v10113_v7  ;;  %14704 = vst [vmem:[#allocation274_spill] sm:$0xff] %v10117_v9  ;;  %v10129_v50 = vmul.f32 %v14710_v8, %v14705_v54  ;;  %v10135_v7 = vmul.f32 %v8868_v18, %v14701_v40  ;;  %v14714_v9 = vld [vmem:[#allocation107_spill] sm:$0xff]  ;;  %v14720_v18 = vld [vmem:[#allocation16_spill] sm:$0xff]  ;;  %3942 = vrot.lane.b32.xlu0 %v10103_v51, %s5716_s0 }
 0xb36   :  { %14707 = vst [vmem:[#allocation154_spill] sm:$0xff] %v10121_v22  ;;  %14709 = vst [vmem:[#allocation105_spill] sm:$0xff] %v10125_v55  ;;  %v10143_v1 = vmul.f32 %v14714_v9, %v14705_v54  ;;  %v14716_v55 = vld [vmem:[#allocation155_spill] sm:$0xff] }
 0xb37   :  { %14711 = vst [vmem:[#allocation139_spill] sm:$0xff] %v10129_v50  ;;  %14712 = vst [vmem:[#allocation53_spill] sm:$0xff] %v10131_v35  ;;  %v10147_v11 = vmul.f32 %v14706_v16, %v14716_v55  ;;  %v14718_v50 = vld [vmem:[#allocation15_spill] sm:$0xff]  ;;  %v10159_v47 = vmul.f32 %v14708_v61, %v14716_v55 }
 0xb38   :  { %14713 = vst [vmem:[#allocation275_spill] sm:$0xff] %v10135_v7  ;;  %14715 = vst [vmem:[#allocation107_spill] sm:$0xff] %v10143_v1  ;;  %v10151_v35 = vmul.f32 %v14706_v16, %v14718_v50  ;;  %v10155_v7 = vmul.f32 %v14706_v16, %v14720_v18  ;;  %v10163_v29 = vmul.f32 %v14708_v61, %v14718_v50  ;;  %3956 = vrot.lane.b32.xlu1 %v9899_v24, %s5716_s0 }
 0xb39   :  { %14717 = vst [vmem:[#allocation155_spill] sm:$0xff] %v10147_v11  ;;  %14722 = vst [vmem:[#allocation276_spill] sm:$0xff] %v10159_v47  ;;  %v10167_v1 = vmul.f32 %v14708_v61, %v14720_v18  ;;  %v10169_v11 = vpop.permute.xlu1 %3932  ;;  %v10177_v16 = vmul.f32 %v14710_v8, %v14718_v50  ;;  %v10181_v47 = vmul.f32 %v14710_v8, %v14720_v18  ;;  %v10187_v61 = vpop.permute.xlu0 %4814  ;;  %4390 = vrot.lane.b32.xlu0 %v10103_v51, %s5718_s21 }
 0xb3a   :  { %14719 = vst [vmem:[#allocation15_spill] sm:$0xff] %v10151_v35  ;;  %14721 = vst [vmem:[#allocation16_spill] sm:$0xff] %v10155_v7  ;;  %v10173_v35 = vmul.f32 %v14710_v8, %v14716_v55  ;;  %v10203_v8 = vmul.f32 %v8870_v10, %v14701_v40 }
 0xb3b   :  { %14723 = vst [vmem:[#allocation277_spill] sm:$0xff] %v10163_v29  ;;  %14724 = vst [vmem:[#allocation278_spill] sm:$0xff] %v10167_v1  ;;  %v10185_v29 = vmul.f32 %v8870_v10, %v14697_v43 }
 0xb3c   :  { %14725 = vst [vmem:[#allocation279_spill] sm:$0xff] %v10169_v11  ;;  %14726 = vst [vmem:[#allocation280_spill] sm:$0xff] %v10173_v35  ;;  %v10191_v11 = vmul.f32 %v14714_v9, %v14716_v55  ;;  %v10195_v35 = vmul.f32 %v14714_v9, %v14718_v50  ;;  %4404 = vrot.lane.b32.xlu1 %v9899_v24, %s5718_s21 }
 0xb3d   :  { %14727 = vst [vmem:[#allocation281_spill] sm:$0xff] %v10177_v16  ;;  %14728 = vst [vmem:[#allocation282_spill] sm:$0xff] %v10181_v47  ;;  %v10199_v16 = vmul.f32 %v8870_v10, %v14389_v2  ;;  %v14735_v47 = vld [vmem:[#allocation127_spill] sm:$0xff]  ;;  %v14741_v10 = vld [vmem:[#allocation140_spill] sm:$0xff]  ;;  %4614 = vrot.lane.b32.xlu0 %v10103_v51, %s5719_s1 }
 0xb3e   :  { %14729 = vst [vmem:[#allocation283_spill] sm:$0xff] %v10185_v29  ;;  %14730 = vst [vmem:[#allocation284_spill] sm:$0xff] %v10187_v61  ;;  %v14736_v29 = vld [vmem:[#allocation87_spill] sm:$0xff]  ;;  %v14742_v61 = vld [vmem:[#allocation144_spill] sm:$0xff] }
 0xb3f   :  { %14731 = vst [vmem:[#allocation285_spill] sm:$0xff] %v10191_v11  ;;  %14732 = vst [vmem:[#allocation286_spill] sm:$0xff] %v10195_v35  ;;  %v10207_v1 = vmul.f32 %v14736_v29, %v14735_v47  ;;  %v14738_v35 = vld [vmem:[#allocation83_spill] sm:$0xff]  ;;  %v10227_v7 = vmul.f32 %v14736_v29, %v14742_v61  ;;  %v10235_v27 = vmul.f32 %v14736_v29, %v14746_v48 }
 0xb40   :  { %14733 = vst [vmem:[#allocation287_spill] sm:$0xff] %v10199_v16  ;;  %14734 = vst [vmem:[#allocation288_spill] sm:$0xff] %v10203_v8  ;;  %v10215_v11 = vmul.f32 %v14738_v35, %v14735_v47  ;;  %v10219_v16 = vmul.f32 %v14714_v9, %v14720_v18  ;;  %v10223_v8 = vmul.f32 %v9256_v25, %v14741_v10  ;;  %4628 = vrot.lane.b32.xlu1 %v9899_v24, %s5719_s1 }
 0xb41   :  { %14737 = vst [vmem:[#allocation127_spill] sm:$0xff] %v10207_v1  ;;  %14743 = vst [vmem:[#allocation140_spill] sm:$0xff] %v10227_v7  ;;  %v14744_v1 = vld [vmem:[#allocation18_spill] sm:$0xff]  ;;  %v10239_v9 = vmul.f32 %v9272_v32, %v14741_v10  ;;  %v10249_v7 = vmul.f32 %v9256_v25, %v14751_v52  ;;  %4838 = vrot.lane.b32.xlu0 %v10103_v51, %s5720_s22 }
 0xb42   :  { %14739 = vst [vmem:[#allocation87_spill] sm:$0xff] %v10215_v11  ;;  %14740 = vst [vmem:[#allocation83_spill] sm:$0xff] %v10219_v16  ;;  %v10231_v22 = vmul.f32 %v14736_v29, %v14744_v1  ;;  %v10243_v16 = vmul.f32 %v9280_v36, %v14741_v10  ;;  %v10245_v11 = vpop.permute.xlu1 %4380  ;;  %v10255_v29 = vpop.permute.xlu0 %3486 }
 0xb43   :  { %14747 = vst [vmem:[#allocation18_spill] sm:$0xff] %v10235_v27  ;;  %14748 = vst [vmem:[#allocation19_spill] sm:$0xff] %v10239_v9  ;;  %v14755_v27 = vld [vmem:[#allocation141_spill] sm:$0xff]  ;;  %v14757_v9 = vld [vmem:[#allocation6_spill] sm:$0xff] }
 0xb44   :  { %14745 = vst [vmem:[#allocation144_spill] sm:$0xff] %v10231_v22  ;;  %14749 = vst [vmem:[#allocation289_spill] sm:$0xff] %v10243_v16  ;;  %v10253_v22 = vmul.f32 %v9296_v31, %v14741_v10  ;;  %v10259_v21 = vmul.f32 %v9256_v25, %v14755_v27  ;;  %v10263_v30 = vmul.f32 %v9256_v25, %v14757_v9  ;;  %4852 = vrot.lane.b32.xlu1 %v9899_v24, %s5720_s22 }
 0xb45   :  { %14750 = vst [vmem:[#allocation290_spill] sm:$0xff] %v10245_v11  ;;  %14752 = vst [vmem:[#allocation5_spill] sm:$0xff] %v10249_v7  ;;  %v10267_v11 = vmul.f32 %v9272_v32, %v14751_v52  ;;  %v10271_v16 = vmul.f32 %v9272_v32, %v14755_v27  ;;  %v10283_v25 = vmul.f32 %v9280_v36, %v14751_v52 }
 0xb46   :  { %14753 = vst [vmem:[#allocation291_spill] sm:$0xff] %v10253_v22  ;;  %14754 = vst [vmem:[#allocation292_spill] sm:$0xff] %v10255_v29  ;;  %v10279_v29 = vmul.f32 %v9272_v32, %v14757_v9  ;;  %v10287_v22 = vmul.f32 %v9280_v36, %v14755_v27  ;;  %v10299_v32 = vmul.f32 %v14738_v35, %v14744_v1 }
 0xb47   :  { %14756 = vst [vmem:[#allocation141_spill] sm:$0xff] %v10259_v21  ;;  %14758 = vst [vmem:[#allocation6_spill] sm:$0xff] %v10263_v30 }
 0xb48   :  { %14759 = vst [vmem:[#allocation293_spill] sm:$0xff] %v10267_v11  ;;  %14760 = vst [vmem:[#allocation294_spill] sm:$0xff] %v10271_v16  ;;  %v10291_v16 = vmul.f32 %v9280_v36, %v14757_v9  ;;  %v10295_v11 = vmul.f32 %v14738_v35, %v14742_v61  ;;  %v10313_v36 = vmul.f32 %v9296_v31, %v14751_v52  ;;  %3270 = vrot.lane.b32.xlu1 %v10103_v51, %s5714_s28 }
 0xb49   :  { %14761 = vst [vmem:[#allocation295_spill] sm:$0xff] %v10279_v29  ;;  %14762 = vst [vmem:[#allocation296_spill] sm:$0xff] %v10283_v25  ;;  %v10303_v29 = vmul.f32 %v14738_v35, %v14746_v48  ;;  %v14768_v25 = vld [vmem:[#allocation95_spill] sm:$0xff]  ;;  %v14773_v35 = vld [vmem:[#allocation68_spill] sm:$0xff] }
 0xb4a   :  { %14763 = vst [vmem:[#allocation297_spill] sm:$0xff] %v10287_v22  ;;  %14764 = vst [vmem:[#allocation298_spill] sm:$0xff] %v10291_v16  ;;  %v10307_v7 = vmul.f32 %v14768_v25, %v14741_v10  ;;  %v10309_v22 = vpop.permute.xlu1 %4604  ;;  %v14774_v16 = vld [vmem:[#allocation104_spill] sm:$0xff] }
 0xb4b   :  { %14765 = vst [vmem:[#allocation299_spill] sm:$0xff] %v10295_v11  ;;  %14766 = vst [vmem:[#allocation300_spill] sm:$0xff] %v10299_v32  ;;  %v10317_v11 = vmul.f32 %v9296_v31, %v14755_v27  ;;  %v10321_v32 = vmul.f32 %v9296_v31, %v14757_v9  ;;  %v10329_v30 = vmul.f32 %v14774_v16, %v14741_v10 }
 0xb4c   :  { %14767 = vst [vmem:[#allocation301_spill] sm:$0xff] %v10303_v29  ;;  %14769 = vst [vmem:[#allocation95_spill] sm:$0xff] %v10309_v22  ;;  %v10325_v29 = vmul.f32 %v14773_v35, %v14741_v10  ;;  %v14776_v22 = vld [vmem:[#allocation92_spill] sm:$0xff]  ;;  %v10347_v31 = vmul.f32 %v14768_v25, %v14755_v27  ;;  %3718 = vrot.lane.b32.xlu1 %v10103_v51, %s5713_s13 }
 0xb4d   :  { %14770 = vst [vmem:[#allocation302_spill] sm:$0xff] %v10313_v36  ;;  %14771 = vst [vmem:[#allocation303_spill] sm:$0xff] %v10317_v11  ;;  %v10333_v21 = vmul.f32 %v14776_v22, %v14741_v10  ;;  %v10335_v36 = vpop.permute.xlu0 %3934  ;;  %v10339_v11 = vmul.f32 %v14768_v25, %v14751_v52  ;;  %v10351_v10 = vmul.f32 %v14768_v25, %v14757_v9 }
 0xb4e   :  { %14772 = vst [vmem:[#allocation304_spill] sm:$0xff] %v10321_v32  ;;  %14775 = vst [vmem:[#allocation68_spill] sm:$0xff] %v10329_v30  ;;  %v10355_v32 = vmul.f32 %v14773_v35, %v14751_v52  ;;  %v10371_v25 = vmul.f32 %v14774_v16, %v14755_v27  ;;  %v10443_v30 = vadd.f32 %v9600_v41, %v9224_v56 }
 0xb4f   :  { %14777 = vst [vmem:[#allocation104_spill] sm:$0xff] %v10333_v21  ;;  %14778 = vst [vmem:[#allocation92_spill] sm:$0xff] %v10335_v36  ;;  %v10359_v36 = vmul.f32 %v14773_v35, %v14755_v27  ;;  %v10363_v21 = vmul.f32 %v14773_v35, %v14757_v9  ;;  %v10385_v35 = vmul.f32 %v14776_v22, %v14755_v27 }
 0xb50   :  { %14779 = vst [vmem:[#allocation305_spill] sm:$0xff] %v10339_v11  ;;  %14780 = vst [vmem:[#allocation306_spill] sm:$0xff] %v10347_v31  ;;  %v10367_v11 = vmul.f32 %v14774_v16, %v14751_v52  ;;  %v10373_v31 = vpop.permute.xlu1 %4828  ;;  %3510 = vrot.lane.b32.xlu0 %v10443_v30, %s5715_s29  ;;  %4166 = vrot.lane.b32.xlu1 %v10103_v51, %s5717_s20 }
 0xb51   :  { %14781 = vst [vmem:[#allocation307_spill] sm:$0xff] %v10351_v10  ;;  %14782 = vst [vmem:[#allocation308_spill] sm:$0xff] %v10355_v32  ;;  %v10377_v32 = vmul.f32 %v14774_v16, %v14757_v9 }
 0xb52   :  { %14783 = vst [vmem:[#allocation309_spill] sm:$0xff] %v10359_v36  ;;  %14784 = vst [vmem:[#allocation310_spill] sm:$0xff] %v10363_v21  ;;  %v10381_v36 = vmul.f32 %v14776_v22, %v14751_v52 }
 0xb53   :  { %14785 = vst [vmem:[#allocation311_spill] sm:$0xff] %v10367_v11  ;;  %14786 = vst [vmem:[#allocation312_spill] sm:$0xff] %v10371_v25  ;;  %v10389_v11 = vmul.f32 %v14776_v22, %v14757_v9  ;;  %v14792_v25 = vld [vmem:[#allocation63_spill] sm:$0xff]  ;;  %v14798_v22 = vld [vmem:[#allocation24_spill] sm:$0xff] }
 0xb54   :  { %14787 = vst [vmem:[#allocation313_spill] sm:$0xff] %v10373_v31  ;;  %14788 = vst [vmem:[#allocation314_spill] sm:$0xff] %v10377_v32  ;;  %v10393_v21 = vmul.f32 %v14792_v25, %v14627_v4  ;;  %v14793_v31 = vld [vmem:[#allocation94_spill] sm:$0xff]  ;;  %v10411_v9 = vmul.f32 %v14798_v22, %v14627_v4  ;;  %v10423_v10 = vmul.f32 %v14792_v25, %v14633_v23  ;;  %3958 = vrot.lane.b32.xlu0 %v10443_v30, %s5716_s0 }
 0xb55   :  { %14789 = vst [vmem:[#allocation315_spill] sm:$0xff] %v10381_v36  ;;  %14790 = vst [vmem:[#allocation316_spill] sm:$0xff] %v10385_v35  ;;  %v10397_v16 = vmul.f32 %v14793_v31, %v14627_v4  ;;  %v14794_v32 = vld [vmem:[#allocation106_spill] sm:$0xff]  ;;  %v14795_v36 = vld [vmem:[#allocation96_spill] sm:$0xff]  ;;  %v10407_v35 = vpop.permute.xlu0 %4382  ;;  %3286 = vrot.lane.b32.xlu1 %v10443_v30, %s5714_s28 }
 0xb56   :  { %14791 = vst [vmem:[#allocation317_spill] sm:$0xff] %v10389_v11  ;;  %v10401_v52 = vmul.f32 %v14794_v32, %v14627_v4  ;;  %v10405_v27 = vmul.f32 %v14795_v36, %v14627_v4  ;;  %14797 = vst [vmem:[#allocation94_spill] sm:$0xff] %v10407_v35  ;;  %v10419_v11 = vmul.f32 %v14792_v25, %v14381_v19 }
 0xb57   :  { %14799 = vst [vmem:[#allocation106_spill] sm:$0xff] %v10411_v9  ;;  %v10427_v35 = vmul.f32 %v14792_v25, %v14382_v53  ;;  %v10431_v4 = vmul.f32 %v14793_v31, %v14381_v19  ;;  %v10435_v9 = vmul.f32 %v14794_v32, %v14381_v19  ;;  %v10449_v25 = vmul.f32 %v14793_v31, %v14382_v53 }
 0xb58   :  { %14796 = vst [vmem:[#allocation63_spill] sm:$0xff] %v10405_v27  ;;  %14800 = vst [vmem:[#allocation96_spill] sm:$0xff] %v10419_v11  ;;  %v10439_v27 = vmul.f32 %v14793_v31, %v14633_v23  ;;  %v10445_v11 = vpop.permute.xlu1 %3246  ;;  %v10463_v56 = vmul.f32 %v14795_v36, %v14381_v19  ;;  %v10467_v41 = vmul.f32 %v14795_v36, %v14633_v23  ;;  %4406 = vrot.lane.b32.xlu0 %v10443_v30, %s5718_s21 }
 0xb59   :  { %14801 = vst [vmem:[#allocation24_spill] sm:$0xff] %v10427_v35  ;;  %14802 = vst [vmem:[#allocation318_spill] sm:$0xff] %v10431_v4  ;;  %v10453_v4 = vmul.f32 %v14794_v32, %v14633_v23  ;;  %v10459_v35 = vpop.permute.xlu0 %4606  ;;  %v10471_v31 = vmul.f32 %v14795_v36, %v14382_v53  ;;  %v10491_v36 = vmul.f32 %v14798_v22, %v14382_v53  ;;  %3734 = vrot.lane.b32.xlu1 %v10443_v30, %s5713_s13 }
 0xb5a   :  { %14803 = vst [vmem:[#allocation319_spill] sm:$0xff] %v10435_v9  ;;  %14804 = vst [vmem:[#allocation320_spill] sm:$0xff] %v10439_v27  ;;  %v10457_v9 = vmul.f32 %v14794_v32, %v14382_v53  ;;  %v14814_v32 = vld [vmem:[#allocation98_spill] sm:$0xff] }
 0xb5b   :  { %14805 = vst [vmem:[#allocation321_spill] sm:$0xff] %v10445_v11  ;;  %14806 = vst [vmem:[#allocation322_spill] sm:$0xff] %v10449_v25  ;;  %v10475_v11 = vmul.f32 %v14798_v22, %v14381_v19  ;;  %v14817_v19 = vld [vmem:[#allocation108_spill] sm:$0xff]  ;;  %v10513_v53 = vmul.f32 %v14814_v32, %v14646_v20 }
 0xb5c   :  { %14807 = vst [vmem:[#allocation323_spill] sm:$0xff] %v10453_v4  ;;  %14808 = vst [vmem:[#allocation324_spill] sm:$0xff] %v10457_v9  ;;  %v10479_v4 = vmul.f32 %v14814_v32, %v14639_v58  ;;  %4630 = vrot.lane.b32.xlu0 %v10443_v30, %s5719_s1 }
 0xb5d   :  { %14809 = vst [vmem:[#allocation325_spill] sm:$0xff] %v10459_v35  ;;  %14810 = vst [vmem:[#allocation326_spill] sm:$0xff] %v10463_v56  ;;  %v10487_v35 = vmul.f32 %v14798_v22, %v14633_v23  ;;  %v14820_v56 = vld [vmem:[#allocation42_spill] sm:$0xff]  ;;  %v10507_v23 = vmul.f32 %v14814_v32, %v14407_v26  ;;  %v10517_v22 = vmul.f32 %v14814_v32, %v14408_v59  ;;  %4182 = vrot.lane.b32.xlu1 %v10443_v30, %s5717_s20 }
 0xb5e   :  { %14811 = vst [vmem:[#allocation327_spill] sm:$0xff] %v10467_v41  ;;  %14812 = vst [vmem:[#allocation328_spill] sm:$0xff] %v10471_v31  ;;  %v14818_v31 = vld [vmem:[#allocation72_spill] sm:$0xff]  ;;  %v10503_v9 = vmul.f32 %v14820_v56, %v14639_v58 }
 0xb5f   :  { %14813 = vst [vmem:[#allocation329_spill] sm:$0xff] %v10475_v11  ;;  %14815 = vst [vmem:[#allocation98_spill] sm:$0xff] %v10487_v35  ;;  %v10495_v11 = vmul.f32 %v14817_v19, %v14639_v58  ;;  %v10499_v41 = vmul.f32 %v14818_v31, %v14639_v58  ;;  %v10509_v35 = vpop.permute.xlu1 %3694  ;;  %v10525_v58 = vmul.f32 %v14817_v19, %v14646_v20 }
 0xb60   :  { %14816 = vst [vmem:[#allocation330_spill] sm:$0xff] %v10491_v36  ;;  %14821 = vst [vmem:[#allocation72_spill] sm:$0xff] %v10503_v9  ;;  %v10521_v36 = vmul.f32 %v14817_v19, %v14407_v26  ;;  %v10527_v9 = vpop.permute.xlu0 %4830  ;;  %v10535_v25 = vmul.f32 %v14818_v31, %v14407_v26  ;;  %v10539_v32 = vmul.f32 %v14818_v31, %v14646_v20  ;;  %4854 = vrot.lane.b32.xlu0 %v10443_v30, %s5720_s22 }
 0xb61   :  { %14819 = vst [vmem:[#allocation108_spill] sm:$0xff] %v10499_v41  ;;  %14822 = vst [vmem:[#allocation42_spill] sm:$0xff] %v10507_v23  ;;  %v10543_v27 = vmul.f32 %v14818_v31, %v14408_v59  ;;  %v14836_v31 = vld [vmem:[#allocation55_spill] sm:$0xff] }
 0xb62   :  { %14823 = vst [vmem:[#allocation331_spill] sm:$0xff] %v10509_v35  ;;  %14824 = vst [vmem:[#allocation332_spill] sm:$0xff] %v10513_v53  ;;  %v10531_v35 = vmul.f32 %v14817_v19, %v14408_v59  ;;  %v10551_v19 = vmul.f32 %v14820_v56, %v14407_v26  ;;  %v10571_v26 = vmul.f32 %v9082_v33, %v14660_v12 }
 0xb63   :  { %14825 = vst [vmem:[#allocation333_spill] sm:$0xff] %v10517_v22  ;;  %14826 = vst [vmem:[#allocation334_spill] sm:$0xff] %v10521_v36  ;;  %v10721_v53 = vmul.f32 %v9118_v34, %v14716_v55  ;;  %v10779_v22 = vmul.f32 %v9159_v63, %v14746_v48 }
 0xb64   :  { %14827 = vst [vmem:[#allocation335_spill] sm:$0xff] %v10525_v58  ;;  %14828 = vst [vmem:[#allocation336_spill] sm:$0xff] %v10527_v9  ;;  %v10555_v9 = vmul.f32 %v14820_v56, %v14646_v20  ;;  %v10575_v20 = vmul.f32 %v9084_v46, %v14660_v12  ;;  %v10639_v58 = vmul.f32 %v9086_v45, %v14385_v44 }
 0xb65   :  { %14829 = vst [vmem:[#allocation337_spill] sm:$0xff] %v10531_v35  ;;  %14830 = vst [vmem:[#allocation338_spill] sm:$0xff] %v10535_v25  ;;  %v10567_v25 = vmul.f32 %v9080_v37, %v14660_v12  ;;  %v10595_v35 = vpop.permute.xlu0 %3264 }
 0xb66   :  { %14831 = vst [vmem:[#allocation339_spill] sm:$0xff] %v10539_v32  ;;  %14832 = vst [vmem:[#allocation340_spill] sm:$0xff] %v10543_v27  ;;  %v10559_v32 = vmul.f32 %v14820_v56, %v14408_v59  ;;  %v10563_v27 = vmul.f32 %v14836_v31, %v14660_v12  ;;  %v10579_v59 = vmul.f32 %v9086_v45, %v14660_v12  ;;  %v10581_v56 = vpop.permute.xlu1 %4142 }
 0xb67   :  { %14833 = vst [vmem:[#allocation341_spill] sm:$0xff] %v10551_v19  ;;  %14834 = vst [vmem:[#allocation342_spill] sm:$0xff] %v10555_v9  ;;  %v10589_v9 = vmul.f32 %v14836_v31, %v14668_v13  ;;  %v10593_v19 = vmul.f32 %v14836_v31, %v14386_v39  ;;  %v10599_v12 = vmul.f32 %v9080_v37, %v14385_v44 }
 0xb68   :  { %14835 = vst [vmem:[#allocation343_spill] sm:$0xff] %v10559_v32  ;;  %14837 = vst [vmem:[#allocation55_spill] sm:$0xff] %v10575_v20  ;;  %v10585_v32 = vmul.f32 %v14836_v31, %v14385_v44  ;;  %v10611_v20 = vmul.f32 %v9080_v37, %v14386_v39  ;;  %v10619_v31 = vmul.f32 %v9082_v33, %v14668_v13 }
 0xb69   :  { %14838 = vst [vmem:[#allocation344_spill] sm:$0xff] %v10579_v59  ;;  %14839 = vst [vmem:[#allocation345_spill] sm:$0xff] %v10581_v56  ;;  %v10603_v56 = vmul.f32 %v9082_v33, %v14385_v44  ;;  %v10607_v59 = vmul.f32 %v9080_v37, %v14668_v13  ;;  %v10631_v37 = vmul.f32 %v9084_v46, %v14668_v13 }
 0xb6a   :  { %14840 = vst [vmem:[#allocation346_spill] sm:$0xff] %v10585_v32  ;;  %14841 = vst [vmem:[#allocation347_spill] sm:$0xff] %v10589_v9  ;;  %v14911_v32 = vld [vmem:[#allocation64_spill] sm:$0xff] }
 0xb6b   :  { %14842 = vst [vmem:[#allocation348_spill] sm:$0xff] %v10593_v19  ;;  %14843 = vst [vmem:[#allocation349_spill] sm:$0xff] %v10599_v12  ;;  %v10891_v19 = vmul.f32 %v14911_v32, %v14675_v49 }
 0xb6c   :  { %14844 = vst [vmem:[#allocation350_spill] sm:$0xff] %v10603_v56  ;;  %14845 = vst [vmem:[#allocation351_spill] sm:$0xff] %v10607_v59  ;;  %v10623_v56 = vmul.f32 %v9082_v33, %v14386_v39  ;;  %v10627_v59 = vmul.f32 %v9084_v46, %v14385_v44  ;;  %v10643_v33 = vmul.f32 %v9086_v45, %v14668_v13 }
 0xb6d   :  { %14846 = vst [vmem:[#allocation352_spill] sm:$0xff] %v10611_v20  ;;  %14847 = vst [vmem:[#allocation353_spill] sm:$0xff] %v10619_v31  ;;  %v10635_v20 = vmul.f32 %v9084_v46, %v14386_v39  ;;  %v10657_v46 = vmul.f32 %v9088_v6, %v14387_v57  ;;  %v10661_v44 = vmul.f32 %v9086_v45, %v14386_v39 }
 0xb6e   :  { %14848 = vst [vmem:[#allocation354_spill] sm:$0xff] %v10623_v56  ;;  %14849 = vst [vmem:[#allocation355_spill] sm:$0xff] %v10627_v59  ;;  %v10647_v56 = vmul.f32 %v9088_v6, %v14675_v49  ;;  %v10649_v59 = vpop.permute.xlu1 %3262  ;;  %v10665_v13 = vmul.f32 %v9096_v62, %v14691_v42  ;;  %v10683_v39 = vmul.f32 %v9100_v17, %v14675_v49 }
 0xb6f   :  { %14850 = vst [vmem:[#allocation356_spill] sm:$0xff] %v10631_v37  ;;  %14851 = vst [vmem:[#allocation357_spill] sm:$0xff] %v10635_v20  ;;  %v10653_v37 = vmul.f32 %v9088_v6, %v14679_v0  ;;  %v10675_v20 = vmul.f32 %v9096_v62, %v14389_v2  ;;  %v10687_v45 = vmul.f32 %v9112_v14, %v14675_v49 }
 0xb70   :  { %14852 = vst [vmem:[#allocation358_spill] sm:$0xff] %v10639_v58  ;;  %14853 = vst [vmem:[#allocation359_spill] sm:$0xff] %v10643_v33  ;;  %v10667_v33 = vpop.permute.xlu0 %3712  ;;  %v10671_v58 = vmul.f32 %v9096_v62, %v14697_v43  ;;  %v10703_v31 = vmul.f32 %v9100_v17, %v14387_v57 }
 0xb71   :  { %14854 = vst [vmem:[#allocation360_spill] sm:$0xff] %v10649_v59  ;;  %14855 = vst [vmem:[#allocation361_spill] sm:$0xff] %v10653_v37  ;;  %v10679_v59 = vmul.f32 %v9088_v6, %v14388_v3  ;;  %v10699_v6 = vmul.f32 %v9100_v17, %v14679_v0  ;;  %v10775_v37 = vmul.f32 %v9159_v63, %v14744_v1 }
 0xb72   :  { %14856 = vst [vmem:[#allocation362_spill] sm:$0xff] %v10657_v46  ;;  %14857 = vst [vmem:[#allocation363_spill] sm:$0xff] %v10661_v44  ;;  %v10695_v44 = vmul.f32 %v9096_v62, %v14701_v40  ;;  %v10707_v46 = vmul.f32 %v9100_v17, %v14388_v3  ;;  %v10715_v62 = vmul.f32 %v9118_v34, %v14705_v54  ;;  %v10717_v23 = vpop.permute.xlu1 %3710 }
 0xb73   :  { %14858 = vst [vmem:[#allocation364_spill] sm:$0xff] %v10667_v33  ;;  %14859 = vst [vmem:[#allocation365_spill] sm:$0xff] %v10671_v58  ;;  %v10729_v17 = vmul.f32 %v9112_v14, %v14388_v3  ;;  %v14979_v33 = vld [vmem:[#allocation7_spill] sm:$0xff] }
 0xb74   :  { %14860 = vst [vmem:[#allocation366_spill] sm:$0xff] %v10675_v20  ;;  %14861 = vst [vmem:[#allocation367_spill] sm:$0xff] %v10679_v59  ;;  %v10711_v59 = vmul.f32 %v9112_v14, %v14679_v0 }
 0xb75   :  { %14862 = vst [vmem:[#allocation368_spill] sm:$0xff] %v10687_v45  ;;  %14863 = vst [vmem:[#allocation369_spill] sm:$0xff] %v10695_v44 }
 0xb76   :  { %14864 = vst [vmem:[#allocation370_spill] sm:$0xff] %v10699_v6  ;;  %14865 = vst [vmem:[#allocation371_spill] sm:$0xff] %v10703_v31  ;;  %v10725_v31 = vmul.f32 %v9112_v14, %v14387_v57  ;;  %v10751_v14 = vmul.f32 %v9159_v63, %v14735_v47 }
 0xb77   :  { %14866 = vst [vmem:[#allocation372_spill] sm:$0xff] %v10707_v46  ;;  %14867 = vst [vmem:[#allocation373_spill] sm:$0xff] %v10711_v59  ;;  %v10733_v59 = vmul.f32 %v9135_v60, %v14691_v42  ;;  %v10735_v46 = vpop.permute.xlu0 %4160 }
 0xb78   :  { %14868 = vst [vmem:[#allocation374_spill] sm:$0xff] %v10717_v23  ;;  %14869 = vst [vmem:[#allocation375_spill] sm:$0xff] %v10721_v53  ;;  %v10739_v23 = vmul.f32 %v9118_v34, %v14718_v50  ;;  %v10743_v53 = vmul.f32 %v9118_v34, %v14720_v18  ;;  %v10763_v34 = vmul.f32 %v9135_v60, %v14701_v40 }
 0xb79   :  { %14870 = vst [vmem:[#allocation376_spill] sm:$0xff] %v10725_v31  ;;  %14871 = vst [vmem:[#allocation377_spill] sm:$0xff] %v10729_v17  ;;  %v10747_v31 = vmul.f32 %v9135_v60, %v14697_v43  ;;  %v10759_v17 = vmul.f32 %v9135_v60, %v14389_v2 }
 0xb7a   :  { %14872 = vst [vmem:[#allocation378_spill] sm:$0xff] %v10739_v23  ;;  %14873 = vst [vmem:[#allocation379_spill] sm:$0xff] %v10743_v53  ;;  %v14877_v23 = vld [vmem:[#allocation100_spill] sm:$0xff] }
 0xb7b   :  { %14874 = vst [vmem:[#allocation380_spill] sm:$0xff] %v10747_v31  ;;  %14875 = vst [vmem:[#allocation381_spill] sm:$0xff] %v10759_v17  ;;  %v10767_v53 = vmul.f32 %v14877_v23, %v14735_v47  ;;  %v10771_v31 = vmul.f32 %v9159_v63, %v14742_v61  ;;  %v14881_v17 = vld [vmem:[#allocation160_spill] sm:$0xff]  ;;  %v10789_v12 = vmul.f32 %v14877_v23, %v14742_v61  ;;  %v14886_v63 = vld [vmem:[#allocation57_spill] sm:$0xff] }
 0xb7c   :  { %14876 = vst [vmem:[#allocation382_spill] sm:$0xff] %v10763_v34  ;;  %14879 = vst [vmem:[#allocation383_spill] sm:$0xff] %v10775_v37  ;;  %v10783_v60 = vadd.f32 %v14881_v17, %v9000_v38  ;;  %v10785_v34 = vpop.permute.xlu1 %4158  ;;  %v10793_v6 = vmul.f32 %v14877_v23, %v14744_v1  ;;  %v10797_v36 = vmul.f32 %v14877_v23, %v14746_v48  ;;  %v10803_v17 = vpop.permute.xlu0 %4608  ;;  %v14891_v23 = vld [vmem:[#allocation78_spill] sm:$0xff] }
 0xb7d   :  { %14878 = vst [vmem:[#allocation100_spill] sm:$0xff] %v10771_v31  ;;  %14880 = vst [vmem:[#allocation384_spill] sm:$0xff] %v10779_v22  ;;  %v10801_v22 = vmul.f32 %v14886_v63, %v14705_v54  ;;  %v10839_v37 = vmul.f32 %v14891_v23, %v14746_v48 }
 0xb7e   :  { %14882 = vst [vmem:[#allocation160_spill] sm:$0xff] %v10785_v34  ;;  %14883 = vst [vmem:[#allocation385_spill] sm:$0xff] %v10789_v12  ;;  %v10807_v34 = vmul.f32 %v14886_v63, %v14716_v55  ;;  %v10811_v12 = vmul.f32 %v14886_v63, %v14718_v50  ;;  %3272 = vrot.lane.b32.xlu0 %v10783_v60, %s5714_s28  ;;  %3496 = vrot.lane.b32.xlu1 %v10783_v60, %s5715_s29 }
 0xb7f   :  { %14884 = vst [vmem:[#allocation386_spill] sm:$0xff] %v10793_v6  ;;  %14885 = vst [vmem:[#allocation387_spill] sm:$0xff] %v10797_v36  ;;  %v10815_v6 = vmul.f32 %v14886_v63, %v14720_v18  ;;  %v10819_v36 = vmul.f32 %v14891_v23, %v14735_v47  ;;  %v14894_v63 = vld [vmem:[#allocation59_spill] sm:$0xff] }
 0xb80   :  { %14887 = vst [vmem:[#allocation57_spill] sm:$0xff] %v10803_v17  ;;  %14888 = vst [vmem:[#allocation388_spill] sm:$0xff] %v10807_v34  ;;  %v10827_v34 = vmul.f32 %v14891_v23, %v14742_v61  ;;  %v10843_v44 = vmul.f32 %v14894_v63, %v14679_v0  ;;  %v10847_v41 = vmul.f32 %v14894_v63, %v14387_v57 }
 0xb81   :  { %14889 = vst [vmem:[#allocation389_spill] sm:$0xff] %v10811_v12  ;;  %14890 = vst [vmem:[#allocation390_spill] sm:$0xff] %v10815_v6  ;;  %v10831_v12 = vmul.f32 %v14891_v23, %v14744_v1  ;;  %v10835_v6 = vmul.f32 %v14894_v63, %v14675_v49 }
 0xb82   :  { %14892 = vst [vmem:[#allocation78_spill] sm:$0xff] %v10827_v34  ;;  %14896 = vst [vmem:[#allocation392_spill] sm:$0xff] %v10839_v37  ;;  %v14899_v34 = vld [vmem:[#allocation82_spill] sm:$0xff]  ;;  %v10867_v37 = vpop.permute.xlu0 %3280  ;;  %3720 = vrot.lane.b32.xlu0 %v10783_v60, %s5713_s13  ;;  %3944 = vrot.lane.b32.xlu1 %v10783_v60, %s5716_s0 }
 0xb83   :  { %14893 = vst [vmem:[#allocation391_spill] sm:$0xff] %v10831_v12  ;;  %14895 = vst [vmem:[#allocation59_spill] sm:$0xff] %v10835_v6  ;;  %v10851_v20 = vmul.f32 %v14899_v34, %v14691_v42  ;;  %v14901_v12 = vld [vmem:[#allocation32_spill] sm:$0xff]  ;;  %v10857_v6 = vpop.permute.xlu1 %3488  ;;  %v10861_v23 = vmul.f32 %v14899_v34, %v14697_v43 }
 0xb84   :  { %14897 = vst [vmem:[#allocation393_spill] sm:$0xff] %v10843_v44  ;;  %14898 = vst [vmem:[#allocation394_spill] sm:$0xff] %v10847_v41  ;;  %v10855_v45 = vmul.f32 %v14901_v12, %v14691_v42  ;;  %v10865_v44 = vmul.f32 %v14894_v63, %v14388_v3  ;;  %v10871_v41 = vmul.f32 %v14899_v34, %v14389_v2  ;;  %v14909_v63 = vld [vmem:[#allocation89_spill] sm:$0xff] }
 0xb85   :  { %14900 = vst [vmem:[#allocation82_spill] sm:$0xff] %v10851_v20  ;;  %14903 = vst [vmem:[#allocation395_spill] sm:$0xff] %v10861_v23  ;;  %v10875_v20 = vmul.f32 %v14899_v34, %v14701_v40  ;;  %v10883_v23 = vmul.f32 %v14901_v12, %v14389_v2  ;;  %v10899_v34 = vmul.f32 %v14901_v12, %v14701_v40 }
 0xb86   :  { %14902 = vst [vmem:[#allocation32_spill] sm:$0xff] %v10855_v45  ;;  %14904 = vst [vmem:[#allocation396_spill] sm:$0xff] %v10865_v44  ;;  %v10879_v45 = vmul.f32 %v14901_v12, %v14697_v43  ;;  %v10887_v44 = vmul.f32 %v14909_v63, %v14705_v54  ;;  %v10911_v49 = vmul.f32 %v14909_v63, %v14718_v50  ;;  %4168 = vrot.lane.b32.xlu0 %v10783_v60, %s5717_s20 }
 0xb87   :  { %14905 = vst [vmem:[#allocation397_spill] sm:$0xff] %v10871_v41  ;;  %14906 = vst [vmem:[#allocation398_spill] sm:$0xff] %v10875_v20  ;;  %v10907_v20 = vmul.f32 %v14909_v63, %v14716_v55  ;;  %v14919_v41 = vld [vmem:[#allocation129_spill] sm:$0xff]  ;;  %4392 = vrot.lane.b32.xlu1 %v10783_v60, %s5718_s21 }
 0xb88   :  { %14907 = vst [vmem:[#allocation399_spill] sm:$0xff] %v10879_v45  ;;  %14908 = vst [vmem:[#allocation400_spill] sm:$0xff] %v10883_v23  ;;  %v14914_v23 = vld [vmem:[#allocation69_spill] sm:$0xff]  ;;  %v10919_v12 = vmul.f32 %v14919_v41, %v14735_v47  ;;  %v10961_v9 = vmul.f32 %v14919_v41, %v14746_v48 }
 0xb89   :  { %14910 = vst [vmem:[#allocation89_spill] sm:$0xff] %v10887_v44  ;;  %14912 = vst [vmem:[#allocation64_spill] sm:$0xff] %v10891_v19  ;;  %v10903_v45 = vmul.f32 %v14914_v23, %v14691_v42  ;;  %v10915_v19 = vmul.f32 %v14909_v63, %v14720_v18  ;;  %v14926_v63 = vld [vmem:[#allocation152_spill] sm:$0xff] }
 0xb8a   :  { %14913 = vst [vmem:[#allocation401_spill] sm:$0xff] %v10899_v34  ;;  %14916 = vst [vmem:[#allocation402_spill] sm:$0xff] %v10907_v20  ;;  %v14921_v34 = vld [vmem:[#allocation27_spill] sm:$0xff]  ;;  %v10929_v20 = vmul.f32 %v14911_v32, %v14679_v0  ;;  %v10951_v0 = vmul.f32 %v14911_v32, %v14388_v3  ;;  %4616 = vrot.lane.b32.xlu0 %v10783_v60, %s5719_s1 }
 0xb8b   :  { %14915 = vst [vmem:[#allocation69_spill] sm:$0xff] %v10903_v45  ;;  %14917 = vst [vmem:[#allocation403_spill] sm:$0xff] %v10911_v49  ;;  %v10923_v42 = vmul.f32 %v14921_v34, %v14735_v47  ;;  %v10925_v45 = vpop.permute.xlu1 %3936  ;;  %v10933_v49 = vmul.f32 %v14911_v32, %v14387_v57  ;;  %v14933_v57 = vld [vmem:[#allocation130_spill] sm:$0xff]  ;;  %v10969_v3 = vmul.f32 %v14921_v34, %v14744_v1  ;;  %v14938_v32 = vld [vmem:[#allocation37_spill] sm:$0xff]  ;;  %4840 = vrot.lane.b32.xlu1 %v10783_v60, %s5720_s22 }
 0xb8c   :  { %14918 = vst [vmem:[#allocation404_spill] sm:$0xff] %v10915_v19  ;;  %14920 = vst [vmem:[#allocation129_spill] sm:$0xff] %v10919_v12  ;;  %v14927_v19 = vld [vmem:[#allocation118_spill] sm:$0xff]  ;;  %v10939_v12 = vpop.permute.xlu0 %3728 }
 0xb8d   :  { %14922 = vst [vmem:[#allocation27_spill] sm:$0xff] %v10923_v42  ;;  %14923 = vst [vmem:[#allocation405_spill] sm:$0xff] %v10925_v45  ;;  %v3312_v31 = vsel %vm576_vm1, %v14927_v19, %v14926_v63  ;;  %v10943_v42 = vmul.f32 %v14919_v41, %v14742_v61  ;;  %v10947_v45 = vmul.f32 %v14919_v41, %v14744_v1 }
 0xb8e   :  { %14924 = vst [vmem:[#allocation406_spill] sm:$0xff] %v10929_v20  ;;  %14925 = vst [vmem:[#allocation407_spill] sm:$0xff] %v10933_v49  ;;  %v14934_v49 = vld [vmem:[#allocation56_spill] sm:$0xff]  ;;  %v10983_v41 = vmul.f32 %v14914_v23, %v14697_v43  ;;  %v11002_v43 = vmul.f32 %v14914_v23, %v14701_v40 }
 0xb8f   :  { %14929 = vst [vmem:[#allocation152_spill] sm:$0xff] %v10939_v12  ;;  %14930 = vst [vmem:[#allocation118_spill] sm:$0xff] %v10943_v42  ;;  %v3313_v20 = vsel %vm576_vm1, %v14934_v49, %v14933_v57  ;;  %v10965_v42 = vmul.f32 %v14921_v34, %v14742_v61  ;;  %v14970_v49 = vld [vmem:[#allocation84_spill] sm:$0xff] }
 0xb90   :  { %14931 = vst [vmem:[#allocation135_spill] sm:$0xff] %v10947_v45  ;;  %14932 = vst [vmem:[#allocation408_spill] sm:$0xff] %v10951_v0  ;;  %v10973_v0 = vmul.f32 %v14938_v32, %v14705_v54  ;;  %v10979_v45 = vmul.f32 %v14921_v34, %v14746_v48  ;;  %v14943_v54 = vld [vmem:[#allocation60_spill] sm:$0xff]  ;;  %v10998_v34 = vmul.f32 %v14938_v32, %v14716_v55 }
 0xb91   :  { %14935 = vst [vmem:[#allocation409_spill] sm:$0xff] %v10961_v9  ;;  %14936 = vst [vmem:[#allocation410_spill] sm:$0xff] %v10965_v42  ;;  %v10987_v9 = vmul.f32 %v14914_v23, %v14389_v2  ;;  %v10994_v42 = vpop.permute.xlu1 %4384  ;;  %v11005_v2 = vpop.permute.xlu0 %4176  ;;  %v11017_v55 = vmul.f32 %v14943_v54, %v14742_v61  ;;  %v14953_v23 = vld [vmem:[#allocation102_spill] sm:$0xff]  ;;  %v14957_v61 = vld [vmem:[#allocation43_spill] sm:$0xff] }
 0xb92   :  { %14937 = vst [vmem:[#allocation411_spill] sm:$0xff] %v10969_v3  ;;  %14939 = vst [vmem:[#allocation37_spill] sm:$0xff] %v10973_v0  ;;  %v3393_v3 = vmul.f32 %v10223_v8, %v3312_v31  ;;  %v10992_v0 = vmul.f32 %v14943_v54, %v14735_v47  ;;  %v11009_v8 = vmul.f32 %v14938_v32, %v14718_v50  ;;  %v14951_v31 = vld [vmem:[#allocation90_spill] sm:$0xff] }
 0xb93   :  { %14940 = vst [vmem:[#allocation412_spill] sm:$0xff] %v10979_v45  ;;  %14941 = vst [vmem:[#allocation413_spill] sm:$0xff] %v10983_v41  ;;  %v3397_v41 = vmul.f32 %v10307_v7, %v3313_v20  ;;  %v11013_v47 = vmul.f32 %v14938_v32, %v14720_v18  ;;  %v11029_v50 = vmul.f32 %v14943_v54, %v14744_v1  ;;  %v14958_v20 = vld [vmem:[#allocation119_spill] sm:$0xff]  ;;  %v14963_v1 = vld [vmem:[#allocation138_spill] sm:$0xff] }
 0xb94   :  { %14942 = vst [vmem:[#allocation414_spill] sm:$0xff] %v10987_v9  ;;  %14944 = vst [vmem:[#allocation60_spill] sm:$0xff] %v10992_v0  ;;  %v11033_v18 = vmul.f32 %v14943_v54, %v14746_v48  ;;  %v3536_v32 = vsel %vm766_vm2, %v14958_v20, %v14957_v61  ;;  %v14967_v0 = vld [vmem:[#allocation151_spill] sm:$0xff]  ;;  %v15019_v61 = vld [vmem:[#allocation28_spill] sm:$0xff] }
 0xb95   :  { %14945 = vst [vmem:[#allocation415_spill] sm:$0xff] %v10998_v34  ;;  %14946 = vst [vmem:[#allocation416_spill] sm:$0xff] %v11002_v43  ;;  %v14952_v34 = vld [vmem:[#allocation35_spill] sm:$0xff]  ;;  %v11057_v57 = vpop.permute.xlu1 %4832 }
 0xb96   :  { %14947 = vst [vmem:[#allocation417_spill] sm:$0xff] %v11005_v2  ;;  %14948 = vst [vmem:[#allocation418_spill] sm:$0xff] %v11009_v8  ;;  %v3201_v40 = vmul.f32 %v14952_v34, %v14951_v31  ;;  %v11023_v7 = vmul.f32 %v14952_v34, %v14953_v23  ;;  %v14959_v31 = vld [vmem:[#allocation111_spill] sm:$0xff]  ;;  %v14962_v8 = vld [vmem:[#allocation148_spill] sm:$0xff] }
 0xb97   :  { %14949 = vst [vmem:[#allocation419_spill] sm:$0xff] %v11013_v47  ;;  %14950 = vst [vmem:[#allocation420_spill] sm:$0xff] %v11017_v55  ;;  %v14960_v55 = vld [vmem:[#allocation112_spill] sm:$0xff]  ;;  %v14961_v47 = vld [vmem:[#allocation39_spill] sm:$0xff] }
 0xb98   :  { %14954 = vst [vmem:[#allocation90_spill] sm:$0xff] %v11023_v7  ;;  %14955 = vst [vmem:[#allocation35_spill] sm:$0xff] %v11029_v50  ;;  %v3205_v23 = vmul.f32 %v14960_v55, %v14959_v31  ;;  %v3314_v43 = vsel %vm576_vm1, %v14962_v8, %v14961_v47  ;;  %v11049_v48 = vmul.f32 %v14960_v55, %v14963_v1  ;;  %v14966_v50 = vld [vmem:[#allocation25_spill] sm:$0xff] }
 0xb99   :  { %14956 = vst [vmem:[#allocation102_spill] sm:$0xff] %v11033_v18  ;;  %v3425_v54 = vadd.f32 %v3393_v3, %v3201_v40  ;;  %v14965_v18 = vld [vmem:[#allocation73_spill] sm:$0xff]  ;;  %14969 = vst [vmem:[#allocation111_spill] sm:$0xff] %v11057_v57  ;;  %v14974_v40 = vld [vmem:[#allocation66_spill] sm:$0xff]  ;;  %v11075_v57 = vpop.permute.xlu0 %4624 }
 0xb9a   :  { %14964 = vst [vmem:[#allocation119_spill] sm:$0xff] %v11049_v48  ;;  %v3537_v9 = vsel %vm766_vm2, %v14966_v50, %v14965_v18  ;;  %v14968_v31 = vld [vmem:[#allocation93_spill] sm:$0xff]  ;;  %v3429_v3 = vadd.f32 %v3397_v41, %v3205_v23  ;;  %v14975_v48 = vld [vmem:[#allocation22_spill] sm:$0xff]  ;;  %14977 = vst [vmem:[#allocation138_spill] sm:$0xff] %v11075_v57  ;;  %v3401_v41 = vmul.f32 %v10325_v29, %v3314_v43 }
 0xb9b   :  { %v3209_v45 = vmul.f32 %v14968_v31, %v14967_v0  ;;  %v11061_v8 = vmul.f32 %v14968_v31, %v14970_v49  ;;  %v14972_v47 = vld [vmem:[#allocation97_spill] sm:$0xff]  ;;  %v3538_v50 = vsel %vm766_vm2, %v14975_v48, %v14974_v40  ;;  %v3617_v49 = vmul.f32 %v10393_v21, %v3536_v32  ;;  %v14981_v48 = vld [vmem:[#allocation91_spill] sm:$0xff]  ;;  %v14985_v21 = vld [vmem:[#allocation70_spill] sm:$0xff] }
 0xb9c   :  { %v14973_v2 = vld [vmem:[#allocation65_spill] sm:$0xff]  ;;  %v14986_v32 = vld [vmem:[#allocation40_spill] sm:$0xff]  ;;  %v14988_v29 = vld [vmem:[#allocation31_spill] sm:$0xff] }
 0xb9d   :  { %14971 = vst [vmem:[#allocation112_spill] sm:$0xff] %v11061_v8  ;;  %v3760_v1 = vsel %vm956_vm3, %v14973_v2, %v14972_v47  ;;  %v14976_v18 = vld [vmem:[#allocation161_spill] sm:$0xff]  ;;  %v14978_v8 = vld [vmem:[#allocation38_spill] sm:$0xff]  ;;  %v11096_v47 = vmul.f32 %v14986_v32, %v14985_v21  ;;  %v11102_v43 = vmul.f32 %v14986_v32, %v14988_v29 }
 0xb9e   :  { %v11073_v0 = vadd.f32 %v14976_v18, %v9000_v38  ;;  %v3761_v17 = vsel %vm956_vm3, %v14979_v33, %v14978_v8  ;;  %v14980_v23 = vld [vmem:[#allocation153_spill] sm:$0xff]  ;;  %v3621_v38 = vmul.f32 %v9839_v15, %v3537_v9  ;;  %v14983_v18 = vld [vmem:[#allocation114_spill] sm:$0xff]  ;;  %v3649_v33 = vadd.f32 %v3617_v49, %v3425_v54  ;;  %v11106_v9 = vpop.permute.xlu1 %3504  ;;  %v15000_v49 = vld [vmem:[#allocation156_spill] sm:$0xff] }
 0xb9f   :  { %v11087_v40 = vmul.f32 %v14981_v48, %v14980_v23  ;;  %v11092_v57 = vmul.f32 %v14981_v48, %v14983_v18  ;;  %14987 = vst [vmem:[#allocation84_spill] sm:$0xff] %v11096_v47  ;;  %14989 = vst [vmem:[#allocation161_spill] sm:$0xff] %v11102_v43  ;;  %v3841_v23 = vmul.f32 %v9883_v28, %v3760_v1  ;;  %v14990_v18 = vld [vmem:[#allocation9_spill] sm:$0xff]  ;;  %v14995_v43 = vld [vmem:[#allocation158_spill] sm:$0xff]  ;;  %v11121_v28 = vpop.permute.xlu0 %3490 }
 0xba0   :  { %3288 = vrot.lane.b32.xlu0 %v11073_v0, %s5714_s28  ;;  %v3625_v15 = vmul.f32 %v10397_v16, %v3538_v50  ;;  %v14993_v21 = vld [vmem:[#allocation77_spill] sm:$0xff]  ;;  %v3653_v12 = vadd.f32 %v3621_v38, %v3429_v3  ;;  %v3845_v29 = vmul.f32 %v10479_v4, %v3761_v17  ;;  %14997 = vst [vmem:[#allocation114_spill] sm:$0xff] %v11121_v28  ;;  %v14998_v16 = vld [vmem:[#allocation36_spill] sm:$0xff]  ;;  %v15003_v17 = vld [vmem:[#allocation75_spill] sm:$0xff] }
 0xba1   :  { %14982 = vst [vmem:[#allocation151_spill] sm:$0xff] %v11087_v40  ;;  %14984 = vst [vmem:[#allocation93_spill] sm:$0xff] %v11092_v57  ;;  %v14991_v40 = vld [vmem:[#allocation62_spill] sm:$0xff]  ;;  %v14994_v47 = vld [vmem:[#allocation117_spill] sm:$0xff]  ;;  %v3873_v58 = vadd.f32 %v3841_v23, %v3649_v33  ;;  %3512 = vrot.lane.b32.xlu1 %v11073_v0, %s5715_s29 }
 0xba2   :  { %v11110_v8 = vmul.f32 %v14991_v40, %v14990_v18  ;;  %v3984_v57 = vsel %vm1146_vm4, %v14994_v47, %v14993_v21  ;;  %v11119_v54 = vmul.f32 %v14991_v40, %v14995_v43  ;;  %v14999_v50 = vld [vmem:[#allocation120_spill] sm:$0xff]  ;;  %v15001_v18 = vld [vmem:[#allocation71_spill] sm:$0xff]  ;;  %v3433_v21 = vadd.f32 %v3401_v41, %v3209_v45  ;;  %v15002_v4 = vld [vmem:[#allocation21_spill] sm:$0xff] }
 0xba3   :  { %v4432_v1 = vsel %vm1526_vm6, %v14999_v50, %v14998_v16  ;;  %v11135_v3 = vmul.f32 %v15003_v17, %v15002_v4  ;;  %v15005_v38 = vld [vmem:[#allocation145_spill] sm:$0xff]  ;;  %v15006_v43 = vld [vmem:[#allocation8_spill] sm:$0xff]  ;;  %v15007_v28 = vld [vmem:[#allocation122_spill] sm:$0xff]  ;;  %v11172_v33 = vpop.permute.xlu0 %3938 }
 0xba4   :  { %14992 = vst [vmem:[#allocation153_spill] sm:$0xff] %v11110_v8  ;;  %14996 = vst [vmem:[#allocation91_spill] sm:$0xff] %v11119_v54  ;;  %v4208_v8 = vsel %vm1336_vm5, %v15001_v18, %v15000_v49  ;;  %v3985_v54 = vsel %vm1146_vm4, %v15006_v43, %v15005_v38  ;;  %v15008_v50 = vld [vmem:[#allocation20_spill] sm:$0xff]  ;;  %v15009_v2 = vld [vmem:[#allocation121_spill] sm:$0xff]  ;;  %3736 = vrot.lane.b32.xlu0 %v11073_v0, %s5713_s13  ;;  %v4065_v18 = vmul.f32 %v10563_v27, %v3984_v57 }
 0xba5   :  { %15004 = vst [vmem:[#allocation70_spill] sm:$0xff] %v11135_v3  ;;  %v3762_v47 = vsel %vm956_vm3, %v15008_v50, %v15007_v28  ;;  %v11147_v45 = vmul.f32 %v15003_v17, %v15009_v2  ;;  %v15011_v41 = vld [vmem:[#allocation115_spill] sm:$0xff]  ;;  %v15012_v4 = vld [vmem:[#allocation109_spill] sm:$0xff]  ;;  %v3657_v43 = vadd.f32 %v3625_v15, %v3433_v21  ;;  %v15014_v38 = vld [vmem:[#allocation162_spill] sm:$0xff]  ;;  %v11160_v50 = vpop.permute.xlu1 %3952  ;;  %v11163_v2 = vmul.f32 %v10665_v13, %v4432_v1 }
 0xba6   :  { %v11153_v3 = vmul.f32 %v15012_v4, %v15011_v41  ;;  %v11158_v7 = vmul.f32 %v15012_v4, %v15014_v38  ;;  %v3877_v17 = vadd.f32 %v3845_v29, %v3653_v12  ;;  %v15020_v41 = vld [vmem:[#allocation150_spill] sm:$0xff]  ;;  %15021 = vst [vmem:[#allocation36_spill] sm:$0xff] %v11172_v33  ;;  %v15023_v23 = vld [vmem:[#allocation113_spill] sm:$0xff]  ;;  %v3849_v12 = vmul.f32 %v10495_v11, %v3762_v47 }
 0xba7   :  { %15010 = vst [vmem:[#allocation40_spill] sm:$0xff] %v11147_v45  ;;  %15016 = vst [vmem:[#allocation62_spill] sm:$0xff] %v11163_v2  ;;  %v15017_v45 = vld [vmem:[#allocation133_spill] sm:$0xff]  ;;  %v3986_v27 = vsel %vm1146_vm4, %v15020_v41, %v15019_v61  ;;  %v15022_v57 = vld [vmem:[#allocation54_spill] sm:$0xff]  ;;  %3960 = vrot.lane.b32.xlu1 %v11073_v0, %s5716_s0 }
 0xba8   :  { %15013 = vst [vmem:[#allocation31_spill] sm:$0xff] %v11153_v3  ;;  %15015 = vst [vmem:[#allocation9_spill] sm:$0xff] %v11158_v7  ;;  %v11166_v28 = vmul.f32 %v15017_v45, %v4208_v8  ;;  %v4880_v15 = vsel %vm1906_vm8, %v15023_v23, %v15022_v57  ;;  %v15024_v21 = vld [vmem:[#allocation41_spill] sm:$0xff]  ;;  %v15026_v8 = vld [vmem:[#allocation131_spill] sm:$0xff]  ;;  %4184 = vrot.lane.b32.xlu0 %v11073_v0, %s5717_s20  ;;  %v3881_v2 = vadd.f32 %v3849_v12, %v3657_v43  ;;  %v11225_v43 = vpop.permute.xlu0 %4386 }
 0xba9   :  { %v15025_v38 = vld [vmem:[#allocation29_spill] sm:$0xff]  ;;  %v4069_v1 = vmul.f32 %v15026_v8, %v3985_v54  ;;  %v15028_v45 = vld [vmem:[#allocation10_spill] sm:$0xff]  ;;  %v15030_v7 = vld [vmem:[#allocation11_spill] sm:$0xff] }
 0xbaa   :  { %15018 = vst [vmem:[#allocation158_spill] sm:$0xff] %v11166_v28  ;;  %v4656_v13 = vsel %vm1716_vm7, %v15025_v38, %v15024_v21  ;;  %v15027_v29 = vld [vmem:[#allocation157_spill] sm:$0xff]  ;;  %v15031_v61 = vld [vmem:[#allocation110_spill] sm:$0xff]  ;;  %v15032_v23 = vld [vmem:[#allocation12_spill] sm:$0xff]  ;;  %v11211_v38 = vpop.permute.xlu1 %4400 }
 0xbab   :  { %v4209_v3 = vsel %vm1336_vm5, %v15028_v45, %v15027_v29  ;;  %v15029_v4 = vld [vmem:[#allocation17_spill] sm:$0xff]  ;;  %v4657_v54 = vsel %vm1716_vm7, %v15032_v23, %v15031_v61  ;;  %v15033_v8 = vld [vmem:[#allocation67_spill] sm:$0xff]  ;;  %v11214_v23 = vmul.f32 %v10751_v14, %v4880_v15  ;;  %v15037_v61 = vld [vmem:[#allocation154_spill] sm:$0xff]  ;;  %4408 = vrot.lane.b32.xlu1 %v11073_v0, %s5718_s21 }
 0xbac   :  { %v4433_v41 = vsel %vm1526_vm6, %v15030_v7, %v15029_v4  ;;  %v15034_v11 = vld [vmem:[#allocation13_spill] sm:$0xff]  ;;  %v4073_v7 = vmul.f32 %v10567_v25, %v3986_v27  ;;  %v11209_v4 = vadd.f32 %v4065_v18, %v3873_v58  ;;  %v15038_v28 = vld [vmem:[#allocation99_spill] sm:$0xff]  ;;  %v15039_v57 = vld [vmem:[#allocation128_spill] sm:$0xff]  ;;  %v11228_v25 = vmul.f32 %v10647_v56, %v4209_v3  ;;  %4632 = vrot.lane.b32.xlu0 %v11073_v0, %s5719_s1 }
 0xbad   :  { %v4881_v47 = vsel %vm1906_vm8, %v15034_v11, %v15033_v8  ;;  %v15035_v33 = vld [vmem:[#allocation149_spill] sm:$0xff]  ;;  %v11217_v11 = vmul.f32 %v15037_v61, %v4656_v13  ;;  %v11219_v8 = vadd.f32 %v4069_v1, %v3877_v17  ;;  %v15041_v58 = vld [vmem:[#allocation136_spill] sm:$0xff]  ;;  %v11234_v14 = vmul.f32 %v10715_v62, %v4657_v54  ;;  %v15046_v27 = vld [vmem:[#allocation47_spill] sm:$0xff] }
 0xbae   :  { %v15036_v45 = vld [vmem:[#allocation61_spill] sm:$0xff]  ;;  %15040 = vst [vmem:[#allocation156_spill] sm:$0xff] %v11228_v25  ;;  %v11231_v18 = vmul.f32 %v15041_v58, %v4433_v41  ;;  %v11237_v61 = vmul.f32 %v10767_v53, %v4881_v47  ;;  %v15049_v41 = vld [vmem:[#allocation126_spill] sm:$0xff]  ;;  %v15050_v13 = vld [vmem:[#allocation103_spill] sm:$0xff] }
 0xbaf   :  { %v4210_v29 = vsel %vm1336_vm5, %v15036_v45, %v15035_v33  ;;  %v4434_v45 = vsel %vm1526_vm6, %v15039_v57, %v15038_v28  ;;  %15043 = vst [vmem:[#allocation121_spill] sm:$0xff] %v11234_v14  ;;  %v15047_v15 = vld [vmem:[#allocation45_spill] sm:$0xff]  ;;  %v15054_v47 = vld [vmem:[#allocation188_spill] sm:$0xff]  ;;  %4856 = vrot.lane.b32.xlu1 %v11073_v0, %s5720_s22 }
 0xbb0   :  { %15042 = vst [vmem:[#allocation21_spill] sm:$0xff] %v11231_v18  ;;  %15044 = vst [vmem:[#allocation115_spill] sm:$0xff] %v11237_v61  ;;  %v11242_v17 = vmul.f32 %v10683_v39, %v4210_v29  ;;  %v4658_v56 = vsel %vm1716_vm7, %v15047_v15, %v15046_v27  ;;  %v15048_v3 = vld [vmem:[#allocation101_spill] sm:$0xff]  ;;  %v11258_v39 = vadd.f32 %v4073_v7, %v3881_v2  ;;  %v15053_v29 = vld [vmem:[#allocation179_spill] sm:$0xff] }
 0xbb1   :  { %v4882_v62 = vsel %vm1906_vm8, %v15049_v41, %v15048_v3  ;;  %v15051_v1 = vld [vmem:[#allocation33_spill] sm:$0xff]  ;;  %v11261_v12 = vmul.f32 %v10733_v59, %v4434_v45  ;;  %v11265_v54 = vmul.f32 %v14952_v34, %v15053_v29  ;;  %v11269_v58 = vmul.f32 %v14952_v34, %v15054_v47  ;;  %v15055_v41 = vld [vmem:[#allocation159_spill] sm:$0xff]  ;;  %v11281_v59 = vpop.permute.xlu0 %4834 }
 0xbb2   :  { %15045 = vst [vmem:[#allocation162_spill] sm:$0xff] %v11242_v17  ;;  %v3539_v53 = vsel %vm766_vm2, %v15051_v1, %v15050_v13  ;;  %v11271_v17 = vpop.permute.xlu1 %4848  ;;  %v15056_v1 = vld [vmem:[#allocation124_spill] sm:$0xff]  ;;  %v15057_v7 = vld [vmem:[#allocation79_spill] sm:$0xff]  ;;  %v15059_v45 = vld [vmem:[#allocation197_spill] sm:$0xff]  ;;  %v11295_v14 = vmul.f32 %v10819_v36, %v4882_v62 }
 0xbb3   :  { %15052 = vst [vmem:[#allocation133_spill] sm:$0xff] %v11261_v12  ;;  %v3987_v13 = vsel %vm1146_vm4, %v15056_v1, %v15055_v41  ;;  %v15058_v2 = vld [vmem:[#allocation163_spill] sm:$0xff]  ;;  %v11285_v29 = vmul.f32 %v14960_v55, %v15059_v45  ;;  %v15060_v12 = vld [vmem:[#allocation206_spill] sm:$0xff]  ;;  %v15061_v47 = vld [vmem:[#allocation105_spill] sm:$0xff]  ;;  %v11298_v1 = vmul.f32 %v10401_v52, %v3539_v53  ;;  %v3320_v52 = vsel %vm576_vm1, %v10867_v37, %v14927_v19 }
 0xbb4   :  { %v11279_v61 = vadd.f32 %v15058_v2, %v15057_v7  ;;  %v11289_v34 = vmul.f32 %v14960_v55, %v15060_v12  ;;  %v11292_v15 = vmul.f32 %v15061_v47, %v4658_v56  ;;  %15063 = vst [vmem:[#allocation131_spill] sm:$0xff] %v11295_v14  ;;  %v11304_v2 = vmul.f32 %v14968_v31, %v9819_v5  ;;  %v15064_v45 = vld [vmem:[#allocation165_spill] sm:$0xff]  ;;  %v15065_v41 = vld [vmem:[#allocation26_spill] sm:$0xff]  ;;  %v15071_v47 = vld [vmem:[#allocation172_spill] sm:$0xff] }
 0xbb5   :  { %v4435_v55 = vsel %vm1526_vm6, %v15065_v41, %v15064_v45  ;;  %v15066_v56 = vld [vmem:[#allocation166_spill] sm:$0xff]  ;;  %v11322_v5 = vmul.f32 %v14968_v31, %v9899_v24  ;;  %v11325_v36 = vmul.f32 %v10571_v26, %v3987_v13  ;;  %v11331_v53 = vmul.f32 %v14981_v48, %v10103_v51  ;;  %v15072_v24 = vld [vmem:[#allocation49_spill] sm:$0xff] }
 0xbb6   :  { %15062 = vst [vmem:[#allocation41_spill] sm:$0xff] %v11292_v15  ;;  %v11312_v12 = vadd.f32 %v15066_v56, %v15057_v7  ;;  %3498 = vrot.lane.b32.xlu0 %v11279_v61, %s5715_s29  ;;  %v11327_v62 = vpop.permute.xlu1 %3266  ;;  %v11335_v7 = vmul.f32 %v14986_v32, %v10783_v60  ;;  %v11339_v19 = vmul.f32 %v14981_v48, %v10443_v30  ;;  %v11353_v60 = vpop.permute.xlu0 %3506  ;;  %v15074_v48 = vld [vmem:[#allocation269_spill] sm:$0xff]  ;;  %v15076_v56 = vld [vmem:[#allocation168_spill] sm:$0xff] }
 0xbb7   :  { %15067 = vst [vmem:[#allocation149_spill] sm:$0xff] %v11322_v5  ;;  %15068 = vst [vmem:[#allocation154_spill] sm:$0xff] %v11331_v53  ;;  %v3315_v26 = vsel %vm576_vm1, %v15072_v24, %v15071_v47  ;;  %v4200_v31 = vsel %vm1336_vm5, %v15000_v49, %v10735_v46  ;;  %v3544_v51 = vsel %vm766_vm2, %v11106_v9, %v14958_v20  ;;  %v15078_v49 = vld [vmem:[#allocation141_spill] sm:$0xff]  ;;  %v15086_v24 = vld [vmem:[#allocation170_spill] sm:$0xff]  ;;  %3274 = vrot.lane.b32.xlu1 %v11279_v61, %s5714_s28 }
 0xbb8   :  { %15069 = vst [vmem:[#allocation99_spill] sm:$0xff] %v11335_v7  ;;  %15070 = vst [vmem:[#allocation136_spill] sm:$0xff] %v11339_v19  ;;  %v11357_v30 = vmul.f32 %v14986_v32, %v11073_v0  ;;  %v11360_v13 = vmul.f32 %v15074_v48, %v4435_v55  ;;  %v15077_v7 = vld [vmem:[#allocation48_spill] sm:$0xff]  ;;  %v3392_v15 = vmul.f32 %v15078_v49, %v3320_v52  ;;  %v15080_v41 = vld [vmem:[#allocation85_spill] sm:$0xff] }
 0xbb9   :  { %v4659_v14 = vsel %vm1716_vm7, %v15077_v7, %v15076_v56  ;;  %v11371_v20 = vmul.f32 %v14991_v40, %v11279_v61  ;;  %v15081_v32 = vld [vmem:[#allocation169_spill] sm:$0xff]  ;;  %v3296_v55 = vsel %vm576_vm1, %v10595_v35, %v10867_v37  ;;  %v4424_v52 = vsel %vm1526_vm6, %v14998_v16, %v10994_v42  ;;  %v15083_v49 = vld [vmem:[#allocation19_spill] sm:$0xff]  ;;  %v15084_v37 = vld [vmem:[#allocation134_spill] sm:$0xff] }
 0xbba   :  { %15073 = vst [vmem:[#allocation47_spill] sm:$0xff] %v11357_v30  ;;  %15075 = vst [vmem:[#allocation179_spill] sm:$0xff] %v11360_v13  ;;  %v11375_v30 = vadd.f32 %v15081_v32, %v15080_v41  ;;  %3946 = vrot.lane.b32.xlu0 %v11279_v61, %s5716_s0  ;;  %v11389_v48 = vmul.f32 %v14991_v40, %v11312_v12  ;;  %v3405_v32 = vmul.f32 %v15083_v49, %v3315_v26  ;;  %v11398_v19 = vpop.permute.xlu1 %3714  ;;  %v15088_v26 = vld [vmem:[#allocation171_spill] sm:$0xff]  ;;  %v15096_v56 = vld [vmem:[#allocation5_spill] sm:$0xff] }
 0xbbb   :  { %15079 = vst [vmem:[#allocation188_spill] sm:$0xff] %v11371_v20  ;;  %v3304_v20 = vsel %vm576_vm1, %v14926_v63, %v10595_v35  ;;  %v4289_v13 = vmul.f32 %v15084_v37, %v4200_v31  ;;  %v3616_v7 = vmul.f32 %v10423_v10, %v3544_v51  ;;  %v11401_v16 = vmul.f32 %v10801_v22, %v4659_v14  ;;  %v11415_v63 = vpop.permute.xlu0 %3954  ;;  %v15090_v10 = vld [vmem:[#allocation43_spill] sm:$0xff]  ;;  %v15091_v14 = vld [vmem:[#allocation6_spill] sm:$0xff]  ;;  %v15093_v51 = vld [vmem:[#allocation365_spill] sm:$0xff] }
 0xbbc   :  { %15082 = vst [vmem:[#allocation79_spill] sm:$0xff] %v11389_v48  ;;  %v11405_v40 = vadd.f32 %v15086_v24, %v15080_v41  ;;  %v15087_v48 = vld [vmem:[#allocation86_spill] sm:$0xff]  ;;  %v3520_v35 = vsel %vm766_vm2, %v10857_v6, %v11106_v9  ;;  %v3528_v22 = vsel %vm766_vm2, %v15090_v10, %v10857_v6  ;;  %v3395_v31 = vmul.f32 %v15091_v14, %v3296_v55  ;;  %v15097_v53 = vld [vmem:[#allocation65_spill] sm:$0xff]  ;;  %v15098_v47 = vld [vmem:[#allocation152_spill] sm:$0xff] }
 0xbbd   :  { %15085 = vst [vmem:[#allocation163_spill] sm:$0xff] %v11401_v16  ;;  %v11409_v49 = vadd.f32 %v15088_v26, %v15087_v48  ;;  %v15092_v41 = vld [vmem:[#allocation90_spill] sm:$0xff]  ;;  %v4513_v37 = vmul.f32 %v15093_v51, %v4424_v52  ;;  %v15094_v26 = vld [vmem:[#allocation173_spill] sm:$0xff]  ;;  %v15095_v16 = vld [vmem:[#allocation52_spill] sm:$0xff]  ;;  %v3394_v45 = vmul.f32 %v15096_v56, %v3304_v20  ;;  %v3768_v6 = vsel %vm956_vm3, %v15098_v47, %v15097_v53 }
 0xbbe   :  { %v3424_v24 = vadd.f32 %v3392_v15, %v15092_v41  ;;  %v4883_v9 = vsel %vm1906_vm8, %v15095_v16, %v15094_v26  ;;  %4394 = vrot.lane.b32.xlu0 %v11279_v61, %s5718_s21  ;;  %v15099_v15 = vld [vmem:[#allocation75_spill] sm:$0xff]  ;;  %v15101_v52 = vld [vmem:[#allocation93_spill] sm:$0xff]  ;;  %v4321_v14 = vadd.f32 %v4289_v13, %v11209_v4  ;;  %v15102_v41 = vld [vmem:[#allocation24_spill] sm:$0xff]  ;;  %v11444_v56 = vpop.permute.xlu1 %4162  ;;  %3722 = vrot.lane.b32.xlu1 %v11279_v61, %s5713_s13 }
 0xbbf   :  { %15089 = vst [vmem:[#allocation197_spill] sm:$0xff] %v11409_v49  ;;  %v11439_v55 = vmul.f32 %v15099_v15, %v11375_v30  ;;  %v3437_v10 = vadd.f32 %v3405_v32, %v15101_v52  ;;  %v3619_v51 = vmul.f32 %v15102_v41, %v3520_v35  ;;  %v15103_v20 = vld [vmem:[#allocation175_spill] sm:$0xff]  ;;  %v15104_v26 = vld [vmem:[#allocation164_spill] sm:$0xff]  ;;  %v15105_v57 = vld [vmem:[#allocation57_spill] sm:$0xff]  ;;  %v3427_v52 = vadd.f32 %v3395_v31, %v11269_v58 }
 0xbc0   :  { %v3648_v16 = vadd.f32 %v3616_v7, %v3424_v24  ;;  %v3763_v53 = vsel %vm956_vm3, %v15104_v26, %v15103_v20  ;;  %v4648_v18 = vsel %vm1716_vm7, %v15024_v21, %v15105_v57  ;;  %v15107_v32 = vld [vmem:[#allocation117_spill] sm:$0xff]  ;;  %v11459_v7 = vpop.permute.xlu0 %4402  ;;  %v15109_v35 = vld [vmem:[#allocation176_spill] sm:$0xff]  ;;  %v15110_v41 = vld [vmem:[#allocation147_spill] sm:$0xff]  ;;  %v4545_v20 = vadd.f32 %v4513_v37, %v4321_v14 }
 0xbc1   :  { %15100 = vst [vmem:[#allocation206_spill] sm:$0xff] %v11439_v55  ;;  %v15106_v55 = vld [vmem:[#allocation96_spill] sm:$0xff]  ;;  %v3992_v4 = vsel %vm1146_vm4, %v11160_v50, %v15107_v32  ;;  %v15108_v13 = vld [vmem:[#allocation185_spill] sm:$0xff]  ;;  %v3840_v26 = vmul.f32 %v15110_v41, %v3768_v6  ;;  %v3426_v21 = vadd.f32 %v3394_v45, %v11265_v54  ;;  %v15114_v58 = vld [vmem:[#allocation54_spill] sm:$0xff]  ;;  %v3651_v45 = vadd.f32 %v3619_v51, %v3427_v52 }
 0xbc2   :  { %v3618_v49 = vmul.f32 %v15106_v55, %v3528_v22  ;;  %v3316_v24 = vsel %vm576_vm1, %v15109_v35, %v15108_v13  ;;  %v15111_v22 = vld [vmem:[#allocation364_spill] sm:$0xff]  ;;  %v15112_v55 = vld [vmem:[#allocation97_spill] sm:$0xff]  ;;  %v15113_v13 = vld [vmem:[#allocation111_spill] sm:$0xff]  ;;  %4842 = vrot.lane.b32.xlu0 %v11279_v61, %s5720_s22  ;;  %v11486_v41 = vpop.permute.xlu1 %4610  ;;  %4170 = vrot.lane.b32.xlu1 %v11279_v61, %s5717_s20 }
 0xbc3   :  { %v3752_v32 = vsel %vm956_vm3, %v15112_v55, %v15111_v22  ;;  %v3744_v35 = vsel %vm956_vm3, %v15111_v22, %v15098_v47  ;;  %v4872_v31 = vsel %vm1906_vm8, %v15114_v58, %v15113_v13  ;;  %v15115_v0 = vld [vmem:[#allocation155_spill] sm:$0xff]  ;;  %v3872_v37 = vadd.f32 %v3840_v26, %v3648_v16  ;;  %v15117_v55 = vld [vmem:[#allocation174_spill] sm:$0xff]  ;;  %v15119_v47 = vld [vmem:[#allocation189_spill] sm:$0xff] }
 0xbc4   :  { %v4737_v54 = vmul.f32 %v15115_v0, %v4648_v18  ;;  %v15116_v6 = vld [vmem:[#allocation347_spill] sm:$0xff]  ;;  %v11490_v25 = vadd.f32 %v15117_v55, %v15087_v48  ;;  %v15120_v22 = vld [vmem:[#allocation180_spill] sm:$0xff]  ;;  %v3650_v5 = vadd.f32 %v3618_v49, %v3426_v21  ;;  %v15121_v3 = vld [vmem:[#allocation405_spill] sm:$0xff]  ;;  %v11500_v16 = vpop.permute.xlu0 %4850  ;;  %v3661_v49 = vadd.f32 %v11298_v1, %v3437_v10 }
 0xbc5   :  { %v4064_v14 = vmul.f32 %v15116_v6, %v3992_v4  ;;  %v3540_v58 = vsel %vm766_vm2, %v15120_v22, %v15119_v47  ;;  %v3968_v18 = vsel %vm1146_vm4, %v15121_v3, %v11160_v50  ;;  %15122 = vst [vmem:[#allocation166_spill] sm:$0xff] %v11500_v16  ;;  %v15123_v26 = vld [vmem:[#allocation77_spill] sm:$0xff]  ;;  %v15125_v0 = vld [vmem:[#allocation100_spill] sm:$0xff]  ;;  %v15126_v21 = vld [vmem:[#allocation146_spill] sm:$0xff] }
 0xbc6   :  { %15118 = vst [vmem:[#allocation105_spill] sm:$0xff] %v11490_v25  ;;  %v3976_v51 = vsel %vm1146_vm4, %v15123_v26, %v15121_v3  ;;  %v15124_v48 = vld [vmem:[#allocation233_spill] sm:$0xff]  ;;  %v4769_v52 = vadd.f32 %v4737_v54, %v4545_v20  ;;  %v4961_v6 = vmul.f32 %v15125_v0, %v4872_v31  ;;  %v3853_v55 = vmul.f32 %v15126_v21, %v3763_v53  ;;  %v15127_v50 = vld [vmem:[#allocation68_spill] sm:$0xff]  ;;  %v15128_v47 = vld [vmem:[#allocation230_spill] sm:$0xff] }
 0xbc7   :  { %v3843_v4 = vmul.f32 %v15124_v48, %v3744_v35  ;;  %v3409_v22 = vmul.f32 %v15127_v50, %v3316_v24  ;;  %v3842_v25 = vmul.f32 %v15128_v47, %v3752_v32  ;;  %3514 = vrot.lane.b32.xlu0 %v11312_v12, %s5715_s29  ;;  %v15129_v3 = vld [vmem:[#allocation417_spill] sm:$0xff]  ;;  %v15130_v31 = vld [vmem:[#allocation348_spill] sm:$0xff]  ;;  %v4096_v26 = vadd.f32 %v4064_v14, %v3872_v37  ;;  %v11521_v48 = vpop.permute.xlu1 %3282  ;;  %v15132_v10 = vld [vmem:[#allocation167_spill] sm:$0xff] }
 0xbc8   :  { %v4192_v20 = vsel %vm1336_vm5, %v10735_v46, %v15129_v3  ;;  %v4067_v54 = vmul.f32 %v15130_v31, %v3968_v18  ;;  %v15131_v1 = vld [vmem:[#allocation177_spill] sm:$0xff]  ;;  %v15133_v24 = vld [vmem:[#allocation142_spill] sm:$0xff]  ;;  %v11529_v50 = vpop.permute.xlu0 %3268  ;;  %v15135_v16 = vld [vmem:[#allocation127_spill] sm:$0xff]  ;;  %v4416_v37 = vsel %vm1526_vm6, %v10994_v42, %v11211_v38  ;;  %v11542_v14 = vmul.f32 %v15099_v15, %v11405_v40  ;;  %4618 = vrot.lane.b32.xlu1 %v11279_v61, %s5719_s1 }
 0xbc9   :  { %v3875_v35 = vadd.f32 %v3843_v4, %v3651_v45  ;;  %v4211_v53 = vsel %vm1336_vm5, %v15132_v10, %v15131_v1  ;;  %v3633_v32 = vmul.f32 %v15133_v24, %v3540_v58  ;;  %v3874_v47 = vadd.f32 %v3842_v25, %v3650_v5  ;;  %v15134_v0 = vld [vmem:[#allocation346_spill] sm:$0xff]  ;;  %v15138_v25 = vld [vmem:[#allocation84_spill] sm:$0xff]  ;;  %v15139_v58 = vld [vmem:[#allocation187_spill] sm:$0xff] }
 0xbca   :  { %v4066_v21 = vmul.f32 %v15134_v0, %v3976_v51  ;;  %v11532_v46 = vmul.f32 %v15135_v16, %v4883_v9  ;;  %v4993_v45 = vadd.f32 %v4961_v6, %v4769_v52  ;;  %15137 = vst [vmem:[#allocation141_spill] sm:$0xff] %v11542_v14  ;;  %v3441_v5 = vadd.f32 %v3409_v22, %v15138_v25  ;;  %v15140_v18 = vld [vmem:[#allocation178_spill] sm:$0xff]  ;;  %v15141_v16 = vld [vmem:[#allocation71_spill] sm:$0xff]  ;;  %v15143_v15 = vld [vmem:[#allocation368_spill] sm:$0xff] }
 0xbcb   :  { %v3764_v9 = vsel %vm956_vm3, %v15140_v18, %v15139_v58  ;;  %v4216_v51 = vsel %vm1336_vm5, %v15129_v3, %v15141_v16  ;;  %v15142_v42 = vld [vmem:[#allocation258_spill] sm:$0xff]  ;;  %3962 = vrot.lane.b32.xlu0 %v11312_v12, %s5716_s0  ;;  %v3885_v52 = vadd.f32 %v3853_v55, %v3661_v49  ;;  %v11557_v6 = vmul.f32 %v15143_v15, %v4211_v53  ;;  %v11560_v0 = vpop.permute.xlu1 %3730  ;;  %v15146_v18 = vld [vmem:[#allocation120_spill] sm:$0xff]  ;;  %v15150_v15 = vld [vmem:[#allocation181_spill] sm:$0xff] }
 0xbcc   :  { %15136 = vst [vmem:[#allocation269_spill] sm:$0xff] %v11532_v46  ;;  %v4290_v4 = vmul.f32 %v15142_v42, %v4192_v20  ;;  %v4099_v22 = vadd.f32 %v4067_v54, %v3875_v35  ;;  %v15145_v31 = vld [vmem:[#allocation158_spill] sm:$0xff]  ;;  %v3665_v25 = vadd.f32 %v3633_v32, %v3441_v5  ;;  %v4098_v14 = vadd.f32 %v4066_v21, %v3874_v47  ;;  %v11567_v42 = vpop.permute.xlu0 %3716  ;;  %v15148_v49 = vld [vmem:[#allocation108_spill] sm:$0xff]  ;;  %v15151_v54 = vld [vmem:[#allocation259_spill] sm:$0xff] }
 0xbcd   :  { %15144 = vst [vmem:[#allocation85_spill] sm:$0xff] %v11557_v6  ;;  %v4320_v24 = vadd.f32 %v15145_v31, %v4096_v26  ;;  %v4440_v3 = vsel %vm1526_vm6, %v11211_v38, %v15146_v18  ;;  %v15147_v20 = vld [vmem:[#allocation366_spill] sm:$0xff]  ;;  %v3857_v55 = vmul.f32 %v15148_v49, %v3764_v9  ;;  %v4291_v26 = vmul.f32 %v15151_v54, %v4216_v51  ;;  %v15152_v32 = vld [vmem:[#allocation116_spill] sm:$0xff]  ;;  %v15153_v38 = vld [vmem:[#allocation191_spill] sm:$0xff] }
 0xbce   :  { %v4514_v16 = vmul.f32 %v15147_v20, %v4416_v37  ;;  %v15149_v53 = vld [vmem:[#allocation190_spill] sm:$0xff]  ;;  %v11576_v47 = vadd.f32 %v15152_v32, %v4993_v45  ;;  %v15155_v5 = vld [vmem:[#allocation192_spill] sm:$0xff]  ;;  %v15156_v18 = vld [vmem:[#allocation183_spill] sm:$0xff]  ;;  %v4322_v31 = vadd.f32 %v4290_v4, %v4098_v14  ;;  %3290 = vrot.lane.b32.xlu1 %v11312_v12, %s5714_s28 }
 0xbcf   :  { %v4212_v35 = vsel %vm1336_vm5, %v15150_v15, %v15149_v53  ;;  %v15154_v21 = vld [vmem:[#allocation182_spill] sm:$0xff]  ;;  %v4660_v9 = vsel %vm1716_vm7, %v15156_v18, %v15155_v5  ;;  %4410 = vrot.lane.b32.xlu0 %v11312_v12, %s5718_s21  ;;  %v15158_v51 = vld [vmem:[#allocation29_spill] sm:$0xff]  ;;  %v11600_v18 = vpop.permute.xlu1 %4178  ;;  %v15161_v14 = vld [vmem:[#allocation59_spill] sm:$0xff]  ;;  %v11605_v5 = vadd.f32 %v3857_v55, %v3665_v25  ;;  %v11610_v53 = vadd.f32 %v11325_v36, %v3885_v52 }
 0xbd0   :  { %v3988_v37 = vsel %vm1146_vm4, %v15154_v21, %v15153_v38  ;;  %v15157_v20 = vld [vmem:[#allocation138_spill] sm:$0xff]  ;;  %v4323_v21 = vadd.f32 %v4291_v26, %v4099_v22  ;;  %v15160_v46 = vld [vmem:[#allocation369_spill] sm:$0xff]  ;;  %v11603_v4 = vmul.f32 %v15161_v14, %v4212_v35  ;;  %v11607_v58 = vpop.permute.xlu0 %4164  ;;  %v15164_v6 = vld [vmem:[#allocation244_spill] sm:$0xff]  ;;  %v4864_v25 = vsel %vm1906_vm8, %v15113_v13, %v11271_v17 }
 0xbd1   :  { %v4640_v45 = vsel %vm1716_vm7, %v15105_v57, %v15157_v20  ;;  %v4664_v49 = vsel %vm1716_vm7, %v15157_v20, %v15158_v51  ;;  %v15159_v54 = vld [vmem:[#allocation62_spill] sm:$0xff]  ;;  %v4515_v38 = vmul.f32 %v15160_v46, %v4440_v3  ;;  %v4546_v57 = vadd.f32 %v4514_v16, %v4322_v31  ;;  %15163 = vst [vmem:[#allocation19_spill] sm:$0xff] %v11610_v53  ;;  %v15167_v3 = vld [vmem:[#allocation15_spill] sm:$0xff]  ;;  %v15168_v52 = vld [vmem:[#allocation16_spill] sm:$0xff] }
 0xbd2   :  { %v4544_v15 = vadd.f32 %v15159_v54, %v4320_v24  ;;  %15162 = vst [vmem:[#allocation169_spill] sm:$0xff] %v11603_v4  ;;  %v11613_v20 = vmul.f32 %v15164_v6, %v3988_v37  ;;  %v15165_v24 = vld [vmem:[#allocation139_spill] sm:$0xff]  ;;  %v5097_v46 = vmul.f32 %v11576_v47, %v11576_v47  ;;  %v4738_v36 = vmul.f32 %v15167_v3, %v4640_v45  ;;  %v15169_v6 = vld [vmem:[#allocation114_spill] sm:$0xff]  ;;  %v15170_v55 = vld [vmem:[#allocation73_spill] sm:$0xff] }
 0xbd3   :  { %v11616_v22 = vmul.f32 %v15165_v24, %v4660_v9  ;;  %v4739_v16 = vmul.f32 %v15168_v52, %v4664_v49  ;;  %v3529_v35 = vsel %vm766_vm2, %v15170_v55, %v15169_v6  ;;  %v3297_v26 = vsel %vm576_vm1, %v11327_v62, %v11521_v48  ;;  %4858 = vrot.lane.b32.xlu0 %v11312_v12, %s5720_s22  ;;  %v15171_v61 = vld [vmem:[#allocation36_spill] sm:$0xff]  ;;  %v15172_v37 = vld [vmem:[#allocation145_spill] sm:$0xff]  ;;  %v15173_v45 = vld [vmem:[#allocation39_spill] sm:$0xff]  ;;  %v11647_v49 = vpop.permute.xlu1 %4626 }
 0xbd4   :  { %v4768_v13 = vadd.f32 %v11217_v11, %v4544_v15  ;;  %v3977_v9 = vsel %vm1146_vm4, %v15172_v37, %v15171_v61  ;;  %v4547_v31 = vadd.f32 %v4515_v38, %v4323_v21  ;;  %v3306_v51 = vsel %vm576_vm1, %v15173_v45, %v11529_v50  ;;  %v15174_v54 = vld [vmem:[#allocation17_spill] sm:$0xff]  ;;  %v15176_v3 = vld [vmem:[#allocation383_spill] sm:$0xff]  ;;  %v11658_v21 = vpop.permute.xlu0 %3284  ;;  %v15177_v55 = vld [vmem:[#allocation222_spill] sm:$0xff]  ;;  %3738 = vrot.lane.b32.xlu1 %v11312_v12, %s5713_s13 }
 0xbd5   :  { %15166 = vst [vmem:[#allocation134_spill] sm:$0xff] %v11616_v22  ;;  %v4425_v14 = vsel %vm1526_vm6, %v15174_v54, %v11225_v43  ;;  %v4770_v24 = vadd.f32 %v4738_v36, %v4546_v57  ;;  %v15175_v11 = vld [vmem:[#allocation113_spill] sm:$0xff]  ;;  %v4962_v38 = vmul.f32 %v15176_v3, %v4864_v25  ;;  %v11661_v52 = vmul.f32 %v5097_v46, %v11576_v47  ;;  %v15178_v45 = vld [vmem:[#allocation67_spill] sm:$0xff]  ;;  %v15187_v10 = vld [vmem:[#allocation66_spill] sm:$0xff] }
 0xbd6   :  { %v4888_v15 = vsel %vm1906_vm8, %v11271_v17, %v15175_v11  ;;  %v11664_v37 = vmul.f32 %v15177_v55, %v3529_v35  ;;  %v4873_v57 = vsel %vm1906_vm8, %v15178_v45, %v11281_v59  ;;  %v15179_v36 = vld [vmem:[#allocation307_spill] sm:$0xff]  ;;  %v15180_v17 = vld [vmem:[#allocation249_spill] sm:$0xff]  ;;  %v15181_v11 = vld [vmem:[#allocation56_spill] sm:$0xff]  ;;  %v11685_v55 = vsel %vm576_vm1, %v11529_v50, %v11658_v21 }
 0xbd7   :  { %v3399_v54 = vmul.f32 %v15179_v36, %v3297_v26  ;;  %v11674_v25 = vmul.f32 %v15180_v17, %v3977_v9  ;;  %v3321_v46 = vsel %vm576_vm1, %v11521_v48, %v15181_v11  ;;  %v15182_v35 = vld [vmem:[#allocation308_spill] sm:$0xff]  ;;  %3276 = vrot.lane.b32.xlu0 %v11375_v30, %s5714_s28  ;;  %v4992_v26 = vadd.f32 %v11214_v23, %v4768_v13  ;;  %v15183_v9 = vld [vmem:[#allocation137_spill] sm:$0xff]  ;;  %v11694_v48 = vpop.permute.xlu1 %3492  ;;  %v15186_v50 = vld [vmem:[#allocation130_spill] sm:$0xff] }
 0xbd8   :  { %v3402_v3 = vmul.f32 %v15182_v35, %v3306_v51  ;;  %v11691_v45 = vmul.f32 %v15183_v9, %v4425_v14  ;;  %v4771_v36 = vadd.f32 %v4739_v16, %v4547_v31  ;;  %v15184_v17 = vld [vmem:[#allocation384_spill] sm:$0xff]  ;;  %v4994_v51 = vadd.f32 %v4962_v38, %v4770_v24  ;;  %v15185_v11 = vld [vmem:[#allocation385_spill] sm:$0xff]  ;;  %v11707_v13 = vpop.permute.xlu0 %3732  ;;  %v15188_v31 = vld [vmem:[#allocation306_spill] sm:$0xff]  ;;  %4186 = vrot.lane.b32.xlu1 %v11312_v12, %s5717_s20 }
 0xbd9   :  { %v4963_v22 = vmul.f32 %v15184_v17, %v4888_v15  ;;  %v11697_v35 = vmul.f32 %v15185_v11, %v4873_v57  ;;  %v3305_v4 = vsel %vm576_vm1, %v15186_v50, %v11327_v62  ;;  %v3530_v23 = vsel %vm766_vm2, %v15187_v10, %v11694_v48  ;;  %v15189_v15 = vld [vmem:[#allocation122_spill] sm:$0xff] }
 0xbda   :  { %v3521_v16 = vsel %vm766_vm2, %v15169_v6, %v11353_v60  ;;  %v3396_v14 = vmul.f32 %v15188_v31, %v3321_v46  ;;  %v3431_v24 = vadd.f32 %v3399_v54, %v11289_v34  ;;  %v3754_v62 = vsel %vm956_vm3, %v15189_v15, %v11567_v42  ;;  %v15190_v6 = vld [vmem:[#allocation318_spill] sm:$0xff]  ;;  %v15191_v46 = vld [vmem:[#allocation305_spill] sm:$0xff] }
 0xbdb   :  { %v3434_v10 = vadd.f32 %v3402_v3, %v11304_v2  ;;  %v4202_v38 = vsel %vm1336_vm5, %v15035_v33, %v11607_v58  ;;  %v3626_v57 = vmul.f32 %v15190_v6, %v3530_v23  ;;  %v11731_v34 = vsel %vm956_vm3, %v11567_v42, %v11707_v13  ;;  %3724 = vrot.lane.b32.xlu0 %v11375_v30, %s5713_s13  ;;  %v15192_v2 = vld [vmem:[#allocation25_spill] sm:$0xff]  ;;  %v11744_v17 = vpop.permute.xlu1 %3940  ;;  %v15193_v42 = vld [vmem:[#allocation223_spill] sm:$0xff]  ;;  %v15194_v50 = vld [vmem:[#allocation334_spill] sm:$0xff] }
 0xbdc   :  { %v4995_v54 = vadd.f32 %v4963_v22, %v4771_v36  ;;  %v3398_v9 = vmul.f32 %v15191_v46, %v3305_v4  ;;  %v3545_v3 = vsel %vm766_vm2, %v11353_v60, %v15192_v2  ;;  %v3745_v33 = vsel %vm956_vm3, %v11398_v19, %v11560_v0  ;;  %v15195_v22 = vld [vmem:[#allocation28_spill] sm:$0xff]  ;;  %v11752_v36 = vpop.permute.xlu0 %4180  ;;  %v15196_v60 = vld [vmem:[#allocation157_spill] sm:$0xff]  ;;  %v15197_v6 = vld [vmem:[#allocation370_spill] sm:$0xff]  ;;  %4634 = vrot.lane.b32.xlu1 %v11312_v12, %s5719_s1 }
 0xbdd   :  { %v3623_v11 = vmul.f32 %v15193_v42, %v3521_v16  ;;  %v3850_v23 = vmul.f32 %v15194_v50, %v3754_v62  ;;  %v3658_v31 = vadd.f32 %v3626_v57, %v3434_v10  ;;  %v3978_v4 = vsel %vm1146_vm4, %v15195_v22, %v11744_v17  ;;  %v15198_v2 = vld [vmem:[#allocation349_spill] sm:$0xff]  ;;  %v15199_v62 = vld [vmem:[#allocation119_spill] sm:$0xff] }
 0xbde   :  { %v4201_v15 = vsel %vm1336_vm5, %v15196_v60, %v11444_v56  ;;  %v4297_v46 = vmul.f32 %v15197_v6, %v4202_v38  ;;  %v4074_v53 = vmul.f32 %v15198_v2, %v3978_v4  ;;  %v4194_v16 = vsel %vm1336_vm5, %v11607_v58, %v11752_v36  ;;  %v15200_v42 = vld [vmem:[#allocation333_spill] sm:$0xff]  ;;  %v15201_v4 = vld [vmem:[#allocation143_spill] sm:$0xff]  ;;  %v15202_v6 = vld [vmem:[#allocation38_spill] sm:$0xff] }
 0xbdf   :  { %v3428_v10 = vadd.f32 %v3396_v14, %v15199_v62  ;;  %v3655_v57 = vadd.f32 %v3623_v11, %v3431_v24  ;;  %v3847_v50 = vmul.f32 %v15200_v42, %v3745_v33  ;;  %v3882_v22 = vadd.f32 %v3850_v23, %v3658_v31  ;;  %4172 = vrot.lane.b32.xlu0 %v11375_v30, %s5717_s20  ;;  %v15203_v2 = vld [vmem:[#allocation7_spill] sm:$0xff]  ;;  %v11780_v24 = vpop.permute.xlu1 %4388  ;;  %v15204_v33 = vld [vmem:[#allocation361_spill] sm:$0xff]  ;;  %v15207_v42 = vld [vmem:[#allocation332_spill] sm:$0xff] }
 0xbe0   :  { %v3430_v38 = vadd.f32 %v3398_v9, %v11285_v29  ;;  %v3620_v60 = vmul.f32 %v15201_v4, %v3545_v3  ;;  %v3753_v58 = vsel %vm956_vm3, %v15202_v6, %v11398_v19  ;;  %v3769_v14 = vsel %vm956_vm3, %v11560_v0, %v15203_v2  ;;  %v15205_v31 = vld [vmem:[#allocation371_spill] sm:$0xff]  ;;  %v11788_v9 = vpop.permute.xlu0 %3494  ;;  %v15208_v6 = vld [vmem:[#allocation42_spill] sm:$0xff]  ;;  %3500 = vrot.lane.b32.xlu1 %v11375_v30, %s5715_s29 }
 0xbe1   :  { %v4293_v11 = vmul.f32 %v15204_v33, %v4201_v15  ;;  %v4106_v23 = vadd.f32 %v4074_v53, %v3882_v22  ;;  %v4298_v62 = vmul.f32 %v15205_v31, %v4194_v16  ;;  %v4426_v29 = vsel %vm1526_vm6, %v15038_v28, %v11780_v24  ;;  %v15206_v53 = vld [vmem:[#allocation380_spill] sm:$0xff]  ;;  %v15209_v2 = vld [vmem:[#allocation10_spill] sm:$0xff] }
 0xbe2   :  { %v11791_v19 = vadd.f32 %v15152_v32, %v4992_v26  ;;  %v3969_v0 = vsel %vm1146_vm4, %v15171_v61, %v11415_v63  ;;  %v4329_v3 = vadd.f32 %v4297_v46, %v11258_v39  ;;  %v4521_v15 = vmul.f32 %v15206_v53, %v4426_v29  ;;  %v15212_v33 = vld [vmem:[#allocation110_spill] sm:$0xff] }
 0xbe3   :  { %v3652_v16 = vadd.f32 %v3620_v60, %v3428_v10  ;;  %v3844_v28 = vmul.f32 %v15207_v42, %v3769_v14  ;;  %v3879_v22 = vadd.f32 %v3847_v50, %v3655_v57  ;;  %v11802_v4 = vadd.f32 %v4298_v62, %v4106_v23  ;;  %3292 = vrot.lane.b32.xlu0 %v11405_v40, %s5714_s28  ;;  %v11812_v12 = vpop.permute.xlu1 %4612  ;;  %v15210_v57 = vld [vmem:[#allocation250_spill] sm:$0xff]  ;;  %v15211_v14 = vld [vmem:[#allocation8_spill] sm:$0xff]  ;;  %v15214_v62 = vld [vmem:[#allocation367_spill] sm:$0xff] }
 0xbe4   :  { %v3654_v26 = vadd.f32 %v11664_v37, %v3430_v38  ;;  %v3846_v61 = vmul.f32 %v15208_v6, %v3753_v58  ;;  %v4217_v39 = vsel %vm1336_vm5, %v11600_v18, %v15209_v2  ;;  %v4553_v46 = vadd.f32 %v4521_v15, %v4329_v3  ;;  %v11823_v38 = vpop.permute.xlu0 %3942  ;;  %v15217_v42 = vld [vmem:[#allocation132_spill] sm:$0xff]  ;;  %3948 = vrot.lane.b32.xlu1 %v11375_v30, %s5716_s0 }
 0xbe5   :  { %v11815_v10 = vadd.f32 %v15152_v32, %v4994_v51  ;;  %v4071_v50 = vmul.f32 %v15210_v57, %v3969_v0  ;;  %v4325_v60 = vadd.f32 %v4293_v11, %v11219_v8  ;;  %v4650_v37 = vsel %vm1716_vm7, %v15046_v27, %v11812_v12  ;;  %v15213_v11 = vld [vmem:[#allocation276_spill] sm:$0xff]  ;;  %v15216_v0 = vld [vmem:[#allocation11_spill] sm:$0xff] }
 0xbe6   :  { %v11826_v58 = vadd.f32 %v15152_v32, %v4995_v54  ;;  %v3993_v51 = vsel %vm1146_vm4, %v11415_v63, %v15211_v14  ;;  %v4649_v8 = vsel %vm1716_vm7, %v15212_v33, %v11486_v41  ;;  %v4745_v23 = vmul.f32 %v15213_v11, %v4650_v37  ;;  %v15215_v54 = vld [vmem:[#allocation148_spill] sm:$0xff] }
 0xbe7   :  { %v3876_v27 = vadd.f32 %v3844_v28, %v3652_v16  ;;  %v4103_v31 = vadd.f32 %v4071_v50, %v3879_v22  ;;  %v4295_v32 = vmul.f32 %v15214_v62, %v4217_v39  ;;  %v3322_v29 = vsel %vm576_vm1, %v11658_v21, %v15215_v54  ;;  %3740 = vrot.lane.b32.xlu0 %v11405_v40, %s5713_s13  ;;  %v11854_v16 = vpop.permute.xlu1 %4836  ;;  %v15218_v22 = vld [vmem:[#allocation375_spill] sm:$0xff] }
 0xbe8   :  { %v3878_v63 = vadd.f32 %v3846_v61, %v3654_v26  ;;  %v4441_v3 = vsel %vm1526_vm6, %v11459_v7, %v15216_v0  ;;  %v4193_v53 = vsel %vm1336_vm5, %v11444_v56, %v11600_v18  ;;  %v4777_v15 = vadd.f32 %v4745_v23, %v4553_v46  ;;  %v15219_v26 = vld [vmem:[#allocation101_spill] sm:$0xff]  ;;  %v11863_v2 = vpop.permute.xlu0 %4390  ;;  %v15221_v46 = vld [vmem:[#allocation310_spill] sm:$0xff]  ;;  %v15227_v23 = vld [vmem:[#allocation12_spill] sm:$0xff]  ;;  %4396 = vrot.lane.b32.xlu1 %v11375_v30, %s5718_s21 }
 0xbe9   :  { %v4068_v28 = vmul.f32 %v15217_v42, %v3993_v51  ;;  %v4549_v21 = vadd.f32 %v11691_v45, %v4325_v60  ;;  %v4741_v6 = vmul.f32 %v15218_v22, %v4649_v8  ;;  %v4874_v61 = vsel %vm1906_vm8, %v15219_v26, %v11854_v16  ;;  %v15220_v18 = vld [vmem:[#allocation309_spill] sm:$0xff]  ;;  %v15222_v45 = vld [vmem:[#allocation78_spill] sm:$0xff] }
 0xbea   :  { %v4417_v56 = vsel %vm1526_vm6, %v11225_v43, %v11459_v7  ;;  %v3400_v39 = vmul.f32 %v15220_v18, %v3322_v29  ;;  %v3403_v57 = vmul.f32 %v15221_v46, %v11685_v55  ;;  %v4969_v50 = vmul.f32 %v15222_v45, %v4874_v61  ;;  %v15223_v60 = vld [vmem:[#allocation14_spill] sm:$0xff]  ;;  %v15225_v43 = vld [vmem:[#allocation13_spill] sm:$0xff]  ;;  %v15235_v46 = vld [vmem:[#allocation379_spill] sm:$0xff] }
 0xbeb   :  { %v4519_v37 = vmul.f32 %v15223_v60, %v4441_v3  ;;  %v4100_v14 = vadd.f32 %v4068_v28, %v3876_v27  ;;  %v15224_v51 = vld [vmem:[#allocation362_spill] sm:$0xff]  ;;  %v4327_v8 = vadd.f32 %v4295_v32, %v4103_v31  ;;  %4188 = vrot.lane.b32.xlu0 %v11405_v40, %s5717_s20  ;;  %v4102_v55 = vadd.f32 %v11674_v25, %v3878_v63  ;;  %v3509_v27 = vpop.permute.xlu1 %3508  ;;  %v15228_v31 = vld [vmem:[#allocation20_spill] sm:$0xff]  ;;  %v15231_v42 = vld [vmem:[#allocation149_spill] sm:$0xff] }
 0xbec   :  { %v4294_v33 = vmul.f32 %v15224_v51, %v4193_v53  ;;  %v15226_v7 = vld [vmem:[#allocation166_spill] sm:$0xff]  ;;  %v4665_v62 = vsel %vm1716_vm7, %v11647_v49, %v15227_v23  ;;  %v11888_v54 = vadd.f32 %v4969_v50, %v4777_v15  ;;  %v4773_v29 = vadd.f32 %v4741_v6, %v4549_v21  ;;  %v11900_v63 = vpop.permute.xlu0 %4614  ;;  %v15230_v53 = vld [vmem:[#allocation112_spill] sm:$0xff]  ;;  %v15236_v50 = vld [vmem:[#allocation197_spill] sm:$0xff]  ;;  %4620 = vrot.lane.b32.xlu1 %v11375_v30, %s5719_s1 }
 0xbed   :  { %v4889_v11 = vsel %vm1906_vm8, %v15226_v7, %v15225_v43  ;;  %v3770_v32 = vsel %vm956_vm3, %v11707_v13, %v15228_v31  ;;  %v3522_v0 = vsel %vm766_vm2, %v11694_v48, %v3509_v27  ;;  %v15229_v3 = vld [vmem:[#allocation22_spill] sm:$0xff]  ;;  %v3432_v15 = vadd.f32 %v3400_v39, %v15230_v53  ;;  %v15232_v21 = vld [vmem:[#allocation320_spill] sm:$0xff]  ;;  %v15237_v60 = vld [vmem:[#allocation335_spill] sm:$0xff] }
 0xbee   :  { %v3546_v25 = vsel %vm766_vm2, %v3509_v27, %v15229_v3  ;;  %v3435_v28 = vadd.f32 %v3403_v57, %v15231_v42  ;;  %v15233_v6 = vld [vmem:[#allocation322_spill] sm:$0xff]  ;;  %v15234_v13 = vld [vmem:[#allocation156_spill] sm:$0xff]  ;;  %v4326_v48 = vadd.f32 %v4294_v33, %v4102_v55  ;;  %v4551_v18 = vadd.f32 %v4519_v37, %v4327_v8  ;;  %v15238_v57 = vld [vmem:[#allocation337_spill] sm:$0xff] }
 0xbef   :  { %v3624_v22 = vmul.f32 %v15232_v21, %v3546_v25  ;;  %v3627_v26 = vmul.f32 %v15233_v6, %v3522_v0  ;;  %v4324_v61 = vadd.f32 %v15234_v13, %v4100_v14  ;;  %v4743_v45 = vmul.f32 %v15235_v46, %v4665_v62  ;;  %3502 = vrot.lane.b32.xlu0 %v15236_v50, %s5715_s29  ;;  %v3957_v27 = vpop.permute.xlu1 %3956  ;;  %v15239_v31 = vld [vmem:[#allocation271_spill] sm:$0xff]  ;;  %v15240_v33 = vld [vmem:[#allocation150_spill] sm:$0xff]  ;;  %v15245_v42 = vld [vmem:[#allocation352_spill] sm:$0xff] }
 0xbf0   :  { %v3848_v39 = vmul.f32 %v15237_v60, %v3770_v32  ;;  %v3851_v51 = vmul.f32 %v15238_v57, %v11731_v34  ;;  %v4518_v0 = vmul.f32 %v15239_v31, %v4417_v56  ;;  %v4641_v37 = vsel %vm1716_vm7, %v11486_v41, %v11647_v49  ;;  %v11926_v55 = vpop.permute.xlu0 %4838  ;;  %v15241_v34 = vld [vmem:[#allocation61_spill] sm:$0xff]  ;;  %v15242_v3 = vld [vmem:[#allocation351_spill] sm:$0xff]  ;;  %v15247_v46 = vld [vmem:[#allocation372_spill] sm:$0xff]  ;;  %3516 = vrot.lane.b32.xlu1 %v11405_v40, %s5715_s29 }
 0xbf1   :  { %v3656_v43 = vadd.f32 %v3624_v22, %v3432_v15  ;;  %v3659_v23 = vadd.f32 %v3627_v26, %v3435_v28  ;;  %v3970_v14 = vsel %vm1146_vm4, %v11744_v17, %v3957_v27  ;;  %v3994_v8 = vsel %vm1146_vm4, %v3957_v27, %v15240_v33  ;;  %v15243_v41 = vld [vmem:[#allocation387_spill] sm:$0xff]  ;;  %v15244_v17 = vld [vmem:[#allocation21_spill] sm:$0xff]  ;;  %v15246_v22 = vld [vmem:[#allocation378_spill] sm:$0xff] }
 0xbf2   :  { %v4218_v56 = vsel %vm1336_vm5, %v11752_v36, %v15241_v34  ;;  %v4072_v25 = vmul.f32 %v15242_v3, %v3994_v8  ;;  %v4967_v49 = vmul.f32 %v15243_v41, %v4889_v11  ;;  %v4548_v53 = vadd.f32 %v15244_v17, %v4324_v61  ;;  %v15248_v61 = vld [vmem:[#allocation128_spill] sm:$0xff]  ;;  %v15250_v57 = vld [vmem:[#allocation382_spill] sm:$0xff] }
 0xbf3   :  { %v3880_v62 = vadd.f32 %v3848_v39, %v3656_v43  ;;  %v3883_v32 = vadd.f32 %v3851_v51, %v3659_v23  ;;  %v4775_v15 = vadd.f32 %v4743_v45, %v4551_v18  ;;  %v4075_v28 = vmul.f32 %v15245_v42, %v3970_v14  ;;  %3950 = vrot.lane.b32.xlu0 %v15236_v50, %s5716_s0  ;;  %v4405_v13 = vpop.permute.xlu1 %4404  ;;  %v15252_v14 = vld [vmem:[#allocation76_spill] sm:$0xff] }
 0xbf4   :  { %v4997_v21 = vadd.f32 %v11697_v35, %v4773_v29  ;;  %v4550_v36 = vadd.f32 %v4518_v0, %v4326_v48  ;;  %v4742_v6 = vmul.f32 %v15246_v22, %v4641_v37  ;;  %v4299_v60 = vmul.f32 %v15247_v46, %v4218_v56  ;;  %v11951_v45 = vpop.permute.xlu0 %3510  ;;  %v15249_v29 = vld [vmem:[#allocation381_spill] sm:$0xff]  ;;  %3964 = vrot.lane.b32.xlu1 %v11405_v40, %s5716_s0 }
 0xbf5   :  { %v11942_v26 = vadd.f32 %v4072_v25, %v3880_v62  ;;  %v4107_v39 = vadd.f32 %v4075_v28, %v3883_v32  ;;  %v4418_v11 = vsel %vm1526_vm6, %v11780_v24, %v4405_v13  ;;  %v4442_v18 = vsel %vm1526_vm6, %v4405_v13, %v15248_v61  ;;  %v15251_v24 = vld [vmem:[#allocation121_spill] sm:$0xff]  ;;  %v15257_v28 = vld [vmem:[#allocation115_spill] sm:$0xff] }
 0xbf6   :  { %v5098_v35 = vmul.f32 %v11815_v10, %v11815_v10  ;;  %v4522_v48 = vmul.f32 %v15249_v29, %v4418_v11  ;;  %v4523_v51 = vmul.f32 %v15250_v57, %v4442_v18  ;;  %v11961_v43 = vsel %vm766_vm2, %v11788_v9, %v11951_v45  ;;  %v15253_v25 = vld [vmem:[#allocation45_spill] sm:$0xff] }
 0xbf7   :  { %v4772_v23 = vadd.f32 %v15251_v24, %v4548_v53  ;;  %v4999_v27 = vadd.f32 %v4967_v49, %v4775_v15  ;;  %v4331_v31 = vadd.f32 %v4299_v60, %v4107_v39  ;;  %4398 = vrot.lane.b32.xlu0 %v15236_v50, %s5718_s21  ;;  %v5096_v0 = vmul.f32 %v11791_v19, %v11791_v19  ;;  %v4629_v56 = vpop.permute.xlu1 %4628  ;;  %v15254_v53 = vld [vmem:[#allocation277_spill] sm:$0xff] }
 0xbf8   :  { %v5099_v37 = vmul.f32 %v11826_v58, %v11826_v58  ;;  %v11973_v33 = vadd.f32 %v15252_v14, %v4997_v21  ;;  %v4865_v8 = vsel %vm1906_vm8, %v11281_v59, %v15226_v7  ;;  %v4554_v34 = vadd.f32 %v4522_v48, %v11802_v4  ;;  %v11986_v49 = vpop.permute.xlu0 %3958  ;;  %v15255_v59 = vld [vmem:[#allocation278_spill] sm:$0xff]  ;;  %4412 = vrot.lane.b32.xlu1 %v11405_v40, %s5718_s21 }
 0xbf9   :  { %v4774_v62 = vadd.f32 %v4742_v6, %v4550_v36  ;;  %v4555_v32 = vadd.f32 %v4523_v51, %v4331_v31  ;;  %v4642_v3 = vsel %vm1716_vm7, %v11812_v12, %v4629_v56  ;;  %v4666_v41 = vsel %vm1716_vm7, %v4629_v56, %v15253_v25  ;;  %v15256_v12 = vld [vmem:[#allocation386_spill] sm:$0xff]  ;;  %v15259_v51 = vld [vmem:[#allocation391_spill] sm:$0xff]  ;;  %v15263_v56 = vld [vmem:[#allocation184_spill] sm:$0xff] }
 0xbfa   :  { %v5114_v17 = vmul.f32 %v5098_v35, %v11815_v10  ;;  %v4746_v15 = vmul.f32 %v15254_v53, %v4642_v3  ;;  %v4747_v7 = vmul.f32 %v15255_v59, %v4666_v41  ;;  %v11995_v4 = vsel %vm1146_vm4, %v11823_v38, %v11986_v49  ;;  %v15258_v35 = vld [vmem:[#allocation126_spill] sm:$0xff]  ;;  %v15265_v41 = vld [vmem:[#allocation103_spill] sm:$0xff]  ;;  %v15266_v53 = vld [vmem:[#allocation172_spill] sm:$0xff] }
 0xbfb   :  { %v4966_v42 = vmul.f32 %v15256_v12, %v4865_v8  ;;  %v4996_v21 = vadd.f32 %v15257_v28, %v4772_v23  ;;  %v12002_v36 = vadd.f32 %v15252_v14, %v4999_v27  ;;  %4622 = vrot.lane.b32.xlu0 %v15236_v50, %s5719_s1  ;;  %v5112_v22 = vmul.f32 %v5096_v0, %v11791_v19  ;;  %v4853_v60 = vpop.permute.xlu1 %4852  ;;  %v15260_v23 = vld [vmem:[#allocation392_spill] sm:$0xff] }
 0xbfc   :  { %v5101_v6 = vmul.f32 %v11973_v33, %v11973_v33  ;;  %v4778_v13 = vadd.f32 %v4746_v15, %v4554_v34  ;;  %v4779_v46 = vadd.f32 %v4747_v7, %v4555_v32  ;;  %v5129_v39 = vmul.f32 0.044715, %v11661_v52  ;;  %v12017_v48 = vpop.permute.xlu0 %4406  ;;  %v15262_v34 = vld [vmem:[#allocation193_spill] sm:$0xff]  ;;  %4636 = vrot.lane.b32.xlu1 %v11405_v40, %s5719_s1 }
 0xbfd   :  { %v5115_v11 = vmul.f32 %v5099_v37, %v11826_v58  ;;  %v4998_v61 = vadd.f32 %v4966_v42, %v4774_v62  ;;  %v4866_v18 = vsel %vm1906_vm8, %v11854_v16, %v4853_v60  ;;  %v4890_v29 = vsel %vm1906_vm8, %v4853_v60, %v15258_v35  ;;  %v15261_v37 = vld [vmem:[#allocation105_spill] sm:$0xff] }
 0xbfe   :  { %v5130_v57 = vmul.f32 0.044715, %v5114_v17  ;;  %v4970_v24 = vmul.f32 %v15259_v51, %v4866_v18  ;;  %v4971_v27 = vmul.f32 %v15260_v23, %v4890_v29  ;;  %v12025_v52 = vsel %vm1526_vm6, %v11863_v2, %v12017_v48  ;;  %v15267_v42 = vld [vmem:[#allocation293_spill] sm:$0xff]  ;;  %v15272_v18 = vld [vmem:[#allocation319_spill] sm:$0xff]  ;;  %v15273_v29 = vld [vmem:[#allocation154_spill] sm:$0xff] }
 0xbff   :  { %v12031_v16 = vadd.f32 %v11613_v20, %v11605_v5  ;;  %v12034_v31 = vadd.f32 %v15252_v14, %v4996_v21  ;;  %v5103_v0 = vmul.f32 %v12002_v36, %v12002_v36  ;;  %3518 = vrot.lane.b32.xlu0 %v15261_v37, %s5715_s29  ;;  %v5128_v8 = vmul.f32 0.044715, %v5112_v22  ;;  %v12050_v20 = vpop.permute.xlu1 %3270  ;;  %v15268_v21 = vld [vmem:[#allocation203_spill] sm:$0xff]  ;;  %v15269_v22 = vld [vmem:[#allocation194_spill] sm:$0xff] }
 0xc00   :  { %v12044_v62 = vsel %vm1526_vm6, %v15263_v56, %v15262_v34  ;;  %v12046_v32 = vadd.f32 %v4970_v24, %v4778_v13  ;;  %v12048_v5 = vadd.f32 %v4971_v27, %v4779_v46  ;;  %v5117_v3 = vmul.f32 %v5101_v6, %v11973_v33  ;;  %v12064_v59 = vpop.permute.xlu0 %4630  ;;  %v15274_v27 = vld [vmem:[#allocation159_spill] sm:$0xff]  ;;  %3278 = vrot.lane.b32.xlu1 %v15236_v50, %s5714_s28 }
 0xc01   :  { %v12054_v25 = vadd.f32 %v15252_v14, %v4998_v61  ;;  %v3531_v17 = vsel %vm766_vm2, %v15265_v41, %v11788_v9  ;;  %v3307_v15 = vsel %vm576_vm1, %v15266_v53, %v12050_v20  ;;  %v5145_v7 = vadd.f32 %v5129_v39, %v11576_v47  ;;  %v15270_v39 = vld [vmem:[#allocation207_spill] sm:$0xff]  ;;  %v15271_v61 = vld [vmem:[#allocation198_spill] sm:$0xff] }
 0xc02   :  { %v5146_v12 = vadd.f32 %v5130_v57, %v11815_v10  ;;  %v3406_v28 = vmul.f32 %v15267_v42, %v3307_v15  ;;  %v12073_v14 = vsel %vm1716_vm7, %v11900_v63, %v12064_v59  ;;  %v5131_v9 = vmul.f32 0.044715, %v5115_v11  ;;  %v15276_v42 = vld [vmem:[#allocation234_spill] sm:$0xff] }
 0xc03   :  { %15264 = vst [vmem:[#allocation170_spill] sm:$0xff] %v12054_v25  ;;  %v12081_v6 = vsel %vm766_vm2, %v15269_v22, %v15268_v21  ;;  %3966 = vrot.lane.b32.xlu0 %v15261_v37, %s5716_s0  ;;  %v5100_v13 = vmul.f32 %v12034_v31, %v12034_v31  ;;  %v5144_v46 = vadd.f32 %v5128_v8, %v11791_v19  ;;  %v12095_v51 = vpop.permute.xlu1 %3718  ;;  %v5133_v24 = vmul.f32 0.044715, %v5117_v3  ;;  %v15275_v8 = vld [vmem:[#allocation175_spill] sm:$0xff]  ;;  %v15279_v22 = vld [vmem:[#allocation165_spill] sm:$0xff] }
 0xc04   :  { %v5119_v60 = vmul.f32 %v5103_v0, %v12002_v36  ;;  %v3317_v11 = vsel %vm576_vm1, %v15271_v61, %v15270_v39  ;;  %v3630_v35 = vmul.f32 %v15272_v18, %v3531_v17  ;;  %v3438_v57 = vadd.f32 %v3406_v28, %v15273_v29  ;;  %v12107_v53 = vpop.permute.xlu0 %4854  ;;  %3726 = vrot.lane.b32.xlu1 %v15236_v50, %s5713_s13 }
 0xc05   :  { %v5102_v23 = vmul.f32 %v12054_v25, %v12054_v25  ;;  %v3979_v0 = vsel %vm1146_vm4, %v15274_v27, %v11823_v38  ;;  %v3755_v41 = vsel %vm956_vm3, %v15275_v8, %v12095_v51  ;;  %v5161_v17 = vmul.f32 0.7978846, %v5145_v7  ;;  %v15278_v8 = vld [vmem:[#allocation350_spill] sm:$0xff] }
 0xc06   :  { %v3662_v15 = vadd.f32 %v3630_v35, %v3438_v57  ;;  %v3854_v28 = vmul.f32 %v15276_v42, %v3755_v41  ;;  %v5162_v3 = vmul.f32 0.7978846, %v5146_v12  ;;  %v5147_v18 = vadd.f32 %v5131_v9, %v11826_v58  ;;  %v15277_v57 = vld [vmem:[#allocation289_spill] sm:$0xff] }
 0xc07   :  { %v12117_v38 = vsel %vm1906_vm8, %v11926_v55, %v12107_v53  ;;  %4846 = vrot.lane.b32.xlu0 %v15236_v50, %s5720_s22  ;;  %v5116_v7 = vmul.f32 %v5100_v13, %v12034_v31  ;;  %v5160_v35 = vmul.f32 0.7978846, %v5144_v46  ;;  %v5135_v29 = vmul.f32 0.044715, %v5119_v60  ;;  %v12126_v9 = vpop.permute.xlu1 %4166  ;;  %v15280_v60 = vld [vmem:[#allocation373_spill] sm:$0xff] }
 0xc08   :  { %v12123_v27 = vmul.f32 %v15277_v57, %v3317_v11  ;;  %v4078_v12 = vmul.f32 %v15278_v8, %v3979_v0  ;;  %v3886_v41 = vadd.f32 %v3854_v28, %v3662_v15  ;;  %v5149_v42 = vadd.f32 %v5133_v24, %v11973_v33  ;;  %v12138_v46 = vpop.permute.xlu0 %3272  ;;  %v15281_v0 = vld [vmem:[#allocation168_spill] sm:$0xff]  ;;  %v15283_v28 = vld [vmem:[#allocation173_spill] sm:$0xff]  ;;  %4174 = vrot.lane.b32.xlu1 %v15236_v50, %s5717_s20 }
 0xc09   :  { %v5118_v61 = vmul.f32 %v5102_v23, %v12054_v25  ;;  %v4427_v21 = vsel %vm1526_vm6, %v15279_v22, %v11863_v2  ;;  %v4203_v13 = vsel %vm1336_vm5, %v15131_v1, %v12126_v9  ;;  %5637 = vtanh.f32 %v5161_v17  ;;  %v15282_v17 = vld [vmem:[#allocation273_spill] sm:$0xff] }
 0xc0a   :  { %v4301_v11 = vmul.f32 %v15280_v60, %v4203_v13  ;;  %v12143_v24 = vadd.f32 %v4078_v12, %v3886_v41  ;;  %5639 = vtanh.f32 %v5162_v3  ;;  %v5163_v23 = vmul.f32 0.7978846, %v5147_v18  ;;  %v15284_v18 = vld [vmem:[#allocation19_spill] sm:$0xff] }
 0xc0b   :  { %v4651_v2 = vsel %vm1716_vm7, %v15281_v0, %v11900_v63  ;;  %4414 = vrot.lane.b32.xlu0 %v15261_v37, %s5718_s21  ;;  %v5132_v1 = vmul.f32 0.044715, %v5116_v7  ;;  %5641 = vtanh.f32 %v5160_v35  ;;  %v5151_v22 = vadd.f32 %v5135_v29, %v12002_v36  ;;  %v3287_v8 = vpop.permute.xlu1 %3286  ;;  %v15285_v63 = vld [vmem:[#allocation33_spill] sm:$0xff]  ;;  %v15289_v0 = vld [vmem:[#allocation295_spill] sm:$0xff] }
 0xc0c   :  { %v4525_v15 = vmul.f32 %v15282_v17, %v4427_v21  ;;  %v4875_v3 = vsel %vm1906_vm8, %v15283_v28, %v11926_v55  ;;  %v4333_v57 = vadd.f32 %v4301_v11, %v15284_v18  ;;  %v5165_v12 = vmul.f32 0.7978846, %v5149_v42  ;;  %v15286_v21 = vld [vmem:[#allocation49_spill] sm:$0xff]  ;;  %v12168_v13 = vpop.permute.xlu0 %3720  ;;  %v15287_v55 = vld [vmem:[#allocation388_spill] sm:$0xff]  ;;  %v15288_v42 = vld [vmem:[#allocation294_spill] sm:$0xff]  ;;  %3294 = vrot.lane.b32.xlu1 %v15261_v37, %s5714_s28 }
 0xc0d   :  { %v5134_v41 = vmul.f32 0.044715, %v5118_v61  ;;  %v3547_v7 = vsel %vm766_vm2, %v11951_v45, %v15285_v63  ;;  %v3299_v35 = vsel %vm576_vm1, %v12050_v20, %v3287_v8  ;;  %v3323_v29 = vsel %vm576_vm1, %v3287_v8, %v15286_v21  ;;  %v15290_v45 = vld [vmem:[#allocation140_spill] sm:$0xff]  ;;  %v15293_v21 = vld [vmem:[#allocation151_spill] sm:$0xff] }
 0xc0e   :  { %v4749_v60 = vmul.f32 %v15287_v55, %v4651_v2  ;;  %v4557_v11 = vadd.f32 %v4525_v15, %v4333_v57  ;;  %v3404_v61 = vmul.f32 %v15288_v42, %v3323_v29  ;;  %v3407_v17 = vmul.f32 %v15289_v0, %v3299_v35  ;;  %v15291_v20 = vld [vmem:[#allocation324_spill] sm:$0xff]  ;;  %v15292_v2 = vld [vmem:[#allocation323_spill] sm:$0xff] }
 0xc0f   :  { %v4973_v28 = vmul.f32 %v15290_v45, %v4875_v3  ;;  %v3631_v18 = vmul.f32 %v15291_v20, %v11961_v43  ;;  %4638 = vrot.lane.b32.xlu0 %v15261_v37, %s5719_s1  ;;  %v5148_v8 = vadd.f32 %v5132_v1, %v12034_v31  ;;  %v5167_v63 = vmul.f32 0.7978846, %v5151_v22  ;;  %v15294_v35 = vld [vmem:[#allocation136_spill] sm:$0xff]  ;;  %v3735_v42 = vpop.permute.xlu1 %3734 }
 0xc10   :  { %v3628_v15 = vmul.f32 %v15292_v2, %v3547_v7  ;;  %v4781_v57 = vadd.f32 %v4749_v60, %v4557_v11  ;;  %v3436_v29 = vadd.f32 %v3404_v61, %v15293_v21  ;;  %v3439_v55 = vadd.f32 %v3407_v17, %v15294_v35  ;;  %v15295_v0 = vld [vmem:[#allocation124_spill] sm:$0xff]  ;;  %v12194_v22 = vpop.permute.xlu0 %4168  ;;  %v15297_v61 = vld [vmem:[#allocation235_spill] sm:$0xff]  ;;  %3742 = vrot.lane.b32.xlu1 %v15261_v37, %s5713_s13 }
 0xc11   :  { %v3995_v3 = vsel %vm1146_vm4, %v11986_v49, %v15295_v0  ;;  %v3747_v43 = vsel %vm956_vm3, %v12095_v51, %v3735_v42  ;;  %v15296_v45 = vld [vmem:[#allocation164_spill] sm:$0xff]  ;;  %5643 = vtanh.f32 %v5163_v23  ;;  %v5164_v2 = vmul.f32 0.7978846, %v5148_v8 }
 0xc12   :  { %v3771_v1 = vsel %vm956_vm3, %v3735_v42, %v15296_v45  ;;  %v12196_v7 = vadd.f32 %v4973_v28, %v4781_v57  ;;  %v3660_v60 = vadd.f32 %v3628_v15, %v3436_v29  ;;  %v3663_v11 = vadd.f32 %v3631_v18, %v3439_v55  ;;  %v15298_v20 = vld [vmem:[#allocation236_spill] sm:$0xff]  ;;  %v15299_v18 = vld [vmem:[#allocation162_spill] sm:$0xff]  ;;  %v15300_v57 = vld [vmem:[#allocation353_spill] sm:$0xff] }
 0xc13   :  { %v3852_v17 = vmul.f32 %v15297_v61, %v3771_v1  ;;  %v12201_v49 = vpop.eup %5637  ;;  %v3855_v51 = vmul.f32 %v15298_v20, %v3747_v43  ;;  %4862 = vrot.lane.b32.xlu0 %v15261_v37, %s5720_s22  ;;  %5645 = vtanh.f32 %v5165_v12  ;;  %v5150_v23 = vadd.f32 %v5134_v41, %v12054_v25  ;;  %v4183_v35 = vpop.permute.xlu1 %4182  ;;  %v153_v55 = vld [vmem:[%s13227_s18 + $0x8] sm:$0xff]  ;;  %v15307_v20 = vld [vmem:[#allocation209_spill] sm:$0xff]  ;;  %v15331_v25 = vld [vmem:[#allocation216_spill] sm:$0xff] }
 0xc14   :  { %v12207_v28 = vpop.eup %5639  ;;  %v4328_v15 = vadd.f32 %v15299_v18, %v11942_v26  ;;  %v4076_v21 = vmul.f32 %v15300_v57, %v3995_v3  ;;  %5647 = vtanh.f32 %v5167_v63  ;;  %v15301_v12 = vld [vmem:[#allocation354_spill] sm:$0xff]  ;;  %v4195_v0 = vsel %vm1336_vm5, %v12126_v9, %v4183_v35  ;;  %v15302_v26 = vld [vmem:[#allocation167_spill] sm:$0xff]  ;;  %v12225_v43 = vpop.permute.xlu0 %4616  ;;  %4190 = vrot.lane.b32.xlu1 %v15261_v37, %s5717_s20 }
 0xc15   :  { %v3884_v29 = vadd.f32 %v3852_v17, %v3660_v60  ;;  %v12215_v42 = vpop.eup %5641  ;;  %v4079_v8 = vmul.f32 %v15301_v12, %v11995_v4  ;;  %v3887_v41 = vadd.f32 %v3855_v51, %v3663_v11  ;;  %v4219_v3 = vsel %vm1336_vm5, %v4183_v35, %v15302_v26  ;;  %v15303_v45 = vld [vmem:[#allocation26_spill] sm:$0xff]  ;;  %v15304_v60 = vld [vmem:[#allocation376_spill] sm:$0xff]  ;;  %v15305_v11 = vld [vmem:[#allocation377_spill] sm:$0xff] }
 0xc16   :  { %v4443_v63 = vsel %vm1526_vm6, %v12017_v48, %v15303_v45  ;;  %v4302_v4 = vmul.f32 %v15304_v60, %v4195_v0  ;;  %v4303_v61 = vmul.f32 %v15305_v11, %v4219_v3  ;;  %v15306_v9 = vld [vmem:[#allocation91_spill] sm:$0xff]  ;;  %v15308_v51 = vld [vmem:[#allocation200_spill] sm:$0xff]  ;;  %5649 = vtanh.f32 %v5164_v2  ;;  %v15309_v48 = vld [vmem:[#allocation274_spill] sm:$0xff] }
 0xc17   :  { %v12231_v1 = vadd.f32 %v4076_v21, %v3884_v29  ;;  %v3445_v17 = vadd.f32 %v12123_v27, %v15306_v9  ;;  %v3765_v18 = vsel %vm956_vm3, %v15308_v51, %v15307_v20  ;;  %v4111_v57 = vadd.f32 %v4079_v8, %v3887_v41  ;;  %5271 = vperm.xlu0 %5578, %v153_v55   ;;  %v15310_v29 = vld [vmem:[#allocation48_spill] sm:$0xff]  ;;  %v12250_v0 = vpop.permute.xlu1 %3496  ;;  %v15311_v26 = vld [vmem:[#allocation63_spill] sm:$0xff]  ;;  %v15312_v45 = vld [vmem:[#allocation133_spill] sm:$0xff] }
 0xc18   :  { %v4526_v21 = vmul.f32 %v15309_v48, %v12025_v52  ;;  %v4667_v35 = vsel %vm1716_vm7, %v12064_v59, %v15310_v29  ;;  %v4334_v12 = vadd.f32 %v4302_v4, %v12143_v24  ;;  %v5166_v27 = vmul.f32 0.7978846, %v5150_v23  ;;  %v15313_v55 = vld [vmem:[#allocation275_spill] sm:$0xff]  ;;  %v12256_v60 = vpop.permute.xlu0 %3288  ;;  %v15315_v11 = vld [vmem:[#allocation186_spill] sm:$0xff]  ;;  %v15316_v24 = vld [vmem:[#allocation389_spill] sm:$0xff]  ;;  %4844 = vrot.lane.b32.xlu1 %v11375_v30, %s5720_s22 }
 0xc19   :  { %v3637_v3 = vmul.f32 %v15311_v26, %v12081_v6  ;;  %v4552_v8 = vadd.f32 %v15312_v45, %v4328_v15  ;;  %v4527_v2 = vmul.f32 %v15313_v55, %v4443_v63  ;;  %v4335_v41 = vadd.f32 %v4303_v61, %v4111_v57  ;;  %v15314_v52 = vld [vmem:[#allocation195_spill] sm:$0xff]  ;;  %v15317_v9 = vld [vmem:[#allocation52_spill] sm:$0xff]  ;;  %v15319_v48 = vld [vmem:[#allocation390_spill] sm:$0xff] }
 0xc1a   :  { %v4884_v59 = vsel %vm1906_vm8, %v15315_v11, %v15314_v52  ;;  %v4750_v4 = vmul.f32 %v15316_v24, %v12073_v14  ;;  %v4891_v6 = vsel %vm1906_vm8, %v12107_v53, %v15317_v9  ;;  %v4558_v23 = vadd.f32 %v4526_v21, %v4334_v12  ;;  %v15318_v61 = vld [vmem:[#allocation227_spill] sm:$0xff]  ;;  %v15320_v45 = vld [vmem:[#allocation205_spill] sm:$0xff]  ;;  %v15321_v55 = vld [vmem:[#allocation196_spill] sm:$0xff] }
 0xc1b   :  { %v5644_v15 = vpop.eup %5643  ;;  %v3669_v63 = vadd.f32 %v3637_v3, %v3445_v17  ;;  %v3861_v57 = vmul.f32 %v15318_v61, %v3765_v18  ;;  %v4751_v29 = vmul.f32 %v15319_v48, %v4667_v35  ;;  %v4559_v26 = vadd.f32 %v4527_v2, %v4335_v41  ;;  %v15322_v24 = vld [vmem:[#allocation144_spill] sm:$0xff]  ;;  %v12278_v21 = vpop.permute.xlu1 %3944  ;;  %v15324_v17 = vld [vmem:[#allocation199_spill] sm:$0xff]  ;;  %v15325_v35 = vld [vmem:[#allocation41_spill] sm:$0xff] }
 0xc1c   :  { %v3989_v14 = vsel %vm1146_vm4, %v15321_v55, %v15320_v45  ;;  %v4974_v50 = vmul.f32 %v15322_v24, %v12117_v38  ;;  %v4782_v53 = vadd.f32 %v4750_v4, %v4558_v23  ;;  %5651 = vtanh.f32 %v5166_v27  ;;  %v15323_v9 = vld [vmem:[#allocation208_spill] sm:$0xff]  ;;  %v15326_v2 = vld [vmem:[#allocation18_spill] sm:$0xff]  ;;  %v12286_v48 = vpop.permute.xlu0 %3736  ;;  %v15330_v27 = vld [vmem:[#allocation201_spill] sm:$0xff]  ;;  %4860 = vrot.lane.b32.xlu1 %v11405_v40, %s5720_s22 }
 0xc1d   :  { %v5646_v12 = vpop.eup %5645  ;;  %v4437_v18 = vsel %vm1526_vm6, %v15324_v17, %v15323_v9  ;;  %v4776_v3 = vadd.f32 %v15325_v35, %v4552_v8  ;;  %v4975_v41 = vmul.f32 %v15326_v2, %v4891_v6  ;;  %v4783_v61 = vadd.f32 %v4751_v29, %v4559_v26  ;;  %v15327_v38 = vld [vmem:[#allocation82_spill] sm:$0xff]  ;;  %v15332_v51 = vld [vmem:[#allocation212_spill] sm:$0xff]  ;;  %v15333_v6 = vld [vmem:[#allocation129_spill] sm:$0xff] }
 0xc1e   :  { %v5648_v37 = vpop.eup %5647  ;;  %v12290_v4 = vmul.f32 %v15327_v38, %v12044_v62  ;;  %v15329_v23 = vld [vmem:[#allocation210_spill] sm:$0xff]  ;;  %v3318_v8 = vsel %vm576_vm1, %v15332_v51, %v15331_v25  ;;  %v12300_v35 = vadd.f32 %v4974_v50, %v4782_v53  ;;  %v12305_v29 = vmul.f32 %v15333_v6, %v4884_v59  ;;  %v15335_v62 = vld [vmem:[#allocation55_spill] sm:$0xff]  ;;  %v15336_v17 = vld [vmem:[#allocation32_spill] sm:$0xff] }
 0xc1f   :  { %v4885_v24 = vsel %vm1906_vm8, %v15330_v27, %v15329_v23  ;;  %v4085_v26 = vmul.f32 %v15335_v62, %v3989_v14  ;;  %v3893_v2 = vadd.f32 %v3861_v57, %v3669_v63  ;;  %v12308_v38 = vadd.f32 %v4975_v41, %v4783_v61  ;;  %v15338_v55 = vld [vmem:[#allocation211_spill] sm:$0xff]  ;;  %v15339_v11 = vld [vmem:[#allocation202_spill] sm:$0xff]  ;;  %v15340_v53 = vld [vmem:[#allocation272_spill] sm:$0xff]  ;;  %v12325_v63 = vpop.permute.xlu1 %4392 }
 0xc20   :  { %15328 = vst [vmem:[#allocation86_spill] sm:$0xff] %v12290_v4  ;;  %15334 = vst [vmem:[#allocation171_spill] sm:$0xff] %v12305_v29  ;;  %v12311_v27 = vmul.f32 %v15336_v17, %v4437_v18  ;;  %v4213_v50 = vsel %vm1336_vm5, %v15339_v11, %v15338_v55  ;;  %v15341_v51 = vld [vmem:[#allocation215_spill] sm:$0xff]  ;;  %v15342_v59 = vld [vmem:[#allocation34_spill] sm:$0xff]  ;;  %v5650_v57 = vpop.eup %5649 }
 0xc21   :  { %v3542_v30 = vsel %vm766_vm2, %v15341_v51, %v15340_v53  ;;  %v12323_v6 = vadd.f32 %v15342_v59, %v11888_v54  ;;  %v15344_v14 = vld [vmem:[#allocation27_spill] sm:$0xff]  ;;  %v15346_v18 = vld [vmem:[#allocation213_spill] sm:$0xff]  ;;  %v15347_v41 = vld [vmem:[#allocation204_spill] sm:$0xff]  ;;  %v12336_v51 = vpop.permute.xlu0 %4184  ;;  %v12354_v4 = vadd.f32 %v4085_v26, %v3893_v2 }
 0xc22   :  { %15337 = vst [vmem:[#allocation43_spill] sm:$0xff] %v12311_v27  ;;  %v12328_v17 = vmul.f32 %v15344_v14, %v4885_v24  ;;  %v4661_v61 = vsel %vm1716_vm7, %v15347_v41, %v15346_v18  ;;  %v15348_v62 = vld [vmem:[#allocation104_spill] sm:$0xff]  ;;  %v15349_v29 = vld [vmem:[#allocation131_spill] sm:$0xff]  ;;  %v15350_v53 = vld [vmem:[#allocation218_spill] sm:$0xff]  ;;  %v5194_v24 = vadd.f32 1.0, %v12207_v28  ;;  %v5193_v14 = vadd.f32 1.0, %v12201_v49 }
 0xc23   :  { %15343 = vst [vmem:[#allocation6_spill] sm:$0xff] %v12323_v6  ;;  %v3417_v25 = vmul.f32 %v15348_v62, %v3318_v8  ;;  %v5000_v27 = vadd.f32 %v15349_v29, %v4776_v3  ;;  %v15351_v54 = vld [vmem:[#allocation214_spill] sm:$0xff]  ;;  %v15352_v41 = vld [vmem:[#allocation255_spill] sm:$0xff]  ;;  %v15354_v3 = vld [vmem:[#allocation221_spill] sm:$0xff]  ;;  %v5105_v40 = vmul.f32 %v12323_v6, %v12323_v6  ;;  %v12358_v28 = vpop.permute.xlu1 %4840  ;;  %v5197_v49 = vadd.f32 1.0, %v5646_v12 }
 0xc24   :  { %15345 = vst [vmem:[#allocation90_spill] sm:$0xff] %v12328_v17  ;;  %v3766_v11 = vsel %vm956_vm3, %v15351_v54, %v15350_v53  ;;  %v5192_v17 = vadd.f32 1.0, %v12215_v42  ;;  %v12348_v8 = vmul.f32 %v15352_v41, %v4213_v50  ;;  %v3641_v29 = vmul.f32 %v15354_v3, %v3542_v30  ;;  %v152_v62 = vld [vmem:[%s13227_s18] sm:$0xff]  ;;  %v15357_v41 = vld [vmem:[#allocation40_spill] sm:$0xff] }
 0xc25   :  { %v5195_v54 = vadd.f32 1.0, %v5644_v15  ;;  %v5196_v53 = vadd.f32 1.0, %v5650_v57  ;;  %v5199_v42 = vadd.f32 1.0, %v5648_v37  ;;  %v15355_v20 = vld [vmem:[#allocation89_spill] sm:$0xff]  ;;  %v3449_v30 = vadd.f32 %v3417_v25, %v15357_v41  ;;  %v15358_v3 = vld [vmem:[#allocation72_spill] sm:$0xff]  ;;  %v12370_v15 = vpop.permute.xlu0 %4632  ;;  %5266 = vperm.xlu1 %5579, %v152_v62   ;;  %v15363_v25 = vld [vmem:[#allocation219_spill] sm:$0xff] }
 0xc26   :  { %15353 = vst [vmem:[#allocation365_spill] sm:$0xff] %v12348_v8  ;;  %v12361_v50 = vmul.f32 %v15355_v20, %v4661_v61  ;;  %v12365_v8 = vmul.f32 %v15358_v3, %v3766_v11  ;;  %v12368_v26 = vadd.f32 %v15342_v59, %v5000_v27  ;;  %v5652_v2 = vpop.eup %5651  ;;  %v15360_v18 = vld [vmem:[#allocation360_spill] sm:$0xff]  ;;  %v15361_v23 = vld [vmem:[#allocation321_spill] sm:$0xff]  ;;  %v5210_v37 = vmul.f32 0.5, %v5194_v24 }
 0xc27   :  { %v3319_v12 = vsel %vm576_vm1, %v15361_v23, %v15360_v18  ;;  %v5209_v20 = vmul.f32 0.5, %v5193_v14  ;;  %v5208_v57 = vmul.f32 0.5, %v5192_v17  ;;  %v15362_v61 = vld [vmem:[#allocation220_spill] sm:$0xff]  ;;  %v12382_v27 = vadd.f32 %v3641_v29, %v3449_v30  ;;  %v3513_v23 = vpop.permute.xlu1 %3512  ;;  %v15366_v17 = vld [vmem:[#allocation279_spill] sm:$0xff]  ;;  %v15367_v18 = vld [vmem:[#allocation217_spill] sm:$0xff] }
 0xc28   :  { %15356 = vst [vmem:[#allocation5_spill] sm:$0xff] %v12361_v50  ;;  %15359 = vst [vmem:[#allocation65_spill] sm:$0xff] %v12365_v8  ;;  %v12380_v11 = vsel %vm1336_vm5, %v15363_v25, %v15362_v61  ;;  %v12386_v41 = vadd.f32 %v15342_v59, %v12046_v32  ;;  %v5211_v3 = vmul.f32 0.5, %v5195_v54  ;;  %v5121_v8 = vmul.f32 %v5105_v40, %v12323_v6  ;;  %v15369_v25 = vld [vmem:[#allocation291_spill] sm:$0xff]  ;;  %v15371_v40 = vld [vmem:[#allocation85_spill] sm:$0xff] }
 0xc29   :  { %15364 = vst [vmem:[#allocation152_spill] sm:$0xff] %v12380_v11  ;;  %15365 = vst [vmem:[#allocation75_spill] sm:$0xff] %v12382_v27  ;;  %v5213_v62 = vmul.f32 0.5, %v5197_v49  ;;  %v5212_v24 = vmul.f32 0.5, %v5196_v53  ;;  %v5215_v14 = vmul.f32 0.5, %v5199_v42  ;;  %v12393_v50 = vsel %vm1146_vm4, %v15367_v18, %v15366_v17  ;;  %v12398_v30 = vpop.permute.xlu0 %3498 }
 0xc2a   :  { %15368 = vst [vmem:[#allocation93_spill] sm:$0xff] %v12393_v50  ;;  %v12396_v29 = vmul.f32 %v15369_v25, %v3319_v12  ;;  %v5198_v32 = vadd.f32 1.0, %v5652_v2  ;;  %v5104_v54 = vmul.f32 %v12368_v26, %v12368_v26  ;;  %v4332_v49 = vadd.f32 %v15371_v40, %v12231_v1  ;;  %v15374_v25 = vld [vmem:[#allocation185_spill] sm:$0xff]  ;;  %v15388_v50 = vld [vmem:[#allocation314_spill] sm:$0xff] }
 0xc2b   :  { %v12405_v53 = vmul.f32 %v5210_v37, %v11815_v10  ;;  %v12408_v42 = vmul.f32 %v5209_v20, %v11576_v47  ;;  %v12411_v61 = vmul.f32 %v5208_v57, %v11791_v19  ;;  %v12415_v12 = vadd.f32 %v15342_v59, %v12048_v5  ;;  %v3961_v37 = vpop.permute.xlu1 %3960  ;;  %v15378_v59 = vld [vmem:[#allocation190_spill] sm:$0xff]  ;;  %v15379_v40 = vld [vmem:[#allocation189_spill] sm:$0xff] }
 0xc2c   :  { %15370 = vst [vmem:[#allocation24_spill] sm:$0xff] %v12396_v29  ;;  %v5106_v2 = vmul.f32 %v12386_v41, %v12386_v41  ;;  %v3308_v1 = vsel %vm576_vm1, %v15374_v25, %v12138_v46  ;;  %v12424_v10 = vmul.f32 %v5211_v3, %v11826_v58  ;;  %v5137_v47 = vmul.f32 0.044715, %v5121_v8  ;;  %v15380_v3 = vld [vmem:[#allocation311_spill] sm:$0xff]  ;;  %v15382_v25 = vld [vmem:[#allocation176_spill] sm:$0xff] }
 0xc2d   :  { %15372 = vst [vmem:[#allocation57_spill] sm:$0xff] %v12405_v53  ;;  %15373 = vst [vmem:[#allocation96_spill] sm:$0xff] %v12411_v61  ;;  %v12427_v19 = vmul.f32 %v5213_v62, %v11973_v33  ;;  %v12430_v20 = vmul.f32 %v5212_v24, %v12034_v31  ;;  %v12433_v5 = vmul.f32 %v5215_v14, %v12002_v36  ;;  %v12443_v8 = vpop.permute.xlu0 %3946  ;;  %v12445_v33 = vmul.f32 0.5, %v5198_v32  ;;  %v15381_v36 = vld [vmem:[#allocation179_spill] sm:$0xff]  ;;  %v15394_v53 = vld [vmem:[#allocation226_spill] sm:$0xff] }
 0xc2e   :  { %15375 = vst [vmem:[#allocation117_spill] sm:$0xff] %v12424_v10  ;;  %v4204_v57 = vsel %vm1336_vm5, %v15378_v59, %v12194_v22  ;;  %v3532_v58 = vsel %vm766_vm2, %v15379_v40, %v12250_v0  ;;  %v5120_v31 = vmul.f32 %v5104_v54, %v12368_v26  ;;  %v3410_v62 = vmul.f32 %v15380_v3, %v3308_v1  ;;  %v15383_v54 = vld [vmem:[#allocation80_spill] sm:$0xff] }
 0xc2f   :  { %15376 = vst [vmem:[#allocation147_spill] sm:$0xff] %v12430_v20  ;;  %15377 = vst [vmem:[#allocation364_spill] sm:$0xff] %v12433_v5  ;;  %v4556_v24 = vadd.f32 %v15381_v36, %v4332_v49  ;;  %v3300_v14 = vsel %vm576_vm1, %v12138_v46, %v12256_v60  ;;  %v3324_v59 = vsel %vm576_vm1, %v12256_v60, %v15382_v25  ;;  %v15384_v46 = vld [vmem:[#allocation393_spill] sm:$0xff]  ;;  %v15385_v36 = vld [vmem:[#allocation224_spill] sm:$0xff]  ;;  %v12477_v17 = vpop.permute.xlu1 %4408 }
 0xc30   :  { %v5107_v32 = vmul.f32 %v12415_v12, %v12415_v12  ;;  %v5122_v40 = vmul.f32 %v5106_v2, %v12386_v41  ;;  %v12463_v1 = vadd.f32 %v15383_v54, %v12196_v7  ;;  %v4428_v49 = vsel %vm1526_vm6, %v15262_v34, %v12325_v63  ;;  %v15386_v25 = vld [vmem:[#allocation180_spill] sm:$0xff]  ;;  %v15391_v20 = vld [vmem:[#allocation163_spill] sm:$0xff] }
 0xc31   :  { %v4305_v3 = vmul.f32 %v15384_v46, %v4204_v57  ;;  %v3634_v18 = vmul.f32 %v15385_v36, %v3532_v58  ;;  %v3524_v60 = vsel %vm766_vm2, %v12250_v0, %v3513_v23  ;;  %v3548_v2 = vsel %vm766_vm2, %v3513_v23, %v15386_v25  ;;  %v15387_v7 = vld [vmem:[#allocation312_spill] sm:$0xff]  ;;  %v12481_v27 = vpop.permute.xlu0 %4394  ;;  %v15389_v58 = vld [vmem:[#allocation99_spill] sm:$0xff] }
 0xc32   :  { %v3408_v11 = vmul.f32 %v15387_v7, %v3324_v59  ;;  %v3411_v29 = vmul.f32 %v15388_v50, %v3300_v14  ;;  %v5153_v34 = vadd.f32 %v5137_v47, %v12323_v6  ;;  %v5136_v57 = vmul.f32 0.044715, %v5120_v31  ;;  %v15390_v36 = vld [vmem:[#allocation187_spill] sm:$0xff]  ;;  %v15393_v50 = vld [vmem:[#allocation225_spill] sm:$0xff]  ;;  %v15395_v31 = vld [vmem:[#allocation192_spill] sm:$0xff] }
 0xc33   :  { %v3442_v46 = vadd.f32 %v3410_v62, %v15389_v58  ;;  %v3756_v0 = vsel %vm956_vm3, %v15390_v36, %v12168_v13  ;;  %v4780_v23 = vadd.f32 %v15391_v20, %v4556_v24  ;;  %v15392_v25 = vld [vmem:[#allocation395_spill] sm:$0xff]  ;;  %v5123_v59 = vmul.f32 %v5107_v32, %v12415_v12  ;;  %v12499_v36 = vpop.permute.xlu1 %4856  ;;  %v15396_v24 = vld [vmem:[#allocation338_spill] sm:$0xff] }
 0xc34   :  { %v4529_v61 = vmul.f32 %v15392_v25, %v4428_v49  ;;  %v5138_v7 = vmul.f32 0.044715, %v5122_v40  ;;  %v3632_v14 = vmul.f32 %v15393_v50, %v3548_v2  ;;  %v3635_v5 = vmul.f32 %v15394_v53, %v3524_v60  ;;  %v15397_v40 = vld [vmem:[#allocation161_spill] sm:$0xff]  ;;  %v15398_v2 = vld [vmem:[#allocation47_spill] sm:$0xff]  ;;  %v15401_v50 = vld [vmem:[#allocation178_spill] sm:$0xff] }
 0xc35   :  { %v4337_v47 = vadd.f32 %v4305_v3, %v12031_v16  ;;  %v4652_v62 = vsel %vm1716_vm7, %v15395_v31, %v12225_v43  ;;  %v3666_v58 = vadd.f32 %v3634_v18, %v3442_v46  ;;  %v5109_v20 = vmul.f32 %v12463_v1, %v12463_v1  ;;  %v15399_v53 = vld [vmem:[#allocation191_spill] sm:$0xff]  ;;  %v12510_v3 = vpop.permute.xlu0 %4842  ;;  %v15400_v60 = vld [vmem:[#allocation269_spill] sm:$0xff] }
 0xc36   :  { %v3858_v32 = vmul.f32 %v15396_v24, %v3756_v0  ;;  %v3440_v49 = vadd.f32 %v3408_v11, %v15397_v40  ;;  %v3443_v25 = vadd.f32 %v3411_v29, %v15398_v2  ;;  %v3980_v16 = vsel %vm1146_vm4, %v15399_v53, %v12278_v21  ;;  %v15402_v0 = vld [vmem:[#allocation280_spill] sm:$0xff]  ;;  %v15403_v53 = vld [vmem:[#allocation182_spill] sm:$0xff] }
 0xc37   :  { %v5004_v18 = vadd.f32 %v15400_v60, %v4780_v23  ;;  %v3748_v46 = vsel %vm956_vm3, %v12168_v13, %v12286_v48  ;;  %v3772_v11 = vsel %vm956_vm3, %v12286_v48, %v15401_v50  ;;  %v4561_v29 = vadd.f32 %v4529_v61, %v4337_v47  ;;  %v12532_v48 = vpop.permute.xlu1 %3274  ;;  %v15404_v47 = vld [vmem:[#allocation251_spill] sm:$0xff] }
 0xc38   :  { %v4753_v31 = vmul.f32 %v15402_v0, %v4652_v62  ;;  %v4876_v24 = vsel %vm1906_vm8, %v15314_v52, %v12358_v28  ;;  %v3664_v40 = vadd.f32 %v3632_v14, %v3440_v49  ;;  %v3667_v23 = vadd.f32 %v3635_v5, %v3443_v25  ;;  %v15405_v50 = vld [vmem:[#allocation339_spill] sm:$0xff]  ;;  %v15406_v52 = vld [vmem:[#allocation340_spill] sm:$0xff]  ;;  %v15409_v49 = vld [vmem:[#allocation118_spill] sm:$0xff] }
 0xc39   :  { %v3890_v2 = vadd.f32 %v3858_v32, %v3666_v58  ;;  %v3972_v13 = vsel %vm1146_vm4, %v12278_v21, %v3961_v37  ;;  %v3996_v60 = vsel %vm1146_vm4, %v3961_v37, %v15403_v53  ;;  %v5125_v61 = vmul.f32 %v5109_v20, %v12463_v1  ;;  %v12542_v21 = vpop.permute.xlu0 %3514  ;;  %v15408_v37 = vld [vmem:[#allocation181_spill] sm:$0xff] }
 0xc3a   :  { %v4082_v62 = vmul.f32 %v15404_v47, %v3980_v16  ;;  %v3856_v0 = vmul.f32 %v15405_v50, %v3772_v11  ;;  %v3859_v14 = vmul.f32 %v15406_v52, %v3748_v46  ;;  %v4196_v5 = vsel %vm1336_vm5, %v12194_v22, %v12336_v51  ;;  %v15410_v11 = vld [vmem:[#allocation252_spill] sm:$0xff]  ;;  %v15411_v47 = vld [vmem:[#allocation253_spill] sm:$0xff] }
 0xc3b   :  { %v12545_v58 = vadd.f32 %v15383_v54, %v5004_v18  ;;  %v4220_v20 = vsel %vm1336_vm5, %v12336_v51, %v15408_v37  ;;  %v4785_v32 = vadd.f32 %v4753_v31, %v4561_v29  ;;  %v4977_v25 = vmul.f32 %v15409_v49, %v4876_v24  ;;  %v15413_v18 = vld [vmem:[#allocation394_spill] sm:$0xff]  ;;  %v12559_v6 = vpop.permute.xlu1 %3722  ;;  %v15419_v49 = vld [vmem:[#allocation281_spill] sm:$0xff] }
 0xc3c   :  { %v3888_v16 = vadd.f32 %v3856_v0, %v3664_v40  ;;  %v3891_v46 = vadd.f32 %v3859_v14, %v3667_v23  ;;  %v4080_v53 = vmul.f32 %v15410_v11, %v3996_v60  ;;  %v4083_v50 = vmul.f32 %v15411_v47, %v3972_v13  ;;  %v15415_v23 = vld [vmem:[#allocation396_spill] sm:$0xff]  ;;  %v15416_v0 = vld [vmem:[#allocation183_spill] sm:$0xff]  ;;  %v15422_v11 = vld [vmem:[#allocation169_spill] sm:$0xff] }
 0xc3d   :  { %15407 = vst [vmem:[#allocation97_spill] sm:$0xff] %v12545_v58  ;;  %v12556_v22 = vadd.f32 %v15383_v54, %v12308_v38  ;;  %v4306_v52 = vmul.f32 %v15413_v18, %v4196_v5  ;;  %v12561_v10 = vmul.f32 0.7978846, %v5153_v34  ;;  %v12564_v51 = vadd.f32 %v5136_v57, %v12368_v26  ;;  %v12575_v40 = vpop.permute.xlu0 %3962  ;;  %v15417_v5 = vld [vmem:[#allocation296_spill] sm:$0xff] }
 0xc3e   :  { %v12566_v29 = vmul.f32 0.044715, %v5123_v59  ;;  %v12569_v31 = vadd.f32 %v5138_v7, %v12386_v41  ;;  %v12573_v24 = vadd.f32 %v15383_v54, %v12300_v35  ;;  %v4114_v38 = vadd.f32 %v4082_v62, %v3890_v2 }
 0xc3f   :  { %15412 = vst [vmem:[#allocation111_spill] sm:$0xff] %v12556_v22  ;;  %v4307_v13 = vmul.f32 %v15415_v23, %v4220_v20  ;;  %v5009_v60 = vadd.f32 %v4977_v25, %v4785_v32  ;;  %v3309_v34 = vsel %vm576_vm1, %v15270_v39, %v12532_v48  ;;  %v12582_v57 = vmul.f32 0.044715, %v5125_v61  ;;  %v12600_v61 = vpop.permute.xlu1 %4170  ;;  %v15418_v20 = vld [vmem:[#allocation58_spill] sm:$0xff] }
 0xc40   :  { %15414 = vst [vmem:[#allocation54_spill] sm:$0xff] %v12573_v24  ;;  %v4644_v59 = vsel %vm1716_vm7, %v12225_v43, %v12370_v15  ;;  %v4112_v35 = vadd.f32 %v4080_v53, %v3888_v16  ;;  %v4115_v54 = vadd.f32 %v4083_v50, %v3891_v46  ;;  %v12590_v7 = vmul.f32 %v12545_v58, %v12545_v58  ;;  %v15421_v46 = vld [vmem:[#allocation260_spill] sm:$0xff]  ;;  %v15423_v50 = vld [vmem:[#allocation397_spill] sm:$0xff] }
 0xc41   :  { %v4338_v2 = vadd.f32 %v4306_v52, %v4114_v38  ;;  %v4420_v62 = vsel %vm1526_vm6, %v12325_v63, %v12477_v17  ;;  %v4444_v39 = vsel %vm1526_vm6, %v12477_v17, %v15263_v56  ;;  %v12604_v43 = vmul.f32 %v12556_v22, %v12556_v22  ;;  %v12619_v17 = vpop.permute.xlu0 %4410  ;;  %v15424_v52 = vld [vmem:[#allocation398_spill] sm:$0xff] }
 0xc42   :  { %v4668_v14 = vsel %vm1716_vm7, %v12370_v15, %v15416_v0  ;;  %v4429_v63 = vsel %vm1526_vm6, %v15323_v9, %v12481_v27  ;;  %v3414_v37 = vmul.f32 %v15417_v5, %v3309_v34  ;;  %v4205_v56 = vsel %vm1336_vm5, %v15338_v55, %v12600_v61  ;;  %v15420_v15 = vld [vmem:[#allocation203_spill] sm:$0xff]  ;;  %v15425_v38 = vld [vmem:[#allocation282_spill] sm:$0xff] }
 0xc43   :  { %v5081_v32 = vadd.f32 %v15418_v20, %v5009_v60  ;;  %v4754_v25 = vmul.f32 %v15419_v49, %v4644_v59  ;;  %v3533_v16 = vsel %vm766_vm2, %v15420_v15, %v12398_v30  ;;  %v4309_v9 = vmul.f32 %v15421_v46, %v4205_v56  ;;  %v15426_v34 = vld [vmem:[#allocation399_spill] sm:$0xff]  ;;  %v12640_v5 = vpop.permute.xlu1 %4618  ;;  %v15430_v56 = vld [vmem:[#allocation213_spill] sm:$0xff] }
 0xc44   :  { %v4336_v53 = vadd.f32 %v15422_v11, %v4112_v35  ;;  %v4339_v47 = vadd.f32 %v4307_v13, %v4115_v54  ;;  %v4530_v18 = vmul.f32 %v15423_v50, %v4420_v62  ;;  %v4531_v55 = vmul.f32 %v15424_v52, %v4444_v39  ;;  %v15427_v35 = vld [vmem:[#allocation326_spill] sm:$0xff]  ;;  %v15429_v39 = vld [vmem:[#allocation188_spill] sm:$0xff] }
 0xc45   :  { %v12632_v23 = vmul.f32 %v15425_v38, %v4668_v14  ;;  %v3981_v60 = vsel %vm1146_vm4, %v15320_v45, %v12443_v8  ;;  %v4533_v59 = vmul.f32 %v15426_v34, %v4429_v63  ;;  %v4341_v0 = vadd.f32 %v4309_v9, %v12354_v4  ;;  %v15428_v54 = vld [vmem:[#allocation210_spill] sm:$0xff]  ;;  %v12652_v49 = vpop.permute.xlu0 %4858  ;;  %v15431_v4 = vld [vmem:[#allocation209_spill] sm:$0xff] }
 0xc46   :  { %v3638_v13 = vmul.f32 %v15427_v35, %v3533_v16  ;;  %v4877_v62 = vsel %vm1906_vm8, %v15428_v54, %v12510_v3  ;;  %v3446_v14 = vadd.f32 %v3414_v37, %v15429_v39  ;;  %v4653_v45 = vsel %vm1716_vm7, %v15430_v56, %v12640_v5  ;;  %v15432_v16 = vld [vmem:[#allocation402_spill] sm:$0xff]  ;;  %v15434_v37 = vld [vmem:[#allocation355_spill] sm:$0xff] }
 0xc47   :  { %v3757_v63 = vsel %vm956_vm3, %v15431_v4, %v12559_v6  ;;  %v4565_v15 = vadd.f32 %v4533_v59, %v4341_v0  ;;  %v4757_v46 = vmul.f32 %v15432_v16, %v4653_v45  ;;  %v5241_v9 = vmul.f32 %v12408_v42, %v5081_v32  ;;  %v15433_v11 = vld [vmem:[#allocation86_spill] sm:$0xff]  ;;  %v3291_v42 = vpop.permute.xlu1 %3290  ;;  %v15443_v16 = vld [vmem:[#allocation328_spill] sm:$0xff] }
 0xc48   :  { %v4560_v50 = vadd.f32 %v15433_v11, %v4336_v53  ;;  %v4086_v52 = vmul.f32 %v15434_v37, %v3981_v60  ;;  %v4562_v38 = vadd.f32 %v4530_v18, %v4338_v2  ;;  %v4563_v34 = vadd.f32 %v4531_v55, %v4339_v47  ;;  %v15435_v35 = vld [vmem:[#allocation410_spill] sm:$0xff]  ;;  %v15437_v53 = vld [vmem:[#allocation237_spill] sm:$0xff] }
 0xc49   :  { %v4981_v54 = vmul.f32 %v15435_v35, %v4877_v62  ;;  %v3525_v39 = vsel %vm766_vm2, %v12398_v30, %v12542_v21  ;;  %v15436_v56 = vld [vmem:[#allocation194_spill] sm:$0xff]  ;;  %v4789_v0 = vadd.f32 %v4757_v46, %v4565_v15  ;;  %v3670_v32 = vadd.f32 %v3638_v13, %v3446_v14  ;;  %v12678_v55 = vpop.permute.xlu0 %3276  ;;  %v15439_v60 = vld [vmem:[#allocation297_spill] sm:$0xff] }
 0xc4a   :  { %v3549_v59 = vsel %vm766_vm2, %v12542_v21, %v15436_v56  ;;  %v3862_v45 = vmul.f32 %v15437_v53, %v3757_v63  ;;  %v3301_v2 = vsel %vm576_vm1, %v12532_v48, %v3291_v42  ;;  %v15438_v47 = vld [vmem:[#allocation198_spill] sm:$0xff]  ;;  %v4868_v30 = vsel %vm1906_vm8, %v12358_v28, %v12499_v36  ;;  %v15442_v63 = vld [vmem:[#allocation327_spill] sm:$0xff]  ;;  %v15444_v28 = vld [vmem:[#allocation196_spill] sm:$0xff] }
 0xc4b   :  { %v3325_v18 = vsel %vm576_vm1, %v3291_v42, %v15438_v47  ;;  %v5013_v21 = vadd.f32 %v4981_v54, %v4789_v0  ;;  %v15440_v62 = vld [vmem:[#allocation298_spill] sm:$0xff]  ;;  %v3636_v15 = vmul.f32 %v15442_v63, %v3549_v59  ;;  %v3639_v46 = vmul.f32 %v15443_v16, %v3525_v39  ;;  %v15445_v35 = vld [vmem:[#allocation153_spill] sm:$0xff]  ;;  %v15446_v56 = vld [vmem:[#allocation79_spill] sm:$0xff]  ;;  %v3739_v42 = vpop.permute.xlu1 %3738 }
 0xc4c   :  { %v3412_v13 = vmul.f32 %v15439_v60, %v3325_v18  ;;  %v3415_v14 = vmul.f32 %v15440_v62, %v3301_v2  ;;  %v15441_v4 = vld [vmem:[#allocation186_spill] sm:$0xff]  ;;  %v3973_v11 = vsel %vm1146_vm4, %v12443_v8, %v12575_v40  ;;  %v3997_v37 = vsel %vm1146_vm4, %v12575_v40, %v15444_v28  ;;  %v15449_v8 = vld [vmem:[#allocation200_spill] sm:$0xff] }
 0xc4d   :  { %v4892_v48 = vsel %vm1906_vm8, %v12499_v36, %v15441_v4  ;;  %v15447_v36 = vld [vmem:[#allocation50_spill] sm:$0xff]  ;;  %v3894_v39 = vadd.f32 %v3862_v45, %v3670_v32  ;;  %v3749_v47 = vsel %vm956_vm3, %v12559_v6, %v3739_v42  ;;  %v3773_v18 = vsel %vm956_vm3, %v3739_v42, %v15449_v8  ;;  %v12710_v60 = vpop.permute.xlu0 %3724  ;;  %v15451_v4 = vld [vmem:[#allocation239_spill] sm:$0xff]  ;;  %v15452_v16 = vld [vmem:[#allocation356_spill] sm:$0xff] }
 0xc4e   :  { %v3444_v54 = vadd.f32 %v3412_v13, %v15445_v35  ;;  %v3447_v0 = vadd.f32 %v3415_v14, %v15446_v56  ;;  %v5085_v53 = vadd.f32 %v15447_v36, %v5013_v21  ;;  %v15448_v59 = vld [vmem:[#allocation134_spill] sm:$0xff]  ;;  %v3863_v63 = vmul.f32 %v15451_v4, %v3749_v47  ;;  %v15453_v32 = vld [vmem:[#allocation357_spill] sm:$0xff]  ;;  %v15454_v35 = vld [vmem:[#allocation199_spill] sm:$0xff] }
 0xc4f   :  { %v4784_v2 = vadd.f32 %v15448_v59, %v4560_v50  ;;  %v15450_v62 = vld [vmem:[#allocation238_spill] sm:$0xff]  ;;  %v4786_v21 = vadd.f32 %v4754_v25, %v4562_v38  ;;  %v4084_v50 = vmul.f32 %v15452_v16, %v3997_v37  ;;  %v4087_v45 = vmul.f32 %v15453_v32, %v3973_v11  ;;  %v4187_v56 = vpop.permute.xlu1 %4186  ;;  %v15462_v4 = vld [vmem:[#allocation365_spill] sm:$0xff] }
 0xc50   :  { %v3668_v40 = vadd.f32 %v3636_v15, %v3444_v54  ;;  %v3671_v13 = vadd.f32 %v3639_v46, %v3447_v0  ;;  %v3860_v14 = vmul.f32 %v15450_v62, %v3773_v18  ;;  %v5245_v28 = vmul.f32 %v12427_v19, %v5085_v53  ;;  %v15455_v11 = vld [vmem:[#allocation202_spill] sm:$0xff]  ;;  %v15456_v53 = vld [vmem:[#allocation261_spill] sm:$0xff] }
 0xc51   :  { %v4421_v6 = vsel %vm1526_vm6, %v12481_v27, %v12619_v17  ;;  %v4445_v15 = vsel %vm1526_vm6, %v12619_v17, %v15454_v35  ;;  %v4118_v25 = vadd.f32 %v4086_v52, %v3894_v39  ;;  %v4197_v38 = vsel %vm1336_vm5, %v12600_v61, %v4187_v56  ;;  %v12731_v37 = vpop.permute.xlu0 %4172  ;;  %v15457_v17 = vld [vmem:[#allocation263_spill] sm:$0xff]  ;;  %v15459_v18 = vld [vmem:[#allocation409_spill] sm:$0xff]  ;;  %v15460_v61 = vld [vmem:[#allocation400_spill] sm:$0xff] }
 0xc52   :  { %v3892_v46 = vadd.f32 %v3860_v14, %v3668_v40  ;;  %v3895_v54 = vadd.f32 %v3863_v63, %v3671_v13  ;;  %v4221_v19 = vsel %vm1336_vm5, %v4187_v56, %v15455_v11  ;;  %v5257_v27 = vpack.c.bf16 %v5245_v28, %v5241_v9  ;;  %v15458_v52 = vld [vmem:[#allocation135_spill] sm:$0xff]  ;;  %v15461_v62 = vld [vmem:[#allocation401_spill] sm:$0xff] }
 0xc53   :  { %v4310_v59 = vmul.f32 %v15456_v53, %v4197_v38  ;;  %v4311_v47 = vmul.f32 %v15457_v17, %v4221_v19  ;;  %v4787_v8 = vadd.f32 %v12632_v23, %v4563_v34  ;;  %v4978_v39 = vmul.f32 %v15458_v52, %v4868_v30  ;;  %v15463_v30 = vld [vmem:[#allocation204_spill] sm:$0xff]  ;;  %v15464_v28 = vld [vmem:[#allocation201_spill] sm:$0xff]  ;;  %v15465_v35 = vld [vmem:[#allocation43_spill] sm:$0xff] }
 0xc54   :  { %v4116_v0 = vadd.f32 %v4084_v50, %v3892_v46  ;;  %v4119_v42 = vadd.f32 %v4087_v45, %v3895_v54  ;;  %v4979_v40 = vmul.f32 %v15459_v18, %v4892_v48  ;;  %v4534_v13 = vmul.f32 %v15460_v61, %v4421_v6  ;;  %5283 = vmatprep.subr.bf16.mxu0 %v5257_v27  ;;  %v4635_v50 = vpop.permute.xlu1 %4634  ;;  %v15466_v56 = vld [vmem:[#allocation403_spill] sm:$0xff]  ;;  %v15467_v38 = vld [vmem:[#allocation404_spill] sm:$0xff] }
 0xc55   :  { %v4535_v14 = vmul.f32 %v15461_v62, %v4445_v15  ;;  %v4342_v9 = vadd.f32 %v4310_v59, %v4118_v25  ;;  %v5110_v32 = vmul.f32 %v12573_v24, %v12573_v24  ;;  %v4869_v23 = vsel %vm1906_vm8, %v12510_v3, %v12652_v49  ;;  %v12753_v45 = vpop.permute.xlu0 %3292  ;;  %v15468_v19 = vld [vmem:[#allocation171_spill] sm:$0xff] }
 0xc56   :  { %v4340_v63 = vadd.f32 %v15462_v4, %v4116_v0  ;;  %v4343_v16 = vadd.f32 %v4311_v47, %v4119_v42  ;;  %v4645_v34 = vsel %vm1716_vm7, %v12640_v5, %v4635_v50  ;;  %v4669_v48 = vsel %vm1716_vm7, %v4635_v50, %v15463_v30  ;;  %v15469_v42 = vld [vmem:[#allocation5_spill] sm:$0xff]  ;;  %v15470_v17 = vld [vmem:[#allocation411_spill] sm:$0xff] }
 0xc57   :  { %v4893_v6 = vsel %vm1906_vm8, %v12652_v49, %v15464_v28  ;;  %v4566_v46 = vadd.f32 %v4534_v13, %v4342_v9  ;;  %v5011_v3 = vadd.f32 %v4979_v40, %v4787_v8  ;;  %v4758_v25 = vmul.f32 %v15466_v56, %v4645_v34  ;;  %v15471_v8 = vld [vmem:[#allocation412_spill] sm:$0xff]  ;;  %v15473_v34 = vld [vmem:[#allocation170_spill] sm:$0xff] }
 0xc58   :  { %v4564_v15 = vadd.f32 %v15465_v35, %v4340_v63  ;;  %v4567_v54 = vadd.f32 %v4535_v14, %v4343_v16  ;;  %v4759_v5 = vmul.f32 %v15467_v38, %v4669_v48  ;;  %v5124_v11 = vmul.f32 %v12590_v7, %v12545_v58  ;;  %v12766_v59 = vpop.permute.xlu1 %3500  ;;  %v15472_v63 = vld [vmem:[#allocation90_spill] sm:$0xff]  ;;  %v15474_v35 = vld [vmem:[#allocation117_spill] sm:$0xff] }
 0xc59   :  { %v5008_v27 = vadd.f32 %v15468_v19, %v4784_v2  ;;  %v5010_v0 = vadd.f32 %v4978_v39, %v4786_v21  ;;  %v5127_v49 = vmul.f32 %v12604_v43, %v12556_v22  ;;  %v4982_v47 = vmul.f32 %v15470_v17, %v4869_v23  ;;  %v12772_v61 = vpop.permute.xlu0 %3740  ;;  %v15478_v19 = vld [vmem:[#allocation147_spill] sm:$0xff]  ;;  %v15482_v17 = vld [vmem:[#allocation232_spill] sm:$0xff] }
 0xc5a   :  { %v4788_v53 = vadd.f32 %v15469_v42, %v4564_v15  ;;  %v4983_v52 = vmul.f32 %v15471_v8, %v4893_v6  ;;  %v4790_v18 = vadd.f32 %v4758_v25, %v4566_v46  ;;  %v4791_v40 = vadd.f32 %v4759_v5, %v4567_v54  ;;  %v15475_v15 = vld [vmem:[#allocation364_spill] sm:$0xff]  ;;  %v15480_v42 = vld [vmem:[#allocation65_spill] sm:$0xff] }
 0xc5b   :  { %v5170_v7 = vmul.f32 0.7978846, %v12569_v31  ;;  %v5157_v2 = vadd.f32 %v12582_v57, %v12463_v1  ;;  %5653 = vtanh.f32 %v12561_v10  ;;  %v5155_v21 = vadd.f32 %v12566_v29, %v12415_v12 }
 0xc5c   :  { %v5083_v43 = vadd.f32 %v15418_v20, %v5011_v3  ;;  %v5014_v39 = vadd.f32 %v4982_v47, %v4790_v18  ;;  %v5015_v13 = vadd.f32 %v4983_v52, %v4791_v40  ;;  %v5140_v62 = vmul.f32 0.044715, %v5124_v11  ;;  %v12782_v4 = vpop.permute.xlu1 %3948  ;;  %v15476_v3 = vld [vmem:[#allocation57_spill] sm:$0xff]  ;;  %v15484_v18 = vld [vmem:[#allocation24_spill] sm:$0xff] }
 0xc5d   :  { %v5082_v14 = vadd.f32 %v15418_v20, %v5010_v0  ;;  %v5012_v9 = vadd.f32 %v15472_v63, %v4788_v53  ;;  %v5143_v31 = vmul.f32 0.044715, %v5127_v49  ;;  %v5126_v16 = vmul.f32 %v5110_v32, %v12573_v24  ;;  %v12787_v10 = vpop.permute.xlu0 %4188  ;;  %v15479_v0 = vld [vmem:[#allocation75_spill] sm:$0xff]  ;;  %v15481_v49 = vld [vmem:[#allocation292_spill] sm:$0xff]  ;;  %v15483_v52 = vld [vmem:[#allocation9_spill] sm:$0xff] }
 0xc5e   :  { %v5086_v57 = vadd.f32 %v15447_v36, %v5014_v39  ;;  %v5080_v29 = vadd.f32 %v15418_v20, %v5008_v27  ;;  %v5087_v50 = vadd.f32 %v15447_v36, %v5015_v13  ;;  %v5168_v23 = vmul.f32 0.7978846, %v12564_v51  ;;  %v15486_v39 = vld [vmem:[#allocation246_spill] sm:$0xff] }
 0xc5f   :  { %5655 = vtanh.f32 %v5170_v7  ;;  %v5230_v30 = vmul.f32 %v12445_v33, %v15473_v34  ;;  %v5173_v48 = vmul.f32 0.7978846, %v5157_v2  ;;  %v5171_v28 = vmul.f32 0.7978846, %v5155_v21  ;;  %v15477_v33 = vld [vmem:[#allocation96_spill] sm:$0xff] }
 0xc60   :  { %v5084_v6 = vadd.f32 %v15447_v36, %v5012_v9  ;;  %v5243_v32 = vmul.f32 %v15474_v35, %v5083_v43  ;;  %v5247_v46 = vmul.f32 %v15475_v15, %v5087_v50  ;;  %v5156_v54 = vadd.f32 %v5140_v62, %v12545_v58  ;;  %v12799_v56 = vpop.permute.xlu1 %4396  ;;  %v15485_v43 = vld [vmem:[#allocation93_spill] sm:$0xff]  ;;  %v15487_v62 = vld [vmem:[#allocation374_spill] sm:$0xff]  ;;  %v15496_v15 = vld [vmem:[#allocation152_spill] sm:$0xff] }
 0xc61   :  { %v5242_v20 = vmul.f32 %v15476_v3, %v5082_v14  ;;  %v5246_v25 = vmul.f32 %v5230_v30, %v5086_v57  ;;  %v5159_v51 = vadd.f32 %v5143_v31, %v12556_v22  ;;  %v5142_v38 = vmul.f32 0.044715, %v5126_v16  ;;  %v12802_v5 = vpop.permute.xlu0 %3502  ;;  %v15488_v14 = vld [vmem:[#allocation331_spill] sm:$0xff]  ;;  %v15489_v57 = vld [vmem:[#allocation290_spill] sm:$0xff]  ;;  %v15494_v35 = vld [vmem:[#allocation105_spill] sm:$0xff] }
 0xc62   :  { %v5240_v11 = vmul.f32 %v15477_v33, %v5080_v29  ;;  %v5244_v36 = vmul.f32 %v15478_v19, %v5084_v6  ;;  %v5259_v27 = vpack.c.bf16 %v5247_v46, %v5243_v32  ;;  %5657 = vtanh.f32 %v5168_v23  ;;  %v15490_v29 = vld [vmem:[#allocation229_spill] sm:$0xff]  ;;  %v15491_v23 = vld [vmem:[#allocation106_spill] sm:$0xff]  ;;  %v15497_v46 = vld [vmem:[#allocation256_spill] sm:$0xff] }
 0xc63   :  { %v3897_v53 = vadd.f32 %v15480_v42, %v15479_v0  ;;  %v3543_v47 = vsel %vm766_vm2, %v15482_v17, %v15481_v49  ;;  %v5258_v8 = vpack.c.bf16 %v5246_v25, %v5242_v20  ;;  %5659 = vtanh.f32 %v5171_v28  ;;  %v15493_v28 = vld [vmem:[#allocation109_spill] sm:$0xff]  ;;  %v15498_v3 = vld [vmem:[#allocation95_spill] sm:$0xff]  ;;  %v15505_v0 = vld [vmem:[#allocation262_spill] sm:$0xff] }
 0xc64   :  { %v3453_v40 = vadd.f32 %v15484_v18, %v15483_v52  ;;  %v5256_v7 = vpack.c.bf16 %v5244_v36, %v5240_v11  ;;  %5326 = vmatprep.subr.bf16.mxu1 %v5259_v27  ;;  %5661 = vtanh.f32 %v5173_v48  ;;  %v5172_v2 = vmul.f32 0.7978846, %v5156_v54  ;;  %v12820_v9 = vpop.permute.xlu1 %4620  ;;  %v15492_v48 = vld [vmem:[#allocation197_spill] sm:$0xff]  ;;  %v15504_v27 = vld [vmem:[#allocation94_spill] sm:$0xff]  ;;  %v15523_v22 = vld [vmem:[#allocation160_spill] sm:$0xff] }
 0xc65   :  { %v5654_v21 = vpop.eup %5653  ;;  %v4089_v13 = vmul.f32 %v15486_v39, %v15485_v43  ;;  %v3767_v63 = vsel %vm956_vm3, %v15488_v14, %v15487_v62  ;;  %5327 = vmatpush1.bf16.msra.mxu1 %v5258_v8  ;;  %v5175_v31 = vmul.f32 0.7978846, %v5159_v51  ;;  %v5158_v16 = vadd.f32 %v5142_v38, %v12573_v24  ;;  %v12828_v30 = vpop.permute.xlu0 %3950  ;;  %v15499_v20 = vld [vmem:[#allocation245_spill] sm:$0xff]  ;;  %v15500_v51 = vld [vmem:[#allocation92_spill] sm:$0xff]  ;;  %v15506_v8 = vld [vmem:[#allocation231_spill] sm:$0xff] }
 0xc66   :  { %v4438_v50 = vsel %vm1526_vm6, %v15490_v29, %v15489_v57  ;;  %v3645_v34 = vmul.f32 %v15491_v23, %v3543_v47  ;;  %5284 = vmatpush1.bf16.msra.mxu0 %v5256_v7  ;;  %v12832_v6 = vmul.f32 %v15493_v28, %v15492_v48  ;;  %v12836_v32 = vmul.f32 %v15493_v28, %v15494_v35  ;;  %v15501_v38 = vld [vmem:[#allocation248_spill] sm:$0xff]  ;;  %v15502_v11 = vld [vmem:[#allocation313_spill] sm:$0xff]  ;;  %v15509_v28 = vld [vmem:[#allocation107_spill] sm:$0xff] }
 0xc67   :  { %v12840_v54 = vmul.f32 %v15497_v46, %v15496_v15  ;;  %v4662_v25 = vsel %vm1716_vm7, %v15499_v20, %v15498_v3  ;;  %v3991_v33 = vsel %vm1146_vm4, %v15501_v38, %v15500_v51  ;;  %v15503_v19 = vld [vmem:[#allocation257_spill] sm:$0xff]  ;;  %v4439_v42 = vsel %vm1526_vm6, %v15505_v0, %v15504_v27  ;;  %v15511_v15 = vld [vmem:[#allocation344_spill] sm:$0xff] }
 0xc68   :  { %15495 = vst [vmem:[#allocation155_spill] sm:$0xff] %v12836_v32  ;;  %v4886_v36 = vsel %vm1906_vm8, %v15503_v19, %v15502_v11  ;;  %v3677_v47 = vadd.f32 %v3645_v34, %v3453_v40  ;;  %v3869_v52 = vmul.f32 %v15506_v8, %v3767_v63  ;;  %5663 = vtanh.f32 %v5172_v2  ;;  %v15507_v43 = vld [vmem:[#allocation69_spill] sm:$0xff]  ;;  %v3517_v23 = vpop.permute.xlu1 %3516  ;;  %v15512_v24 = vld [vmem:[#allocation216_spill] sm:$0xff]  ;;  %v15525_v19 = vld [vmem:[#allocation315_spill] sm:$0xff] }
 0xc69   :  { %v5656_v18 = vpop.eup %5655  ;;  %v12859_v7 = vadd.f32 %v4089_v13, %v3897_v53  ;;  %v12862_v39 = vmul.f32 %v15507_v43, %v4438_v50  ;;  %5665 = vtanh.f32 %v5175_v31  ;;  %v5174_v48 = vmul.f32 0.7978846, %v5158_v16  ;;  %v12872_v2 = vpop.permute.xlu0 %4398  ;;  %v15513_v13 = vld [vmem:[#allocation60_spill] sm:$0xff]  ;;  %v15515_v50 = vld [vmem:[#allocation270_spill] sm:$0xff]  ;;  %v15517_v31 = vld [vmem:[#allocation325_spill] sm:$0xff] }
 0xc6a   :  { %v12865_v35 = vmul.f32 %v15509_v28, %v4662_v25  ;;  %v4093_v46 = vmul.f32 %v15511_v15, %v3991_v33  ;;  %v3310_v40 = vsel %vm576_vm1, %v15512_v24, %v12678_v55  ;;  %v5201_v53 = vadd.f32 1.0, %v5654_v21  ;;  %v15518_v16 = vld [vmem:[#allocation53_spill] sm:$0xff]  ;;  %v15519_v33 = vld [vmem:[#allocation212_spill] sm:$0xff] }
 0xc6b   :  { %15508 = vst [vmem:[#allocation347_spill] sm:$0xff] %v12862_v39  ;;  %v12875_v63 = vmul.f32 %v15513_v13, %v4886_v36  ;;  %v12878_v34 = vmul.f32 %v15515_v50, %v4439_v42  ;;  %v4663_v25 = vsel %vm1716_vm7, %v15518_v16, %v15517_v31  ;;  %v3326_v8 = vsel %vm576_vm1, %v12753_v45, %v15519_v33  ;;  %v15520_v43 = vld [vmem:[#allocation336_spill] sm:$0xff]  ;;  %v15524_v33 = vld [vmem:[#allocation345_spill] sm:$0xff] }
 0xc6c   :  { %15510 = vst [vmem:[#allocation174_spill] sm:$0xff] %v12865_v35  ;;  %v5658_v24 = vpop.eup %5657  ;;  %v15521_v28 = vld [vmem:[#allocation284_spill] sm:$0xff]  ;;  %v3901_v36 = vadd.f32 %v3869_v52, %v3677_v47  ;;  %v3302_v42 = vsel %vm576_vm1, %v12678_v55, %v12753_v45  ;;  %v4215_v58 = vsel %vm1336_vm5, %v15524_v33, %v15523_v22  ;;  %v3965_v52 = vpop.permute.xlu1 %3964  ;;  %5667 = vtanh.f32 %v5174_v48  ;;  %v15528_v33 = vld [vmem:[#allocation37_spill] sm:$0xff]  ;;  %v15531_v48 = vld [vmem:[#allocation87_spill] sm:$0xff] }
 0xc6d   :  { %15514 = vst [vmem:[#allocation405_spill] sm:$0xff] %v12875_v63  ;;  %15516 = vst [vmem:[#allocation77_spill] sm:$0xff] %v12878_v34  ;;  %v4887_v21 = vsel %vm1906_vm8, %v15521_v28, %v15520_v43  ;;  %v15522_v15 = vld [vmem:[#allocation272_spill] sm:$0xff]  ;;  %v5660_v50 = vpop.eup %5659  ;;  %v3418_v63 = vmul.f32 %v15525_v19, %v3310_v40  ;;  %v15526_v34 = vld [vmem:[#allocation215_spill] sm:$0xff]  ;;  %v12912_v28 = vpop.permute.xlu0 %4622  ;;  %v5202_v16 = vadd.f32 1.0, %v5656_v18  ;;  %v5217_v0 = vmul.f32 0.5, %v5201_v53 }
 0xc6e   :  { %v3534_v13 = vsel %vm766_vm2, %v15522_v15, %v12766_v59  ;;  %v3550_v47 = vsel %vm766_vm2, %v3517_v23, %v15526_v34  ;;  %v5662_v55 = vpop.eup %5661  ;;  %v15527_v45 = vld [vmem:[#allocation316_spill] sm:$0xff]  ;;  %v3526_v15 = vsel %vm766_vm2, %v12766_v59, %v3517_v23  ;;  %v12915_v14 = vmul.f32 %v15528_v33, %v4663_v25  ;;  %v15529_v19 = vld [vmem:[#allocation317_spill] sm:$0xff]  ;;  %v15534_v35 = vld [vmem:[#allocation206_spill] sm:$0xff] }
 0xc6f   :  { %v3416_v11 = vmul.f32 %v15527_v45, %v3326_v8  ;;  %v3419_v40 = vmul.f32 %v15529_v19, %v3302_v42  ;;  %v15530_v32 = vld [vmem:[#allocation228_spill] sm:$0xff]  ;;  %v5200_v43 = vadd.f32 1.0, %v5658_v24  ;;  %v12920_v38 = vmul.f32 %v15531_v48, %v4887_v21  ;;  %v15535_v53 = vld [vmem:[#allocation241_spill] sm:$0xff]  ;;  %v15537_v21 = vld [vmem:[#allocation70_spill] sm:$0xff] }
 0xc70   :  { %v3642_v34 = vmul.f32 %v15530_v32, %v3534_v13  ;;  %v15532_v8 = vld [vmem:[#allocation64_spill] sm:$0xff]  ;;  %v5203_v23 = vadd.f32 1.0, %v5660_v50  ;;  %v3450_v18 = vadd.f32 %v3418_v63, %v15534_v35  ;;  %v3643_v39 = vmul.f32 %v15535_v53, %v3526_v15  ;;  %v4413_v25 = vpop.permute.xlu1 %4412  ;;  %v15536_v32 = vld [vmem:[#allocation218_spill] sm:$0xff]  ;;  %v15540_v63 = vld [vmem:[#allocation141_spill] sm:$0xff] }
 0xc71   :  { %v12923_v45 = vmul.f32 %v15532_v8, %v4215_v58  ;;  %v15533_v20 = vld [vmem:[#allocation240_spill] sm:$0xff]  ;;  %v12928_v33 = vadd.f32 %v4093_v46, %v3901_v36  ;;  %v5205_v42 = vadd.f32 1.0, %v5662_v55  ;;  %v3758_v24 = vsel %vm956_vm3, %v15536_v32, %v12710_v60  ;;  %v12935_v13 = vpop.permute.xlu0 %3518  ;;  %v15538_v50 = vld [vmem:[#allocation6_spill] sm:$0xff]  ;;  %v15544_v32 = vld [vmem:[#allocation217_spill] sm:$0xff] }
 0xc72   :  { %v3640_v59 = vmul.f32 %v15533_v20, %v3550_v47  ;;  %v5664_v19 = vpop.eup %5663  ;;  %v3448_v58 = vadd.f32 %v3416_v11, %v15537_v21  ;;  %v5218_v20 = vmul.f32 0.5, %v5202_v16  ;;  %v12938_v47 = vmul.f32 %v5217_v0, %v15538_v50  ;;  %v15541_v36 = vld [vmem:[#allocation214_spill] sm:$0xff]  ;;  %v15542_v16 = vld [vmem:[#allocation279_spill] sm:$0xff] }
 0xc73   :  { %v5666_v35 = vpop.eup %5665  ;;  %v3451_v15 = vadd.f32 %v3419_v40, %v15540_v63  ;;  %v3674_v46 = vadd.f32 %v3642_v34, %v3450_v18  ;;  %v3774_v55 = vsel %vm956_vm3, %v12772_v61, %v15541_v36  ;;  %v5216_v48 = vmul.f32 0.5, %v5200_v43  ;;  %v15543_v40 = vld [vmem:[#allocation341_spill] sm:$0xff]  ;;  %v15545_v63 = vld [vmem:[#allocation342_spill] sm:$0xff] }
 0xc74   :  { %15539 = vst [vmem:[#allocation233_spill] sm:$0xff] %v12938_v47  ;;  %v3750_v11 = vsel %vm956_vm3, %v12710_v60, %v12772_v61  ;;  %v3982_v0 = vsel %vm1146_vm4, %v15542_v16, %v12782_v4  ;;  %v3672_v8 = vadd.f32 %v3640_v59, %v3448_v58  ;;  %v5219_v53 = vmul.f32 0.5, %v5203_v23  ;;  %v12957_v43 = vpop.permute.xlu1 %4636 }
 0xc75   :  { %v3866_v34 = vmul.f32 %v15543_v40, %v3758_v24  ;;  %v3675_v18 = vadd.f32 %v3643_v39, %v3451_v15  ;;  %v3998_v21 = vsel %vm1146_vm4, %v3965_v52, %v15544_v32  ;;  %v5221_v50 = vmul.f32 0.5, %v5205_v42  ;;  %v12963_v61 = vpop.permute.xlu0 %3966  ;;  %v15546_v39 = vld [vmem:[#allocation220_spill] sm:$0xff]  ;;  %v15547_v15 = vld [vmem:[#allocation343_spill] sm:$0xff]  ;;  %v15548_v42 = vld [vmem:[#allocation254_spill] sm:$0xff] }
 0xc76   :  { %v3864_v36 = vmul.f32 %v15545_v63, %v3774_v55  ;;  %v3974_v60 = vsel %vm1146_vm4, %v12782_v4, %v3965_v52  ;;  %v5204_v59 = vadd.f32 1.0, %v5664_v19  ;;  %v5207_v23 = vadd.f32 1.0, %v5666_v35  ;;  %v5668_v58 = vpop.eup %5667  ;;  %v15549_v63 = vld [vmem:[#allocation265_spill] sm:$0xff] }
 0xc77   :  { %v4206_v24 = vsel %vm1336_vm5, %v15546_v39, %v12731_v37  ;;  %v3867_v16 = vmul.f32 %v15547_v15, %v3750_v11  ;;  %v3898_v40 = vadd.f32 %v3866_v34, %v3674_v46  ;;  %v4090_v32 = vmul.f32 %v15548_v42, %v3982_v0  ;;  %v15550_v39 = vld [vmem:[#allocation266_spill] sm:$0xff] }
 0xc78   :  { %v3896_v55 = vadd.f32 %v3864_v36, %v3672_v8  ;;  %v4088_v47 = vmul.f32 %v15549_v63, %v3998_v21  ;;  %v12973_v4 = vmul.f32 %v5218_v20, %v12386_v41  ;;  %v12976_v52 = vmul.f32 %v5216_v48, %v12368_v26  ;;  %v3279_v46 = vpop.permute.xlu1 %3278  ;;  %v15551_v8 = vld [vmem:[#allocation264_spill] sm:$0xff] }
 0xc79   :  { %v4198_v19 = vsel %vm1336_vm5, %v12731_v37, %v12787_v10  ;;  %v3899_v35 = vadd.f32 %v3867_v16, %v3675_v18  ;;  %v4091_v11 = vmul.f32 %v15550_v39, %v3974_v60  ;;  %v12984_v0 = vmul.f32 %v5219_v53, %v12415_v12  ;;  %v15552_v37 = vld [vmem:[#allocation360_spill] sm:$0xff]  ;;  %v15553_v53 = vld [vmem:[#allocation219_spill] sm:$0xff]  ;;  %v15559_v39 = vld [vmem:[#allocation329_spill] sm:$0xff] }
 0xc7a   :  { %v4313_v34 = vmul.f32 %v15551_v8, %v4206_v24  ;;  %v4430_v26 = vsel %vm1526_vm6, %v15489_v57, %v12799_v56  ;;  %v12992_v41 = vmul.f32 %v5221_v50, %v12463_v1  ;;  %v5206_v20 = vadd.f32 1.0, %v5668_v58  ;;  %v15554_v60 = vld [vmem:[#allocation267_spill] sm:$0xff]  ;;  %v13010_v58 = vpop.permute.xlu0 %4846  ;;  %v15555_v24 = vld [vmem:[#allocation413_spill] sm:$0xff] }
 0xc7b   :  { %v4122_v48 = vadd.f32 %v4090_v32, %v3898_v40  ;;  %v3311_v18 = vsel %vm576_vm1, %v15552_v37, %v3279_v46  ;;  %v12997_v21 = vmul.f32 0.5, %v5204_v59  ;;  %v12999_v12 = vmul.f32 0.5, %v5207_v23 }
 0xc7c   :  { %v4222_v36 = vsel %vm1336_vm5, %v12787_v10, %v15553_v53  ;;  %v4314_v57 = vmul.f32 %v15554_v60, %v4198_v19  ;;  %v4654_v1 = vsel %vm1716_vm7, %v15498_v3, %v12820_v9  ;;  %v4120_v50 = vadd.f32 %v4088_v47, %v3896_v55  ;;  %v3727_v16 = vpop.permute.xlu1 %3726  ;;  %v15556_v47 = vld [vmem:[#allocation302_spill] sm:$0xff]  ;;  %v15557_v55 = vld [vmem:[#allocation268_spill] sm:$0xff] }
 0xc7d   :  { %v4537_v59 = vmul.f32 %v15555_v24, %v4430_v26  ;;  %v3535_v23 = vsel %vm766_vm2, %v15481_v49, %v12802_v5  ;;  %v4123_v15 = vadd.f32 %v4091_v11, %v3899_v35  ;;  %v4422_v10 = vsel %vm1526_vm6, %v12799_v56, %v4413_v25  ;;  %v15558_v49 = vld [vmem:[#allocation285_spill] sm:$0xff]  ;;  %v15560_v11 = vld [vmem:[#allocation414_spill] sm:$0xff] }
 0xc7e   :  { %v4345_v40 = vadd.f32 %v4313_v34, %v12859_v7  ;;  %v4446_v3 = vsel %vm1526_vm6, %v4413_v25, %v15490_v29  ;;  %v3422_v42 = vmul.f32 %v15556_v47, %v3311_v18  ;;  %v13025_v32 = vmul.f32 0.5, %v5206_v20  ;;  %v15562_v18 = vld [vmem:[#allocation358_spill] sm:$0xff] }
 0xc7f   :  { %v4315_v63 = vmul.f32 %v15557_v55, %v4222_v36  ;;  %v4346_v19 = vadd.f32 %v4314_v57, %v4122_v48  ;;  %v4761_v35 = vmul.f32 %v15558_v49, %v4654_v1  ;;  %v3983_v56 = vsel %vm1146_vm4, %v15500_v51, %v12828_v30  ;;  %v15561_v48 = vld [vmem:[#allocation416_spill] sm:$0xff]  ;;  %v4415_v36 = vpop.permute.xlu0 %4414  ;;  %v15564_v24 = vld [vmem:[#allocation406_spill] sm:$0xff] }
 0xc80   :  { %v3646_v7 = vmul.f32 %v15559_v39, %v3535_v23  ;;  %v4431_v29 = vsel %vm1526_vm6, %v15504_v27, %v12872_v2  ;;  %v4344_v25 = vadd.f32 %v12840_v54, %v4120_v50  ;;  %v4538_v8 = vmul.f32 %v15560_v11, %v4422_v10  ;;  %v4175_v37 = vpop.permute.xlu1 %4174  ;;  %v15565_v23 = vld [vmem:[#allocation347_spill] sm:$0xff]  ;;  %v15573_v11 = vld [vmem:[#allocation174_spill] sm:$0xff] }
 0xc81   :  { %v4569_v34 = vadd.f32 %v4537_v59, %v4345_v40  ;;  %v4655_v26 = vsel %vm1716_vm7, %v15517_v31, %v12912_v28  ;;  %v4347_v20 = vadd.f32 %v4315_v63, %v4123_v15  ;;  %v4539_v51 = vmul.f32 %v15561_v48, %v4446_v3  ;;  %v15563_v31 = vld [vmem:[#allocation283_spill] sm:$0xff]  ;;  %v15567_v3 = vld [vmem:[#allocation98_spill] sm:$0xff] }
 0xc82   :  { %v4094_v53 = vmul.f32 %v15562_v18, %v3983_v56  ;;  %v3551_v27 = vsel %vm766_vm2, %v12935_v13, %v15482_v17  ;;  %v3454_v54 = vadd.f32 %v3422_v42, %v12832_v6  ;;  %v4207_v60 = vsel %vm1336_vm5, %v15523_v22, %v4175_v37  ;;  %v15566_v17 = vld [vmem:[#allocation415_spill] sm:$0xff]  ;;  %v15569_v56 = vld [vmem:[#allocation321_spill] sm:$0xff]  ;;  %v15576_v18 = vld [vmem:[#allocation248_spill] sm:$0xff] }
 0xc83   :  { %v13054_v57 = vadd.f32 %v4761_v35, %v4569_v34  ;;  %v4541_v1 = vmul.f32 %v15563_v31, %v4431_v29  ;;  %v3759_v50 = vsel %vm956_vm3, %v15487_v62, %v3727_v16  ;;  %v4317_v59 = vmul.f32 %v15564_v24, %v4207_v60  ;;  %v15571_v29 = vld [vmem:[#allocation303_spill] sm:$0xff]  ;;  %v15574_v34 = vld [vmem:[#allocation245_spill] sm:$0xff] }
 0xc84   :  { %v4568_v15 = vadd.f32 %v15565_v23, %v4344_v25  ;;  %v4765_v10 = vmul.f32 %v15566_v17, %v4655_v26  ;;  %v13063_v6 = vadd.f32 %v4538_v8, %v4346_v19  ;;  %v3527_v22 = vsel %vm766_vm2, %v12802_v5, %v12935_v13  ;;  %v3295_v55 = vpop.permute.xlu1 %3294  ;;  %v15568_v19 = vld [vmem:[#allocation242_spill] sm:$0xff]  ;;  %v15572_v25 = vld [vmem:[#allocation304_spill] sm:$0xff]  ;;  %v15578_v60 = vld [vmem:[#allocation31_spill] sm:$0xff] }
 0xc85   :  { %v13069_v40 = vadd.f32 %v4539_v51, %v4347_v20  ;;  %v3644_v47 = vmul.f32 %v15567_v3, %v3551_v27  ;;  %v4646_v62 = vsel %vm1716_vm7, %v12820_v9, %v12957_v43  ;;  %v4349_v42 = vadd.f32 %v4317_v59, %v12928_v33  ;;  %v15570_v13 = vld [vmem:[#allocation330_spill] sm:$0xff]  ;;  %v4639_v51 = vpop.permute.xlu0 %4638  ;;  %v15577_v27 = vld [vmem:[#allocation336_spill] sm:$0xff]  ;;  %v15581_v17 = vld [vmem:[#allocation331_spill] sm:$0xff] }
 0xc86   :  { %v3678_v63 = vadd.f32 %v3646_v7, %v3454_v54  ;;  %v3870_v49 = vmul.f32 %v15568_v19, %v3759_v50  ;;  %v3303_v35 = vsel %vm576_vm1, %v3279_v46, %v3295_v55  ;;  %v3327_v5 = vsel %vm576_vm1, %v3295_v55, %v15569_v56  ;;  %v15575_v26 = vld [vmem:[#allocation286_spill] sm:$0xff]  ;;  %v15579_v50 = vld [vmem:[#allocation155_spill] sm:$0xff] }
 0xc87   :  { %v3647_v39 = vmul.f32 %v15570_v13, %v3527_v22  ;;  %v3975_v9 = vsel %vm1146_vm4, %v12828_v30, %v12963_v61  ;;  %v3420_v33 = vmul.f32 %v15571_v29, %v3327_v5  ;;  %v3423_v7 = vmul.f32 %v15572_v25, %v3303_v35  ;;  %v15583_v55 = vld [vmem:[#allocation247_spill] sm:$0xff]  ;;  %v15587_v25 = vld [vmem:[#allocation53_spill] sm:$0xff] }
 0xc88   :  { %v4792_v8 = vadd.f32 %v15573_v11, %v4568_v15  ;;  %v4670_v46 = vsel %vm1716_vm7, %v12957_v43, %v15574_v34  ;;  %v4762_v20 = vmul.f32 %v15575_v26, %v4646_v62  ;;  %v4573_v48 = vadd.f32 %v4541_v1, %v4349_v42  ;;  %v3743_v59 = vpop.permute.xlu1 %3742  ;;  %v15580_v43 = vld [vmem:[#allocation363_spill] sm:$0xff] }
 0xc89   :  { %v3999_v30 = vsel %vm1146_vm4, %v12963_v61, %v15576_v18  ;;  %v4879_v54 = vsel %vm1906_vm8, %v15577_v27, %v13010_v58  ;;  %v3452_v31 = vadd.f32 %v3420_v33, %v15578_v60  ;;  %v3455_v24 = vadd.f32 %v3423_v7, %v15579_v50  ;;  %v15582_v62 = vld [vmem:[#allocation243_spill] sm:$0xff]  ;;  %v4863_v11 = vpop.permute.xlu0 %4862 }
 0xc8a   :  { %v4095_v23 = vmul.f32 %v15580_v43, %v3975_v9  ;;  %v3902_v15 = vadd.f32 %v3870_v49, %v3678_v63  ;;  %v3751_v1 = vsel %vm956_vm3, %v3727_v16, %v3743_v59  ;;  %v3775_v61 = vsel %vm956_vm3, %v3743_v59, %v15581_v17  ;;  %v15584_v35 = vld [vmem:[#allocation359_spill] sm:$0xff]  ;;  %v15586_v16 = vld [vmem:[#allocation262_spill] sm:$0xff] }
 0xc8b   :  { %v3676_v22 = vadd.f32 %v3644_v47, %v3452_v31  ;;  %v3679_v3 = vadd.f32 %v3647_v39, %v3455_v24  ;;  %v3868_v42 = vmul.f32 %v15582_v62, %v3775_v61  ;;  %v3871_v19 = vmul.f32 %v15583_v55, %v3751_v1  ;;  %v15585_v5 = vld [vmem:[#allocation299_spill] sm:$0xff]  ;;  %v15594_v1 = vld [vmem:[#allocation418_spill] sm:$0xff]  ;;  %v15597_v62 = vld [vmem:[#allocation313_spill] sm:$0xff] }
 0xc8c   :  { %v4092_v56 = vmul.f32 %v15584_v35, %v3999_v30  ;;  %v4989_v13 = vmul.f32 %v15585_v5, %v4879_v54  ;;  %v4423_v63 = vsel %vm1526_vm6, %v12872_v2, %v4415_v36  ;;  %v4797_v49 = vadd.f32 %v4765_v10, %v4573_v48  ;;  %v4191_v33 = vpop.permute.xlu1 %4190  ;;  %v15588_v10 = vld [vmem:[#allocation345_spill] sm:$0xff]  ;;  %v15589_v18 = vld [vmem:[#allocation407_spill] sm:$0xff]  ;;  %v15590_v30 = vld [vmem:[#allocation408_spill] sm:$0xff] }
 0xc8d   :  { %v4447_v9 = vsel %vm1526_vm6, %v4415_v36, %v15586_v16  ;;  %v4647_v47 = vsel %vm1716_vm7, %v12912_v28, %v4639_v51  ;;  %v3900_v39 = vadd.f32 %v3868_v42, %v3676_v22  ;;  %v3903_v29 = vadd.f32 %v3871_v19, %v3679_v3  ;;  %v15591_v54 = vld [vmem:[#allocation83_spill] sm:$0xff]  ;;  %v15596_v3 = vld [vmem:[#allocation284_spill] sm:$0xff]  ;;  %v15598_v55 = vld [vmem:[#allocation77_spill] sm:$0xff] }
 0xc8e   :  { %v4671_v7 = vsel %vm1716_vm7, %v4639_v51, %v15587_v25  ;;  %v4126_v34 = vadd.f32 %v4094_v53, %v3902_v15  ;;  %v4199_v2 = vsel %vm1336_vm5, %v4175_v37, %v4191_v33  ;;  %v4223_v36 = vsel %vm1336_vm5, %v4191_v33, %v15588_v10  ;;  %v15592_v31 = vld [vmem:[#allocation287_spill] sm:$0xff]  ;;  %v15593_v51 = vld [vmem:[#allocation288_spill] sm:$0xff]  ;;  %v15600_v5 = vld [vmem:[#allocation405_spill] sm:$0xff] }
 0xc8f   :  { %v4124_v26 = vadd.f32 %v4092_v56, %v3900_v39  ;;  %v4127_v48 = vadd.f32 %v4095_v23, %v3903_v29  ;;  %v4318_v28 = vmul.f32 %v15589_v18, %v4199_v2  ;;  %v4319_v27 = vmul.f32 %v15590_v30, %v4223_v36  ;;  %v15595_v61 = vld [vmem:[#allocation419_spill] sm:$0xff]  ;;  %v15604_v10 = vld [vmem:[#allocation257_spill] sm:$0xff]  ;;  %v15607_v18 = vld [vmem:[#allocation102_spill] sm:$0xff] }
 0xc90   :  { %v4763_v60 = vmul.f32 %v15591_v54, %v4670_v46  ;;  %v4542_v50 = vmul.f32 %v15592_v31, %v4423_v63  ;;  %v4543_v24 = vmul.f32 %v15593_v51, %v4447_v9  ;;  %v5021_v53 = vadd.f32 %v4989_v13, %v4797_v49  ;;  %v4845_v23 = vpop.permute.xlu1 %4844  ;;  %v15601_v49 = vld [vmem:[#allocation300_spill] sm:$0xff]  ;;  %v15602_v9 = vld [vmem:[#allocation123_spill] sm:$0xff]  ;;  %v15605_v36 = vld [vmem:[#allocation125_spill] sm:$0xff] }
 0xc91   :  { %v4871_v37 = vsel %vm1906_vm8, %v13010_v58, %v4863_v11  ;;  %v4348_v59 = vadd.f32 %v12923_v45, %v4124_v26  ;;  %v4350_v43 = vadd.f32 %v4318_v28, %v4126_v34  ;;  %v4351_v15 = vadd.f32 %v4319_v27, %v4127_v48  ;;  %v15599_v45 = vld [vmem:[#allocation420_spill] sm:$0xff]  ;;  %v15603_v34 = vld [vmem:[#allocation301_spill] sm:$0xff] }
 0xc92   :  { %v4766_v17 = vmul.f32 %v15594_v1, %v4647_v47  ;;  %v4767_v22 = vmul.f32 %v15595_v61, %v4671_v7  ;;  %v4895_v46 = vsel %vm1906_vm8, %v4863_v11, %v15596_v3  ;;  %v4878_v42 = vsel %vm1906_vm8, %v15597_v62, %v4845_v23  ;;  %v15608_v31 = vld [vmem:[#allocation233_spill] sm:$0xff] }
 0xc93   :  { %v4572_v19 = vadd.f32 %v15598_v55, %v4348_v59  ;;  %v4574_v58 = vadd.f32 %v4542_v50, %v4350_v43  ;;  %v4575_v35 = vadd.f32 %v4543_v24, %v4351_v15  ;;  %v4985_v56 = vmul.f32 %v15599_v45, %v4878_v42  ;;  %v15609_v24 = vld [vmem:[#allocation97_spill] sm:$0xff]  ;;  %v15610_v59 = vld [vmem:[#allocation111_spill] sm:$0xff] }
 0xc94   :  { %v5016_v13 = vadd.f32 %v15600_v5, %v4792_v8  ;;  %v4794_v63 = vadd.f32 %v4762_v20, %v13063_v6  ;;  %v4990_v16 = vmul.f32 %v15601_v49, %v4871_v37  ;;  %v5093_v47 = vadd.f32 %v15602_v9, %v5021_v53  ;;  %v4861_v7 = vpop.permute.xlu1 %4860  ;;  %v5588_v42 = vld [vmem:[%s13226_s17] sm:$0xff]   ;;  %s5721_s17 = smov [#allocation2]  }
 0xc95   :  { %v4796_v39 = vadd.f32 %v12915_v14, %v4572_v19  ;;  %v4798_v29 = vadd.f32 %v4766_v17, %v4574_v58  ;;  %v4799_v33 = vadd.f32 %v4767_v22, %v4575_v35  ;;  %v5017_v25 = vadd.f32 %v4985_v56, %v13054_v57  ;;  %v15606_v14 = vld [vmem:[#allocation35_spill] sm:$0xff]  ;;  %v15612_v56 = vld [vmem:[#allocation30_spill] sm:$0xff]  ;;  %s5390_s20 = sshll.u32 %s5721_s17, 4  ;;  %s5391_s20 = int_to_ptr.vmem [resolvable:$true] %s5390_s20 }
 0xc96   :  { %v4795_v11 = vadd.f32 %v4763_v60, %v13069_v40  ;;  %v4991_v2 = vmul.f32 %v15603_v34, %v4895_v46  ;;  %v4870_v8 = vsel %vm1906_vm8, %v4845_v23, %v4861_v7  ;;  %v4894_v6 = vsel %vm1906_vm8, %v4861_v7, %v15604_v10  ;;  %v15611_v23 = vld [vmem:[#allocation54_spill] sm:$0xff]  ;;  %v15616_v10 = vld [vmem:[#allocation23_spill] sm:$0xff]  ;;  %s5680_s21 = scalar_lea.vmem %s5391_s20, 1024  ;;  %p5685_p1 = scmp.lt.s32.totalorder %s5391_s20, %s5391_s20 }
 0xc97   :  { %v5022_v20 = vadd.f32 %v4990_v16, %v4798_v29  ;;  %v5089_v26 = vadd.f32 %v15605_v36, %v5017_v25  ;;  %v4986_v48 = vmul.f32 %v15606_v14, %v4870_v8  ;;  %v4987_v28 = vmul.f32 %v15607_v18, %v4894_v6  ;;  %v15614_v25 = vld [vmem:[#allocation81_spill] sm:$0xff]  ;;  %v15618_v14 = vld [vmem:[#allocation44_spill] sm:$0xff]  ;;  %v15619_v18 = vld [vmem:[#allocation74_spill] sm:$0xff]  ;;  %p5681_p0 = scmp.ne.s32.totalorder %s5391_s20, %s5680_s21  ;;  %p5686_p2 = scmp.lt.s32.totalorder %s5680_s21, %s5680_s21 }
 0xc98   :  { %v5253_v57 = vmul.f32 %v12992_v41, %v5093_v47  ;;  %v5020_v40 = vadd.f32 %v12920_v38, %v4796_v39  ;;  %v5088_v30 = vadd.f32 %v15605_v36, %v5016_v13  ;;  %v5023_v27 = vadd.f32 %v4991_v2, %v4799_v33 }
 0xc99   :  { %v5018_v54 = vadd.f32 %v4986_v48, %v4794_v63  ;;  %v5019_v60 = vadd.f32 %v4987_v28, %v4795_v11  ;;  %v5249_v50 = vmul.f32 %v15608_v31, %v5089_v26  ;;  %v5094_v44 = vadd.f32 %v15602_v9, %v5022_v20  ;;  %v15615_v11 = vld [vmem:[#allocation51_spill] sm:$0xff]  ;;  %v15617_v20 = vld [vmem:[#allocation46_spill] sm:$0xff]  ;;  %p5687_p3 = por %p5686_p2, %p5685_p1 }
 0xc9a   :  { %v5092_v51 = vadd.f32 %v15602_v9, %v5020_v40  ;;  %v5236_v53 = vmul.f32 %v12997_v21, %v15609_v24  ;;  %v5095_v37 = vadd.f32 %v15602_v9, %v5023_v27  ;;  %v5239_v41 = vmul.f32 %v12999_v12, %v15610_v59  ;;  %v15613_v9 = vld [vmem:[#allocation88_spill] sm:$0xff] }
 0xc9b   :  { %v5090_v38 = vadd.f32 %v15605_v36, %v5018_v54  ;;  %v5091_v43 = vadd.f32 %v15605_v36, %v5019_v60  ;;  %v5261_v15 = vpack.c.bf16 %v5253_v57, %v5249_v50  ;;  %v5238_v1 = vmul.f32 %v13025_v32, %v15611_v23  ;;  %v5272_v32 = vpop.permute.xlu0 %5271  ;;  %p5688_p4 = pnand %p5687_p3, %p5681_p0 }
 0xc9c   :  { %v5248_v17 = vmul.f32 %v12976_v52, %v5088_v30  ;;  %v5252_v61 = vmul.f32 %v5236_v53, %v5092_v51  ;;  %v5255_v3 = vmul.f32 %v5239_v41, %v5095_v37 }
 0xc9d   :  { %v5250_v22 = vmul.f32 %v12973_v4, %v5090_v38  ;;  %5285 = vmatprep.subr.bf16.mxu0 %v5261_v15  ;;  %v5251_v21 = vmul.f32 %v12984_v0, %v5091_v43  ;;  %v5254_v46 = vmul.f32 %v5238_v1, %v5094_v44 }
 0xc9e   :  { %v5260_v62 = vpack.c.bf16 %v5252_v61, %v5248_v17 }
 0xc9f   :  { %v5263_v12 = vpack.c.bf16 %v5255_v3, %v5251_v21  ;;  %v5262_v55 = vpack.c.bf16 %v5254_v46, %v5250_v22 }
 0xca0   :  { %5286 = vmatpush1.bf16.msra.mxu0 %v5260_v62 }
 0xca1   :  { %5328 = vmatprep.subr.bf16.mxu1 %v5263_v12 }
 0xca2   :  { %5329 = vmatpush1.bf16.msra.mxu1 %v5262_v55 }
 0xca3   :  { %5458 = vmatmul.mubr.msk.bf16.vlgmr.msra.gmra.mrb[48].mxu0 %vm5279_vm11, %v5588_v42 }
 0xca4   :  { %v5267_v52 = vpop.permute.xlu1 %5266 }
 0xca5   :  { %5459 = vmatmul.mubr.msk.bf16.vlgmr.msra.gmra.mrb[48].mxu1 %vm5279_vm11, %v5588_v42 }
 0xd76   :  { %v5317_v4 = vpop.f32.mrb[48].mxu0 }
 0xd77   :  { %v5318_v19 = vadd.f32 %v5317_v4, %v5267_v52  ;;  %v5319_v0 = vpop.f32.mrb[49].mxu0 }
 0xd78   :  { %v5320_v58 = vadd.f32 %v5319_v0, %v5267_v52  ;;  %v5321_v35 = vpop.f32.mrb[50].mxu0  ;;  %v5360_v45 = vpop.f32.mrb[48].mxu1 }
 0xd79   :  { %v5369_v5 = vadd.f32 %v5318_v19, %v15612_v56  ;;  %v5322_v13 = vadd.f32 %v5321_v35, %v5272_v32  ;;  %v5323_v63 = vpop.f32.mrb[51].mxu0  ;;  %v5361_v49 = vadd.f32 %v5360_v45, %v5267_v52  ;;  %v5362_v16 = vpop.f32.mrb[49].mxu1 }
 0xd7a   :  { %v5370_v47 = vadd.f32 %v5320_v58, %v15613_v9  ;;  %v5324_v39 = vadd.f32 %v5323_v63, %v5272_v32  ;;  %v5363_v29 = vadd.f32 %v5362_v16, %v5267_v52  ;;  %v5364_v33 = vpop.f32.mrb[50].mxu1 }
 0xd7b   :  { %5377 = vst [vmem:[#allocation2] sm:$0xff] %v5369_v5  ;;  %v5373_v7 = vadd.f32 %v5322_v13, %v15614_v25  ;;  %v5371_v34 = vadd.f32 %v5361_v49, %v15615_v11  ;;  %v5365_v2 = vadd.f32 %v5364_v33, %v5272_v32  ;;  %v5366_v8 = vpop.f32.mrb[51].mxu1 }
 0xd7c   :  { %5378 = vst [vmem:[#allocation2 + $0x8] sm:$0xff] %v5370_v47  ;;  %v5374_v6 = vadd.f32 %v5324_v39, %v15616_v10  ;;  %v5372_v36 = vadd.f32 %v5363_v29, %v15617_v20  ;;  %v5367_v26 = vadd.f32 %v5366_v8, %v5272_v32 }
 0xd7d   :  { %5381 = vst [vmem:[#allocation2 + $0x20] sm:$0xff] %v5373_v7  ;;  %5379 = vst [vmem:[#allocation2 + $0x10] sm:$0xff] %v5371_v34  ;;  %v5375_v48 = vadd.f32 %v5365_v2, %v15618_v14 }
 0xd7e   :  { %5382 = vst [vmem:[#allocation2 + $0x28] sm:$0xff] %v5374_v6  ;;  %5380 = vst [vmem:[#allocation2 + $0x18] sm:$0xff] %v5372_v36  ;;  %v5376_v28 = vadd.f32 %v5367_v26, %v15619_v18 }
 0xd7f   :  { %5383 = vst [vmem:[#allocation2 + $0x30] sm:$0xff] %v5375_v48 }
 0xd80   :  { %5384 = vst [vmem:[#allocation2 + $0x38] sm:$0xff] %v5376_v28 }
 0xd81   :  { %5691 = shalt.err (!%p5688_p4)
}
 0xd82   :  { %s5692_s2 = scalar_lea.hbm %s13228_s19, 1024 }
 0xd83   :  { %p5693_p5 = scmp.ne.s32.totalorder %s13228_s19, %s5692_s2  ;;  %p5696_p6 = scmp.lt.u32.totalorder %s5692_s2, %s13228_s19 }
 0xd85   :  { %p5698_p7 = pnand %p5696_p6, %p5693_p5 }
 0xd87   :  { %5701 = shalt.err (!%p5698_p7)
}
 0xd88   :  { %s5722_s4 = smov 512   ;;  %s5723_s25 = smov 32  }
 0xd89   :  { %5396 = dma.vmem_to_hbm [thread:$0]  %s5391_s20, 1024, %s13228_s19, [#allocation3], %s5722_s4, %s5722_s4, %s5723_s25  }
 0xd8a   :  { %5702 = dma.done.wait [#allocation3], 1024  }
 0xd8b   :  { %5703 = vsyncadd [#allocation3], 4294966272 }
 0xd8c   :  { %5400 = vsyncpa [#allocation3], 1 }

</bundles_post_ra>
